<compile_context>
chip_gen: v7x
topology: tpu7x:2x2x1
jax: 0.10.0
libtpu: 0.0.40
codegen_flags: <defaults>
</compile_context>

<pallas_src>
import jax
import jax.numpy as jnp
from jax.experimental import pallas as pl
from jax.experimental.pallas import tpu as pltpu

_KN = (((1,), (0,)), ((), ()))   # (rows, K) x (K, N)
_NT = (((1,), (1,)), ((), ()))   # (rows, K) x (N, K)   (weights stored (N, K))


# ----------------------------------------------------------------------------
# The single fused kernel
# ----------------------------------------------------------------------------
def cnn_fused_kernel(x_ref, w1_ref, b1_ref, s1_ref, t1_ref,
                     w2_ref, b2_ref, s2_ref, t2_ref,
                     fw1_ref, fb1_ref, fw2_ref, fb2_ref,
                     out_ref, feat_ref,
                     xpk1, xpk2):
    # x_ref:   (B, H, W, 12)  bf16   NHWC input
    # w1_ref:  (3, 36, 64)    bf16   conv1 weight, [dy, dx*Cin+c, cout]
    # w2_ref:  (3, 192, 156)  bf16   conv2 weight
    # b*/s*/t*:(1, Cout)      f32    conv bias / BN scale / BN shift
    # fw1_ref: (16, 16, 156)  bf16   fc1 weight, [pos=i*4+j, out, cin]
    # fw2_ref: (2, 16)        f32    fc2 weight, transposed
    # out_ref: (B, 2) f32     feat_ref: (B, 16) f32
    B, H, W, Cin = x_ref.shape
    C1 = b1_ref.shape[1]                    # 64
    C2 = b2_ref.shape[1]                    # 156
    H2, W2 = H // 2, W // 2                 # 8, 8
    H4, W4 = H2 // 2, W2 // 2               # 4, 4

    def pack_dx(dst_ref, src, h, w, cin):
        # dst_ref[b, y+1, x, dx*cin + c] = src[b, y, x+dx-1, c]  (zero halo).
        # The only sublane-unaligned slices of the whole conv live here, on
        # narrow cin-wide bf16 data (a few KB each).
        dst_ref[...] = jnp.zeros(dst_ref.shape, dst_ref.dtype)
        dst_ref[:, 1:h + 1, 1:w,     0 * cin:1 * cin] = src[:, :, 0:w - 1, :]
        dst_ref[:, 1:h + 1, :,       1 * cin:2 * cin] = src
        dst_ref[:, 1:h + 1, 0:w - 1, 2 * cin:3 * cin] = src[:, :, 1:w, :]

    def conv_relu_bn(src_ref, w_ref, b_ref, s_ref, t_ref, h, w, cin, cout):
        # 3 dy-tap matmuls over the full padded height (contiguous lhs view);
        # the dy shift becomes a free major-dim slice on the output.
        hp = h + 2
        lhs = src_ref[...].reshape(B * hp * w, 3 * cin)          # bf16, free view
        full = [jax.lax.dot_general(lhs, w_ref[dy], _KN,
                                    preferred_element_type=jnp.float32)
                .reshape(B, hp, w, cout) for dy in range(3)]
        acc = full[0][:, 0:h] + full[1][:, 1:h + 1] + full[2][:, 2:h + 2]
        # module order: conv(+bias) -> ReLU -> BatchNorm affine
        return jnp.maximum(acc + b_ref[...], 0.0) * s_ref[...] + t_ref[...]

    def maxpool2x2(a):
        Bb, h, w, c = a.shape
        a = a.reshape(Bb * h // 2, 2, w, c)
        a = jnp.maximum(a[:, 0], a[:, 1])                        # pool along H
        a = a.reshape(Bb * h // 2, w // 2, 2, c)
        a = jnp.maximum(a[:, :, 0], a[:, :, 1])                  # pool along W
        return a.reshape(Bb, h // 2, w // 2, c)

    # -------- conv block 1: conv3x3(same)+bias -> ReLU -> BN -> maxpool -----
    pack_dx(xpk1, x_ref[...], H, W, Cin)
    y1 = conv_relu_bn(xpk1, w1_ref, b1_ref, s1_ref, t1_ref, H, W, Cin, C1)
    p1 = maxpool2x2(y1)                                          # (B, 8, 8, 64) f32

    # -------- conv block 2 --------------------------------------------------
    pack_dx(xpk2, p1.astype(jnp.bfloat16), H2, W2, C1)
    y2 = conv_relu_bn(xpk2, w2_ref, b2_ref, s2_ref, t2_ref, H2, W2, C1, C2)
    p2 = maxpool2x2(y2)                                          # (B, 4, 4, 156) f32

    # -------- Dropout2d: eval-mode identity.  fc1 + fc2 ---------------------
    # fc1 as 16 accumulated per-position dots: no flatten relayout, no
    # staging buffer, no masked stores.
    p2b = p2.astype(jnp.bfloat16)
    hid = jnp.zeros((B, fb1_ref.shape[1]), jnp.float32) + fb1_ref[...]
    for i in range(H4):
        for j in range(W4):
            hid = hid + jax.lax.dot_general(
                p2b[:, i, j, :], fw1_ref[i * W4 + j], _NT,
                preferred_element_type=jnp.float32)
    feat_ref[...] = hid
    out_ref[...] = (jax.lax.dot_general(hid, fw2_ref[...], _NT,
                                        preferred_element_type=jnp.float32)
                    + fb2_ref[...])


# ----------------------------------------------------------------------------
# Wrapper: one pallas_call for the whole forward pass
# ----------------------------------------------------------------------------
def cnn_std_forward(x_nchw, kp):
    # NCHW -> NHWC, cast to bf16 once (MXU operand dtype)
    x = jnp.transpose(x_nchw.astype(jnp.float32), (0, 2, 3, 1)).astype(jnp.bfloat16)
    B, H, W, Cin = x.shape
    C1 = kp["b1"].shape[1]                  # 64
    NF = kp["fb1"].shape[1]                 # 16
    NO = kp["fw2"].shape[0]                 # 2

    def fs(shape):
        zero = (0,) * len(shape)
        return pl.BlockSpec(shape, lambda i, _z=zero: _z)

    args = (x, kp["w1"], kp["b1"], kp["s1"], kp["t1"],
            kp["w2"], kp["b2"], kp["s2"], kp["t2"],
            kp["fw1"], kp["fb1"], kp["fw2"], kp["fb2"])

    logits, feat = pl.pallas_call(
        cnn_fused_kernel,
        out_shape=(jax.ShapeDtypeStruct((B, NO), jnp.float32),
                   jax.ShapeDtypeStruct((B, NF), jnp.float32)),
        grid=(1,),
        in_specs=[fs(a.shape) for a in args],
        out_specs=(fs((B, NO)), fs((B, NF))),
        scratch_shapes=[
            pltpu.VMEM((B, H + 2, W, 3 * Cin), jnp.bfloat16),            # xpk1
            pltpu.VMEM((B, H // 2 + 2, W // 2, 3 * C1), jnp.bfloat16),   # xpk2
        ],
        compiler_params=pltpu.CompilerParams(
            dimension_semantics=("arbitrary",)),
    )(*args)
    return logits, feat


# ----------------------------------------------------------------------------
# Parameter preparation (one-time, outside the kernel)
# ----------------------------------------------------------------------------
def prepare_kernel_params(p):
    """Reshape conv weights to (dy, dx*Cin+c, Cout) for the dx-packed tap
    matmuls, pre-permute fc1 to per-spatial-position (pos, out, in) blocks in
    NHWC order, and store matmul weights in bf16.  BN scale/shift stay
    separate f32 vectors (no scale>0 assumption)."""
    kp = {}
    kp["w1"] = p["cw1"].reshape(3, 3 * 12, 64).astype(jnp.bfloat16)
    kp["b1"] = p["cb1"].reshape(1, 64).astype(jnp.float32)
    kp["s1"] = p["s1"].reshape(1, 64).astype(jnp.float32)
    kp["t1"] = p["t1"].reshape(1, 64).astype(jnp.float32)
    kp["w2"] = p["cw2"].reshape(3, 3 * 64, 156).astype(jnp.bfloat16)
    kp["b2"] = p["cb2"].reshape(1, 156).astype(jnp.float32)
    kp["s2"] = p["s2"].reshape(1, 156).astype(jnp.float32)
    kp["t2"] = p["t2"].reshape(1, 156).astype(jnp.float32)
    # fc1: rows are NCHW-flatten indexed (c*16 + i*4 + j); regroup to
    # [pos=i*4+j, out, c] so the kernel can contract over channels per
    # spatial position of the NHWC pooled map.
    fw1 = p["fw1"].reshape(156, 4, 4, 16).transpose(1, 2, 3, 0)   # (i, j, o, c)
    kp["fw1"] = fw1.reshape(16, 16, 156).astype(jnp.bfloat16)
    kp["fb1"] = p["fb1"].reshape(1, 16).astype(jnp.float32)
    kp["fw2"] = p["fw2"].T.astype(jnp.float32)                    # (2, 16)
    kp["fb2"] = p["fb2"].reshape(1, 2).astype(jnp.float32)
    return kp


# ----------------------------------------------------------------------------
# Pure-JAX reference (f32, uses the raw parameters)
# ----------------------------------------------------------------------------
def ref_forward(x_nchw, p):
    x = jnp.transpose(x_nchw.astype(jnp.float32), (0, 2, 3, 1))

    def block(x, w, b, scale, shift):
        y = jax.lax.conv_general_dilated(
            x, w, window_strides=(1, 1), padding="SAME",
            dimension_numbers=("NHWC", "HWIO", "NHWC"))
        y = y + b.reshape(1, 1, 1, -1)
        y = jnp.maximum(y, 0.0)
        y = y * scale.reshape(1, 1, 1, -1) + shift.reshape(1, 1, 1, -1)
        return jax.lax.reduce_window(y, -jnp.inf, jax.lax.max,
                                     (1, 2, 2, 1), (1, 2, 2, 1), "VALID")

    y = block(x, p["cw1"], p["cb1"], p["s1"], p["t1"])
    y = block(y, p["cw2"], p["cb2"], p["s2"], p["t2"])
    f = jnp.transpose(y, (0, 3, 1, 2)).reshape(x.shape[0], -1)   # NCHW flatten
    h = f @ p["fw1"] + p["fb1"]
    o = h @ p["fw2"] + p["fb2"]
    return o, h


# ----------------------------------------------------------------------------
# Deterministic parameter construction (mirrors cnn_std's shapes)
# ----------------------------------------------------------------------------
def make_params(key):
    ks = jax.random.split(key, 16)
    eps = 1e-5

    def bn(kg, kb, km, kv, c):
        gamma = jax.random.uniform(kg, (c,), minval=0.5, maxval=1.5)
        beta = 0.1 * jax.random.normal(kb, (c,))
        mean = 0.1 * jax.random.normal(km, (c,))
        var = jax.random.uniform(kv, (c,), minval=0.5, maxval=1.5)
        scale = gamma / jnp.sqrt(var + eps)
        shift = beta - mean * scale
        return (scale.reshape(1, c).astype(jnp.float32),
                shift.reshape(1, c).astype(jnp.float32))

    p = {}
    p["cw1"] = (0.1 * jax.random.normal(ks[0], (3, 3, 12, 64))).astype(jnp.float32)
    p["cb1"] = (0.1 * jax.random.normal(ks[1], (1, 64))).astype(jnp.float32)
    p["s1"], p["t1"] = bn(ks[2], ks[3], ks[4], ks[5], 64)
    p["cw2"] = (0.05 * jax.random.normal(ks[6], (3, 3, 64, 156))).astype(jnp.float32)
    p["cb2"] = (0.1 * jax.random.normal(ks[7], (1, 156))).astype(jnp.float32)
    p["s2"], p["t2"] = bn(ks[8], ks[9], ks[10], ks[11], 156)
    p["fw1"] = (0.02 * jax.random.normal(ks[12], (156 * 4 * 4, 16))).astype(jnp.float32)
    p["fb1"] = (0.1 * jax.random.normal(ks[13], (1, 16))).astype(jnp.float32)
    p["fw2"] = (0.2 * jax.random.normal(ks[14], (16, 2))).astype(jnp.float32)
    p["fb2"] = (0.1 * jax.random.normal(ks[15], (1, 2))).astype(jnp.float32)
    return p


if __name__ == "__main__":
    key = jax.random.PRNGKey(0)
    kx, kparam = jax.random.split(key)
    params = make_params(kparam)
    kparams = prepare_kernel_params(params)     # one-time, outside jit

    # PyTorch-style NCHW input: batch=2, channels=12, spatial=16x16
    x = jax.random.normal(kx, (2, 12, 16, 16), dtype=jnp.float32)

    fwd = jax.jit(cnn_std_forward)
    logits, feat16 = fwd(x, kparams)
    jax.block_until_ready((logits, feat16))

    assert logits.shape == (2, 2) and feat16.shape == (2, 16)

    # Sanity check against a pure-f32 JAX reference.  Tolerance is sized for
    # the bf16 MXU operands used in the kernel (~0.4% per rounding, two conv
    # layers + fc); the layer ordering / weight permutations are exact.
    ref_logits, ref_feat16 = ref_forward(x, params)
    assert jnp.allclose(logits, ref_logits, rtol=5e-2, atol=5e-2)
    assert jnp.allclose(feat16, ref_feat16, rtol=5e-2, atol=5e-2)

    print("KERNEL_OK")
</pallas_src>

<mosaic_0001>
module attributes {stable_mosaic.version = 11 : i64} {
  func.func @cnn_fused_kernel(%arg0: i32, %arg1: memref<2x16x16x12xbf16, #tpu.memory_space<vmem>>, %arg2: memref<3x36x64xbf16, #tpu.memory_space<vmem>>, %arg3: memref<1x64xf32, #tpu.memory_space<vmem>>, %arg4: memref<1x64xf32, #tpu.memory_space<vmem>>, %arg5: memref<1x64xf32, #tpu.memory_space<vmem>>, %arg6: memref<3x192x156xbf16, #tpu.memory_space<vmem>>, %arg7: memref<1x156xf32, #tpu.memory_space<vmem>>, %arg8: memref<1x156xf32, #tpu.memory_space<vmem>>, %arg9: memref<1x156xf32, #tpu.memory_space<vmem>>, %arg10: memref<16x16x156xbf16, #tpu.memory_space<vmem>>, %arg11: memref<1x16xf32, #tpu.memory_space<vmem>>, %arg12: memref<2x16xf32, #tpu.memory_space<vmem>>, %arg13: memref<1x2xf32, #tpu.memory_space<vmem>>, %arg14: memref<2x2xf32, #tpu.memory_space<vmem>>, %arg15: memref<2x16xf32, #tpu.memory_space<vmem>>, %arg16: memref<2x18x16x36xbf16, #tpu.memory_space<vmem>>, %arg17: memref<2x10x8x192xbf16, #tpu.memory_space<vmem>>) attributes {dimension_semantics = [#tpu.dimension_semantics<arbitrary>], iteration_bounds = array<i64: 1>, scalar_prefetch = 0 : i64, scratch_operands = 2 : i64, tpu.core_type = #tpu.core_type<tc>, window_params = [{pipeline_mode = #tpu.pipeline_mode<synchronous>, transform_indices = @transform_0, window_bounds = array<i64: 2, 16, 16, 12>}, {pipeline_mode = #tpu.pipeline_mode<synchronous>, transform_indices = @transform_1, window_bounds = array<i64: 3, 36, 64>}, {pipeline_mode = #tpu.pipeline_mode<synchronous>, transform_indices = @transform_2, window_bounds = array<i64: 1, 64>}, {pipeline_mode = #tpu.pipeline_mode<synchronous>, transform_indices = @transform_3, window_bounds = array<i64: 1, 64>}, {pipeline_mode = #tpu.pipeline_mode<synchronous>, transform_indices = @transform_4, window_bounds = array<i64: 1, 64>}, {pipeline_mode = #tpu.pipeline_mode<synchronous>, transform_indices = @transform_5, window_bounds = array<i64: 3, 192, 156>}, {pipeline_mode = #tpu.pipeline_mode<synchronous>, transform_indices = @transform_6, window_bounds = array<i64: 1, 156>}, {pipeline_mode = #tpu.pipeline_mode<synchronous>, transform_indices = @transform_7, window_bounds = array<i64: 1, 156>}, {pipeline_mode = #tpu.pipeline_mode<synchronous>, transform_indices = @transform_8, window_bounds = array<i64: 1, 156>}, {pipeline_mode = #tpu.pipeline_mode<synchronous>, transform_indices = @transform_9, window_bounds = array<i64: 16, 16, 156>}, {pipeline_mode = #tpu.pipeline_mode<synchronous>, transform_indices = @transform_10, window_bounds = array<i64: 1, 16>}, {pipeline_mode = #tpu.pipeline_mode<synchronous>, transform_indices = @transform_11, window_bounds = array<i64: 2, 16>}, {pipeline_mode = #tpu.pipeline_mode<synchronous>, transform_indices = @transform_12, window_bounds = array<i64: 1, 2>}, {pipeline_mode = #tpu.pipeline_mode<synchronous>, transform_indices = @transform_13, window_bounds = array<i64: 2, 2>}, {pipeline_mode = #tpu.pipeline_mode<synchronous>, transform_indices = @transform_14, window_bounds = array<i64: 2, 16>}]} {
    %c0 = arith.constant 0 : index
    %c0_0 = arith.constant 0 : index
    %c0_1 = arith.constant 0 : index
    %c0_2 = arith.constant 0 : index
    %0 = vector.load %arg1[%c0, %c0_0, %c0_1, %c0_2] : memref<2x16x16x12xbf16, #tpu.memory_space<vmem>>, vector<2x16x16x12xbf16>
    %cst = arith.constant 0.000000e+00 : bf16
    %1 = vector.broadcast %cst : bf16 to vector<2x18x16x36xbf16>
    %c0_3 = arith.constant 0 : index
    %c0_4 = arith.constant 0 : index
    %c0_5 = arith.constant 0 : index
    %c0_6 = arith.constant 0 : index
    %2 = vector.load %arg16[%c0_3, %c0_4, %c0_5, %c0_6] : memref<2x18x16x36xbf16, #tpu.memory_space<vmem>>, vector<2x18x16x36xbf16>
    tpu.vector_store %arg16[%c0_3, %c0_4, %c0_5, %c0_6], %1 {strides = array<i32>} : memref<2x18x16x36xbf16, #tpu.memory_space<vmem>>, vector<2x18x16x36xbf16>,
    %3 = vector.extract_strided_slice %0 {offsets = [0, 0, 0, 0], sizes = [2, 16, 15, 12], strides = [1, 1, 1, 1]} : vector<2x16x16x12xbf16> to vector<2x16x15x12xbf16>
    %c0_7 = arith.constant 0 : index
    %c1 = arith.constant 1 : index
    %c1_8 = arith.constant 1 : index
    %c0_9 = arith.constant 0 : index
    %4 = vector.load %arg16[%c0_7, %c1, %c1_8, %c0_9] : memref<2x18x16x36xbf16, #tpu.memory_space<vmem>>, vector<2x16x15x12xbf16>
    tpu.vector_store %arg16[%c0_7, %c1, %c1_8, %c0_9], %3 {strides = array<i32>} : memref<2x18x16x36xbf16, #tpu.memory_space<vmem>>, vector<2x16x15x12xbf16>,
    %c0_10 = arith.constant 0 : index
    %c1_11 = arith.constant 1 : index
    %c0_12 = arith.constant 0 : index
    %c12 = arith.constant 12 : index
    %5 = vector.load %arg16[%c0_10, %c1_11, %c0_12, %c12] : memref<2x18x16x36xbf16, #tpu.memory_space<vmem>>, vector<2x16x16x12xbf16>
    tpu.vector_store %arg16[%c0_10, %c1_11, %c0_12, %c12], %0 {strides = array<i32>} : memref<2x18x16x36xbf16, #tpu.memory_space<vmem>>, vector<2x16x16x12xbf16>,
    %6 = vector.extract_strided_slice %0 {offsets = [0, 0, 1, 0], sizes = [2, 16, 15, 12], strides = [1, 1, 1, 1]} : vector<2x16x16x12xbf16> to vector<2x16x15x12xbf16>
    %c0_13 = arith.constant 0 : index
    %c1_14 = arith.constant 1 : index
    %c0_15 = arith.constant 0 : index
    %c24 = arith.constant 24 : index
    %7 = vector.load %arg16[%c0_13, %c1_14, %c0_15, %c24] : memref<2x18x16x36xbf16, #tpu.memory_space<vmem>>, vector<2x16x15x12xbf16>
    tpu.vector_store %arg16[%c0_13, %c1_14, %c0_15, %c24], %6 {strides = array<i32>} : memref<2x18x16x36xbf16, #tpu.memory_space<vmem>>, vector<2x16x15x12xbf16>,
    %c0_16 = arith.constant 0 : index
    %c0_17 = arith.constant 0 : index
    %c0_18 = arith.constant 0 : index
    %c0_19 = arith.constant 0 : index
    %8 = vector.load %arg16[%c0_16, %c0_17, %c0_18, %c0_19] : memref<2x18x16x36xbf16, #tpu.memory_space<vmem>>, vector<2x18x16x36xbf16>
    %9 = vector.shape_cast %8 : vector<2x18x16x36xbf16> to vector<576x36xbf16>
    %c0_20 = arith.constant 0 : index
    %c0_21 = arith.constant 0 : index
    %c0_22 = arith.constant 0 : index
    %10 = vector.load %arg2[%c0_20, %c0_21, %c0_22] : memref<3x36x64xbf16, #tpu.memory_space<vmem>>, vector<1x36x64xbf16>
    %11 = vector.shape_cast %10 : vector<1x36x64xbf16> to vector<36x64xbf16>
    %cst_23 = arith.constant dense<0.000000e+00> : vector<576x64xf32>
    %12 = tpu.matmul %9, %11, %cst_23 {dimension_numbers = #tpu.dot_dimension_numbers<[1], [0], [0], [1], [0, 0, 1, 1], [], []>} : vector<576x36xbf16>, vector<36x64xbf16>, vector<576x64xf32> -> vector<576x64xf32>
    %13 = vector.shape_cast %12 : vector<576x64xf32> to vector<2x18x16x64xf32>
    %c1_24 = arith.constant 1 : index
    %c0_25 = arith.constant 0 : index
    %c0_26 = arith.constant 0 : index
    %14 = vector.load %arg2[%c1_24, %c0_25, %c0_26] : memref<3x36x64xbf16, #tpu.memory_space<vmem>>, vector<1x36x64xbf16>
    %15 = vector.shape_cast %14 : vector<1x36x64xbf16> to vector<36x64xbf16>
    %cst_27 = arith.constant dense<0.000000e+00> : vector<576x64xf32>
    %16 = tpu.matmul %9, %15, %cst_27 {dimension_numbers = #tpu.dot_dimension_numbers<[1], [0], [0], [1], [0, 0, 1, 1], [], []>} : vector<576x36xbf16>, vector<36x64xbf16>, vector<576x64xf32> -> vector<576x64xf32>
    %17 = vector.shape_cast %16 : vector<576x64xf32> to vector<2x18x16x64xf32>
    %c2 = arith.constant 2 : index
    %c0_28 = arith.constant 0 : index
    %c0_29 = arith.constant 0 : index
    %18 = vector.load %arg2[%c2, %c0_28, %c0_29] : memref<3x36x64xbf16, #tpu.memory_space<vmem>>, vector<1x36x64xbf16>
    %19 = vector.shape_cast %18 : vector<1x36x64xbf16> to vector<36x64xbf16>
    %cst_30 = arith.constant dense<0.000000e+00> : vector<576x64xf32>
    %20 = tpu.matmul %9, %19, %cst_30 {dimension_numbers = #tpu.dot_dimension_numbers<[1], [0], [0], [1], [0, 0, 1, 1], [], []>} : vector<576x36xbf16>, vector<36x64xbf16>, vector<576x64xf32> -> vector<576x64xf32>
    %21 = vector.shape_cast %20 : vector<576x64xf32> to vector<2x18x16x64xf32>
    %22 = vector.extract_strided_slice %13 {offsets = [0, 0, 0, 0], sizes = [2, 16, 16, 64], strides = [1, 1, 1, 1]} : vector<2x18x16x64xf32> to vector<2x16x16x64xf32>
    %23 = vector.extract_strided_slice %17 {offsets = [0, 1, 0, 0], sizes = [2, 16, 16, 64], strides = [1, 1, 1, 1]} : vector<2x18x16x64xf32> to vector<2x16x16x64xf32>
    %24 = arith.addf %22, %23 : vector<2x16x16x64xf32>
    %25 = vector.extract_strided_slice %21 {offsets = [0, 2, 0, 0], sizes = [2, 16, 16, 64], strides = [1, 1, 1, 1]} : vector<2x18x16x64xf32> to vector<2x16x16x64xf32>
    %26 = arith.addf %24, %25 : vector<2x16x16x64xf32>
    %c0_31 = arith.constant 0 : index
    %c0_32 = arith.constant 0 : index
    %27 = vector.load %arg3[%c0_31, %c0_32] : memref<1x64xf32, #tpu.memory_space<vmem>>, vector<1x64xf32>
    %28 = vector.shape_cast %27 : vector<1x64xf32> to vector<1x1x1x64xf32>
    %29 = vector.broadcast %28 : vector<1x1x1x64xf32> to vector<2x16x16x64xf32>
    %30 = arith.addf %26, %29 : vector<2x16x16x64xf32>
    %cst_33 = arith.constant 0.000000e+00 : f32
    %31 = vector.broadcast %cst_33 : f32 to vector<2x16x16x64xf32>
    %32 = arith.maximumf %30, %31 : vector<2x16x16x64xf32>
    %c0_34 = arith.constant 0 : index
    %c0_35 = arith.constant 0 : index
    %33 = vector.load %arg4[%c0_34, %c0_35] : memref<1x64xf32, #tpu.memory_space<vmem>>, vector<1x64xf32>
    %34 = vector.shape_cast %33 : vector<1x64xf32> to vector<1x1x1x64xf32>
    %35 = vector.broadcast %34 : vector<1x1x1x64xf32> to vector<2x16x16x64xf32>
    %36 = arith.mulf %32, %35 : vector<2x16x16x64xf32>
    %c0_36 = arith.constant 0 : index
    %c0_37 = arith.constant 0 : index
    %37 = vector.load %arg5[%c0_36, %c0_37] : memref<1x64xf32, #tpu.memory_space<vmem>>, vector<1x64xf32>
    %38 = vector.shape_cast %37 : vector<1x64xf32> to vector<1x1x1x64xf32>
    %39 = vector.broadcast %38 : vector<1x1x1x64xf32> to vector<2x16x16x64xf32>
    %40 = arith.addf %36, %39 : vector<2x16x16x64xf32>
    %41 = vector.shape_cast %40 : vector<2x16x16x64xf32> to vector<16x2x16x64xf32>
    %42 = vector.extract_strided_slice %41 {offsets = [0, 0, 0, 0], sizes = [16, 1, 16, 64], strides = [1, 1, 1, 1]} : vector<16x2x16x64xf32> to vector<16x1x16x64xf32>
    %43 = vector.shape_cast %42 : vector<16x1x16x64xf32> to vector<16x16x64xf32>
    %44 = vector.extract_strided_slice %41 {offsets = [0, 1, 0, 0], sizes = [16, 1, 16, 64], strides = [1, 1, 1, 1]} : vector<16x2x16x64xf32> to vector<16x1x16x64xf32>
    %45 = vector.shape_cast %44 : vector<16x1x16x64xf32> to vector<16x16x64xf32>
    %46 = arith.maximumf %43, %45 : vector<16x16x64xf32>
    %47 = vector.shape_cast %46 : vector<16x16x64xf32> to vector<16x8x2x64xf32>
    %48 = vector.extract_strided_slice %47 {offsets = [0, 0, 0, 0], sizes = [16, 8, 1, 64], strides = [1, 1, 1, 1]} : vector<16x8x2x64xf32> to vector<16x8x1x64xf32>
    %49 = vector.shape_cast %48 : vector<16x8x1x64xf32> to vector<16x8x64xf32>
    %50 = vector.extract_strided_slice %47 {offsets = [0, 0, 1, 0], sizes = [16, 8, 1, 64], strides = [1, 1, 1, 1]} : vector<16x8x2x64xf32> to vector<16x8x1x64xf32>
    %51 = vector.shape_cast %50 : vector<16x8x1x64xf32> to vector<16x8x64xf32>
    %52 = arith.maximumf %49, %51 : vector<16x8x64xf32>
    %53 = vector.shape_cast %52 : vector<16x8x64xf32> to vector<2x8x8x64xf32>
    %54 = arith.truncf %53 : vector<2x8x8x64xf32> to vector<2x8x8x64xbf16>
    %cst_38 = arith.constant 0.000000e+00 : bf16
    %55 = vector.broadcast %cst_38 : bf16 to vector<2x10x8x192xbf16>
    %c0_39 = arith.constant 0 : index
    %c0_40 = arith.constant 0 : index
    %c0_41 = arith.constant 0 : index
    %c0_42 = arith.constant 0 : index
    %56 = vector.load %arg17[%c0_39, %c0_40, %c0_41, %c0_42] : memref<2x10x8x192xbf16, #tpu.memory_space<vmem>>, vector<2x10x8x192xbf16>
    tpu.vector_store %arg17[%c0_39, %c0_40, %c0_41, %c0_42], %55 {strides = array<i32>} : memref<2x10x8x192xbf16, #tpu.memory_space<vmem>>, vector<2x10x8x192xbf16>,
    %57 = vector.extract_strided_slice %54 {offsets = [0, 0, 0, 0], sizes = [2, 8, 7, 64], strides = [1, 1, 1, 1]} : vector<2x8x8x64xbf16> to vector<2x8x7x64xbf16>
    %c0_43 = arith.constant 0 : index
    %c1_44 = arith.constant 1 : index
    %c1_45 = arith.constant 1 : index
    %c0_46 = arith.constant 0 : index
    %58 = vector.load %arg17[%c0_43, %c1_44, %c1_45, %c0_46] : memref<2x10x8x192xbf16, #tpu.memory_space<vmem>>, vector<2x8x7x64xbf16>
    tpu.vector_store %arg17[%c0_43, %c1_44, %c1_45, %c0_46], %57 {strides = array<i32>} : memref<2x10x8x192xbf16, #tpu.memory_space<vmem>>, vector<2x8x7x64xbf16>,
    %c0_47 = arith.constant 0 : index
    %c1_48 = arith.constant 1 : index
    %c0_49 = arith.constant 0 : index
    %c64 = arith.constant 64 : index
    %59 = vector.load %arg17[%c0_47, %c1_48, %c0_49, %c64] : memref<2x10x8x192xbf16, #tpu.memory_space<vmem>>, vector<2x8x8x64xbf16>
    tpu.vector_store %arg17[%c0_47, %c1_48, %c0_49, %c64], %54 {strides = array<i32>} : memref<2x10x8x192xbf16, #tpu.memory_space<vmem>>, vector<2x8x8x64xbf16>,
    %60 = vector.extract_strided_slice %54 {offsets = [0, 0, 1, 0], sizes = [2, 8, 7, 64], strides = [1, 1, 1, 1]} : vector<2x8x8x64xbf16> to vector<2x8x7x64xbf16>
    %c0_50 = arith.constant 0 : index
    %c1_51 = arith.constant 1 : index
    %c0_52 = arith.constant 0 : index
    %c128 = arith.constant 128 : index
    %61 = vector.load %arg17[%c0_50, %c1_51, %c0_52, %c128] : memref<2x10x8x192xbf16, #tpu.memory_space<vmem>>, vector<2x8x7x64xbf16>
    tpu.vector_store %arg17[%c0_50, %c1_51, %c0_52, %c128], %60 {strides = array<i32>} : memref<2x10x8x192xbf16, #tpu.memory_space<vmem>>, vector<2x8x7x64xbf16>,
    %c0_53 = arith.constant 0 : index
    %c0_54 = arith.constant 0 : index
    %c0_55 = arith.constant 0 : index
    %c0_56 = arith.constant 0 : index
    %62 = vector.load %arg17[%c0_53, %c0_54, %c0_55, %c0_56] : memref<2x10x8x192xbf16, #tpu.memory_space<vmem>>, vector<2x10x8x192xbf16>
    %63 = vector.shape_cast %62 : vector<2x10x8x192xbf16> to vector<160x192xbf16>
    %c0_57 = arith.constant 0 : index
    %c0_58 = arith.constant 0 : index
    %c0_59 = arith.constant 0 : index
    %64 = vector.load %arg6[%c0_57, %c0_58, %c0_59] : memref<3x192x156xbf16, #tpu.memory_space<vmem>>, vector<1x192x156xbf16>
    %65 = vector.shape_cast %64 : vector<1x192x156xbf16> to vector<192x156xbf16>
    %cst_60 = arith.constant dense<0.000000e+00> : vector<160x156xf32>
    %66 = tpu.matmul %63, %65, %cst_60 {dimension_numbers = #tpu.dot_dimension_numbers<[1], [0], [0], [1], [0, 0, 1, 1], [], []>} : vector<160x192xbf16>, vector<192x156xbf16>, vector<160x156xf32> -> vector<160x156xf32>
    %67 = vector.shape_cast %66 : vector<160x156xf32> to vector<2x10x8x156xf32>
    %c1_61 = arith.constant 1 : index
    %c0_62 = arith.constant 0 : index
    %c0_63 = arith.constant 0 : index
    %68 = vector.load %arg6[%c1_61, %c0_62, %c0_63] : memref<3x192x156xbf16, #tpu.memory_space<vmem>>, vector<1x192x156xbf16>
    %69 = vector.shape_cast %68 : vector<1x192x156xbf16> to vector<192x156xbf16>
    %cst_64 = arith.constant dense<0.000000e+00> : vector<160x156xf32>
    %70 = tpu.matmul %63, %69, %cst_64 {dimension_numbers = #tpu.dot_dimension_numbers<[1], [0], [0], [1], [0, 0, 1, 1], [], []>} : vector<160x192xbf16>, vector<192x156xbf16>, vector<160x156xf32> -> vector<160x156xf32>
    %71 = vector.shape_cast %70 : vector<160x156xf32> to vector<2x10x8x156xf32>
    %c2_65 = arith.constant 2 : index
    %c0_66 = arith.constant 0 : index
    %c0_67 = arith.constant 0 : index
    %72 = vector.load %arg6[%c2_65, %c0_66, %c0_67] : memref<3x192x156xbf16, #tpu.memory_space<vmem>>, vector<1x192x156xbf16>
    %73 = vector.shape_cast %72 : vector<1x192x156xbf16> to vector<192x156xbf16>
    %cst_68 = arith.constant dense<0.000000e+00> : vector<160x156xf32>
    %74 = tpu.matmul %63, %73, %cst_68 {dimension_numbers = #tpu.dot_dimension_numbers<[1], [0], [0], [1], [0, 0, 1, 1], [], []>} : vector<160x192xbf16>, vector<192x156xbf16>, vector<160x156xf32> -> vector<160x156xf32>
    %75 = vector.shape_cast %74 : vector<160x156xf32> to vector<2x10x8x156xf32>
    %76 = vector.extract_strided_slice %67 {offsets = [0, 0, 0, 0], sizes = [2, 8, 8, 156], strides = [1, 1, 1, 1]} : vector<2x10x8x156xf32> to vector<2x8x8x156xf32>
    %77 = vector.extract_strided_slice %71 {offsets = [0, 1, 0, 0], sizes = [2, 8, 8, 156], strides = [1, 1, 1, 1]} : vector<2x10x8x156xf32> to vector<2x8x8x156xf32>
    %78 = arith.addf %76, %77 : vector<2x8x8x156xf32>
    %79 = vector.extract_strided_slice %75 {offsets = [0, 2, 0, 0], sizes = [2, 8, 8, 156], strides = [1, 1, 1, 1]} : vector<2x10x8x156xf32> to vector<2x8x8x156xf32>
    %80 = arith.addf %78, %79 : vector<2x8x8x156xf32>
    %c0_69 = arith.constant 0 : index
    %c0_70 = arith.constant 0 : index
    %81 = vector.load %arg7[%c0_69, %c0_70] : memref<1x156xf32, #tpu.memory_space<vmem>>, vector<1x156xf32>
    %82 = vector.shape_cast %81 : vector<1x156xf32> to vector<1x1x1x156xf32>
    %83 = vector.broadcast %82 : vector<1x1x1x156xf32> to vector<2x8x8x156xf32>
    %84 = arith.addf %80, %83 : vector<2x8x8x156xf32>
    %cst_71 = arith.constant 0.000000e+00 : f32
    %85 = vector.broadcast %cst_71 : f32 to vector<2x8x8x156xf32>
    %86 = arith.maximumf %84, %85 : vector<2x8x8x156xf32>
    %c0_72 = arith.constant 0 : index
    %c0_73 = arith.constant 0 : index
    %87 = vector.load %arg8[%c0_72, %c0_73] : memref<1x156xf32, #tpu.memory_space<vmem>>, vector<1x156xf32>
    %88 = vector.shape_cast %87 : vector<1x156xf32> to vector<1x1x1x156xf32>
    %89 = vector.broadcast %88 : vector<1x1x1x156xf32> to vector<2x8x8x156xf32>
    %90 = arith.mulf %86, %89 : vector<2x8x8x156xf32>
    %c0_74 = arith.constant 0 : index
    %c0_75 = arith.constant 0 : index
    %91 = vector.load %arg9[%c0_74, %c0_75] : memref<1x156xf32, #tpu.memory_space<vmem>>, vector<1x156xf32>
    %92 = vector.shape_cast %91 : vector<1x156xf32> to vector<1x1x1x156xf32>
    %93 = vector.broadcast %92 : vector<1x1x1x156xf32> to vector<2x8x8x156xf32>
    %94 = arith.addf %90, %93 : vector<2x8x8x156xf32>
    %95 = vector.shape_cast %94 : vector<2x8x8x156xf32> to vector<8x2x8x156xf32>
    %96 = vector.extract_strided_slice %95 {offsets = [0, 0, 0, 0], sizes = [8, 1, 8, 156], strides = [1, 1, 1, 1]} : vector<8x2x8x156xf32> to vector<8x1x8x156xf32>
    %97 = vector.shape_cast %96 : vector<8x1x8x156xf32> to vector<8x8x156xf32>
    %98 = vector.extract_strided_slice %95 {offsets = [0, 1, 0, 0], sizes = [8, 1, 8, 156], strides = [1, 1, 1, 1]} : vector<8x2x8x156xf32> to vector<8x1x8x156xf32>
    %99 = vector.shape_cast %98 : vector<8x1x8x156xf32> to vector<8x8x156xf32>
    %100 = arith.maximumf %97, %99 : vector<8x8x156xf32>
    %101 = vector.shape_cast %100 : vector<8x8x156xf32> to vector<8x4x2x156xf32>
    %102 = vector.extract_strided_slice %101 {offsets = [0, 0, 0, 0], sizes = [8, 4, 1, 156], strides = [1, 1, 1, 1]} : vector<8x4x2x156xf32> to vector<8x4x1x156xf32>
    %103 = vector.shape_cast %102 : vector<8x4x1x156xf32> to vector<8x4x156xf32>
    %104 = vector.extract_strided_slice %101 {offsets = [0, 0, 1, 0], sizes = [8, 4, 1, 156], strides = [1, 1, 1, 1]} : vector<8x4x2x156xf32> to vector<8x4x1x156xf32>
    %105 = vector.shape_cast %104 : vector<8x4x1x156xf32> to vector<8x4x156xf32>
    %106 = arith.maximumf %103, %105 : vector<8x4x156xf32>
    %107 = vector.shape_cast %106 : vector<8x4x156xf32> to vector<2x4x4x156xf32>
    %108 = arith.truncf %107 : vector<2x4x4x156xf32> to vector<2x4x4x156xbf16>
    %cst_76 = arith.constant 0.000000e+00 : f32
    %109 = vector.broadcast %cst_76 : f32 to vector<2x16xf32>
    %c0_77 = arith.constant 0 : index
    %c0_78 = arith.constant 0 : index
    %110 = vector.load %arg11[%c0_77, %c0_78] : memref<1x16xf32, #tpu.memory_space<vmem>>, vector<1x16xf32>
    %111 = vector.broadcast %110 : vector<1x16xf32> to vector<2x16xf32>
    %112 = arith.addf %109, %111 : vector<2x16xf32>
    %113 = vector.extract_strided_slice %108 {offsets = [0, 0, 0, 0], sizes = [2, 1, 1, 156], strides = [1, 1, 1, 1]} : vector<2x4x4x156xbf16> to vector<2x1x1x156xbf16>
    %114 = vector.shape_cast %113 : vector<2x1x1x156xbf16> to vector<2x156xbf16>
    %c0_79 = arith.constant 0 : index
    %c0_80 = arith.constant 0 : index
    %c0_81 = arith.constant 0 : index
    %115 = vector.load %arg10[%c0_79, %c0_80, %c0_81] : memref<16x16x156xbf16, #tpu.memory_space<vmem>>, vector<1x16x156xbf16>
    %116 = vector.shape_cast %115 : vector<1x16x156xbf16> to vector<16x156xbf16>
    %cst_82 = arith.constant dense<0.000000e+00> : vector<2x16xf32>
    %117 = tpu.matmul %114, %116, %cst_82 {dimension_numbers = #tpu.dot_dimension_numbers<[1], [1], [0], [0], [0, 0, 1, 0], [], []>} : vector<2x156xbf16>, vector<16x156xbf16>, vector<2x16xf32> -> vector<2x16xf32>
    %118 = arith.addf %112, %117 : vector<2x16xf32>
    %119 = vector.extract_strided_slice %108 {offsets = [0, 0, 1, 0], sizes = [2, 1, 1, 156], strides = [1, 1, 1, 1]} : vector<2x4x4x156xbf16> to vector<2x1x1x156xbf16>
    %120 = vector.shape_cast %119 : vector<2x1x1x156xbf16> to vector<2x156xbf16>
    %c1_83 = arith.constant 1 : index
    %c0_84 = arith.constant 0 : index
    %c0_85 = arith.constant 0 : index
    %121 = vector.load %arg10[%c1_83, %c0_84, %c0_85] : memref<16x16x156xbf16, #tpu.memory_space<vmem>>, vector<1x16x156xbf16>
    %122 = vector.shape_cast %121 : vector<1x16x156xbf16> to vector<16x156xbf16>
    %cst_86 = arith.constant dense<0.000000e+00> : vector<2x16xf32>
    %123 = tpu.matmul %120, %122, %cst_86 {dimension_numbers = #tpu.dot_dimension_numbers<[1], [1], [0], [0], [0, 0, 1, 0], [], []>} : vector<2x156xbf16>, vector<16x156xbf16>, vector<2x16xf32> -> vector<2x16xf32>
    %124 = arith.addf %118, %123 : vector<2x16xf32>
    %125 = vector.extract_strided_slice %108 {offsets = [0, 0, 2, 0], sizes = [2, 1, 1, 156], strides = [1, 1, 1, 1]} : vector<2x4x4x156xbf16> to vector<2x1x1x156xbf16>
    %126 = vector.shape_cast %125 : vector<2x1x1x156xbf16> to vector<2x156xbf16>
    %c2_87 = arith.constant 2 : index
    %c0_88 = arith.constant 0 : index
    %c0_89 = arith.constant 0 : index
    %127 = vector.load %arg10[%c2_87, %c0_88, %c0_89] : memref<16x16x156xbf16, #tpu.memory_space<vmem>>, vector<1x16x156xbf16>
    %128 = vector.shape_cast %127 : vector<1x16x156xbf16> to vector<16x156xbf16>
    %cst_90 = arith.constant dense<0.000000e+00> : vector<2x16xf32>
    %129 = tpu.matmul %126, %128, %cst_90 {dimension_numbers = #tpu.dot_dimension_numbers<[1], [1], [0], [0], [0, 0, 1, 0], [], []>} : vector<2x156xbf16>, vector<16x156xbf16>, vector<2x16xf32> -> vector<2x16xf32>
    %130 = arith.addf %124, %129 : vector<2x16xf32>
    %131 = vector.extract_strided_slice %108 {offsets = [0, 0, 3, 0], sizes = [2, 1, 1, 156], strides = [1, 1, 1, 1]} : vector<2x4x4x156xbf16> to vector<2x1x1x156xbf16>
    %132 = vector.shape_cast %131 : vector<2x1x1x156xbf16> to vector<2x156xbf16>
    %c3 = arith.constant 3 : index
    %c0_91 = arith.constant 0 : index
    %c0_92 = arith.constant 0 : index
    %133 = vector.load %arg10[%c3, %c0_91, %c0_92] : memref<16x16x156xbf16, #tpu.memory_space<vmem>>, vector<1x16x156xbf16>
    %134 = vector.shape_cast %133 : vector<1x16x156xbf16> to vector<16x156xbf16>
    %cst_93 = arith.constant dense<0.000000e+00> : vector<2x16xf32>
    %135 = tpu.matmul %132, %134, %cst_93 {dimension_numbers = #tpu.dot_dimension_numbers<[1], [1], [0], [0], [0, 0, 1, 0], [], []>} : vector<2x156xbf16>, vector<16x156xbf16>, vector<2x16xf32> -> vector<2x16xf32>
    %136 = arith.addf %130, %135 : vector<2x16xf32>
    %137 = vector.extract_strided_slice %108 {offsets = [0, 1, 0, 0], sizes = [2, 1, 1, 156], strides = [1, 1, 1, 1]} : vector<2x4x4x156xbf16> to vector<2x1x1x156xbf16>
    %138 = vector.shape_cast %137 : vector<2x1x1x156xbf16> to vector<2x156xbf16>
    %c4 = arith.constant 4 : index
    %c0_94 = arith.constant 0 : index
    %c0_95 = arith.constant 0 : index
    %139 = vector.load %arg10[%c4, %c0_94, %c0_95] : memref<16x16x156xbf16, #tpu.memory_space<vmem>>, vector<1x16x156xbf16>
    %140 = vector.shape_cast %139 : vector<1x16x156xbf16> to vector<16x156xbf16>
    %cst_96 = arith.constant dense<0.000000e+00> : vector<2x16xf32>
    %141 = tpu.matmul %138, %140, %cst_96 {dimension_numbers = #tpu.dot_dimension_numbers<[1], [1], [0], [0], [0, 0, 1, 0], [], []>} : vector<2x156xbf16>, vector<16x156xbf16>, vector<2x16xf32> -> vector<2x16xf32>
    %142 = arith.addf %136, %141 : vector<2x16xf32>
    %143 = vector.extract_strided_slice %108 {offsets = [0, 1, 1, 0], sizes = [2, 1, 1, 156], strides = [1, 1, 1, 1]} : vector<2x4x4x156xbf16> to vector<2x1x1x156xbf16>
    %144 = vector.shape_cast %143 : vector<2x1x1x156xbf16> to vector<2x156xbf16>
    %c5 = arith.constant 5 : index
    %c0_97 = arith.constant 0 : index
    %c0_98 = arith.constant 0 : index
    %145 = vector.load %arg10[%c5, %c0_97, %c0_98] : memref<16x16x156xbf16, #tpu.memory_space<vmem>>, vector<1x16x156xbf16>
    %146 = vector.shape_cast %145 : vector<1x16x156xbf16> to vector<16x156xbf16>
    %cst_99 = arith.constant dense<0.000000e+00> : vector<2x16xf32>
    %147 = tpu.matmul %144, %146, %cst_99 {dimension_numbers = #tpu.dot_dimension_numbers<[1], [1], [0], [0], [0, 0, 1, 0], [], []>} : vector<2x156xbf16>, vector<16x156xbf16>, vector<2x16xf32> -> vector<2x16xf32>
    %148 = arith.addf %142, %147 : vector<2x16xf32>
    %149 = vector.extract_strided_slice %108 {offsets = [0, 1, 2, 0], sizes = [2, 1, 1, 156], strides = [1, 1, 1, 1]} : vector<2x4x4x156xbf16> to vector<2x1x1x156xbf16>
    %150 = vector.shape_cast %149 : vector<2x1x1x156xbf16> to vector<2x156xbf16>
    %c6 = arith.constant 6 : index
    %c0_100 = arith.constant 0 : index
    %c0_101 = arith.constant 0 : index
    %151 = vector.load %arg10[%c6, %c0_100, %c0_101] : memref<16x16x156xbf16, #tpu.memory_space<vmem>>, vector<1x16x156xbf16>
    %152 = vector.shape_cast %151 : vector<1x16x156xbf16> to vector<16x156xbf16>
    %cst_102 = arith.constant dense<0.000000e+00> : vector<2x16xf32>
    %153 = tpu.matmul %150, %152, %cst_102 {dimension_numbers = #tpu.dot_dimension_numbers<[1], [1], [0], [0], [0, 0, 1, 0], [], []>} : vector<2x156xbf16>, vector<16x156xbf16>, vector<2x16xf32> -> vector<2x16xf32>
    %154 = arith.addf %148, %153 : vector<2x16xf32>
    %155 = vector.extract_strided_slice %108 {offsets = [0, 1, 3, 0], sizes = [2, 1, 1, 156], strides = [1, 1, 1, 1]} : vector<2x4x4x156xbf16> to vector<2x1x1x156xbf16>
    %156 = vector.shape_cast %155 : vector<2x1x1x156xbf16> to vector<2x156xbf16>
    %c7 = arith.constant 7 : index
    %c0_103 = arith.constant 0 : index
    %c0_104 = arith.constant 0 : index
    %157 = vector.load %arg10[%c7, %c0_103, %c0_104] : memref<16x16x156xbf16, #tpu.memory_space<vmem>>, vector<1x16x156xbf16>
    %158 = vector.shape_cast %157 : vector<1x16x156xbf16> to vector<16x156xbf16>
    %cst_105 = arith.constant dense<0.000000e+00> : vector<2x16xf32>
    %159 = tpu.matmul %156, %158, %cst_105 {dimension_numbers = #tpu.dot_dimension_numbers<[1], [1], [0], [0], [0, 0, 1, 0], [], []>} : vector<2x156xbf16>, vector<16x156xbf16>, vector<2x16xf32> -> vector<2x16xf32>
    %160 = arith.addf %154, %159 : vector<2x16xf32>
    %161 = vector.extract_strided_slice %108 {offsets = [0, 2, 0, 0], sizes = [2, 1, 1, 156], strides = [1, 1, 1, 1]} : vector<2x4x4x156xbf16> to vector<2x1x1x156xbf16>
    %162 = vector.shape_cast %161 : vector<2x1x1x156xbf16> to vector<2x156xbf16>
    %c8 = arith.constant 8 : index
    %c0_106 = arith.constant 0 : index
    %c0_107 = arith.constant 0 : index
    %163 = vector.load %arg10[%c8, %c0_106, %c0_107] : memref<16x16x156xbf16, #tpu.memory_space<vmem>>, vector<1x16x156xbf16>
    %164 = vector.shape_cast %163 : vector<1x16x156xbf16> to vector<16x156xbf16>
    %cst_108 = arith.constant dense<0.000000e+00> : vector<2x16xf32>
    %165 = tpu.matmul %162, %164, %cst_108 {dimension_numbers = #tpu.dot_dimension_numbers<[1], [1], [0], [0], [0, 0, 1, 0], [], []>} : vector<2x156xbf16>, vector<16x156xbf16>, vector<2x16xf32> -> vector<2x16xf32>
    %166 = arith.addf %160, %165 : vector<2x16xf32>
    %167 = vector.extract_strided_slice %108 {offsets = [0, 2, 1, 0], sizes = [2, 1, 1, 156], strides = [1, 1, 1, 1]} : vector<2x4x4x156xbf16> to vector<2x1x1x156xbf16>
    %168 = vector.shape_cast %167 : vector<2x1x1x156xbf16> to vector<2x156xbf16>
    %c9 = arith.constant 9 : index
    %c0_109 = arith.constant 0 : index
    %c0_110 = arith.constant 0 : index
    %169 = vector.load %arg10[%c9, %c0_109, %c0_110] : memref<16x16x156xbf16, #tpu.memory_space<vmem>>, vector<1x16x156xbf16>
    %170 = vector.shape_cast %169 : vector<1x16x156xbf16> to vector<16x156xbf16>
    %cst_111 = arith.constant dense<0.000000e+00> : vector<2x16xf32>
    %171 = tpu.matmul %168, %170, %cst_111 {dimension_numbers = #tpu.dot_dimension_numbers<[1], [1], [0], [0], [0, 0, 1, 0], [], []>} : vector<2x156xbf16>, vector<16x156xbf16>, vector<2x16xf32> -> vector<2x16xf32>
    %172 = arith.addf %166, %171 : vector<2x16xf32>
    %173 = vector.extract_strided_slice %108 {offsets = [0, 2, 2, 0], sizes = [2, 1, 1, 156], strides = [1, 1, 1, 1]} : vector<2x4x4x156xbf16> to vector<2x1x1x156xbf16>
    %174 = vector.shape_cast %173 : vector<2x1x1x156xbf16> to vector<2x156xbf16>
    %c10 = arith.constant 10 : index
    %c0_112 = arith.constant 0 : index
    %c0_113 = arith.constant 0 : index
    %175 = vector.load %arg10[%c10, %c0_112, %c0_113] : memref<16x16x156xbf16, #tpu.memory_space<vmem>>, vector<1x16x156xbf16>
    %176 = vector.shape_cast %175 : vector<1x16x156xbf16> to vector<16x156xbf16>
    %cst_114 = arith.constant dense<0.000000e+00> : vector<2x16xf32>
    %177 = tpu.matmul %174, %176, %cst_114 {dimension_numbers = #tpu.dot_dimension_numbers<[1], [1], [0], [0], [0, 0, 1, 0], [], []>} : vector<2x156xbf16>, vector<16x156xbf16>, vector<2x16xf32> -> vector<2x16xf32>
    %178 = arith.addf %172, %177 : vector<2x16xf32>
    %179 = vector.extract_strided_slice %108 {offsets = [0, 2, 3, 0], sizes = [2, 1, 1, 156], strides = [1, 1, 1, 1]} : vector<2x4x4x156xbf16> to vector<2x1x1x156xbf16>
    %180 = vector.shape_cast %179 : vector<2x1x1x156xbf16> to vector<2x156xbf16>
    %c11 = arith.constant 11 : index
    %c0_115 = arith.constant 0 : index
    %c0_116 = arith.constant 0 : index
    %181 = vector.load %arg10[%c11, %c0_115, %c0_116] : memref<16x16x156xbf16, #tpu.memory_space<vmem>>, vector<1x16x156xbf16>
    %182 = vector.shape_cast %181 : vector<1x16x156xbf16> to vector<16x156xbf16>
    %cst_117 = arith.constant dense<0.000000e+00> : vector<2x16xf32>
    %183 = tpu.matmul %180, %182, %cst_117 {dimension_numbers = #tpu.dot_dimension_numbers<[1], [1], [0], [0], [0, 0, 1, 0], [], []>} : vector<2x156xbf16>, vector<16x156xbf16>, vector<2x16xf32> -> vector<2x16xf32>
    %184 = arith.addf %178, %183 : vector<2x16xf32>
    %185 = vector.extract_strided_slice %108 {offsets = [0, 3, 0, 0], sizes = [2, 1, 1, 156], strides = [1, 1, 1, 1]} : vector<2x4x4x156xbf16> to vector<2x1x1x156xbf16>
    %186 = vector.shape_cast %185 : vector<2x1x1x156xbf16> to vector<2x156xbf16>
    %c12_118 = arith.constant 12 : index
    %c0_119 = arith.constant 0 : index
    %c0_120 = arith.constant 0 : index
    %187 = vector.load %arg10[%c12_118, %c0_119, %c0_120] : memref<16x16x156xbf16, #tpu.memory_space<vmem>>, vector<1x16x156xbf16>
    %188 = vector.shape_cast %187 : vector<1x16x156xbf16> to vector<16x156xbf16>
    %cst_121 = arith.constant dense<0.000000e+00> : vector<2x16xf32>
    %189 = tpu.matmul %186, %188, %cst_121 {dimension_numbers = #tpu.dot_dimension_numbers<[1], [1], [0], [0], [0, 0, 1, 0], [], []>} : vector<2x156xbf16>, vector<16x156xbf16>, vector<2x16xf32> -> vector<2x16xf32>
    %190 = arith.addf %184, %189 : vector<2x16xf32>
    %191 = vector.extract_strided_slice %108 {offsets = [0, 3, 1, 0], sizes = [2, 1, 1, 156], strides = [1, 1, 1, 1]} : vector<2x4x4x156xbf16> to vector<2x1x1x156xbf16>
    %192 = vector.shape_cast %191 : vector<2x1x1x156xbf16> to vector<2x156xbf16>
    %c13 = arith.constant 13 : index
    %c0_122 = arith.constant 0 : index
    %c0_123 = arith.constant 0 : index
    %193 = vector.load %arg10[%c13, %c0_122, %c0_123] : memref<16x16x156xbf16, #tpu.memory_space<vmem>>, vector<1x16x156xbf16>
    %194 = vector.shape_cast %193 : vector<1x16x156xbf16> to vector<16x156xbf16>
    %cst_124 = arith.constant dense<0.000000e+00> : vector<2x16xf32>
    %195 = tpu.matmul %192, %194, %cst_124 {dimension_numbers = #tpu.dot_dimension_numbers<[1], [1], [0], [0], [0, 0, 1, 0], [], []>} : vector<2x156xbf16>, vector<16x156xbf16>, vector<2x16xf32> -> vector<2x16xf32>
    %196 = arith.addf %190, %195 : vector<2x16xf32>
    %197 = vector.extract_strided_slice %108 {offsets = [0, 3, 2, 0], sizes = [2, 1, 1, 156], strides = [1, 1, 1, 1]} : vector<2x4x4x156xbf16> to vector<2x1x1x156xbf16>
    %198 = vector.shape_cast %197 : vector<2x1x1x156xbf16> to vector<2x156xbf16>
    %c14 = arith.constant 14 : index
    %c0_125 = arith.constant 0 : index
    %c0_126 = arith.constant 0 : index
    %199 = vector.load %arg10[%c14, %c0_125, %c0_126] : memref<16x16x156xbf16, #tpu.memory_space<vmem>>, vector<1x16x156xbf16>
    %200 = vector.shape_cast %199 : vector<1x16x156xbf16> to vector<16x156xbf16>
    %cst_127 = arith.constant dense<0.000000e+00> : vector<2x16xf32>
    %201 = tpu.matmul %198, %200, %cst_127 {dimension_numbers = #tpu.dot_dimension_numbers<[1], [1], [0], [0], [0, 0, 1, 0], [], []>} : vector<2x156xbf16>, vector<16x156xbf16>, vector<2x16xf32> -> vector<2x16xf32>
    %202 = arith.addf %196, %201 : vector<2x16xf32>
    %203 = vector.extract_strided_slice %108 {offsets = [0, 3, 3, 0], sizes = [2, 1, 1, 156], strides = [1, 1, 1, 1]} : vector<2x4x4x156xbf16> to vector<2x1x1x156xbf16>
    %204 = vector.shape_cast %203 : vector<2x1x1x156xbf16> to vector<2x156xbf16>
    %c15 = arith.constant 15 : index
    %c0_128 = arith.constant 0 : index
    %c0_129 = arith.constant 0 : index
    %205 = vector.load %arg10[%c15, %c0_128, %c0_129] : memref<16x16x156xbf16, #tpu.memory_space<vmem>>, vector<1x16x156xbf16>
    %206 = vector.shape_cast %205 : vector<1x16x156xbf16> to vector<16x156xbf16>
    %cst_130 = arith.constant dense<0.000000e+00> : vector<2x16xf32>
    %207 = tpu.matmul %204, %206, %cst_130 {dimension_numbers = #tpu.dot_dimension_numbers<[1], [1], [0], [0], [0, 0, 1, 0], [], []>} : vector<2x156xbf16>, vector<16x156xbf16>, vector<2x16xf32> -> vector<2x16xf32>
    %208 = arith.addf %202, %207 : vector<2x16xf32>
    %c0_131 = arith.constant 0 : index
    %c0_132 = arith.constant 0 : index
    %209 = vector.load %arg15[%c0_131, %c0_132] : memref<2x16xf32, #tpu.memory_space<vmem>>, vector<2x16xf32>
    tpu.vector_store %arg15[%c0_131, %c0_132], %208 {strides = array<i32>} : memref<2x16xf32, #tpu.memory_space<vmem>>, vector<2x16xf32>,
    %c0_133 = arith.constant 0 : index
    %c0_134 = arith.constant 0 : index
    %210 = vector.load %arg12[%c0_133, %c0_134] : memref<2x16xf32, #tpu.memory_space<vmem>>, vector<2x16xf32>
    %cst_135 = arith.constant dense<0.000000e+00> : vector<2x2xf32>
    %211 = tpu.matmul %208, %210, %cst_135 {dimension_numbers = #tpu.dot_dimension_numbers<[1], [1], [0], [0], [0, 0, 1, 0], [], []>} : vector<2x16xf32>, vector<2x16xf32>, vector<2x2xf32> -> vector<2x2xf32>
    %c0_136 = arith.constant 0 : index
    %c0_137 = arith.constant 0 : index
    %212 = vector.load %arg13[%c0_136, %c0_137] : memref<1x2xf32, #tpu.memory_space<vmem>>, vector<1x2xf32>
    %213 = vector.broadcast %212 : vector<1x2xf32> to vector<2x2xf32>
    %214 = arith.addf %211, %213 : vector<2x2xf32>
    %c0_138 = arith.constant 0 : index
    %c0_139 = arith.constant 0 : index
    %215 = vector.load %arg14[%c0_138, %c0_139] : memref<2x2xf32, #tpu.memory_space<vmem>>, vector<2x2xf32>
    tpu.vector_store %arg14[%c0_138, %c0_139], %214 {strides = array<i32>} : memref<2x2xf32, #tpu.memory_space<vmem>>, vector<2x2xf32>,
    return
  }
  func.func @transform_0(%arg0: i32) -> (i32, i32, i32, i32) {
    %c0_i32 = arith.constant 0 : i32
    %c0_i32_0 = arith.constant 0 : i32
    %c0_i32_1 = arith.constant 0 : i32
    %c0_i32_2 = arith.constant 0 : i32
    %c0_i32_3 = arith.constant 0 : i32
    return %c0_i32, %c0_i32_0, %c0_i32_1, %c0_i32_2 : i32, i32, i32, i32
  }
  func.func @transform_1(%arg0: i32) -> (i32, i32, i32) {
    %c0_i32 = arith.constant 0 : i32
    %c0_i32_0 = arith.constant 0 : i32
    %c0_i32_1 = arith.constant 0 : i32
    %c0_i32_2 = arith.constant 0 : i32
    return %c0_i32, %c0_i32_0, %c0_i32_1 : i32, i32, i32
  }
  func.func @transform_2(%arg0: i32) -> (i32, i32) {
    %c0_i32 = arith.constant 0 : i32
    %c0_i32_0 = arith.constant 0 : i32
    %c0_i32_1 = arith.constant 0 : i32
    return %c0_i32, %c0_i32_0 : i32, i32
  }
  func.func @transform_3(%arg0: i32) -> (i32, i32) {
    %c0_i32 = arith.constant 0 : i32
    %c0_i32_0 = arith.constant 0 : i32
    %c0_i32_1 = arith.constant 0 : i32
    return %c0_i32, %c0_i32_0 : i32, i32
  }
  func.func @transform_4(%arg0: i32) -> (i32, i32) {
    %c0_i32 = arith.constant 0 : i32
    %c0_i32_0 = arith.constant 0 : i32
    %c0_i32_1 = arith.constant 0 : i32
    return %c0_i32, %c0_i32_0 : i32, i32
  }
  func.func @transform_5(%arg0: i32) -> (i32, i32, i32) {
    %c0_i32 = arith.constant 0 : i32
    %c0_i32_0 = arith.constant 0 : i32
    %c0_i32_1 = arith.constant 0 : i32
    %c0_i32_2 = arith.constant 0 : i32
    return %c0_i32, %c0_i32_0, %c0_i32_1 : i32, i32, i32
  }
  func.func @transform_6(%arg0: i32) -> (i32, i32) {
    %c0_i32 = arith.constant 0 : i32
    %c0_i32_0 = arith.constant 0 : i32
    %c0_i32_1 = arith.constant 0 : i32
    return %c0_i32, %c0_i32_0 : i32, i32
  }
  func.func @transform_7(%arg0: i32) -> (i32, i32) {
    %c0_i32 = arith.constant 0 : i32
    %c0_i32_0 = arith.constant 0 : i32
    %c0_i32_1 = arith.constant 0 : i32
    return %c0_i32, %c0_i32_0 : i32, i32
  }
  func.func @transform_8(%arg0: i32) -> (i32, i32) {
    %c0_i32 = arith.constant 0 : i32
    %c0_i32_0 = arith.constant 0 : i32
    %c0_i32_1 = arith.constant 0 : i32
    return %c0_i32, %c0_i32_0 : i32, i32
  }
  func.func @transform_9(%arg0: i32) -> (i32, i32, i32) {
    %c0_i32 = arith.constant 0 : i32
    %c0_i32_0 = arith.constant 0 : i32
    %c0_i32_1 = arith.constant 0 : i32
    %c0_i32_2 = arith.constant 0 : i32
    return %c0_i32, %c0_i32_0, %c0_i32_1 : i32, i32, i32
  }
  func.func @transform_10(%arg0: i32) -> (i32, i32) {
    %c0_i32 = arith.constant 0 : i32
    %c0_i32_0 = arith.constant 0 : i32
    %c0_i32_1 = arith.constant 0 : i32
    return %c0_i32, %c0_i32_0 : i32, i32
  }
  func.func @transform_11(%arg0: i32) -> (i32, i32) {
    %c0_i32 = arith.constant 0 : i32
    %c0_i32_0 = arith.constant 0 : i32
    %c0_i32_1 = arith.constant 0 : i32
    return %c0_i32, %c0_i32_0 : i32, i32
  }
  func.func @transform_12(%arg0: i32) -> (i32, i32) {
    %c0_i32 = arith.constant 0 : i32
    %c0_i32_0 = arith.constant 0 : i32
    %c0_i32_1 = arith.constant 0 : i32
    return %c0_i32, %c0_i32_0 : i32, i32
  }
  func.func @transform_13(%arg0: i32) -> (i32, i32) {
    %c0_i32 = arith.constant 0 : i32
    %c0_i32_0 = arith.constant 0 : i32
    %c0_i32_1 = arith.constant 0 : i32
    return %c0_i32, %c0_i32_0 : i32, i32
  }
  func.func @transform_14(%arg0: i32) -> (i32, i32) {
    %c0_i32 = arith.constant 0 : i32
    %c0_i32_0 = arith.constant 0 : i32
    %c0_i32_1 = arith.constant 0 : i32
    return %c0_i32, %c0_i32_0 : i32, i32
  }
}

</mosaic_0001>

<bundles_post_ra>
// kernel: cnn_std_forward.1
= control target key start
LH: loop header
LB: loop body
LE: loop exit
PB: predicated region body
PF: predicated region fallthrough
CT: control target
= control target key end

     0   :  { %20 = vsyncpa [#allocation5], 0  ;;  %s10204_s17 = smov 12   ;;  %s10205_s22 = smov 24   ;;  %vm113_vm0 = vcmask 293888   ;;  %vm567_vm1 = vcmask 97280   ;;  %s14938_s0 = inlined_call_operand.vmem [shape: bf16[2,16,16,12], index: 0, kind: input, shape index: {}]   ;;  %s14939_s1 = inlined_call_operand.vmem [shape: bf16[3,36,64], index: 1, kind: input, shape index: {}]   ;;  %s14940_s2 = inlined_call_operand.vmem [shape: f32[1,64], index: 2, kind: input, shape index: {}]   ;;  %s14941_s3 = inlined_call_operand.vmem [shape: f32[1,64], index: 3, kind: input, shape index: {}]   ;;  %s14942_s4 = inlined_call_operand.vmem [shape: f32[1,64], index: 4, kind: input, shape index: {}]   ;;  %s14943_s5 = inlined_call_operand.vmem [shape: bf16[3,192,156], index: 5, kind: input, shape index: {}]   ;;  %s14944_s6 = inlined_call_operand.vmem [shape: f32[1,156], index: 6, kind: input, shape index: {}]   ;;  %s14945_s7 = inlined_call_operand.vmem [shape: f32[1,156], index: 7, kind: input, shape index: {}]   ;;  %s14946_s8 = inlined_call_operand.vmem [shape: f32[1,156], index: 8, kind: input, shape index: {}]   ;;  %s14947_s9 = inlined_call_operand.vmem [shape: bf16[16,16,156], index: 9, kind: input, shape index: {}]   ;;  %s14948_s10 = inlined_call_operand.vmem [shape: f32[1,16], index: 10, kind: input, shape index: {}]   ;;  %s14949_s11 = inlined_call_operand.vmem [shape: f32[2,16], index: 11, kind: input, shape index: {}]   ;;  %s14950_s12 = inlined_call_operand.vmem [shape: f32[1,2], index: 12, kind: input, shape index: {}]   ;;  %s14951_s13 = inlined_call_operand.hbm [shape: f32[2,2], index: 13, kind: output, shape index: {0}]   ;;  %s14952_s14 = inlined_call_operand.hbm [shape: f32[2,16], index: 14, kind: output, shape index: {1}]  }
   0x1   :  { %v10291_v0 = vld [vmem:[%s14938_s0] sm:$0xff]   ;;  %v10296_v1 = vld [vmem:[%s14938_s0 + $0x10] sm:$0xff]   ;;  %v10303_v2 = vld [vmem:[%s14938_s0 + $0x8] sm:$0xff]   ;;  %vm568_vm2 = vsmask.f32 7938  ;;  %vm1218_vm4 = vcmask 1041408  }
   0x2   :  { %666 = vrot.lane.b32.xlu0 %v10291_v0, %s10204_s17  ;;  %670 = vrot.lane.b32.xlu1 %v10296_v1, %s10204_s17  ;;  %v311_v3 = vshrl.u32 %v10291_v0, 16  ;;  %v314_v4 = vshll.u32 %v10291_v0, 16  ;;  %v321_v5 = vshll.u32 %v10303_v2, 16  ;;  %v318_v7 = vshrl.u32 %v10303_v2, 16  ;;  %v10319_v9 = vld [vmem:[%s14938_s0 + $0x18] sm:$0xff]   ;;  %v10333_v16 = vld [vmem:[%s14938_s0 + $0x20] sm:$0xff]   ;;  %vm10631_vm3 = vmand %vm567_vm1, %vm568_vm2 }
   0x3   :  { %v328_v8 = vshll.u32 %v10296_v1, 16  ;;  %v325_v13 = vshrl.u32 %v10296_v1, 16  ;;  %v335_v15 = vshll.u32 %v10319_v9, 16  ;;  %v332_v18 = vshrl.u32 %v10319_v9, 16  ;;  %v10345_v21 = vld [vmem:[%s14938_s0 + $0x28] sm:$0xff]   ;;  %v10357_v26 = vld [vmem:[%s14938_s0 + $0x30] sm:$0xff]  }
   0x4   :  { %v795_v6 = vrot.slane %v314_v4, 1  ;;  %v797_v10 = vrot.slane %v321_v5, 1  ;;  %v342_v20 = vshll.u32 %v10333_v16, 16  ;;  %v339_v23 = vshrl.u32 %v10333_v16, 16  ;;  %v10369_v31 = vld [vmem:[%s14938_s0 + $0x38] sm:$0xff]   ;;  %v10381_v36 = vld [vmem:[%s14938_s0 + $0x40] sm:$0xff]  }
   0x5   :  { %v799_v14 = vrot.slane %v328_v8, 1  ;;  %v801_v19 = vrot.slane %v335_v15, 1  ;;  %v349_v25 = vshll.u32 %v10345_v21, 16  ;;  %v346_v28 = vshrl.u32 %v10345_v21, 16  ;;  %v10393_v41 = vld [vmem:[%s14938_s0 + $0x48] sm:$0xff]   ;;  %v10399_v45 = vld [vmem:[%s14938_s0 + $0x50] sm:$0xff]  }
   0x6   :  { %668 = vrot.lane.b32.xlu0 %v10303_v2, %s10204_s17  ;;  %v796_v11 = vor.u32 %v795_v6, %v311_v3  ;;  %v798_v12 = vor.u32 %v797_v10, %v318_v7  ;;  %v803_v24 = vrot.slane %v342_v20, 1  ;;  %v356_v30 = vshll.u32 %v10357_v26, 16  ;;  %v10422_v55 = vld [vmem:[%s14938_s0 + $0x58] sm:$0xff]   ;;  %v10435_v62 = vld [vmem:[%s14938_s0 + $0x60] sm:$0xff]   ;;  %v10440_v63 = vld [vmem:[%s14938_s0 + $0x68] sm:$0xff]  }
   0x7   :  { %v800_v17 = vor.u32 %v799_v14, %v325_v13  ;;  %v802_v22 = vor.u32 %v801_v19, %v332_v18  ;;  %v805_v29 = vrot.slane %v349_v25, 1  ;;  %v353_v33 = vshrl.u32 %v10357_v26, 16 }
   0x8   :  { %859 = vrot.lane.b32.xlu1 %v796_v11, %s10205_s22  ;;  %v804_v27 = vor.u32 %v803_v24, %v339_v23  ;;  %v807_v34 = vrot.slane %v356_v30, 1  ;;  %v363_v35 = vshll.u32 %v10369_v31, 16  ;;  %v360_v38 = vshrl.u32 %v10369_v31, 16 }
   0x9   :  { %v806_v32 = vor.u32 %v805_v29, %v346_v28  ;;  %v370_v40 = vshll.u32 %v10381_v36, 16  ;;  %v313_v42 = vrot.slane %v311_v3, 7  ;;  %v320_v43 = vrot.slane %v318_v7, 7  ;;  %v10568_v29 = vld [vmem:[%s14938_s0 + $0x80] sm:$0xff]  }
   0xa   :  { %672 = vrot.lane.b32.xlu0 %v10319_v9, %s10204_s17  ;;  %v808_v37 = vor.u32 %v807_v34, %v353_v33  ;;  %v809_v39 = vrot.slane %v363_v35, 1  ;;  %v367_v46 = vshrl.u32 %v10381_v36, 16  ;;  %v377_v48 = vshll.u32 %v10393_v41, 16  ;;  %v9951_v9 = vld [vmem:[%s14939_s1] sm:$0xff]  }
   0xb   :  { %v811_v47 = vrot.slane %v370_v40, 1  ;;  %v10405_v49 = vrot.slane %v325_v13, 7  ;;  %v10407_v50 = vrot.slane %v332_v18, 7  ;;  %v10409_v51 = vrot.slane %v339_v23, 7  ;;  %9606 = vmatprep.subr.bf16.mxu0 %v9951_v9 }
   0xc   :  { %861 = vrot.lane.b32.xlu1 %v798_v12, %s10205_s22  ;;  %v810_v44 = vor.u32 %v809_v39, %v360_v38  ;;  %v10411_v52 = vrot.slane %v346_v28, 7  ;;  %v10415_v53 = vrot.slane %v353_v33, 7  ;;  %v10417_v54 = vrot.slane %v360_v38, 7  ;;  %v10465_v12 = vld [vmem:[%s14938_s0 + $0x70] sm:$0xff]   ;;  %v9953_v39 = vld [vmem:[%s14939_s1 + $0x8] sm:$0xff]   ;;  %9607 = vmatpush3.bf16.msra.mxu0 %v9951_v9 }
   0xd   :  { %v384_v56 = vshll.u32 %v10399_v45, 16  ;;  %v374_v57 = vshrl.u32 %v10393_v41, 16  ;;  %v381_v58 = vshrl.u32 %v10399_v45, 16  ;;  %v10428_v59 = vrot.slane %v367_v46, 7  ;;  %v10607_v38 = vld [vmem:[%s14938_s0 + $0x90] sm:$0xff]   ;;  %9608 = vmatprep.subr.bf16.mxu0 %v9953_v39 }
   0xe   :  { %674 = vrot.lane.b32.xlu0 %v10333_v16, %s10204_s17  ;;  %v812_v60 = vor.u32 %v811_v47, %v367_v46  ;;  %v813_v61 = vrot.slane %v377_v48, 1  ;;  %v10444_v3 = vor.u32 %v314_v4, %v313_v42  ;;  %v10456_v10 = vor.u32 %v321_v5, %v320_v43 }
   0xf   :  { %v10448_v6 = vrot.slane %v374_v57, 7  ;;  %v10452_v7 = vrot.slane %v381_v58, 7  ;;  %v815_v11 = vrot.slane %v384_v56, 1  ;;  %v388_v0 = vshrl.u32 %v10422_v55, 16 }
  0x10   :  { %863 = vrot.lane.b32.xlu1 %v800_v17, %s10205_s22  ;;  %v391_v4 = vshll.u32 %v10422_v55, 16  ;;  %v395_v13 = vshrl.u32 %v10435_v62, 16  ;;  %v398_v14 = vshll.u32 %v10435_v62, 16  ;;  %v814_v2 = vor.u32 %v813_v61, %v374_v57  ;;  %v10477_v17 = vld [vmem:[%s14938_s0 + $0x78] sm:$0xff]   ;;  %9609 = vmatpush3.bf16.msra.mxu0 %v9953_v39 }
  0x11   :  { %v10472_v5 = vrot.slane %v388_v0, 7  ;;  %v402_v18 = vshrl.u32 %v10440_v63, 16  ;;  %v405_v19 = vshll.u32 %v10440_v63, 16  ;;  %v330_v23 = vor.u32 %v328_v8, %v10405_v49 }
  0x12   :  { %676 = vrot.lane.b32.xlu0 %v10345_v21, %s10204_s17  ;;  %v10559_v24 = vor.u32 %v335_v15, %v10407_v50  ;;  %v412_v28 = vshll.u32 %v10465_v12, 16  ;;  %v10573_v1 = vor.u32 %v342_v20, %v10409_v51  ;;  %v10578_v8 = vor.u32 %v349_v25, %v10411_v52  ;;  %v10594_v21 = vld [vmem:[%s14938_s0 + $0x88] sm:$0xff]  }
  0x13   :  { %v816_v15 = vor.u32 %v815_v11, %v381_v58  ;;  %v397_v16 = vrot.slane %v395_v13, 7  ;;  %v819_v20 = vrot.slane %v398_v14, 1  ;;  %v404_v25 = vrot.slane %v402_v18, 7  ;;  %v9955_v58 = vld [vmem:[%s14939_s1 + $0x10] ss:$0 sps:$4 sm:$0x33]  }
  0x14   :  { %865 = vrot.lane.b32.xlu1 %v802_v22, %s10205_s22  ;;  %v14953_v22 = vmov 0   ;;  %v821_v33 = vrot.slane %v405_v19, 1  ;;  %v10615_v42 = vor.u32 %v356_v30, %v10415_v53  ;;  %v10620_v43 = vor.u32 %v363_v35, %v10417_v54  ;;  %v10699_v11 = vld [vmem:[%s14938_s0 + $0xa0] sm:$0xff]   ;;  %9909 = vmatprep.subr.msk.bf16.mxu0 %vm1218_vm4, %v9955_v58 }
  0x15   :  { %115 = vst.msk [vmem:[#allocation2 + $0x8] sm:$0xff] %vm113_vm0, %v14953_v22  ;;  %114 = vst.msk [vmem:[#allocation2] sm:$0xff] %vm113_vm0, %v14953_v22  ;;  %v423_v46 = vshrl.u32 %v10568_v29, 16  ;;  %v10638_v30 = vor.u32 %v370_v40, %v10428_v59  ;;  %v419_v47 = vshll.u32 %v10477_v17, 16  ;;  %v10651_v49 = vor.u32 %v384_v56, %v10452_v7  ;;  %v10658_v40 = vld [vmem:[%s14938_s0 + $0x98] sm:$0xff]  }
  0x16   :  { %678 = vrot.lane.b32.xlu0 %v10357_v26, %s10204_s17  ;;  %116 = vst.msk [vmem:[#allocation2 + $0x10] sm:$0xff] %vm113_vm0, %v14953_v22  ;;  %117 = vst.msk [vmem:[#allocation2 + $0x18] sm:$0xff] %vm113_vm0, %v14953_v22  ;;  %v10681_v59 = vor.u32 %v391_v4, %v10472_v5  ;;  %v451_v39 = vshrl.u32 %v10699_v11, 16 }
  0x17   :  { %118 = vst.msk [vmem:[#allocation2 + $0x20] sm:$0xff] %vm113_vm0, %v14953_v22  ;;  %119 = vst.msk [vmem:[#allocation2 + $0x28] sm:$0xff] %vm113_vm0, %v14953_v22 }
  0x18   :  { %867 = vrot.lane.b32.xlu1 %v804_v27, %s10205_s22  ;;  %120 = vst.msk [vmem:[#allocation2 + $0x30] sm:$0xff] %vm113_vm0, %v14953_v22  ;;  %121 = vst.msk [vmem:[#allocation2 + $0x38] sm:$0xff] %vm113_vm0, %v14953_v22  ;;  %v409_v27 = vshrl.u32 %v10465_v12, 16 }
  0x19   :  { %122 = vst.msk [vmem:[#allocation2 + $0x40] sm:$0xff] %vm113_vm0, %v14953_v22  ;;  %123 = vst.msk [vmem:[#allocation2 + $0x48] sm:$0xff] %vm113_vm0, %v14953_v22 }
  0x1a   :  { %680 = vrot.lane.b32.xlu0 %v10369_v31, %s10204_s17  ;;  %124 = vst.msk [vmem:[#allocation2 + $0x50] sm:$0xff] %vm113_vm0, %v14953_v22  ;;  %125 = vst.msk [vmem:[#allocation2 + $0x58] sm:$0xff] %vm113_vm0, %v14953_v22  ;;  %v411_v34 = vrot.slane %v409_v27, 7  ;;  %v10643_v31 = vor.u32 %v377_v48, %v10448_v6  ;;  %v437_v48 = vshrl.u32 %v10607_v38, 16 }
  0x1b   :  { %126 = vst.msk [vmem:[#allocation2 + $0x60] sm:$0xff] %vm113_vm0, %v14953_v22  ;;  %127 = vst.msk [vmem:[#allocation2 + $0x68] sm:$0xff] %vm113_vm0, %v14953_v22 }
  0x1c   :  { %869 = vrot.lane.b32.xlu1 %v806_v32, %s10205_s22  ;;  %128 = vst.msk [vmem:[#allocation2 + $0x70] sm:$0xff] %vm113_vm0, %v14953_v22  ;;  %129 = vst.msk [vmem:[#allocation2 + $0x78] sm:$0xff] %vm113_vm0, %v14953_v22  ;;  %v817_v32 = vrot.slane %v391_v4, 1  ;;  %v570_v50 = vld [vmem:[#allocation2 + $0x8] sm:$0xff]  ;;  %v439_v61 = vrot.slane %v437_v48, 7  ;;  %v1054_v7 = vld [vmem:[#allocation2] sm:$0xff] }
  0x1d   :  { %130 = vst.msk [vmem:[#allocation2 + $0x80] sm:$0xff] %vm113_vm0, %v14953_v22  ;;  %131 = vst.msk [vmem:[#allocation2 + $0x88] sm:$0xff] %vm113_vm0, %v14953_v22  ;;  %v576_v51 = vld [vmem:[#allocation2 + $0x18] sm:$0xff]  ;;  %v573_v52 = vld [vmem:[#allocation2 + $0x10] sm:$0xff]  ;;  %v571_v53 = vsel %vm10631_vm3, %v10444_v3, %v570_v50  ;;  %9612 = vmatprep.mubr.msk.bf16.mxu0 %vm113_vm0, %v1054_v7 }
  0x1e   :  { %682 = vrot.lane.b32.xlu0 %v10381_v36, %s10204_s17  ;;  %132 = vst.msk [vmem:[#allocation2 + $0x90] sm:$0xff] %vm113_vm0, %v14953_v22  ;;  %133 = vst.msk [vmem:[#allocation2 + $0x98] sm:$0xff] %vm113_vm0, %v14953_v22  ;;  %v425_v36 = vrot.slane %v423_v46, 7  ;;  %v577_v54 = vsel %vm10631_vm3, %v330_v23, %v576_v51  ;;  %v574_v56 = vsel %vm10631_vm3, %v10456_v10, %v573_v52  ;;  %v579_v57 = vld [vmem:[#allocation2 + $0x20] sm:$0xff]  ;;  %v582_v6 = vld [vmem:[#allocation2 + $0x28] sm:$0xff] }
  0x1f   :  { %134 = vst.msk [vmem:[#allocation2 + $0xa0] sm:$0xff] %vm113_vm0, %v14953_v22  ;;  %135 = vst.msk [vmem:[#allocation2 + $0xa8] sm:$0xff] %vm113_vm0, %v14953_v22  ;;  %v580_v3 = vsel %vm10631_vm3, %v10559_v24, %v579_v57  ;;  %v820_v10 = vor.u32 %v819_v20, %v395_v13  ;;  %v10708_v4 = vld [vmem:[%s14939_s1 + $0x14] sm:$0xff]   ;;  %v10716_v13 = vor.u32 %v821_v33, %v402_v18  ;;  %v10775_v52 = vld [vmem:[%s14939_s1 + $0x24] ss:$0 sps:$4 sm:$0x33]  }
  0x20   :  { %871 = vrot.lane.b32.xlu1 %v808_v37, %s10205_s22  ;;  %136 = vst.msk [vmem:[#allocation2 + $0xb0] sm:$0xff] %vm113_vm0, %v14953_v22  ;;  %137 = vst.msk [vmem:[#allocation2 + $0xb8] sm:$0xff] %vm113_vm0, %v14953_v22  ;;  %v416_v37 = vshrl.u32 %v10477_v17, 16  ;;  %v585_v5 = vld [vmem:[#allocation2 + $0x30] sm:$0xff]  ;;  %v588_v23 = vld [vmem:[#allocation2 + $0x38] sm:$0xff]  ;;  %v10724_v24 = vor.u32 %v412_v28, %v411_v34  ;;  %9845 = vmatprep.subr.bf16.mxu1 %v10708_v4 }
  0x21   :  { %138 = vst.msk [vmem:[#allocation2 + $0xc0] sm:$0xff] %vm113_vm0, %v14953_v22  ;;  %139 = vst.msk [vmem:[#allocation2 + $0xc8] sm:$0xff] %vm113_vm0, %v14953_v22  ;;  %v586_v18 = vsel %vm10631_vm3, %v10578_v8, %v585_v5  ;;  %v594_v9 = vld [vmem:[#allocation2 + $0x48] sm:$0xff]  ;;  %v589_v8 = vsel %vm10631_vm3, %v10615_v42, %v588_v23  ;;  %9848 = vmatpush3.bf16.msra.mxu1 %v10708_v4  ;;  %v597_v42 = vld [vmem:[#allocation2 + $0x50] sm:$0xff] }
  0x22   :  { %684 = vrot.lane.b32.xlu0 %v10393_v41, %s10204_s17  ;;  %140 = vst.msk [vmem:[#allocation2 + $0xd0] sm:$0xff] %vm113_vm0, %v14953_v22  ;;  %141 = vst.msk [vmem:[#allocation2 + $0xd8] sm:$0xff] %vm113_vm0, %v14953_v22  ;;  %v418_v35 = vrot.slane %v416_v37, 7  ;;  %v430_v41 = vshrl.u32 %v10594_v21, 16  ;;  %v10757_v34 = vld [vmem:[%s14938_s0 + $0xa8] sm:$0xff]   ;;  %v595_v50 = vsel %vm10631_vm3, %v10638_v30, %v594_v9  ;;  %v598_v51 = vsel %vm10631_vm3, %v10643_v31, %v597_v42  ;;  %v603_v31 = vld [vmem:[#allocation2 + $0x60] sm:$0xff] }
  0x23   :  { %142 = vst.msk [vmem:[#allocation2 + $0xe0] sm:$0xff] %vm113_vm0, %v14953_v22  ;;  %143 = vst.msk [vmem:[#allocation2 + $0xe8] sm:$0xff] %vm113_vm0, %v14953_v22  ;;  %v825_v30 = vrot.slane %v419_v47, 1  ;;  %v609_v57 = vld [vmem:[#allocation2 + $0x70] sm:$0xff] }
  0x24   :  { %873 = vrot.lane.b32.xlu1 %v810_v44, %s10205_s22  ;;  %144 = vst.msk [vmem:[#allocation2 + $0xf0] sm:$0xff] %vm113_vm0, %v14953_v22  ;;  %145 = vst.msk [vmem:[#allocation2 + $0xf8] sm:$0xff] %vm113_vm0, %v14953_v22  ;;  %v10626_v44 = vrot.slane %v412_v28, 1  ;;  %v440_v28 = vshll.u32 %v10607_v38, 16  ;;  %v421_v20 = vor.u32 %v419_v47, %v418_v35  ;;  %v604_v47 = vsel %vm10631_vm3, %v10681_v59, %v603_v31 }
  0x25   :  { %146 = vst.msk [vmem:[#allocation2 + $0x100] sm:$0xff] %vm113_vm0, %v14953_v22  ;;  %147 = vst.msk [vmem:[#allocation2 + $0x108] sm:$0xff] %vm113_vm0, %v14953_v22  ;;  %v826_v23 = vor.u32 %v825_v30, %v416_v37  ;;  %v461_v37 = vshll.u32 %v10757_v34, 16 }
  0x26   :  { %686 = vrot.lane.b32.xlu0 %v10399_v45, %s10204_s17  ;;  %148 = vst.msk [vmem:[#allocation2 + $0x110] sm:$0xff] %vm113_vm0, %v14953_v22  ;;  %149 = vst.msk [vmem:[#allocation2 + $0x118] sm:$0xff] %vm113_vm0, %v14953_v22  ;;  %v818_v45 = vor.u32 %v817_v32, %v388_v0  ;;  %v583_v0 = vsel %vm10631_vm3, %v10573_v1, %v582_v6  ;;  %v591_v1 = vld [vmem:[#allocation2 + $0x40] sm:$0xff]  ;;  %v442_v35 = vor.u32 %v440_v28, %v439_v61  ;;  %v618_v61 = vld [vmem:[#allocation2 + $0x98] sm:$0xff] }
  0x27   :  { %572 = vst [vmem:[#allocation2 + $0x8] sm:$0xff] %v571_v53  ;;  %578 = vst [vmem:[#allocation2 + $0x18] sm:$0xff] %v577_v54  ;;  %v453_v53 = vrot.slane %v451_v39, 7  ;;  %v454_v54 = vshll.u32 %v10699_v11, 16  ;;  %v621_v7 = vld [vmem:[#allocation2 + $0xa0] sm:$0xff]  ;;  %v831_v31 = vrot.slane %v440_v28, 1 }
  0x28   :  { %875 = vrot.lane.b32.xlu1 %v812_v60, %s10205_s22  ;;  %v432_v60 = vrot.slane %v430_v41, 7  ;;  %575 = vst [vmem:[#allocation2 + $0x10] sm:$0xff] %v574_v56  ;;  %581 = vst [vmem:[#allocation2 + $0x20] sm:$0xff] %v580_v3  ;;  %v606_v56 = vld [vmem:[#allocation2 + $0x68] sm:$0xff]  ;;  %v10800_v3 = vsel %vm1218_vm4, %v10775_v52, 0 }
  0x29   :  { %584 = vst [vmem:[#allocation2 + $0x28] sm:$0xff] %v583_v0  ;;  %587 = vst [vmem:[#allocation2 + $0x30] sm:$0xff] %v586_v18  ;;  %v10814_v0 = vld [vmem:[%s14938_s0 + $0xb0] sm:$0xff]  }
  0x2a   :  { %688 = vrot.lane.b32.xlu0 %v10422_v55, %s10204_s17  ;;  %v10692_v55 = vor.u32 %v398_v14, %v397_v16  ;;  %v444_v14 = vshrl.u32 %v10658_v40, 16  ;;  %v592_v16 = vsel %vm10631_vm3, %v10620_v43, %v591_v1  ;;  %590 = vst [vmem:[#allocation2 + $0x38] sm:$0xff] %v589_v8  ;;  %v600_v43 = vld [vmem:[#allocation2 + $0x58] sm:$0xff]  ;;  %596 = vst [vmem:[#allocation2 + $0x48] sm:$0xff] %v595_v50  ;;  %v627_v1 = vld [vmem:[#allocation2 + $0xb0] sm:$0xff]  ;;  %v465_v9 = vshrl.u32 %v10814_v0, 16 }
  0x2b   :  { %593 = vst [vmem:[#allocation2 + $0x40] sm:$0xff] %v592_v16  ;;  %599 = vst [vmem:[#allocation2 + $0x50] sm:$0xff] %v598_v51  ;;  %v630_v8 = vld [vmem:[#allocation2 + $0xb8] sm:$0xff]  ;;  %v633_v50 = vld [vmem:[#allocation2 + $0xc0] sm:$0xff] }
  0x2c   :  { %877 = vrot.lane.b32.xlu1 %v814_v2, %s10205_s22  ;;  %v1220_v2 = vsel %vm1218_vm4, %v9955_v58, 0  ;;  %v446_v32 = vrot.slane %v444_v14, 7  ;;  %v612_v58 = vld [vmem:[#allocation2 + $0x78] sm:$0xff]  ;;  %605 = vst [vmem:[#allocation2 + $0x60] sm:$0xff] %v604_v47  ;;  %v607_v6 = vsel %vm10631_vm3, %v10692_v55, %v606_v56  ;;  %v636_v56 = vld [vmem:[#allocation2 + $0xc8] sm:$0xff]  ;;  %v832_v47 = vor.u32 %v831_v31, %v437_v48 }
  0x2d   :  { %9611 = vmatpush3.bf16.msra.mxu0 %v1220_v2  ;;  %v613_v59 = vsel %vm10631_vm3, %v10724_v24, %v612_v58  ;;  %608 = vst [vmem:[#allocation2 + $0x68] sm:$0xff] %v607_v6  ;;  %v456_v24 = vor.u32 %v454_v54, %v453_v53 }
  0x2e   :  { %690 = vrot.lane.b32.xlu0 %v10435_v62, %s10204_s17  ;;  %v10712_v62 = vor.u32 %v405_v19, %v404_v25  ;;  %v426_v19 = vshll.u32 %v10568_v29, 16  ;;  %9684 = vmatprep.subr.bf16.mxu0 %v10708_v4  ;;  %614 = vst [vmem:[#allocation2 + $0x78] sm:$0xff] %v613_v59 }
  0x30   :  { %879 = vrot.lane.b32.xlu1 %v816_v15, %s10205_s22  ;;  %v10735_v15 = vld [vmem:[%s14939_s1 + $0x1c] sm:$0xff]   ;;  %v428_v25 = vor.u32 %v426_v19, %v425_v36  ;;  %v447_v36 = vshll.u32 %v10658_v40, 16 }
  0x31   :  { %9846 = vmatprep.subr.bf16.mxu1 %v10735_v15 }
  0x32   :  { %692 = vrot.lane.b32.xlu0 %v10440_v63, %s10204_s17  ;;  %v433_v63 = vshll.u32 %v10594_v21, 16  ;;  %9849 = vmatpush3.bf16.msra.mxu1 %v10735_v15  ;;  %v833_v58 = vrot.slane %v447_v36, 1 }
  0x33   :  { %9911 = vmatprep.subr.msk.bf16.mxu1 %vm1218_vm4, %v10775_v52 }
  0x34   :  { %881 = vrot.lane.b32.xlu1 %v818_v45, %s10205_s22  ;;  %v435_v33 = vor.u32 %v433_v63, %v432_v60  ;;  %v824_v45 = vor.u32 %v10626_v44, %v409_v27  ;;  %v458_v27 = vshrl.u32 %v10757_v34, 16  ;;  %v601_v44 = vsel %vm10631_vm3, %v10651_v49, %v600_v43  ;;  %v615_v60 = vld [vmem:[#allocation2 + $0x80] sm:$0xff] }
  0x35   :  { %602 = vst [vmem:[#allocation2 + $0x58] sm:$0xff] %v601_v44  ;;  %v610_v49 = vsel %vm10631_vm3, %v10712_v62, %v609_v57  ;;  %v616_v55 = vsel %vm10631_vm3, %v421_v20, %v615_v60  ;;  %v619_v62 = vsel %vm10631_vm3, %v428_v25, %v618_v61  ;;  %v467_v20 = vrot.slane %v465_v9, 7  ;;  %v639_v60 = vld [vmem:[#allocation2 + $0xd0] sm:$0xff] }
  0x36   :  { %694 = vrot.lane.b32.xlu0 %v10465_v12, %s10204_s17  ;;  %v449_v12 = vor.u32 %v447_v36, %v446_v32  ;;  %611 = vst [vmem:[#allocation2 + $0x70] sm:$0xff] %v610_v49  ;;  %v622_v2 = vsel %vm10631_vm3, %v435_v33, %v621_v7  ;;  %617 = vst [vmem:[#allocation2 + $0x80] sm:$0xff] %v616_v55  ;;  %v460_v18 = vrot.slane %v458_v27, 7  ;;  %9850 = vmatpush3.bf16.msra.mxu1 %v10800_v3  ;;  %v10859_v33 = vld [vmem:[%s14938_s0 + $0xc0] sm:$0xff]  }
  0x37   :  { %620 = vst [vmem:[#allocation2 + $0x98] sm:$0xff] %v619_v62  ;;  %623 = vst [vmem:[#allocation2 + $0xa0] sm:$0xff] %v622_v2  ;;  %v827_v32 = vrot.slane %v426_v19, 1  ;;  %v631_v25 = vsel %vm10631_vm3, %v456_v24, %v630_v8  ;;  %v468_v19 = vshll.u32 %v10814_v0, 16  ;;  %v834_v59 = vor.u32 %v833_v58, %v444_v14  ;;  %v645_v24 = vld [vmem:[#allocation2 + $0xe0] sm:$0xff] }
  0x38   :  { %883 = vrot.lane.b32.xlu1 %v820_v10, %s10205_s22  ;;  %v624_v10 = vld [vmem:[#allocation2 + $0xa8] sm:$0xff]  ;;  %v463_v16 = vor.u32 %v461_v37, %v460_v18  ;;  %632 = vst [vmem:[#allocation2 + $0xb8] sm:$0xff] %v631_v25  ;;  %v835_v7 = vrot.slane %v454_v54, 1 }
  0x39   :  { %v625_v5 = vsel %vm10631_vm3, %v442_v35, %v624_v10  ;;  %v828_v43 = vor.u32 %v827_v32, %v423_v46  ;;  %v829_v35 = vrot.slane %v433_v63, 1  ;;  %v470_v51 = vor.u32 %v468_v19, %v467_v20  ;;  %v642_v10 = vld [vmem:[#allocation2 + $0xd8] sm:$0xff] }
  0x3a   :  { %696 = vrot.lane.b32.xlu0 %v10477_v17, %s10204_s17  ;;  %626 = vst [vmem:[#allocation2 + $0xa8] sm:$0xff] %v625_v5  ;;  %v10841_v17 = vld [vmem:[%s14938_s0 + $0xb8] sm:$0xff]   ;;  %v634_v30 = vsel %vm10631_vm3, %v463_v16, %v633_v50  ;;  %v479_v63 = vshrl.u32 %v10859_v33, 16  ;;  %v836_v5 = vor.u32 %v835_v7, %v451_v39  ;;  %v839_v8 = vrot.slane %v468_v19, 1  ;;  %v648_v16 = vld [vmem:[#allocation2 + $0xe8] sm:$0xff] }
  0x3b   :  { %v472_v42 = vshrl.u32 %v10841_v17, 16  ;;  %635 = vst [vmem:[#allocation2 + $0xc0] sm:$0xff] %v634_v30  ;;  %v475_v46 = vshll.u32 %v10841_v17, 16  ;;  %v830_v53 = vor.u32 %v829_v35, %v430_v41  ;;  %v637_v44 = vsel %vm10631_vm3, %v470_v51, %v636_v56  ;;  %v651_v51 = vld [vmem:[#allocation2 + $0xf0] sm:$0xff] }
  0x3c   :  { %885 = vrot.lane.b32.xlu1 %v10716_v13, %s10205_s22  ;;  %v628_v13 = vsel %vm10631_vm3, %v449_v12, %v627_v1  ;;  %v481_v12 = vrot.slane %v479_v63, 7  ;;  %638 = vst [vmem:[#allocation2 + $0xc8] sm:$0xff] %v637_v44  ;;  %v482_v41 = vshll.u32 %v10859_v33, 16  ;;  %v840_v35 = vor.u32 %v839_v8, %v465_v9 }
  0x3d   :  { %629 = vst [vmem:[#allocation2 + $0xb0] sm:$0xff] %v628_v13  ;;  %v841_v50 = vrot.slane %v475_v46, 1 }
  0x3e   :  { %887 = vrot.lane.b32.xlu0 %v824_v45, %s10205_s22  ;;  %v474_v45 = vrot.slane %v472_v42, 7  ;;  %v484_v61 = vor.u32 %v482_v41, %v481_v12  ;;  %v843_v56 = vrot.slane %v482_v41, 1 }
  0x3f   :  { %v842_v31 = vor.u32 %v841_v50, %v472_v42 }
  0x40   :  { %889 = vrot.lane.b32.xlu1 %v826_v23, %s10205_s22  ;;  %v477_v57 = vor.u32 %v475_v46, %v474_v45  ;;  %v643_v2 = vsel %vm10631_vm3, %v484_v61, %v642_v10  ;;  %v837_v23 = vrot.slane %v461_v37, 1 }
  0x41   :  { %644 = vst [vmem:[#allocation2 + $0xd8] sm:$0xff] %v643_v2 }
  0x42   :  { %698 = vrot.lane.b32.xlu0 %v10568_v29, %s10204_s17  ;;  %v10880_v29 = vld [vmem:[%s14938_s0 + $0xc8] sm:$0xff]   ;;  %v640_v49 = vsel %vm10631_vm3, %v477_v57, %v639_v60  ;;  %v838_v32 = vor.u32 %v837_v23, %v458_v27  ;;  %v654_v57 = vld [vmem:[#allocation2 + $0xf8] sm:$0xff] }
  0x43   :  { %v486_v28 = vshrl.u32 %v10880_v29, 16  ;;  %641 = vst [vmem:[#allocation2 + $0xd0] sm:$0xff] %v640_v49  ;;  %v489_v48 = vshll.u32 %v10880_v29, 16 }
  0x44   :  { %700 = vrot.lane.b32.xlu1 %v10594_v21, %s10204_s17  ;;  %v10900_v21 = vld [vmem:[%s14938_s0 + $0xd0] sm:$0xff]  }
  0x45   :  { %v488_v6 = vrot.slane %v486_v28, 7  ;;  %v493_v36 = vshrl.u32 %v10900_v21, 16  ;;  %v496_v14 = vshll.u32 %v10900_v21, 16 }
  0x46   :  { %702 = vrot.lane.b32.xlu0 %v10607_v38, %s10204_s17  ;;  %v10920_v38 = vld [vmem:[%s14938_s0 + $0xd8] sm:$0xff]  }
  0x47   :  { %v491_v55 = vor.u32 %v489_v48, %v488_v6  ;;  %v495_v62 = vrot.slane %v493_v36, 7  ;;  %v500_v54 = vshrl.u32 %v10920_v38, 16  ;;  %v503_v39 = vshll.u32 %v10920_v38, 16 }
  0x48   :  { %891 = vrot.lane.b32.xlu1 %v828_v43, %s10205_s22 }
  0x49   :  { %v498_v18 = vor.u32 %v496_v14, %v495_v62  ;;  %v502_v1 = vrot.slane %v500_v54, 7  ;;  %v646_v13 = vsel %vm10631_vm3, %v491_v55, %v645_v24 }
  0x4a   :  { %704 = vrot.lane.b32.xlu0 %v10658_v40, %s10204_s17  ;;  %v10940_v40 = vld [vmem:[%s14938_s0 + $0xe0] sm:$0xff]   ;;  %647 = vst [vmem:[#allocation2 + $0xe0] sm:$0xff] %v646_v13 }
  0x4b   :  { %v507_v37 = vshrl.u32 %v10940_v40, 16  ;;  %v505_v20 = vor.u32 %v503_v39, %v502_v1  ;;  %v649_v43 = vsel %vm10631_vm3, %v498_v18, %v648_v16  ;;  %v510_v27 = vshll.u32 %v10940_v40, 16 }
  0x4c   :  { %893 = vrot.lane.b32.xlu1 %v830_v53, %s10205_s22  ;;  %650 = vst [vmem:[#allocation2 + $0xe8] sm:$0xff] %v649_v43 }
  0x4d   :  { %v509_v25 = vrot.slane %v507_v37, 7  ;;  %v652_v53 = vsel %vm10631_vm3, %v505_v20, %v651_v51 }
  0x4e   :  { %706 = vrot.lane.b32.xlu0 %v10699_v11, %s10204_s17  ;;  %v10958_v11 = vld [vmem:[%s14938_s0 + $0xe8] sm:$0xff]   ;;  %653 = vst [vmem:[#allocation2 + $0xf0] sm:$0xff] %v652_v53 }
  0x4f   :  { %v514_v19 = vshrl.u32 %v10958_v11, 16  ;;  %v512_v45 = vor.u32 %v510_v27, %v509_v25  ;;  %v517_v9 = vshll.u32 %v10958_v11, 16 }
  0x50   :  { %895 = vrot.lane.b32.xlu1 %v832_v47, %s10205_s22 }
  0x51   :  { %v516_v30 = vrot.slane %v514_v19, 7  ;;  %v655_v47 = vsel %vm10631_vm3, %v512_v45, %v654_v57 }
  0x52   :  { %708 = vrot.lane.b32.xlu0 %v10757_v34, %s10204_s17  ;;  %v10976_v34 = vld [vmem:[%s14938_s0 + $0xf0] sm:$0xff]   ;;  %656 = vst [vmem:[#allocation2 + $0xf8] sm:$0xff] %v655_v47 }
  0x53   :  { %v521_v46 = vshrl.u32 %v10976_v34, 16  ;;  %v519_v12 = vor.u32 %v517_v9, %v516_v30  ;;  %v524_v58 = vshll.u32 %v10976_v34, 16 }
  0x54   :  { %897 = vrot.lane.b32.xlu1 %v834_v59, %s10205_s22 }
  0x55   :  { %v523_v44 = vrot.slane %v521_v46, 7 }
  0x56   :  { %710 = vrot.lane.b32.xlu0 %v10814_v0, %s10204_s17  ;;  %v10994_v0 = vld [vmem:[%s14938_s0 + $0xf8] sm:$0xff]  }
  0x57   :  { %v528_v60 = vshrl.u32 %v10994_v0, 16 }
  0x58   :  { %899 = vrot.lane.b32.xlu1 %v836_v5, %s10205_s22 }
  0x5a   :  { %712 = vrot.lane.b32.xlu0 %v10841_v17, %s10204_s17 }
  0x5c   :  { %901 = vrot.lane.b32.xlu1 %v838_v32, %s10205_s22 }
  0x5e   :  { %714 = vrot.lane.b32.xlu0 %v10859_v33, %s10204_s17 }
  0x60   :  { %903 = vrot.lane.b32.xlu1 %v840_v35, %s10205_s22 }
  0x62   :  { %716 = vrot.lane.b32.xlu0 %v10880_v29, %s10204_s17 }
  0x63   :  { %21 = vsyncpa [#allocation7], 0  ;;  %v844_v17 = vor.u32 %v843_v56, %v479_v63  ;;  %v845_v42 = vrot.slane %v489_v48, 1  ;;  %v657_v41 = vld [vmem:[#allocation2 + $0x100] sm:$0xff]  ;;  %v526_v61 = vor.u32 %v524_v58, %v523_v44  ;;  %v530_v6 = vrot.slane %v528_v60, 7  ;;  %v660_v7 = vld [vmem:[#allocation2 + $0x108] sm:$0xff] }
  0x64   :  { %905 = vrot.lane.b32.xlu1 %v842_v31, %s10205_s22  ;;  %v658_v49 = vsel %vm10631_vm3, %v519_v12, %v657_v41  ;;  %v531_v59 = vshll.u32 %v10994_v0, 16  ;;  %v847_v63 = vrot.slane %v496_v14, 1  ;;  %v849_v62 = vrot.slane %v503_v39, 1  ;;  %v663_v2 = vld [vmem:[#allocation2 + $0x110] sm:$0xff]  ;;  %s10208_s29 = smov 64   ;;  %s10211_s16 = smov [#allocation6]  }
  0x65   :  { %659 = vst [vmem:[#allocation2 + $0x100] sm:$0xff] %v658_v49  ;;  %v846_v33 = vor.u32 %v845_v42, %v486_v28  ;;  %v661_v10 = vsel %vm10631_vm3, %v526_v61, %v660_v7  ;;  %v851_v14 = vrot.slane %v510_v27, 1  ;;  %vm762_vm5 = vcmask 195680   ;;  %s8629_s18 = sshll.u32 %s10211_s16, 4  ;;  %s8630_s18 = int_to_ptr.vmem [resolvable:$true] %s8629_s18 }
  0x66   :  { %718 = vrot.lane.b32.xlu0 %v10900_v21, %s10204_s17  ;;  %v533_v48 = vor.u32 %v531_v59, %v530_v6  ;;  %662 = vst [vmem:[#allocation2 + $0x108] sm:$0xff] %v661_v10  ;;  %v848_v55 = vor.u32 %v847_v63, %v493_v36  ;;  %v850_v28 = vor.u32 %v849_v62, %v500_v54  ;;  %v853_v5 = vrot.slane %v517_v9, 1  ;;  %s10156_s19 = scalar_lea.vmem %s8630_s18, 32  ;;  %p10161_p1 = scmp.lt.s32.totalorder %s8630_s18, %s8630_s18 }
  0x67   :  { %v852_v26 = vor.u32 %v851_v14, %v507_v37  ;;  %vm955_vm6 = vcmask 294080   ;;  %vm956_vm7 = vsmask.f32 7424  ;;  %v857_v24 = vrot.slane %v531_v59, 1  ;;  %p10157_p0 = scmp.ne.s32.totalorder %s8630_s18, %s10156_s19  ;;  %p10162_p2 = scmp.lt.s32.totalorder %s10156_s19, %s10156_s19 }
  0x68   :  { %907 = vrot.lane.b32.xlu1 %v844_v17, %s10205_s22  ;;  %v664_v29 = vsel %vm10631_vm3, %v533_v48, %v663_v2  ;;  %v854_v23 = vor.u32 %v853_v5, %v514_v19  ;;  %vm11049_vm8 = vmand %vm955_vm6, %vm956_vm7  ;;  %vm4463_vm9 = vcmask 1042434   ;;  %vm4823_vm10 = vcmask 1041409  }
  0x69   :  { %665 = vst [vmem:[#allocation2 + $0x110] sm:$0xff] %v664_v29  ;;  %vm4466_vm11 = vcmask 1043459   ;;  %vm4469_vm12 = vcmask 1044484   ;;  %vm4472_vm13 = vcmask 1045509   ;;  %vm4475_vm14 = vcmask 1046534   ;;  %p10163_p3 = por %p10162_p2, %p10161_p1 }
  0x6a   :  { %720 = vrot.lane.b32.xlu0 %v10920_v38, %s10204_s17  ;;  %v855_v38 = vrot.slane %v524_v58, 1  ;;  %vm4478_vm15 = vcmask 1047559   ;;  %vm3991_vm1 = vcmask 523268   ;;  %vm5352_vm6 = vsmask.f32 3328 }
  0x6b   :  { %p10164_p4 = pnand %p10163_p3, %p10157_p0 }
  0x6c   :  { %909 = vrot.lane.b32.xlu1 %v846_v33, %s10205_s22  ;;  %v856_v18 = vor.u32 %v855_v38, %v521_v46 }
  0x6e   :  { %722 = vrot.lane.b32.xlu0 %v10940_v40, %s10204_s17  ;;  %v11389_v40 = vld [vmem:[#allocation2 + $0x118] sm:$0xff] }
  0x70   :  { %911 = vrot.lane.b32.xlu1 %v848_v55, %s10205_s22 }
  0x72   :  { %724 = vrot.lane.b32.xlu0 %v10958_v11, %s10204_s17  ;;  %v858_v11 = vor.u32 %v857_v24, %v528_v60 }
  0x74   :  { %v667_v21 = vpop.permute.xlu0 %666  ;;  %v671_v36 = vpop.permute.xlu1 %670  ;;  %913 = vrot.lane.b32.xlu1 %v850_v28, %s10205_s22 }
  0x75   :  { %763 = vst.msk [vmem:[#allocation2 + $0x8] sm:$0xff] %vm762_vm5, %v667_v21  ;;  %765 = vst.msk [vmem:[#allocation2 + $0x18] sm:$0xff] %vm762_vm5, %v671_v36 }
  0x76   :  { %726 = vrot.lane.b32.xlu0 %v10976_v34, %s10204_s17 }
  0x78   :  { %v669_v54 = vpop.permute.xlu0 %668  ;;  %915 = vrot.lane.b32.xlu1 %v852_v26, %s10205_s22 }
  0x79   :  { %764 = vst.msk [vmem:[#allocation2 + $0x10] sm:$0xff] %vm762_vm5, %v669_v54 }
  0x7a   :  { %728 = vrot.lane.b32.xlu0 %v10994_v0, %s10204_s17  ;;  %v860_v1 = vpop.permute.xlu1 %859 }
  0x7c   :  { %v958_v13 = vld [vmem:[#allocation2 + $0x8] sm:$0xff]  ;;  %v673_v39 = vpop.permute.xlu0 %672  ;;  %917 = vrot.lane.b32.xlu1 %v854_v23, %s10205_s22  ;;  %v964_v25 = vld [vmem:[#allocation2 + $0x18] sm:$0xff] }
  0x7d   :  { %v11057_v37 = vsel %vm11049_vm8, %v860_v1, %v958_v13  ;;  %766 = vst.msk [vmem:[#allocation2 + $0x20] sm:$0xff] %vm762_vm5, %v673_v39 }
  0x7e   :  { %960 = vst [vmem:[#allocation2 + $0x8] sm:$0xff] %v11057_v37  ;;  %9613 = vmatmul.mubr.msk.bf16.vlgmr.msra.gmra.mrb[0].mxu0 %vm113_vm0, %v11057_v37  ;;  %919 = vrot.lane.b32.xlu0 %v856_v18, %s10205_s22  ;;  %v862_v32 = vpop.permute.xlu1 %861 }
  0x7f   :  { %9685 = vmatpush3.bf16.msra.mxu0 %v10708_v4 }
  0x80   :  { %v961_v8 = vld [vmem:[#allocation2 + $0x10] sm:$0xff]  ;;  %v675_v16 = vpop.permute.xlu0 %674  ;;  %9686 = vmatprep.subr.bf16.mxu0 %v10735_v15  ;;  %921 = vrot.lane.b32.xlu1 %v858_v11, %s10205_s22 }
  0x81   :  { %v11069_v20 = vsel %vm11049_vm8, %v862_v32, %v961_v8  ;;  %767 = vst.msk [vmem:[#allocation2 + $0x28] sm:$0xff] %vm762_vm5, %v675_v16  ;;  %v11220_v32 = vld [vmem:[#allocation2 + $0x88] sm:$0xff]  ;;  %v11222_v16 = vld [vmem:[#allocation2 + $0x90] sm:$0xff] }
  0x82   :  { %963 = vst [vmem:[#allocation2 + $0x10] sm:$0xff] %v11069_v20  ;;  %9616 = vmatprep.mubr.msk.bf16.mxu0 %vm113_vm0, %v11069_v20  ;;  %v864_v43 = vpop.permute.xlu1 %863 }
  0x83   :  { %9687 = vmatpush3.bf16.msra.mxu0 %v10735_v15  ;;  %v11079_v4 = vsel %vm11049_vm8, %v864_v43, %v964_v25  ;;  %v11091_v15 = vld [vmem:[%s14939_s1 + $0x28] sm:$0xff]  }
  0x84   :  { %v677_v34 = vpop.permute.xlu0 %676  ;;  %9910 = vmatprep.subr.msk.bf16.mxu0 %vm1218_vm4, %v10775_v52  ;;  %966 = vst [vmem:[#allocation2 + $0x18] sm:$0xff] %v11079_v4  ;;  %v967_v27 = vld [vmem:[#allocation2 + $0x20] sm:$0xff] }
  0x85   :  { %768 = vst.msk [vmem:[#allocation2 + $0x30] sm:$0xff] %vm762_vm5, %v677_v34 }
  0x86   :  { %9617 = vmatmul.mubr.msk.bf16.gmra.mrb[4].mxu0 %vm113_vm0, %v11079_v4  ;;  %v866_v19 = vpop.permute.xlu1 %865 }
  0x87   :  { %9689 = vmatpush3.bf16.msra.mxu0 %v10800_v3  ;;  %v11095_v35 = vsel %vm11049_vm8, %v866_v19, %v967_v27 }
  0x88   :  { %v679_v52 = vpop.permute.xlu0 %678  ;;  %969 = vst [vmem:[#allocation2 + $0x20] sm:$0xff] %v11095_v35  ;;  %v970_v50 = vld [vmem:[#allocation2 + $0x28] sm:$0xff]  ;;  %9620 = vmatprep.mubr.msk.bf16.mxu0 %vm113_vm0, %v11095_v35  ;;  %9762 = vmatprep.subr.bf16.mxu0 %v11091_v15 }
  0x89   :  { %769 = vst.msk [vmem:[#allocation2 + $0x38] sm:$0xff] %vm762_vm5, %v679_v52 }
  0x8a   :  { %v868_v3 = vpop.permute.xlu1 %867 }
  0x8b   :  { %v11104_v51 = vsel %vm11049_vm8, %v868_v3, %v970_v50 }
  0x8c   :  { %v681_v45 = vpop.permute.xlu0 %680  ;;  %972 = vst [vmem:[#allocation2 + $0x28] sm:$0xff] %v11104_v51  ;;  %v973_v30 = vld [vmem:[#allocation2 + $0x30] sm:$0xff] }
  0x8d   :  { %770 = vst.msk [vmem:[#allocation2 + $0x40] sm:$0xff] %vm762_vm5, %v681_v45 }
  0x8e   :  { %9621 = vmatmul.mubr.msk.bf16.gmra.mrb[8].mxu0 %vm113_vm0, %v11104_v51  ;;  %v870_v53 = vpop.permute.xlu1 %869 }
  0x8f   :  { %v11112_v0 = vsel %vm11049_vm8, %v870_v53, %v973_v30 }
  0x90   :  { %v683_v9 = vpop.permute.xlu0 %682  ;;  %975 = vst [vmem:[#allocation2 + $0x30] sm:$0xff] %v11112_v0  ;;  %v976_v46 = vld [vmem:[#allocation2 + $0x38] sm:$0xff]  ;;  %9702 = vmatprep.mubr.msk.bf16.mxu1 %vm113_vm0, %v11112_v0  ;;  %9624 = vmatprep.mubr.msk.bf16.mxu0 %vm113_vm0, %v11112_v0 }
  0x91   :  { %771 = vst.msk [vmem:[#allocation2 + $0x48] sm:$0xff] %vm762_vm5, %v683_v9 }
  0x92   :  { %v872_v31 = vpop.permute.xlu1 %871 }
  0x93   :  { %v11122_v56 = vsel %vm11049_vm8, %v872_v31, %v976_v46 }
  0x94   :  { %v685_v57 = vpop.permute.xlu0 %684  ;;  %978 = vst [vmem:[#allocation2 + $0x38] sm:$0xff] %v11122_v56  ;;  %v979_v12 = vld [vmem:[#allocation2 + $0x40] sm:$0xff]  ;;  %9703 = vmatmul.mubr.msk.bf16.vlgmr.msra.gmra.mrb[0].mxu1 %vm113_vm0, %v11122_v56 }
  0x95   :  { %772 = vst.msk [vmem:[#allocation2 + $0x50] sm:$0xff] %vm762_vm5, %v685_v57 }
  0x96   :  { %9625 = vmatmul.mubr.msk.bf16.gmra.mrb[12].mxu0 %vm113_vm0, %v11122_v56  ;;  %v874_v44 = vpop.permute.xlu1 %873 }
  0x97   :  { %v11132_v47 = vsel %vm11049_vm8, %v874_v44, %v979_v12 }
  0x98   :  { %v687_v58 = vpop.permute.xlu0 %686  ;;  %981 = vst [vmem:[#allocation2 + $0x40] sm:$0xff] %v11132_v47  ;;  %v982_v60 = vld [vmem:[#allocation2 + $0x48] sm:$0xff]  ;;  %9706 = vmatprep.mubr.msk.bf16.mxu1 %vm113_vm0, %v11132_v47  ;;  %9628 = vmatprep.mubr.msk.bf16.mxu0 %vm113_vm0, %v11132_v47 }
  0x99   :  { %773 = vst.msk [vmem:[#allocation2 + $0x58] sm:$0xff] %vm762_vm5, %v687_v58 }
  0x9a   :  { %v876_v17 = vpop.permute.xlu1 %875 }
  0x9b   :  { %v11142_v42 = vsel %vm11049_vm8, %v876_v17, %v982_v60 }
  0x9c   :  { %v689_v41 = vpop.permute.xlu0 %688  ;;  %984 = vst [vmem:[#allocation2 + $0x48] sm:$0xff] %v11142_v42  ;;  %v985_v61 = vld [vmem:[#allocation2 + $0x50] sm:$0xff]  ;;  %9707 = vmatmul.mubr.msk.bf16.gmra.mrb[4].mxu1 %vm113_vm0, %v11142_v42 }
  0x9d   :  { %774 = vst.msk [vmem:[#allocation2 + $0x60] sm:$0xff] %vm762_vm5, %v689_v41 }
  0x9e   :  { %9629 = vmatmul.mubr.msk.bf16.gmra.mrb[16].mxu0 %vm113_vm0, %v11142_v42  ;;  %v878_v6 = vpop.permute.xlu1 %877 }
  0x9f   :  { %v11152_v49 = vsel %vm11049_vm8, %v878_v6, %v985_v61 }
  0xa0   :  { %v691_v59 = vpop.permute.xlu0 %690  ;;  %987 = vst [vmem:[#allocation2 + $0x50] sm:$0xff] %v11152_v49  ;;  %v988_v33 = vld [vmem:[#allocation2 + $0x58] sm:$0xff]  ;;  %9710 = vmatprep.mubr.msk.bf16.mxu1 %vm113_vm0, %v11152_v49  ;;  %9632 = vmatprep.mubr.msk.bf16.mxu0 %vm113_vm0, %v11152_v49 }
  0xa1   :  { %775 = vst.msk [vmem:[#allocation2 + $0x68] sm:$0xff] %vm762_vm5, %v691_v59 }
  0xa2   :  { %v880_v63 = vpop.permute.xlu1 %879 }
  0xa3   :  { %v11162_v7 = vsel %vm11049_vm8, %v880_v63, %v988_v33 }
  0xa4   :  { %v693_v48 = vpop.permute.xlu0 %692  ;;  %990 = vst [vmem:[#allocation2 + $0x58] sm:$0xff] %v11162_v7  ;;  %v991_v10 = vld [vmem:[#allocation2 + $0x60] sm:$0xff]  ;;  %9711 = vmatmul.mubr.msk.bf16.gmra.mrb[8].mxu1 %vm113_vm0, %v11162_v7 }
  0xa5   :  { %776 = vst.msk [vmem:[#allocation2 + $0x70] sm:$0xff] %vm762_vm5, %v693_v48 }
  0xa6   :  { %9633 = vmatmul.mubr.msk.bf16.gmra.mrb[20].mxu0 %vm113_vm0, %v11162_v7  ;;  %v882_v55 = vpop.permute.xlu1 %881 }
  0xa7   :  { %v11172_v62 = vsel %vm11049_vm8, %v882_v55, %v991_v10 }
  0xa8   :  { %v695_v2 = vpop.permute.xlu0 %694  ;;  %993 = vst [vmem:[#allocation2 + $0x60] sm:$0xff] %v11172_v62  ;;  %v994_v29 = vld [vmem:[#allocation2 + $0x68] sm:$0xff]  ;;  %9636 = vmatprep.mubr.msk.bf16.mxu0 %vm113_vm0, %v11172_v62  ;;  %9714 = vmatprep.mubr.msk.bf16.mxu1 %vm113_vm0, %v11172_v62 }
  0xa9   :  { %777 = vst.msk [vmem:[#allocation2 + $0x78] sm:$0xff] %vm762_vm5, %v695_v2 }
  0xaa   :  { %v884_v28 = vpop.permute.xlu1 %883 }
  0xab   :  { %v11182_v14 = vsel %vm11049_vm8, %v884_v28, %v994_v29 }
  0xac   :  { %v697_v21 = vpop.permute.xlu0 %696  ;;  %996 = vst [vmem:[#allocation2 + $0x68] sm:$0xff] %v11182_v14  ;;  %v997_v36 = vld [vmem:[#allocation2 + $0x70] sm:$0xff]  ;;  %9715 = vmatmul.mubr.msk.bf16.gmra.mrb[12].mxu1 %vm113_vm0, %v11182_v14 }
  0xad   :  { %778 = vst.msk [vmem:[#allocation2 + $0x80] sm:$0xff] %vm762_vm5, %v697_v21 }
  0xae   :  { %9637 = vmatmul.mubr.msk.bf16.gmra.mrb[24].mxu0 %vm113_vm0, %v11182_v14  ;;  %v886_v26 = vpop.permute.xlu1 %885 }
  0xaf   :  { %v11192_v5 = vsel %vm11049_vm8, %v886_v26, %v997_v36 }
  0xb0   :  { %v1000_v38 = vld [vmem:[#allocation2 + $0x78] sm:$0xff]  ;;  %v888_v54 = vpop.permute.xlu0 %887  ;;  %999 = vst [vmem:[#allocation2 + $0x70] sm:$0xff] %v11192_v5  ;;  %9640 = vmatprep.mubr.msk.bf16.mxu0 %vm113_vm0, %v11192_v5  ;;  %9718 = vmatprep.mubr.msk.bf16.mxu1 %vm113_vm0, %v11192_v5 }
  0xb1   :  { %v11197_v23 = vsel %vm11049_vm8, %v888_v54, %v1000_v38 }
  0xb2   :  { %1002 = vst [vmem:[#allocation2 + $0x78] sm:$0xff] %v11197_v23  ;;  %v890_v24 = vpop.permute.xlu1 %889 }
  0xb4   :  { %v1003_v18 = vld [vmem:[#allocation2 + $0x80] sm:$0xff]  ;;  %v699_v1 = vpop.permute.xlu0 %698  ;;  %9719 = vmatmul.mubr.msk.bf16.gmra.mrb[16].mxu1 %vm113_vm0, %v11197_v23 }
  0xb5   :  { %v11206_v13 = vsel %vm11049_vm8, %v890_v24, %v1003_v18  ;;  %779 = vst.msk [vmem:[#allocation2 + $0x98] sm:$0xff] %vm762_vm5, %v699_v1 }
  0xb6   :  { %1005 = vst [vmem:[#allocation2 + $0x80] sm:$0xff] %v11206_v13  ;;  %9641 = vmatmul.mubr.msk.bf16.gmra.mrb[28].mxu0 %vm113_vm0, %v11197_v23  ;;  %9722 = vmatprep.mubr.msk.bf16.mxu1 %vm113_vm0, %v11206_v13  ;;  %v701_v39 = vpop.permute.xlu1 %700 }
  0xb7   :  { %9644 = vmatprep.mubr.msk.bf16.mxu0 %vm113_vm0, %v11206_v13  ;;  %780 = vst.msk [vmem:[#allocation2 + $0xa0] sm:$0xff] %vm762_vm5, %v701_v39 }
  0xb8   :  { %v703_v11 = vpop.permute.xlu0 %702 }
  0xb9   :  { %781 = vst.msk [vmem:[#allocation2 + $0xa8] sm:$0xff] %vm762_vm5, %v703_v11 }
  0xba   :  { %v892_v8 = vpop.permute.xlu1 %891 }
  0xbc   :  { %v1006_v25 = vld [vmem:[#allocation2 + $0x98] sm:$0xff]  ;;  %v705_v43 = vpop.permute.xlu0 %704  ;;  %9723 = vmatmul.mubr.msk.bf16.gmra.mrb[20].mxu1 %vm113_vm0, %v11220_v32 }
  0xbd   :  { %v11226_v34 = vsel %vm11049_vm8, %v892_v8, %v1006_v25  ;;  %782 = vst.msk [vmem:[#allocation2 + $0xb0] sm:$0xff] %vm762_vm5, %v705_v43  ;;  %9726 = vmatprep.mubr.msk.bf16.mxu1 %vm113_vm0, %v11222_v16 }
  0xbe   :  { %1008 = vst [vmem:[#allocation2 + $0x98] sm:$0xff] %v11226_v34  ;;  %9645 = vmatmul.mubr.msk.bf16.gmra.mrb[32].mxu0 %vm113_vm0, %v11220_v32  ;;  %v1009_v27 = vld [vmem:[#allocation2 + $0xa0] sm:$0xff]  ;;  %v894_v19 = vpop.permute.xlu1 %893 }
  0xbf   :  { %9648 = vmatprep.mubr.msk.bf16.mxu0 %vm113_vm0, %v11222_v16  ;;  %v11240_v52 = vsel %vm11049_vm8, %v894_v19, %v1009_v27 }
  0xc0   :  { %v707_v50 = vpop.permute.xlu0 %706  ;;  %1011 = vst [vmem:[#allocation2 + $0xa0] sm:$0xff] %v11240_v52  ;;  %v1012_v3 = vld [vmem:[#allocation2 + $0xa8] sm:$0xff] }
  0xc1   :  { %783 = vst.msk [vmem:[#allocation2 + $0xb8] sm:$0xff] %vm762_vm5, %v707_v50 }
  0xc2   :  { %v896_v45 = vpop.permute.xlu1 %895 }
  0xc3   :  { %v11246_v30 = vsel %vm11049_vm8, %v896_v45, %v1012_v3 }
  0xc4   :  { %v709_v53 = vpop.permute.xlu0 %708  ;;  %1014 = vst [vmem:[#allocation2 + $0xa8] sm:$0xff] %v11246_v30  ;;  %9727 = vmatmul.mubr.msk.bf16.gmra.mrb[24].mxu1 %vm113_vm0, %v11226_v34  ;;  %v1015_v9 = vld [vmem:[#allocation2 + $0xb0] sm:$0xff] }
  0xc5   :  { %784 = vst.msk [vmem:[#allocation2 + $0xc0] sm:$0xff] %vm762_vm5, %v709_v53  ;;  %9730 = vmatprep.mubr.msk.bf16.mxu1 %vm113_vm0, %v11240_v52 }
  0xc6   :  { %9649 = vmatmul.mubr.msk.bf16.gmra.mrb[36].mxu0 %vm113_vm0, %v11226_v34  ;;  %v898_v46 = vpop.permute.xlu1 %897 }
  0xc7   :  { %9652 = vmatprep.mubr.msk.bf16.mxu0 %vm113_vm0, %v11240_v52  ;;  %v11260_v31 = vsel %vm11049_vm8, %v898_v46, %v1015_v9 }
  0xc8   :  { %v711_v57 = vpop.permute.xlu0 %710  ;;  %1017 = vst [vmem:[#allocation2 + $0xb0] sm:$0xff] %v11260_v31  ;;  %v1018_v12 = vld [vmem:[#allocation2 + $0xb8] sm:$0xff] }
  0xc9   :  { %785 = vst.msk [vmem:[#allocation2 + $0xc8] sm:$0xff] %vm762_vm5, %v711_v57 }
  0xca   :  { %v900_v44 = vpop.permute.xlu1 %899 }
  0xcb   :  { %v11266_v58 = vsel %vm11049_vm8, %v900_v44, %v1018_v12 }
  0xcc   :  { %v713_v60 = vpop.permute.xlu0 %712  ;;  %1020 = vst [vmem:[#allocation2 + $0xb8] sm:$0xff] %v11266_v58  ;;  %9731 = vmatmul.mubr.msk.bf16.gmra.mrb[28].mxu1 %vm113_vm0, %v11246_v30  ;;  %v1021_v17 = vld [vmem:[#allocation2 + $0xc0] sm:$0xff] }
  0xcd   :  { %786 = vst.msk [vmem:[#allocation2 + $0xd0] sm:$0xff] %vm762_vm5, %v713_v60  ;;  %9734 = vmatprep.mubr.msk.bf16.mxu1 %vm113_vm0, %v11260_v31 }
  0xce   :  { %9653 = vmatmul.mubr.msk.bf16.gmra.mrb[40].mxu0 %vm113_vm0, %v11246_v30  ;;  %v902_v41 = vpop.permute.xlu1 %901 }
  0xcf   :  { %9656 = vmatprep.mubr.msk.bf16.mxu0 %vm113_vm0, %v11260_v31  ;;  %v11280_v61 = vsel %vm11049_vm8, %v902_v41, %v1021_v17 }
  0xd0   :  { %v715_v6 = vpop.permute.xlu0 %714  ;;  %1023 = vst [vmem:[#allocation2 + $0xc0] sm:$0xff] %v11280_v61  ;;  %v1024_v59 = vld [vmem:[#allocation2 + $0xc8] sm:$0xff] }
  0xd1   :  { %787 = vst.msk [vmem:[#allocation2 + $0xd8] sm:$0xff] %vm762_vm5, %v715_v6 }
  0xd2   :  { %v904_v33 = vpop.permute.xlu1 %903 }
  0xd3   :  { %v11286_v63 = vsel %vm11049_vm8, %v904_v33, %v1024_v59  ;;  %v10149_v59 = vld [vmem:[#allocation2] sm:$0xff]  ;;  %v9961_v33 = vld [vmem:[%s14939_s1 + $0x30] sm:$0xff]  }
  0xd4   :  { %v717_v48 = vpop.permute.xlu0 %716  ;;  %1026 = vst [vmem:[#allocation2 + $0xc8] sm:$0xff] %v11286_v63  ;;  %9735 = vmatmul.mubr.msk.bf16.gmra.mrb[32].mxu1 %vm113_vm0, %v11266_v58  ;;  %v1027_v10 = vld [vmem:[#allocation2 + $0xd0] sm:$0xff] }
  0xd5   :  { %788 = vst.msk [vmem:[#allocation2 + $0xe0] sm:$0xff] %vm762_vm5, %v717_v48  ;;  %9738 = vmatprep.mubr.msk.bf16.mxu1 %vm113_vm0, %v11280_v61  ;;  %v9962_v48 = vld [vmem:[%s14939_s1 + $0x38] ss:$0 sps:$4 sm:$0x33]  }
  0xd6   :  { %9657 = vmatmul.mubr.msk.bf16.gmra.mrb[44].mxu0 %vm113_vm0, %v11266_v58  ;;  %v906_v55 = vpop.permute.xlu1 %905 }
  0xd7   :  { %9660 = vmatprep.mubr.msk.bf16.mxu0 %vm113_vm0, %v11280_v61  ;;  %v11300_v2 = vsel %vm11049_vm8, %v906_v55, %v1027_v10  ;;  %v1894_v10 = vsel %vm1218_vm4, %v9962_v48, 0 }
  0xd8   :  { %v719_v29 = vpop.permute.xlu0 %718  ;;  %1029 = vst [vmem:[#allocation2 + $0xd0] sm:$0xff] %v11300_v2  ;;  %v1030_v28 = vld [vmem:[#allocation2 + $0xd8] sm:$0xff] }
  0xd9   :  { %789 = vst.msk [vmem:[#allocation2 + $0xe8] sm:$0xff] %vm762_vm5, %v719_v29 }
  0xda   :  { %v908_v21 = vpop.permute.xlu1 %907 }
  0xdb   :  { %v11306_v36 = vsel %vm11049_vm8, %v908_v21, %v1030_v28 }
  0xdc   :  { %v721_v26 = vpop.permute.xlu0 %720  ;;  %1032 = vst [vmem:[#allocation2 + $0xd8] sm:$0xff] %v11306_v36  ;;  %9739 = vmatmul.mubr.msk.bf16.gmra.mrb[36].mxu1 %vm113_vm0, %v11286_v63  ;;  %v1033_v38 = vld [vmem:[#allocation2 + $0xe0] sm:$0xff] }
  0xdd   :  { %790 = vst.msk [vmem:[#allocation2 + $0xf0] sm:$0xff] %vm762_vm5, %v721_v26  ;;  %9742 = vmatprep.mubr.msk.bf16.mxu1 %vm113_vm0, %v11300_v2 }
  0xde   :  { %9661 = vmatmul.mubr.msk.bf16.gmra.mrb[48].mxu0 %vm113_vm0, %v11286_v63  ;;  %v910_v54 = vpop.permute.xlu1 %909 }
  0xdf   :  { %9664 = vmatprep.mubr.msk.bf16.mxu0 %vm113_vm0, %v11300_v2  ;;  %v11320_v24 = vsel %vm11049_vm8, %v910_v54, %v1033_v38 }
  0xe0   :  { %v723_v18 = vpop.permute.xlu0 %722  ;;  %1035 = vst [vmem:[#allocation2 + $0xe0] sm:$0xff] %v11320_v24  ;;  %v1036_v1 = vld [vmem:[#allocation2 + $0xe8] sm:$0xff] }
  0xe1   :  { %791 = vst.msk [vmem:[#allocation2 + $0xf8] sm:$0xff] %vm762_vm5, %v723_v18 }
  0xe2   :  { %v912_v39 = vpop.permute.xlu1 %911 }
  0xe3   :  { %v11326_v11 = vsel %vm11049_vm8, %v912_v39, %v1036_v1 }
  0xe4   :  { %v725_v8 = vpop.permute.xlu0 %724  ;;  %1038 = vst [vmem:[#allocation2 + $0xe8] sm:$0xff] %v11326_v11  ;;  %9743 = vmatmul.mubr.msk.bf16.gmra.mrb[40].mxu1 %vm113_vm0, %v11306_v36  ;;  %v1039_v25 = vld [vmem:[#allocation2 + $0xf0] sm:$0xff] }
  0xe5   :  { %792 = vst.msk [vmem:[#allocation2 + $0x100] sm:$0xff] %vm762_vm5, %v725_v8  ;;  %9746 = vmatprep.mubr.msk.bf16.mxu1 %vm113_vm0, %v11320_v24 }
  0xe6   :  { %9665 = vmatmul.mubr.msk.bf16.gmra.mrb[52].mxu0 %vm113_vm0, %v11306_v36  ;;  %v914_v43 = vpop.permute.xlu1 %913 }
  0xe7   :  { %9668 = vmatprep.mubr.msk.bf16.mxu0 %vm113_vm0, %v11320_v24  ;;  %v11340_v27 = vsel %vm11049_vm8, %v914_v43, %v1039_v25 }
  0xe8   :  { %v727_v19 = vpop.permute.xlu0 %726  ;;  %1041 = vst [vmem:[#allocation2 + $0xf0] sm:$0xff] %v11340_v27  ;;  %v1042_v50 = vld [vmem:[#allocation2 + $0xf8] sm:$0xff] }
  0xe9   :  { %793 = vst.msk [vmem:[#allocation2 + $0x108] sm:$0xff] %vm762_vm5, %v727_v19 }
  0xea   :  { %v916_v3 = vpop.permute.xlu1 %915 }
  0xeb   :  { %v11346_v45 = vsel %vm11049_vm8, %v916_v3, %v1042_v50 }
  0xec   :  { %v729_v53 = vpop.permute.xlu0 %728  ;;  %1044 = vst [vmem:[#allocation2 + $0xf8] sm:$0xff] %v11346_v45  ;;  %9747 = vmatmul.mubr.msk.bf16.gmra.mrb[44].mxu1 %vm113_vm0, %v11326_v11  ;;  %v1045_v9 = vld [vmem:[#allocation2 + $0x100] sm:$0xff] }
  0xed   :  { %794 = vst.msk [vmem:[#allocation2 + $0x110] sm:$0xff] %vm762_vm5, %v729_v53  ;;  %9750 = vmatprep.mubr.msk.bf16.mxu1 %vm113_vm0, %v11340_v27  ;;  %vm5111_vm5 = vcmask 1043968  }
  0xee   :  { %9669 = vmatmul.mubr.msk.bf16.gmra.mrb[56].mxu0 %vm113_vm0, %v11326_v11  ;;  %v918_v46 = vpop.permute.xlu1 %917 }
  0xef   :  { %9672 = vmatprep.mubr.msk.bf16.mxu0 %vm113_vm0, %v11340_v27  ;;  %v11360_v57 = vsel %vm11049_vm8, %v918_v46, %v1045_v9 }
  0xf0   :  { %v1048_v12 = vld [vmem:[#allocation2 + $0x108] sm:$0xff]  ;;  %v920_v44 = vpop.permute.xlu0 %919  ;;  %1047 = vst [vmem:[#allocation2 + $0x100] sm:$0xff] %v11360_v57 }
  0xf1   :  { %v11365_v60 = vsel %vm11049_vm8, %v920_v44, %v1048_v12 }
  0xf2   :  { %1050 = vst [vmem:[#allocation2 + $0x108] sm:$0xff] %v11365_v60  ;;  %v922_v17 = vpop.permute.xlu1 %921 }
  0xf4   :  { %v1051_v41 = vld [vmem:[#allocation2 + $0x110] sm:$0xff]  ;;  %9751 = vmatmul.mubr.msk.bf16.gmra.mrb[48].mxu1 %vm113_vm0, %v11346_v45 }
  0xf5   :  { %v11372_v6 = vsel %vm11049_vm8, %v922_v17, %v1051_v41  ;;  %9754 = vmatprep.mubr.msk.bf16.mxu1 %vm113_vm0, %v11360_v57 }
  0xf6   :  { %9673 = vmatmul.mubr.msk.bf16.gmra.mrb[60].mxu0 %vm113_vm0, %v11346_v45  ;;  %1053 = vst [vmem:[#allocation2 + $0x110] sm:$0xff] %v11372_v6 }
  0xf7   :  { %9676 = vmatprep.mubr.msk.bf16.mxu0 %vm113_vm0, %v11360_v57 }
  0xfc   :  { %9755 = vmatmul.mubr.msk.bf16.gmra.mrb[52].mxu1 %vm113_vm0, %v11365_v60 }
  0xfd   :  { %9758 = vmatprep.mubr.msk.bf16.mxu1 %vm113_vm0, %v11372_v6 }
  0xfe   :  { %9677 = vmatmul.mubr.msk.bf16.gmra.mrb[64].mxu0 %vm113_vm0, %v11365_v60 }
  0xff   :  { %9680 = vmatprep.mubr.msk.bf16.mxu0 %vm113_vm0, %v11372_v6 }
 0x104   :  { %9759 = vmatmul.mubr.msk.bf16.gmra.mrb[56].mxu1 %vm113_vm0, %v11389_v40 }
 0x106   :  { %9681 = vmatmul.mubr.msk.bf16.gmra.mrb[68].mxu0 %vm113_vm0, %v11389_v40 }
 0x107   :  { %9690 = vmatprep.mubr.msk.bf16.mxu0 %vm113_vm0, %v10149_v59 }
 0x10e   :  { %9691 = vmatmul.mubr.msk.bf16.vlgmr.msra.gmra.mrb[72].mxu0 %vm113_vm0, %v11057_v37 }
 0x10f   :  { %9763 = vmatpush3.bf16.msra.mxu0 %v11091_v15  ;;  %9694 = vmatprep.mubr.msk.bf16.mxu0 %vm113_vm0, %v11069_v20 }
 0x110   :  { %9764 = vmatprep.subr.bf16.mxu0 %v9961_v33 }
 0x113   :  { %9765 = vmatpush3.bf16.msra.mxu0 %v9961_v33 }
 0x114   :  { %9912 = vmatprep.subr.msk.bf16.mxu0 %vm1218_vm4, %v9962_v48  ;;  %vm4708_vm4 = vcmask 519168  }
 0x115   :  { %vm13497_vm7 = vmand %vm4708_vm4, %vm568_vm2  ;;  %vm5656_vm2 = vcmask 523264  }
 0x116   :  { %9695 = vmatmul.mubr.msk.bf16.gmra.mrb[76].mxu0 %vm113_vm0, %v11079_v4  ;;  %vm13512_vm8 = vmand %vm4708_vm4, %vm5352_vm6 }
 0x117   :  { %9698 = vmatprep.mubr.msk.bf16.mxu0 %vm113_vm0, %v11095_v35  ;;  %9767 = vmatpush3.bf16.msra.mxu0 %v1894_v10 }
 0x11e   :  { %9699 = vmatmul.mubr.msk.bf16.gmra.mrb[80].mxu0 %vm113_vm0, %v11104_v51 }
 0x11f   :  { %9768 = vmatprep.mubr.msk.bf16.mxu0 %vm113_vm0, %v10149_v59 }
 0x126   :  { %9769 = vmatmul.mubr.msk.bf16.vlgmr.msra.gmra.mrb[84].mxu0 %vm113_vm0, %v11057_v37 }
 0x127   :  { %9772 = vmatprep.mubr.msk.bf16.mxu0 %vm113_vm0, %v11069_v20 }
 0x12e   :  { %9773 = vmatmul.mubr.msk.bf16.gmra.mrb[88].mxu0 %vm113_vm0, %v11079_v4 }
 0x12f   :  { %9776 = vmatprep.mubr.msk.bf16.mxu0 %vm113_vm0, %v11095_v35 }
 0x136   :  { %9777 = vmatmul.mubr.msk.bf16.gmra.mrb[92].mxu0 %vm113_vm0, %v11104_v51 }
 0x137   :  { %9780 = vmatprep.mubr.msk.bf16.mxu0 %vm113_vm0, %v11112_v0 }
 0x13e   :  { %9781 = vmatmul.mubr.msk.bf16.gmra.mrb[96].mxu0 %vm113_vm0, %v11122_v56 }
 0x13f   :  { %9784 = vmatprep.mubr.msk.bf16.mxu0 %vm113_vm0, %v11132_v47 }
 0x146   :  { %9785 = vmatmul.mubr.msk.bf16.gmra.mrb[100].mxu0 %vm113_vm0, %v11142_v42 }
 0x147   :  { %9788 = vmatprep.mubr.msk.bf16.mxu0 %vm113_vm0, %v11152_v49 }
 0x14e   :  { %9789 = vmatmul.mubr.msk.bf16.gmra.mrb[104].mxu0 %vm113_vm0, %v11162_v7 }
 0x14f   :  { %9792 = vmatprep.mubr.msk.bf16.mxu0 %vm113_vm0, %v11172_v62 }
 0x151   :  { %v11440_v37 = vpop.f32.mrb[0].mxu0 }
 0x152   :  { %v11442_v20 = vpop.f32.mrb[1].mxu0 }
 0x153   :  { %v11444_v4 = vpop.f32.mrb[2].mxu0 }
 0x154   :  { %v11446_v15 = vpop.f32.mrb[3].mxu0 }
 0x156   :  { %9793 = vmatmul.mubr.msk.bf16.gmra.mrb[108].mxu0 %vm113_vm0, %v11182_v14 }
 0x157   :  { %9796 = vmatprep.mubr.msk.bf16.mxu0 %vm113_vm0, %v11192_v5 }
 0x159   :  { %v11452_v35 = vpop.f32.mrb[4].mxu0 }
 0x15a   :  { %v11454_v51 = vpop.f32.mrb[5].mxu0 }
 0x15b   :  { %v11456_v0 = vpop.f32.mrb[6].mxu0 }
 0x15c   :  { %v11458_v56 = vpop.f32.mrb[7].mxu0 }
 0x15e   :  { %9797 = vmatmul.mubr.msk.bf16.gmra.mrb[112].mxu0 %vm113_vm0, %v11197_v23 }
 0x15f   :  { %9800 = vmatprep.mubr.msk.bf16.mxu0 %vm113_vm0, %v11206_v13 }
 0x161   :  { %v9622_v47 = vpop.f32.mrb[8].mxu0 }
 0x162   :  { %v11464_v42 = vpop.f32.mrb[9].mxu0 }
 0x163   :  { %v9623_v49 = vpop.f32.mrb[10].mxu0 }
 0x164   :  { %v11466_v7 = vpop.f32.mrb[11].mxu0 }
 0x166   :  { %9801 = vmatmul.mubr.msk.bf16.gmra.mrb[116].mxu0 %vm113_vm0, %v11220_v32 }
 0x167   :  { %9804 = vmatprep.mubr.msk.bf16.mxu0 %vm113_vm0, %v11222_v16  ;;  %v9704_v62 = vpop.f32.mrb[0].mxu1 }
 0x168   :  { %v1639_v14 = vpop.f32.mrb[1].mxu1 }
 0x169   :  { %v9626_v5 = vpop.f32.mrb[12].mxu0  ;;  %v11472_v55 = vadd.f32 %v9622_v47, %v1639_v14  ;;  %v9705_v23 = vpop.f32.mrb[2].mxu1 }
 0x16a   :  { %v1304_v29 = vpop.f32.mrb[13].mxu0  ;;  %v1642_v28 = vpop.f32.mrb[3].mxu1 }
 0x16b   :  { %v11474_v13 = vadd.f32 %v9704_v62, %v1304_v29  ;;  %v9627_v21 = vpop.f32.mrb[14].mxu0  ;;  %v11476_v26 = vadd.f32 %v9623_v49, %v1642_v28 }
 0x16c   :  { %v1307_v38 = vpop.f32.mrb[15].mxu0 }
 0x16d   :  { %v11478_v54 = vadd.f32 %v9705_v23, %v1307_v38 }
 0x16e   :  { %9805 = vmatmul.mubr.msk.bf16.gmra.mrb[120].mxu0 %vm113_vm0, %v11226_v34 }
 0x16f   :  { %9808 = vmatprep.mubr.msk.bf16.mxu0 %vm113_vm0, %v11240_v52  ;;  %v9708_v32 = vpop.f32.mrb[4].mxu1 }
 0x170   :  { %v1655_v16 = vpop.f32.mrb[5].mxu1 }
 0x171   :  { %v9630_v18 = vpop.f32.mrb[16].mxu0  ;;  %v11484_v1 = vadd.f32 %v9626_v5, %v1655_v16  ;;  %v9709_v39 = vpop.f32.mrb[6].mxu1 }
 0x172   :  { %v1320_v8 = vpop.f32.mrb[17].mxu0  ;;  %v1658_v43 = vpop.f32.mrb[7].mxu1 }
 0x173   :  { %v11486_v25 = vadd.f32 %v9708_v32, %v1320_v8  ;;  %v9631_v19 = vpop.f32.mrb[18].mxu0  ;;  %v11488_v50 = vadd.f32 %v9627_v21, %v1658_v43 }
 0x174   :  { %v1323_v3 = vpop.f32.mrb[19].mxu0 }
 0x175   :  { %v11490_v53 = vadd.f32 %v9709_v39, %v1323_v3 }
 0x176   :  { %9809 = vmatmul.mubr.msk.bf16.gmra.mrb[124].mxu0 %vm113_vm0, %v11246_v30 }
 0x177   :  { %9812 = vmatprep.mubr.msk.bf16.mxu0 %vm113_vm0, %v11260_v31  ;;  %v9712_v34 = vpop.f32.mrb[8].mxu1 }
 0x178   :  { %v1671_v52 = vpop.f32.mrb[9].mxu1 }
 0x179   :  { %v9634_v9 = vpop.f32.mrb[20].mxu0  ;;  %v11496_v46 = vadd.f32 %v9630_v18, %v1671_v52  ;;  %v9713_v12 = vpop.f32.mrb[10].mxu1 }
 0x17a   :  { %v1336_v44 = vpop.f32.mrb[21].mxu0  ;;  %v1674_v41 = vpop.f32.mrb[11].mxu1 }
 0x17b   :  { %v11498_v17 = vadd.f32 %v9712_v34, %v1336_v44  ;;  %v9635_v59 = vpop.f32.mrb[22].mxu0  ;;  %v11500_v33 = vadd.f32 %v9631_v19, %v1674_v41 }
 0x17c   :  { %v1339_v48 = vpop.f32.mrb[23].mxu0 }
 0x17d   :  { %v11502_v10 = vadd.f32 %v9713_v12, %v1339_v48 }
 0x17e   :  { %9813 = vmatmul.mubr.msk.bf16.gmra.mrb[128].mxu0 %vm113_vm0, %v11266_v58 }
 0x17f   :  { %9816 = vmatprep.mubr.msk.bf16.mxu0 %vm113_vm0, %v11280_v61  ;;  %v9716_v30 = vpop.f32.mrb[12].mxu1 }
 0x180   :  { %v1687_v31 = vpop.f32.mrb[13].mxu1 }
 0x181   :  { %v9638_v47 = vpop.f32.mrb[24].mxu0  ;;  %v11508_v49 = vadd.f32 %v9634_v9, %v1687_v31  ;;  %v9717_v62 = vpop.f32.mrb[14].mxu1 }
 0x182   :  { %v1352_v14 = vpop.f32.mrb[25].mxu0  ;;  %v1690_v23 = vpop.f32.mrb[15].mxu1 }
 0x183   :  { %v11510_v5 = vadd.f32 %v9716_v30, %v1352_v14  ;;  %v9639_v29 = vpop.f32.mrb[26].mxu0  ;;  %v11512_v28 = vadd.f32 %v9635_v59, %v1690_v23 }
 0x184   :  { %v1355_v21 = vpop.f32.mrb[27].mxu0 }
 0x185   :  { %15044 = vst [vmem:[#allocation10_spill] sm:$0xff] %v11510_v5  ;;  %v11514_v38 = vadd.f32 %v9717_v62, %v1355_v21 }
 0x186   :  { %9817 = vmatmul.mubr.msk.bf16.gmra.mrb[132].mxu0 %vm113_vm0, %v11286_v63 }
 0x187   :  { %15045 = vst [vmem:[#allocation11_spill] sm:$0xff] %v11514_v38  ;;  %9820 = vmatprep.mubr.msk.bf16.mxu0 %vm113_vm0, %v11300_v2  ;;  %v9720_v58 = vpop.f32.mrb[16].mxu1 }
 0x188   :  { %v1703_v61 = vpop.f32.mrb[17].mxu1 }
 0x189   :  { %v9642_v32 = vpop.f32.mrb[28].mxu0  ;;  %v11520_v16 = vadd.f32 %v9638_v47, %v1703_v61  ;;  %v9721_v18 = vpop.f32.mrb[18].mxu1 }
 0x18a   :  { %v1368_v39 = vpop.f32.mrb[29].mxu0  ;;  %v1706_v43 = vpop.f32.mrb[19].mxu1 }
 0x18b   :  { %15046 = vst [vmem:[#allocation12_spill] sm:$0xff] %v11520_v16  ;;  %v11522_v8 = vadd.f32 %v9720_v58, %v1368_v39  ;;  %v9643_v19 = vpop.f32.mrb[30].mxu0  ;;  %v11524_v3 = vadd.f32 %v9639_v29, %v1706_v43 }
 0x18c   :  { %v1371_v34 = vpop.f32.mrb[31].mxu0 }
 0x18d   :  { %15047 = vst [vmem:[#allocation13_spill] sm:$0xff] %v11522_v8  ;;  %15048 = vst [vmem:[#allocation14_spill] sm:$0xff] %v11524_v3  ;;  %v11526_v52 = vadd.f32 %v9721_v18, %v1371_v34 }
 0x18e   :  { %9821 = vmatmul.mubr.msk.bf16.gmra.mrb[136].mxu0 %vm113_vm0, %v11306_v36 }
 0x18f   :  { %15049 = vst [vmem:[#allocation15_spill] sm:$0xff] %v11526_v52  ;;  %9824 = vmatprep.mubr.msk.bf16.mxu0 %vm113_vm0, %v11320_v24  ;;  %v9724_v63 = vpop.f32.mrb[20].mxu1 }
 0x190   :  { %v1719_v2 = vpop.f32.mrb[21].mxu1 }
 0x191   :  { %v9646_v9 = vpop.f32.mrb[32].mxu0  ;;  %v11532_v12 = vadd.f32 %v9642_v32, %v1719_v2  ;;  %v9725_v44 = vpop.f32.mrb[22].mxu1 }
 0x192   :  { %v1384_v41 = vpop.f32.mrb[33].mxu0  ;;  %v1722_v59 = vpop.f32.mrb[23].mxu1 }
 0x193   :  { %15050 = vst [vmem:[#allocation16_spill] sm:$0xff] %v11532_v12  ;;  %v9647_v48 = vpop.f32.mrb[34].mxu0  ;;  %v11534_v30 = vadd.f32 %v9643_v19, %v1722_v59 }
 0x194   :  { %v1386_v31 = vpop.f32.mrb[35].mxu0 }
 0x195   :  { %15051 = vst [vmem:[#allocation17_spill] sm:$0xff] %v11534_v30 }
 0x196   :  { %9825 = vmatmul.mubr.msk.bf16.gmra.mrb[140].mxu0 %vm113_vm0, %v11326_v11 }
 0x197   :  { %9828 = vmatprep.mubr.msk.bf16.mxu0 %vm113_vm0, %v11340_v27  ;;  %v9728_v36 = vpop.f32.mrb[24].mxu1 }
 0x198   :  { %v1733_v24 = vpop.f32.mrb[25].mxu1 }
 0x199   :  { %v9650_v47 = vpop.f32.mrb[36].mxu0  ;;  %v9729_v62 = vpop.f32.mrb[26].mxu1 }
 0x19a   :  { %v1396_v14 = vpop.f32.mrb[37].mxu0  ;;  %v1735_v29 = vpop.f32.mrb[27].mxu1 }
 0x19b   :  { %v11540_v23 = vadd.f32 %v9728_v36, %v1396_v14  ;;  %v9651_v21 = vpop.f32.mrb[38].mxu0 }
 0x19c   :  { %v1399_v58 = vpop.f32.mrb[39].mxu0 }
 0x19d   :  { %15052 = vst [vmem:[#allocation18_spill] sm:$0xff] %v11540_v23  ;;  %v11542_v61 = vadd.f32 %v9729_v62, %v1399_v58 }
 0x19e   :  { %9829 = vmatmul.mubr.msk.bf16.gmra.mrb[144].mxu0 %vm113_vm0, %v11346_v45 }
 0x19f   :  { %15053 = vst [vmem:[#allocation19_spill] sm:$0xff] %v11542_v61  ;;  %9832 = vmatprep.mubr.msk.bf16.mxu0 %vm113_vm0, %v11360_v57  ;;  %v9732_v11 = vpop.f32.mrb[28].mxu1 }
 0x1a0   :  { %v1747_v27 = vpop.f32.mrb[29].mxu1 }
 0x1a1   :  { %v9654_v32 = vpop.f32.mrb[40].mxu0  ;;  %v11548_v18 = vadd.f32 %v9650_v47, %v1747_v27  ;;  %v9733_v39 = vpop.f32.mrb[30].mxu1 }
 0x1a2   :  { %v1412_v43 = vpop.f32.mrb[41].mxu0  ;;  %v1750_v34 = vpop.f32.mrb[31].mxu1 }
 0x1a3   :  { %15054 = vst [vmem:[#allocation20_spill] sm:$0xff] %v11548_v18  ;;  %v11550_v19 = vadd.f32 %v9732_v11, %v1412_v43  ;;  %v9655_v63 = vpop.f32.mrb[42].mxu0  ;;  %v11552_v2 = vadd.f32 %v9651_v21, %v1750_v34 }
 0x1a4   :  { %v1415_v9 = vpop.f32.mrb[43].mxu0 }
 0x1a5   :  { %15055 = vst [vmem:[#allocation21_spill] sm:$0xff] %v11550_v19  ;;  %15056 = vst [vmem:[#allocation22_spill] sm:$0xff] %v11552_v2  ;;  %v11554_v44 = vadd.f32 %v9733_v39, %v1415_v9 }
 0x1a6   :  { %9833 = vmatmul.mubr.msk.bf16.gmra.mrb[148].mxu0 %vm113_vm0, %v11365_v60 }
 0x1a7   :  { %15057 = vst [vmem:[#allocation23_spill] sm:$0xff] %v11554_v44  ;;  %9836 = vmatprep.mubr.msk.bf16.mxu0 %vm113_vm0, %v11372_v6  ;;  %v9736_v45 = vpop.f32.mrb[32].mxu1 }
 0x1a8   :  { %v1763_v57 = vpop.f32.mrb[33].mxu1 }
 0x1a9   :  { %v9658_v41 = vpop.f32.mrb[44].mxu0  ;;  %v11560_v59 = vadd.f32 %v9654_v32, %v1763_v57  ;;  %v9737_v48 = vpop.f32.mrb[34].mxu1 }
 0x1aa   :  { %v1428_v31 = vpop.f32.mrb[45].mxu0  ;;  %v1766_v24 = vpop.f32.mrb[35].mxu1 }
 0x1ab   :  { %15058 = vst [vmem:[#allocation24_spill] sm:$0xff] %v11560_v59  ;;  %v11562_v36 = vadd.f32 %v9736_v45, %v1428_v31  ;;  %v9659_v47 = vpop.f32.mrb[46].mxu0  ;;  %v11564_v62 = vadd.f32 %v9655_v63, %v1766_v24 }
 0x1ac   :  { %v1431_v14 = vpop.f32.mrb[47].mxu0 }
 0x1ad   :  { %15059 = vst [vmem:[#allocation25_spill] sm:$0xff] %v11562_v36  ;;  %15060 = vst [vmem:[#allocation26_spill] sm:$0xff] %v11564_v62  ;;  %v11566_v29 = vadd.f32 %v9737_v48, %v1431_v14 }
 0x1ae   :  { %9837 = vmatmul.mubr.msk.bf16.gmra.mrb[152].mxu0 %vm113_vm0, %v11389_v40  ;;  %vm3990_vm0 = vcmask 1043456  }
 0x1af   :  { %15061 = vst [vmem:[#allocation27_spill] sm:$0xff] %v11566_v29  ;;  %v9740_v60 = vpop.f32.mrb[36].mxu1  ;;  %vm13407_vm3 = vmor %vm3991_vm1, %vm3990_vm0 }
 0x1b0   :  { %v1779_v6 = vpop.f32.mrb[37].mxu1 }
 0x1b1   :  { %v9662_v21 = vpop.f32.mrb[48].mxu0  ;;  %v11570_v58 = vadd.f32 %v9658_v41, %v1779_v6  ;;  %v9741_v11 = vpop.f32.mrb[38].mxu1 }
 0x1b2   :  { %v1444_v27 = vpop.f32.mrb[49].mxu0  ;;  %v1782_v39 = vpop.f32.mrb[39].mxu1 }
 0x1b3   :  { %15062 = vst [vmem:[#allocation28_spill] sm:$0xff] %v11570_v58  ;;  %v11572_v32 = vadd.f32 %v9740_v60, %v1444_v27  ;;  %v9663_v43 = vpop.f32.mrb[50].mxu0  ;;  %v11574_v34 = vadd.f32 %v9659_v47, %v1782_v39 }
 0x1b4   :  { %v1447_v63 = vpop.f32.mrb[51].mxu0 }
 0x1b5   :  { %15063 = vst [vmem:[#allocation29_spill] sm:$0xff] %v11572_v32  ;;  %15064 = vst [vmem:[#allocation30_spill] sm:$0xff] %v11574_v34  ;;  %v11576_v9 = vadd.f32 %v9741_v11, %v1447_v63 }
 0x1b7   :  { %15065 = vst [vmem:[#allocation31_spill] sm:$0xff] %v11576_v9  ;;  %v9744_v45 = vpop.f32.mrb[40].mxu1 }
 0x1b8   :  { %v1795_v57 = vpop.f32.mrb[41].mxu1 }
 0x1b9   :  { %v9666_v48 = vpop.f32.mrb[52].mxu0  ;;  %v11578_v40 = vadd.f32 %v9662_v21, %v1795_v57  ;;  %v9745_v31 = vpop.f32.mrb[42].mxu1 }
 0x1ba   :  { %v1460_v24 = vpop.f32.mrb[53].mxu0  ;;  %v1798_v14 = vpop.f32.mrb[43].mxu1 }
 0x1bb   :  { %15066 = vst [vmem:[#allocation32_spill] sm:$0xff] %v11578_v40  ;;  %v11580_v41 = vadd.f32 %v9744_v45, %v1460_v24  ;;  %v9667_v6 = vpop.f32.mrb[54].mxu0  ;;  %v11582_v60 = vadd.f32 %v9663_v43, %v1798_v14 }
 0x1bc   :  { %v1463_v27 = vpop.f32.mrb[55].mxu0 }
 0x1bd   :  { %15067 = vst [vmem:[#allocation33_spill] sm:$0xff] %v11580_v41  ;;  %15068 = vst [vmem:[#allocation34_spill] sm:$0xff] %v11582_v60  ;;  %v11584_v22 = vadd.f32 %v9745_v31, %v1463_v27 }
 0x1bf   :  { %15069 = vst [vmem:[#allocation35_spill] sm:$0xff] %v11584_v22  ;;  %v9748_v47 = vpop.f32.mrb[44].mxu1 }
 0x1c0   :  { %v1811_v39 = vpop.f32.mrb[45].mxu1 }
 0x1c1   :  { %v9670_v11 = vpop.f32.mrb[56].mxu0  ;;  %v11586_v63 = vadd.f32 %v9666_v48, %v1811_v39  ;;  %v9749_v9 = vpop.f32.mrb[46].mxu1 }
 0x1c2   :  { %v1476_v32 = vpop.f32.mrb[57].mxu0  ;;  %v1814_v57 = vpop.f32.mrb[47].mxu1 }
 0x1c3   :  { %15070 = vst [vmem:[#allocation36_spill] sm:$0xff] %v11586_v63  ;;  %v11588_v21 = vadd.f32 %v9748_v47, %v1476_v32  ;;  %v9671_v40 = vpop.f32.mrb[58].mxu0  ;;  %v11590_v45 = vadd.f32 %v9667_v6, %v1814_v57 }
 0x1c4   :  { %v1479_v24 = vpop.f32.mrb[59].mxu0 }
 0x1c5   :  { %15071 = vst [vmem:[#allocation37_spill] sm:$0xff] %v11588_v21  ;;  %15072 = vst [vmem:[#allocation38_spill] sm:$0xff] %v11590_v45  ;;  %v11592_v41 = vadd.f32 %v9749_v9, %v1479_v24 }
 0x1c7   :  { %15073 = vst [vmem:[#allocation39_spill] sm:$0xff] %v11592_v41  ;;  %v9752_v43 = vpop.f32.mrb[48].mxu1 }
 0x1c8   :  { %v1827_v14 = vpop.f32.mrb[49].mxu1 }
 0x1c9   :  { %v9674_v31 = vpop.f32.mrb[60].mxu0  ;;  %v11594_v27 = vadd.f32 %v9670_v11, %v1827_v14  ;;  %v9753_v22 = vpop.f32.mrb[50].mxu1 }
 0x1ca   :  { %v1492_v60 = vpop.f32.mrb[61].mxu0  ;;  %v1830_v39 = vpop.f32.mrb[51].mxu1 }
 0x1cb   :  { %15074 = vst [vmem:[#allocation40_spill] sm:$0xff] %v11594_v27  ;;  %v11596_v48 = vadd.f32 %v9752_v43, %v1492_v60  ;;  %v9675_v63 = vpop.f32.mrb[62].mxu0  ;;  %v11598_v32 = vadd.f32 %v9671_v40, %v1830_v39 }
 0x1cc   :  { %v1495_v47 = vpop.f32.mrb[63].mxu0 }
 0x1cd   :  { %15075 = vst [vmem:[#allocation41_spill] sm:$0xff] %v11596_v48  ;;  %15076 = vst [vmem:[#allocation42_spill] sm:$0xff] %v11598_v32  ;;  %v11600_v21 = vadd.f32 %v9753_v22, %v1495_v47 }
 0x1cf   :  { %15077 = vst [vmem:[#allocation43_spill] sm:$0xff] %v11600_v21  ;;  %v9756_v6 = vpop.f32.mrb[52].mxu1 }
 0x1d0   :  { %v1843_v57 = vpop.f32.mrb[53].mxu1 }
 0x1d1   :  { %v9678_v9 = vpop.f32.mrb[64].mxu0  ;;  %v11602_v24 = vadd.f32 %v9674_v31, %v1843_v57  ;;  %v9757_v41 = vpop.f32.mrb[54].mxu1 }
 0x1d2   :  { %v1508_v45 = vpop.f32.mrb[65].mxu0  ;;  %v1846_v14 = vpop.f32.mrb[55].mxu1 }
 0x1d3   :  { %15078 = vst [vmem:[#allocation44_spill] sm:$0xff] %v11602_v24  ;;  %v11604_v11 = vadd.f32 %v9756_v6, %v1508_v45  ;;  %v9679_v27 = vpop.f32.mrb[66].mxu0  ;;  %v11606_v60 = vadd.f32 %v9675_v63, %v1846_v14 }
 0x1d4   :  { %v1511_v43 = vpop.f32.mrb[67].mxu0 }
 0x1d5   :  { %15079 = vst [vmem:[#allocation45_spill] sm:$0xff] %v11604_v11  ;;  %15080 = vst [vmem:[#allocation46_spill] sm:$0xff] %v11606_v60  ;;  %v11608_v48 = vadd.f32 %v9757_v41, %v1511_v43 }
 0x1d7   :  { %15081 = vst [vmem:[#allocation47_spill] sm:$0xff] %v11608_v48  ;;  %v9760_v40 = vpop.f32.mrb[56].mxu1 }
 0x1d8   :  { %v1859_v39 = vpop.f32.mrb[57].mxu1 }
 0x1d9   :  { %v9682_v22 = vpop.f32.mrb[68].mxu0  ;;  %v11610_v47 = vadd.f32 %v9678_v9, %v1859_v39  ;;  %v9761_v21 = vpop.f32.mrb[58].mxu1 }
 0x1da   :  { %v1524_v32 = vpop.f32.mrb[69].mxu0  ;;  %v1862_v31 = vpop.f32.mrb[59].mxu1 }
 0x1db   :  { %15082 = vst [vmem:[#allocation48_spill] sm:$0xff] %v11610_v47  ;;  %v9683_v57 = vpop.f32.mrb[70].mxu0  ;;  %v11612_v24 = vadd.f32 %v9679_v27, %v1862_v31 }
 0x1dc   :  { %v1526_v45 = vpop.f32.mrb[71].mxu0 }
 0x1dd   :  { %15083 = vst [vmem:[#allocation49_spill] sm:$0xff] %v11612_v24 }
 0x1e1   :  { %v9692_v6 = vpop.f32.mrb[72].mxu0 }
 0x1e2   :  { %v2209_v11 = vadd.f32 %v9692_v6, %v11442_v20  ;;  %v1593_v63 = vpop.f32.mrb[73].mxu0 }
 0x1e3   :  { %v9693_v14 = vpop.f32.mrb[74].mxu0 }
 0x1e4   :  { %v2210_v41 = vadd.f32 %v9693_v14, %v11446_v15  ;;  %v1595_v43 = vpop.f32.mrb[75].mxu0 }
 0x1e9   :  { %v9696_v40 = vpop.f32.mrb[76].mxu0 }
 0x1ea   :  { %v2213_v22 = vadd.f32 %v9696_v40, %v11454_v51  ;;  %v1607_v9 = vpop.f32.mrb[77].mxu0 }
 0x1eb   :  { %v2211_v21 = vadd.f32 %v11440_v37, %v1607_v9  ;;  %v9697_v32 = vpop.f32.mrb[78].mxu0 }
 0x1ec   :  { %v2214_v39 = vadd.f32 %v9697_v32, %v11458_v56  ;;  %v1610_v27 = vpop.f32.mrb[79].mxu0 }
 0x1ed   :  { %v2212_v31 = vadd.f32 %v11444_v4, %v1610_v27  ;;  %v11631_v4 = vld [vmem:[%s14940_s2] ss:$0 sm:$0xff]  ;;  %v10207_v27 = vmov 1983009808  }
 0x1f1   :  { %v9700_v57 = vpop.f32.mrb[80].mxu0 }
 0x1f2   :  { %v11621_v20 = vadd.f32 %v9700_v57, %v11464_v42  ;;  %v1623_v45 = vpop.f32.mrb[81].mxu0  ;;  %v2680_v57 = vunpack.c.l.s4 %v10207_v27 }
 0x1f3   :  { %v2215_v15 = vadd.f32 %v11452_v35, %v1623_v45  ;;  %v9701_v6 = vpop.f32.mrb[82].mxu0 }
 0x1f4   :  { %v11625_v63 = vadd.f32 %v9701_v6, %v11466_v7  ;;  %v1626_v51 = vpop.f32.mrb[83].mxu0  ;;  %v2682_v7 = vlaneseq }
 0x1f5   :  { %v2216_v37 = vadd.f32 %v11456_v0, %v1626_v51 }
 0x1f9   :  { %v9770_v14 = vpop.f32.mrb[84].mxu0 }
 0x1fa   :  { %v1930_v43 = vpop.f32.mrb[85].mxu0  ;;  %v11637_v14 = vld [vmem:[%s14941_s3] ss:$0 sm:$0xff] }
 0x1fb   :  { %v9771_v56 = vpop.f32.mrb[86].mxu0 }
 0x1fc   :  { %v1932_v40 = vpop.f32.mrb[87].mxu0 }
 0x201   :  { %v9774_v9 = vpop.f32.mrb[88].mxu0 }
 0x202   :  { %v2275_v42 = vadd.f32 %v9774_v9, %v2211_v21  ;;  %v1942_v32 = vpop.f32.mrb[89].mxu0 }
 0x203   :  { %v2273_v35 = vadd.f32 %v2209_v11, %v1942_v32  ;;  %v9775_v45 = vpop.f32.mrb[90].mxu0  ;;  %v11644_v11 = vld [vmem:[%s14942_s4] ss:$0 sm:$0xff] }
 0x204   :  { %v2346_v6 = vadd.f32 %v11631_v4, %v2275_v42  ;;  %v2276_v0 = vadd.f32 %v9775_v45, %v2212_v31  ;;  %v1945_v51 = vpop.f32.mrb[91].mxu0  ;;  %v2681_v42 = vunpack.c.0.s8 %v2680_v57  ;;  %v11646_v31 = vshrl.u32 %v2682_v7, 7 }
 0x205   :  { %v2344_v43 = vadd.f32 %v11631_v4, %v2273_v35  ;;  %v2274_v56 = vadd.f32 %v2210_v41, %v1945_v51 }
 0x206   :  { %v2410_v40 = vmax.f32 %v2346_v6, 0.0  ;;  %v2347_v21 = vadd.f32 %v11631_v4, %v2276_v0  ;;  %15084 = vst [vmem:[#allocation50_spill] sm:$0xff] %v11646_v31  ;;  %v11655_v57 = vsub.s32 %v2681_v42, %v11646_v31 }
 0x207   :  { %v2408_v9 = vmax.f32 %v2344_v43, 0.0  ;;  %v2345_v32 = vadd.f32 %v11631_v4, %v2274_v56 }
 0x208   :  { %v2481_v27 = vmul.f32 %v11637_v14, %v2410_v40  ;;  %v2411_v45 = vmax.f32 %v2347_v21, 0.0  ;;  %15085 = vst [vmem:[#allocation51_spill] sm:$0xff] %v11655_v57 }
 0x209   :  { %v2479_v35 = vmul.f32 %v11637_v14, %v2408_v9  ;;  %v2409_v41 = vmax.f32 %v2345_v32, 0.0  ;;  %v9778_v6 = vpop.f32.mrb[92].mxu0 }
 0x20a   :  { %v2552_v0 = vadd.f32 %v11644_v11, %v2481_v27  ;;  %v2482_v51 = vmul.f32 %v11637_v14, %v2411_v45  ;;  %v2279_v48 = vadd.f32 %v9778_v6, %v2215_v15  ;;  %v1958_v24 = vpop.f32.mrb[93].mxu0 }
 0x20b   :  { %v2550_v43 = vadd.f32 %v11644_v11, %v2479_v35  ;;  %v2480_v7 = vmul.f32 %v11637_v14, %v2409_v41  ;;  %v2277_v56 = vadd.f32 %v2213_v22, %v1958_v24  ;;  %v9779_v40 = vpop.f32.mrb[94].mxu0 }
 0x20c   :  { %v2553_v21 = vadd.f32 %v11644_v11, %v2482_v51  ;;  %v2350_v9 = vadd.f32 %v11631_v4, %v2279_v48  ;;  %v2280_v32 = vadd.f32 %v9779_v40, %v2216_v37  ;;  %v1961_v47 = vpop.f32.mrb[95].mxu0 }
 0x20d   :  { %v2614_v27 = vmax.f32 %v2550_v43, %v2552_v0  ;;  %v2551_v45 = vadd.f32 %v11644_v11, %v2480_v7  ;;  %v2348_v15 = vadd.f32 %v11631_v4, %v2277_v56  ;;  %v2278_v6 = vadd.f32 %v2214_v39, %v1961_v47 }
 0x20e   :  { %v2414_v35 = vmax.f32 %v2350_v9, 0.0  ;;  %v2351_v42 = vadd.f32 %v11631_v4, %v2280_v32 }
 0x20f   :  { %v2678_v31 = vcombine.high %v2614_v27, %v2614_v27  ;;  %v2685_v41 = vrot.slane %v2614_v27, %v11655_v57  ;;  %v2615_v24 = vmax.f32 %v2551_v45, %v2553_v21  ;;  %v2412_v22 = vmax.f32 %v2348_v15, 0.0 }
 0x210   :  { %v2485_v51 = vmul.f32 %v11637_v14, %v2414_v35  ;;  %v2415_v60 = vmax.f32 %v2351_v42, 0.0  ;;  %v11666_v48 = vadd.f32 %v11631_v4, %v2278_v6 }
 0x211   :  { %v2692_v37 = vrot.slane %v2678_v31, %v11655_v57  ;;  %v2693_v0 = vcombine.high %v2685_v41, %v2685_v41  ;;  %v8803_v43 = vrot.slane %v2685_v41, 9  ;;  %v2695_v7 = vcombine.high %v2615_v24, %v2615_v24  ;;  %v11669_v47 = vpop.f32.mrb[96].mxu0 }
 0x212   :  { %v2702_v39 = vrot.slane %v2615_v24, %v11655_v57  ;;  %v2556_v56 = vadd.f32 %v11644_v11, %v2485_v51  ;;  %v2483_v40 = vmul.f32 %v11637_v14, %v2412_v22  ;;  %v2486_v21 = vmul.f32 %v11637_v14, %v2415_v60  ;;  %v11675_v9 = vpop.f32.mrb[97].mxu0 }
 0x213   :  { %v2694_v32 = vcombine.high %v2692_v37, %v2692_v37  ;;  %v8804_v27 = vrot.slane %v2693_v0, 9  ;;  %v8805_v31 = vrot.slane %v2692_v37, 9  ;;  %v3734_v45 = vmax.f32 %v2685_v41, %v8803_v43  ;;  %v9783_v15 = vpop.f32.mrb[98].mxu0 }
 0x214   :  { %v11678_v6 = vrot.slane %v2695_v7, %v11655_v57  ;;  %v2710_v35 = vcombine.high %v2702_v39, %v2702_v39  ;;  %v8807_v42 = vrot.slane %v2702_v39, 9  ;;  %v2554_v24 = vadd.f32 %v11644_v11, %v2483_v40  ;;  %v11681_v29 = vpop.f32.mrb[99].mxu0 }
 0x215   :  { %v8806_v51 = vrot.slane %v2694_v32, 9  ;;  %v3735_v22 = vmax.f32 %v2693_v0, %v8804_v27  ;;  %v3736_v34 = vmax.f32 %v2692_v37, %v8805_v31  ;;  %v9359_v60 = vpack.c.bf16 %v3734_v45, %v3734_v45 }
 0x216   :  { %v8808_v36 = vrot.slane %v2710_v35, 9  ;;  %v3738_v44 = vmax.f32 %v2702_v39, %v8807_v42  ;;  %v2616_v62 = vmax.f32 %v2554_v24, %v2556_v56  ;;  %v2557_v58 = vadd.f32 %v11644_v11, %v2486_v21 }
 0x217   :  { %v3737_v41 = vmax.f32 %v2694_v32, %v8806_v51  ;;  %v9360_v43 = vpack.c.bf16 %v3735_v22, %v3735_v22  ;;  %v9361_v19 = vpack.c.bf16 %v3736_v34, %v3736_v34  ;;  %v11684_v7 = vunpack.c.l.b16 %v9359_v60 }
 0x218   :  { %v11686_v59 = vmax.f32 %v2710_v35, %v8808_v36  ;;  %v9363_v61 = vpack.c.bf16 %v3738_v44, %v3738_v44  ;;  %v2712_v40 = vcombine.high %v2616_v62, %v2616_v62  ;;  %v2719_v2 = vrot.slane %v2616_v62, %v11655_v57 }
 0x219   :  { %v9362_v23 = vpack.c.bf16 %v3737_v41, %v3737_v41  ;;  %v11689_v0 = vunpack.c.l.b16 %v9360_v43  ;;  %v11691_v37 = vunpack.c.l.b16 %v9361_v19  ;;  %v4461_v27 = vrot.slane %v11684_v7, 7  ;;  %v11694_v39 = vpop.f32.mrb[100].mxu0 }
 0x21a   :  { %v11698_v56 = vunpack.c.l.b16 %v9363_v61  ;;  %v2726_v36 = vrot.slane %v2712_v40, %v11655_v57  ;;  %v2727_v44 = vcombine.high %v2719_v2, %v2719_v2  ;;  %v11701_v32 = vpop.f32.mrb[101].mxu0  ;;  %v8811_v51 = vrot.slane %v2719_v2, 9 }
 0x21b   :  { %15086 = vst [vmem:[#allocation52_spill] sm:$0xff] %v11691_v37  ;;  %v11703_v62 = vunpack.c.l.b16 %v9362_v23  ;;  %v4462_v31 = vrot.slane %v11689_v0, 6  ;;  %v5128_v45 = vrot.slane %v11691_v37, 7  ;;  %v11708_v35 = vpop.f32.mrb[102].mxu0  ;;  %v2413_v18 = vmax.f32 %v11666_v48, 0.0 }
 0x21c   :  { %15087 = vst [vmem:[#allocation53_spill] sm:$0xff] %v11698_v56  ;;  %v2728_v24 = vcombine.high %v2726_v36, %v2726_v36  ;;  %v11712_v22 = vpop.f32.mrb[103].mxu0  ;;  %v8812_v40 = vrot.slane %v2727_v44, 9  ;;  %v8813_v19 = vrot.slane %v2726_v36, 9  ;;  %v3742_v42 = vmax.f32 %v2719_v2, %v8811_v51 }
 0x21d   :  { %15088 = vst [vmem:[#allocation54_spill] sm:$0xff] %v11703_v62  ;;  %v11715_v60 = vsel %vm4463_vm9, %v4462_v31, %v4461_v27  ;;  %v5129_v41 = vsel %vm4823_vm10, %v5128_v45, %v11689_v0  ;;  %v5130_v43 = vrot.slane %v11703_v62, 6  ;;  %v2283_v27 = vadd.f32 %v11669_v47, %v11472_v55 }
 0x21e   :  { %15089 = vst [vmem:[#allocation55_spill] sm:$0xff] %v11715_v60  ;;  %v8814_v34 = vrot.slane %v2728_v24, 9  ;;  %v3743_v31 = vmax.f32 %v2727_v44, %v8812_v40  ;;  %v3744_v23 = vmax.f32 %v2726_v36, %v8813_v19  ;;  %v9366_v45 = vpack.c.bf16 %v3742_v42, %v3742_v42 }
 0x21f   :  { %v11722_v61 = vsel %vm4463_vm9, %v5130_v43, %v5129_v41  ;;  %v2484_v52 = vmul.f32 %v11637_v14, %v2413_v18  ;;  %v2354_v30 = vadd.f32 %v11631_v4, %v2283_v27  ;;  %v2281_v2 = vadd.f32 %v11621_v20, %v11675_v9 }
 0x220   :  { %v3745_v60 = vmax.f32 %v2728_v24, %v8814_v34  ;;  %v2284_v51 = vadd.f32 %v9783_v15, %v11476_v26  ;;  %v9367_v21 = vpack.c.bf16 %v3743_v31, %v3743_v31  ;;  %v9368_v48 = vpack.c.bf16 %v3744_v23, %v3744_v23 }
 0x221   :  { %v11733_v41 = vpop.f32.mrb[104].mxu0  ;;  %v11735_v8 = vunpack.c.l.b16 %v9366_v45  ;;  %v2555_v47 = vadd.f32 %v11644_v11, %v2484_v52  ;;  %v2418_v34 = vmax.f32 %v2354_v30, 0.0  ;;  %v2352_v18 = vadd.f32 %v11631_v4, %v2281_v2 }
 0x222   :  { %v9369_v43 = vpack.c.bf16 %v3745_v60, %v3745_v60  ;;  %v11737_v55 = vpop.f32.mrb[105].mxu0  ;;  %v2355_v36 = vadd.f32 %v11631_v4, %v2284_v51  ;;  %v11744_v20 = vunpack.c.l.b16 %v9367_v21  ;;  %v11746_v26 = vunpack.c.l.b16 %v9368_v48 }
 0x223   :  { %v11742_v44 = vpop.f32.mrb[106].mxu0  ;;  %v4480_v15 = vrot.slane %v11735_v8, 7  ;;  %v2617_v42 = vmax.f32 %v2555_v47, %v2557_v58  ;;  %v2489_v52 = vmul.f32 %v11637_v14, %v2418_v34  ;;  %v2416_v30 = vmax.f32 %v2352_v18, 0.0 }
 0x224   :  { %15090 = vst [vmem:[#allocation56_spill] sm:$0xff] %v11746_v26  ;;  %v11748_v9 = vunpack.c.l.b16 %v9369_v43  ;;  %v11751_v19 = vpop.f32.mrb[107].mxu0  ;;  %v2419_v24 = vmax.f32 %v2355_v36, 0.0  ;;  %v4481_v60 = vrot.slane %v11744_v20, 6  ;;  %v5140_v27 = vrot.slane %v11746_v26, 7 }
 0x225   :  { %v2729_v45 = vcombine.high %v2617_v42, %v2617_v42  ;;  %v2736_v2 = vrot.slane %v2617_v42, %v11655_v57  ;;  %v2560_v51 = vadd.f32 %v11644_v11, %v2489_v52  ;;  %v2487_v48 = vmul.f32 %v11637_v14, %v2416_v30 }
 0x226   :  { %15091 = vst [vmem:[#allocation57_spill] sm:$0xff] %v11748_v9  ;;  %v5142_v31 = vrot.slane %v11748_v9, 6  ;;  %v11762_v58 = vsel %vm4463_vm9, %v4481_v60, %v4480_v15  ;;  %v5141_v21 = vsel %vm4823_vm10, %v5140_v27, %v11744_v20  ;;  %v2490_v43 = vmul.f32 %v11637_v14, %v2419_v24 }
 0x227   :  { %15092 = vst [vmem:[#allocation58_spill] sm:$0xff] %v11762_v58  ;;  %v11772_v34 = vrot.slane %v2729_v45, %v11655_v57  ;;  %v2744_v18 = vcombine.high %v2736_v2, %v2736_v2  ;;  %v8815_v36 = vrot.slane %v2736_v2, 9  ;;  %v2558_v15 = vadd.f32 %v11644_v11, %v2487_v48 }
 0x228   :  { %v11769_v47 = vsel %vm4463_vm9, %v5142_v31, %v5141_v21  ;;  %v2561_v52 = vadd.f32 %v11644_v11, %v2490_v43  ;;  %v2282_v60 = vadd.f32 %v11625_v63, %v11681_v29  ;;  %v2287_v30 = vadd.f32 %v11694_v39, %v11484_v1 }
 0x229   :  { %v11774_v42 = vpop.f32.mrb[108].mxu0  ;;  %v8816_v27 = vrot.slane %v2744_v18, 9  ;;  %v3746_v45 = vmax.f32 %v2736_v2, %v8815_v36  ;;  %v2285_v21 = vadd.f32 %v11474_v13, %v11701_v32  ;;  %v2618_v48 = vmax.f32 %v2558_v15, %v2560_v51 }
 0x22a   :  { %v11782_v24 = vpop.f32.mrb[109].mxu0  ;;  %v2353_v43 = vadd.f32 %v11631_v4, %v2282_v60  ;;  %v2358_v23 = vadd.f32 %v11631_v4, %v2287_v30  ;;  %v2288_v29 = vadd.f32 %v11708_v35, %v11488_v50  ;;  %v2286_v13 = vadd.f32 %v11478_v54, %v11712_v22 }
 0x22b   :  { %v11787_v40 = vpop.f32.mrb[110].mxu0  ;;  %v11795_v63 = vmax.f32 %v2744_v18, %v8816_v27  ;;  %v9370_v39 = vpack.c.bf16 %v3746_v45, %v3746_v45  ;;  %v2356_v2 = vadd.f32 %v11631_v4, %v2285_v21  ;;  %v2746_v32 = vcombine.high %v2618_v48, %v2618_v48 }
 0x22c   :  { %v11793_v1 = vpop.f32.mrb[111].mxu0  ;;  %v2753_v51 = vrot.slane %v2618_v48, %v11655_v57  ;;  %v2417_v36 = vmax.f32 %v2353_v43, 0.0  ;;  %v2422_v15 = vmax.f32 %v2358_v23, 0.0  ;;  %v2359_v35 = vadd.f32 %v11631_v4, %v2288_v29 }
 0x22d   :  { %v11803_v30 = vunpack.c.l.b16 %v9370_v39  ;;  %v2420_v50 = vmax.f32 %v2356_v2, 0.0  ;;  %v2760_v18 = vrot.slane %v2746_v32, %v11655_v57 }
 0x22e   :  { %v2761_v27 = vcombine.high %v2753_v51, %v2753_v51  ;;  %v8819_v45 = vrot.slane %v2753_v51, 9  ;;  %v2488_v21 = vmul.f32 %v11637_v14, %v2417_v36  ;;  %v2493_v23 = vmul.f32 %v11637_v14, %v2422_v15 }
 0x22f   :  { %15093 = vst [vmem:[#allocation59_spill] sm:$0xff] %v11803_v30  ;;  %v2491_v48 = vmul.f32 %v11637_v14, %v2420_v50  ;;  %v2762_v39 = vcombine.high %v2760_v18, %v2760_v18  ;;  %v8821_v60 = vrot.slane %v2760_v18, 9  ;;  %v2423_v58 = vmax.f32 %v2359_v35, 0.0 }
 0x230   :  { %v8820_v2 = vrot.slane %v2761_v27, 9  ;;  %v3750_v29 = vmax.f32 %v2753_v51, %v8819_v45  ;;  %v2559_v32 = vadd.f32 %v11644_v11, %v2488_v21  ;;  %v2564_v36 = vadd.f32 %v11644_v11, %v2493_v23 }
 0x231   :  { %v11812_v43 = vpop.f32.mrb[112].mxu0  ;;  %v2562_v54 = vadd.f32 %v11644_v11, %v2491_v48  ;;  %v8822_v15 = vrot.slane %v2762_v39, 9  ;;  %v3752_v50 = vmax.f32 %v2760_v18, %v8821_v60  ;;  %v2494_v51 = vmul.f32 %v11637_v14, %v2423_v58 }
 0x232   :  { %15094 = vst [vmem:[#allocation60_spill] sm:$0xff] %v11812_v43  ;;  %v11814_v31 = vpop.f32.mrb[113].mxu0  ;;  %v3751_v12 = vmax.f32 %v2761_v27, %v8820_v2  ;;  %v9373_v38 = vpack.c.bf16 %v3750_v29, %v3750_v29  ;;  %v2619_v5 = vmax.f32 %v2559_v32, %v2561_v52  ;;  %v2357_v45 = vadd.f32 %v11631_v4, %v2286_v13 }
 0x233   :  { %15095 = vst [vmem:[#allocation61_spill] sm:$0xff] %v11814_v31  ;;  %v11819_v22 = vpop.f32.mrb[114].mxu0  ;;  %v2620_v43 = vmax.f32 %v2562_v54, %v2564_v36  ;;  %v3753_v21 = vmax.f32 %v2762_v39, %v8822_v15  ;;  %v9375_v23 = vpack.c.bf16 %v3752_v50, %v3752_v50 }
 0x234   :  { %15096 = vst [vmem:[#allocation62_spill] sm:$0xff] %v11819_v22  ;;  %v11821_v3 = vpop.f32.mrb[115].mxu0  ;;  %v9374_v31 = vpack.c.bf16 %v3751_v12, %v3751_v12  ;;  %v11825_v16 = vunpack.c.l.b16 %v9373_v38  ;;  %v2763_v35 = vcombine.high %v2619_v5, %v2619_v5  ;;  %v2770_v48 = vrot.slane %v2619_v5, %v11655_v57 }
 0x235   :  { %v2780_v22 = vcombine.high %v2620_v43, %v2620_v43  ;;  %v2787_v60 = vrot.slane %v2620_v43, %v11655_v57  ;;  %v9376_v18 = vpack.c.bf16 %v3753_v21, %v3753_v21  ;;  %v11831_v52 = vunpack.c.l.b16 %v9375_v23 }
 0x236   :  { %15097 = vst [vmem:[#allocation63_spill] sm:$0xff] %v11825_v16  ;;  %v11829_v27 = vunpack.c.l.b16 %v9374_v31  ;;  %v4493_v58 = vrot.slane %v11825_v16, 7  ;;  %v11835_v13 = vrot.slane %v2763_v35, %v11655_v57  ;;  %v2778_v12 = vcombine.high %v2770_v48, %v2770_v48 }
 0x237   :  { %15099 = vst [vmem:[#allocation65_spill] sm:$0xff] %v11831_v52  ;;  %v8823_v54 = vrot.slane %v2770_v48, 9  ;;  %v2794_v38 = vrot.slane %v2780_v22, %v11655_v57  ;;  %v11840_v5 = vunpack.c.l.b16 %v9376_v18  ;;  %v5152_v2 = vrot.slane %v11831_v52, 7 }
 0x238   :  { %15098 = vst [vmem:[#allocation64_spill] sm:$0xff] %v11829_v27  ;;  %v4494_v43 = vrot.slane %v11829_v27, 6  ;;  %v8824_v32 = vrot.slane %v2778_v12, 9  ;;  %v2795_v50 = vcombine.high %v2787_v60, %v2787_v60 }
 0x239   :  { %v11838_v39 = vpop.f32.mrb[116].mxu0  ;;  %15101 = vst [vmem:[#allocation67_spill] sm:$0xff] %v11840_v5  ;;  %v3754_v15 = vmax.f32 %v2770_v48, %v8823_v54  ;;  %v5153_v35 = vsel %vm4823_vm10, %v5152_v2, %v11829_v27  ;;  %v5154_v18 = vrot.slane %v11840_v5, 6  ;;  %v2796_v36 = vcombine.high %v2794_v38, %v2794_v38 }
 0x23a   :  { %15100 = vst [vmem:[#allocation66_spill] sm:$0xff] %v11838_v39  ;;  %v11845_v29 = vpop.f32.mrb[117].mxu0  ;;  %v11851_v22 = vsel %vm4463_vm9, %v4494_v43, %v4493_v58  ;;  %v8827_v48 = vrot.slane %v2787_v60, 9  ;;  %v8829_v58 = vrot.slane %v2794_v38, 9  ;;  %v2565_v43 = vadd.f32 %v11644_v11, %v2494_v51 }
 0x23b   :  { %15102 = vst [vmem:[#allocation68_spill] sm:$0xff] %v11845_v29  ;;  %v11848_v21 = vpop.f32.mrb[118].mxu0  ;;  %15104 = vst [vmem:[#allocation70_spill] sm:$0xff] %v11851_v22  ;;  %v11859_v29 = vmax.f32 %v2778_v12, %v8824_v32  ;;  %v9377_v39 = vpack.c.bf16 %v3754_v15, %v3754_v15  ;;  %v11862_v54 = vsel %vm4463_vm9, %v5154_v18, %v5153_v35  ;;  %v8830_v22 = vrot.slane %v2796_v36, 9 }
 0x23c   :  { %15103 = vst [vmem:[#allocation69_spill] sm:$0xff] %v11848_v21  ;;  %v11857_v31 = vpop.f32.mrb[119].mxu0  ;;  %15106 = vst [vmem:[#allocation72_spill] sm:$0xff] %v11862_v54  ;;  %v8828_v21 = vrot.slane %v2795_v50, 9  ;;  %v3758_v5 = vmax.f32 %v2787_v60, %v8827_v48  ;;  %v3760_v12 = vmax.f32 %v2794_v38, %v8829_v58  ;;  %v2421_v32 = vmax.f32 %v2357_v45, 0.0 }
 0x23d   :  { %15105 = vst [vmem:[#allocation71_spill] sm:$0xff] %v11857_v31  ;;  %v11867_v2 = vunpack.c.l.b16 %v9377_v39  ;;  %v2291_v15 = vadd.f32 %v11733_v41, %v11496_v46  ;;  %v3761_v54 = vmax.f32 %v2796_v36, %v8830_v22  ;;  %v2289_v46 = vadd.f32 %v11486_v25, %v11737_v55 }
 0x23e   :  { %v3759_v31 = vmax.f32 %v2795_v50, %v8828_v21  ;;  %v9380_v52 = vpack.c.bf16 %v3758_v5, %v3758_v5  ;;  %v9382_v27 = vpack.c.bf16 %v3760_v12, %v3760_v12  ;;  %v2492_v39 = vmul.f32 %v11637_v14, %v2421_v32 }
 0x23f   :  { %15107 = vst [vmem:[#allocation73_spill] sm:$0xff] %v11867_v2  ;;  %v2362_v23 = vadd.f32 %v11631_v4, %v2291_v15  ;;  %v9383_v50 = vpack.c.bf16 %v3761_v54, %v3761_v54  ;;  %v2292_v41 = vadd.f32 %v11742_v44, %v11500_v33  ;;  %v2360_v54 = vadd.f32 %v11631_v4, %v2289_v46 }
 0x240   :  { %v9381_v16 = vpack.c.bf16 %v3759_v31, %v3759_v31  ;;  %v11875_v38 = vunpack.c.l.b16 %v9380_v52  ;;  %v11883_v5 = vunpack.c.l.b16 %v9382_v27  ;;  %v2563_v31 = vadd.f32 %v11644_v11, %v2492_v39 }
 0x241   :  { %v9806_v51 = vpop.f32.mrb[120].mxu0  ;;  %v2426_v21 = vmax.f32 %v2362_v23, 0.0  ;;  %v11886_v48 = vunpack.c.l.b16 %v9383_v50  ;;  %v2363_v25 = vadd.f32 %v11631_v4, %v2292_v41  ;;  %v2424_v12 = vmax.f32 %v2360_v54, 0.0 }
 0x242   :  { %v2070_v60 = vpop.f32.mrb[121].mxu0  ;;  %v11881_v36 = vunpack.c.l.b16 %v9381_v16  ;;  %15108 = vst [vmem:[#allocation74_spill] sm:$0xff] %v11883_v5  ;;  %v4506_v52 = vrot.slane %v11875_v38, 7  ;;  %v5164_v16 = vrot.slane %v11883_v5, 7  ;;  %v2621_v44 = vmax.f32 %v2563_v31, %v2565_v43 }
 0x243   :  { %v9807_v45 = vpop.f32.mrb[122].mxu0  ;;  %15109 = vst [vmem:[#allocation75_spill] sm:$0xff] %v11886_v48  ;;  %v5166_v23 = vrot.slane %v11886_v48, 6  ;;  %v2497_v58 = vmul.f32 %v11637_v14, %v2426_v21  ;;  %v2495_v50 = vmul.f32 %v11637_v14, %v2424_v12  ;;  %v2427_v46 = vmax.f32 %v2363_v25, 0.0 }
 0x244   :  { %v2072_v22 = vpop.f32.mrb[123].mxu0  ;;  %v4507_v55 = vrot.slane %v11881_v36, 6  ;;  %v5165_v15 = vsel %vm4823_vm10, %v5164_v16, %v11881_v36  ;;  %v2797_v51 = vcombine.high %v2621_v44, %v2621_v44  ;;  %v2804_v39 = vrot.slane %v2621_v44, %v11655_v57 }
 0x245   :  { %v11904_v60 = vsel %vm4463_vm9, %v5166_v23, %v5165_v15  ;;  %v2568_v43 = vadd.f32 %v11644_v11, %v2497_v58  ;;  %v2290_v22 = vadd.f32 %v11490_v53, %v11751_v19  ;;  %v2566_v54 = vadd.f32 %v11644_v11, %v2495_v50 }
 0x246   :  { %v11898_v32 = vsel %vm4463_vm9, %v4507_v55, %v4506_v52  ;;  %v11911_v45 = vrot.slane %v2797_v51, %v11655_v57  ;;  %v2812_v31 = vcombine.high %v2804_v39, %v2804_v39  ;;  %v8831_v21 = vrot.slane %v2804_v39, 9 }
 0x247   :  { %15110 = vst [vmem:[#allocation76_spill] sm:$0xff] %v11898_v32  ;;  %v2498_v55 = vmul.f32 %v11637_v14, %v2427_v46  ;;  %v2711_v16 = vcombine.high %v11678_v6, %v11678_v6  ;;  %v15111_v25 = vrot.slane %v11678_v6, 9  ;;  %v2361_v53 = vadd.f32 %v11631_v4, %v2290_v22 }
 0x248   :  { %v8832_v58 = vrot.slane %v2812_v31, 9  ;;  %v3762_v15 = vmax.f32 %v2804_v39, %v8831_v21  ;;  %v2622_v51 = vmax.f32 %v2566_v54, %v2568_v43 }
 0x249   :  { %v11908_v41 = vpop.f32.mrb[124].mxu0  ;;  %v3740_v44 = vmax.f32 %v11678_v6, %v15111_v25  ;;  %v2569_v50 = vadd.f32 %v11644_v11, %v2498_v55  ;;  %v8810_v46 = vrot.slane %v2711_v16, 9  ;;  %v2425_v6 = vmax.f32 %v2361_v53, 0.0 }
 0x24a   :  { %v11915_v52 = vpop.f32.mrb[125].mxu0  ;;  %v11931_v33 = vmax.f32 %v2812_v31, %v8832_v58  ;;  %v9384_v35 = vpack.c.bf16 %v3762_v15, %v3762_v15  ;;  %v15113_v25 = vpack.c.bf16 %v11686_v59, %v11686_v59  ;;  %v2814_v39 = vcombine.high %v2622_v51, %v2622_v51 }
 0x24b   :  { %v11924_v23 = vpop.f32.mrb[126].mxu0  ;;  %v9365_v27 = vpack.c.bf16 %v3740_v44, %v3740_v44  ;;  %v2821_v21 = vrot.slane %v2622_v51, %v11655_v57  ;;  %v3741_v22 = vmax.f32 %v2711_v16, %v8810_v46  ;;  %v2496_v31 = vmul.f32 %v11637_v14, %v2425_v6 }
 0x24c   :  { %v11928_v19 = vpop.f32.mrb[127].mxu0  ;;  %v11936_v18 = vunpack.c.l.b16 %v15113_v25  ;;  %v11943_v54 = vunpack.c.l.b16 %v9384_v35  ;;  %v4822_v55 = vrot.slane %v11689_v0, 7  ;;  %v2828_v59 = vrot.slane %v2814_v39, %v11655_v57 }
 0x24d   :  { %15112 = vst [vmem:[#allocation77_spill] sm:$0xff] %v11928_v19  ;;  %v11939_v12 = vunpack.c.l.b16 %v9365_v27  ;;  %v2829_v44 = vcombine.high %v2821_v21, %v2821_v21  ;;  %v8835_v58 = vrot.slane %v2821_v21, 9  ;;  %v9471_v15 = vpack.c.bf16 %v3741_v22, %v3741_v22 }
 0x24e   :  { %15114 = vst [vmem:[#allocation78_spill] sm:$0xff] %v11936_v18  ;;  %15116 = vst [vmem:[#allocation80_spill] sm:$0xff] %v11943_v54  ;;  %v2567_v51 = vadd.f32 %v11644_v11, %v2496_v31  ;;  %v4824_v35 = vsel %vm4823_vm10, %v4822_v55, %v11684_v7  ;;  %v2830_v6 = vcombine.high %v2828_v59, %v2828_v59  ;;  %v8837_v25 = vrot.slane %v2828_v59, 9 }
 0x24f   :  { %15115 = vst [vmem:[#allocation79_spill] sm:$0xff] %v11939_v12  ;;  %v8836_v0 = vrot.slane %v2829_v44, 9  ;;  %v3766_v39 = vmax.f32 %v2821_v21, %v8835_v58  ;;  %v11957_v22 = vunpack.c.l.b16 %v9471_v15  ;;  %v4825_v27 = vrot.slane %v11691_v37, 6 }
 0x250   :  { %v2623_v43 = vmax.f32 %v2567_v51, %v2569_v50  ;;  %v4827_v16 = vrot.slane %v11703_v62, 5  ;;  %v8838_v32 = vrot.slane %v2830_v6, 9  ;;  %v4829_v50 = vrot.slane %v11698_v56, 4 }
 0x251   :  { %v11948_v53 = vpop.f32.mrb[128].mxu0  ;;  %v3767_v31 = vmax.f32 %v2829_v44, %v8836_v0  ;;  %v9387_v19 = vpack.c.bf16 %v3766_v39, %v3766_v39  ;;  %v4826_v21 = vsel %vm4463_vm9, %v4825_v27, %v4824_v35 }
 0x252   :  { %15117 = vst [vmem:[#allocation81_spill] sm:$0xff] %v11948_v53  ;;  %v11955_v46 = vpop.f32.mrb[129].mxu0  ;;  %v3768_v53 = vmax.f32 %v2828_v59, %v8837_v25  ;;  %v2831_v55 = vcombine.high %v2623_v43, %v2623_v43  ;;  %v3769_v15 = vmax.f32 %v2830_v6, %v8838_v32  ;;  %v4828_v25 = vsel %vm4466_vm11, %v4827_v16, %v4826_v21 }
 0x253   :  { %15118 = vst [vmem:[#allocation82_spill] sm:$0xff] %v11955_v46  ;;  %v11961_v7 = vpop.f32.mrb[130].mxu0  ;;  %v2838_v46 = vrot.slane %v2623_v43, %v11655_v57  ;;  %v9388_v51 = vpack.c.bf16 %v3767_v31, %v3767_v31  ;;  %v11968_v62 = vunpack.c.l.b16 %v9387_v19  ;;  %v4830_v19 = vsel %vm4469_vm12, %v4829_v50, %v4828_v25 }
 0x254   :  { %v11966_v58 = vpop.f32.mrb[131].mxu0  ;;  %v9389_v37 = vpack.c.bf16 %v3768_v53, %v3768_v53  ;;  %v11971_v59 = vrot.slane %v2831_v55, %v11655_v57  ;;  %v9390_v39 = vpack.c.bf16 %v3769_v15, %v3769_v15  ;;  %v4831_v15 = vrot.slane %v11936_v18, 3 }
 0x255   :  { %15119 = vst [vmem:[#allocation83_spill] sm:$0xff] %v11966_v58  ;;  %v2846_v44 = vcombine.high %v2838_v46, %v2838_v46  ;;  %v8839_v0 = vrot.slane %v2838_v46, 9  ;;  %v11974_v43 = vunpack.c.l.b16 %v9388_v51  ;;  %v4519_v35 = vrot.slane %v11968_v62, 7 }
 0x256   :  { %v11976_v27 = vunpack.c.l.b16 %v9389_v37  ;;  %v11981_v6 = vunpack.c.l.b16 %v9390_v39  ;;  %v4833_v51 = vrot.slane %v11939_v12, 2  ;;  %v4835_v39 = vrot.slane %v11957_v22, 1 }
 0x257   :  { %v8840_v58 = vrot.slane %v2846_v44, 9  ;;  %v3770_v53 = vmax.f32 %v2838_v46, %v8839_v0  ;;  %v4520_v31 = vrot.slane %v11974_v43, 6  ;;  %v5134_v46 = vrot.slane %v11936_v18, 4 }
 0x258   :  { %15120 = vst [vmem:[#allocation84_spill] sm:$0xff] %v11976_v27  ;;  %15121 = vst [vmem:[#allocation85_spill] sm:$0xff] %v11981_v6  ;;  %v5176_v16 = vrot.slane %v11976_v27, 7  ;;  %v5178_v0 = vrot.slane %v11981_v6, 6 }
 0x259   :  { %v11986_v21 = vmax.f32 %v2846_v44, %v8840_v58  ;;  %v9391_v37 = vpack.c.bf16 %v3770_v53, %v3770_v53  ;;  %v11991_v32 = vsel %vm4463_vm9, %v4520_v31, %v4519_v35  ;;  %v4832_v44 = vsel %vm4472_vm13, %v4831_v15, %v4830_v19 }
 0x25a   :  { %15122 = vst [vmem:[#allocation86_spill] sm:$0xff] %v11991_v32  ;;  %v5177_v50 = vsel %vm4823_vm10, %v5176_v16, %v11974_v43  ;;  %v4834_v35 = vsel %vm4475_vm14, %v4833_v51, %v4832_v44  ;;  %v15124_v31 = vrot.slane %v11698_v56, 5  ;;  %v5136_v15 = vrot.slane %v11939_v12, 3  ;;  %v15160_v12 = vld [vmem:[#allocation66_spill] sm:$0xff] }
 0x25b   :  { %v11999_v58 = vunpack.c.l.b16 %v9391_v37  ;;  %v12004_v53 = vsel %vm4463_vm9, %v5178_v0, %v5177_v50  ;;  %v4836_v19 = vsel %vm4478_vm15, %v4835_v39, %v4834_v35  ;;  %v5138_v51 = vrot.slane %v11957_v22, 2 }
 0x25c   :  { %v5133_v16 = vsel %vm4466_vm11, %v15124_v31, %v11722_v61  ;;  %v5047_v25 = vpack.c.b16 %v4836_v19, %v4836_v19  ;;  %v2295_v0 = vadd.f32 %v11774_v42, %v11508_v49  ;;  %v2293_v44 = vadd.f32 %v11498_v17, %v11782_v24 }
 0x25d   :  { %15123 = vst [vmem:[#allocation87_spill] sm:$0xff] %v11999_v58  ;;  %v5135_v50 = vsel %vm4469_vm12, %v5134_v46, %v5133_v16  ;;  %v2296_v31 = vadd.f32 %v11787_v40, %v11512_v28  ;;  %v2294_v39 = vadd.f32 %v11502_v10, %v11793_v1  ;;  %v2745_v49 = vcombine.high %v11772_v34, %v11772_v34 }
 0x25e   :  { %v5137_v61 = vsel %vm4472_vm13, %v5136_v15, %v5135_v50  ;;  %5063 = vrot.lane.b32.xlu0 %v5047_v25, %s10208_s29  ;;  %v2366_v22 = vadd.f32 %v11631_v4, %v2295_v0  ;;  %v15126_v42 = vrot.slane %v11772_v34, 9  ;;  %v2364_v10 = vadd.f32 %v11631_v4, %v2293_v44  ;;  %v12047_v15 = vpop.f32.mrb[132].mxu0 }
 0x25f   :  { %v12028_v35 = vsel %vm4475_vm14, %v5138_v51, %v5137_v61  ;;  %v2367_v40 = vadd.f32 %v11631_v4, %v2296_v31  ;;  %v2365_v24 = vadd.f32 %v11631_v4, %v2294_v39  ;;  %v8818_v46 = vrot.slane %v2745_v49, 9  ;;  %v12050_v61 = vpop.f32.mrb[133].mxu0 }
 0x260   :  { %15125 = vst [vmem:[#allocation88_spill] sm:$0xff] %v12028_v35  ;;  %v3748_v17 = vmax.f32 %v11772_v34, %v15126_v42  ;;  %v2430_v1 = vmax.f32 %v2366_v22, 0.0  ;;  %v15127_v16 = vpack.c.bf16 %v11795_v63, %v11795_v63  ;;  %v2428_v34 = vmax.f32 %v2364_v10, 0.0  ;;  %15129 = vst [vmem:[#allocation90_spill] sm:$0xff] %v12050_v61  ;;  %v12056_v42 = vpop.f32.mrb[134].mxu0 }
 0x261   :  { %v2431_v50 = vmax.f32 %v2367_v40, 0.0  ;;  %v2429_v51 = vmax.f32 %v2365_v24, 0.0  ;;  %v4837_v0 = vrot.slane %v11744_v20, 7  ;;  %v3749_v31 = vmax.f32 %v2745_v49, %v8818_v46  ;;  %15131 = vst [vmem:[#allocation92_spill] sm:$0xff] %v12056_v42  ;;  %v12063_v40 = vpop.f32.mrb[135].mxu0 }
 0x262   :  { %v9372_v25 = vpack.c.bf16 %v3748_v17, %v3748_v17  ;;  %v12045_v19 = vunpack.c.l.b16 %v15127_v16  ;;  %v2501_v44 = vmul.f32 %v11637_v14, %v2430_v1  ;;  %v4839_v22 = vrot.slane %v11746_v26, 6  ;;  %15132 = vst [vmem:[#allocation93_spill] sm:$0xff] %v12063_v40 }
 0x263   :  { %v2499_v63 = vmul.f32 %v11637_v14, %v2428_v34  ;;  %v2502_v17 = vmul.f32 %v11637_v14, %v2431_v50  ;;  %v2500_v10 = vmul.f32 %v11637_v14, %v2429_v51  ;;  %v4838_v20 = vsel %vm4823_vm10, %v4837_v0, %v11735_v8 }
 0x264   :  { %15128 = vst [vmem:[#allocation89_spill] sm:$0xff] %v12045_v19  ;;  %v12053_v39 = vunpack.c.l.b16 %v9372_v25  ;;  %v2572_v24 = vadd.f32 %v11644_v11, %v2501_v44  ;;  %v9472_v49 = vpack.c.bf16 %v3749_v31, %v3749_v31  ;;  %v4840_v1 = vsel %vm4463_vm9, %v4839_v22, %v4838_v20 }
 0x265   :  { %v4841_v46 = vrot.slane %v11748_v9, 5  ;;  %v2570_v25 = vadd.f32 %v11644_v11, %v2499_v63  ;;  %v2573_v16 = vadd.f32 %v11644_v11, %v2502_v17  ;;  %v2571_v34 = vadd.f32 %v11644_v11, %v2500_v10 }
 0x266   :  { %15130 = vst [vmem:[#allocation91_spill] sm:$0xff] %v12053_v39  ;;  %v4843_v50 = vrot.slane %v11803_v30, 4  ;;  %v4807_v51 = vunpack.c.l.b16 %v9472_v49  ;;  %v4845_v0 = vrot.slane %v12045_v19, 3  ;;  %v4847_v44 = vrot.slane %v12053_v39, 2 }
 0x267   :  { %v4842_v8 = vsel %vm4466_vm11, %v4841_v46, %v4840_v1  ;;  %v2624_v31 = vmax.f32 %v2570_v25, %v2572_v24  ;;  %v2625_v55 = vmax.f32 %v2571_v34, %v2573_v16  ;;  %v15133_v63 = vrot.slane %v11803_v30, 5 }
 0x268   :  { %v4844_v22 = vsel %vm4469_vm12, %v4843_v50, %v4842_v8  ;;  %v4849_v20 = vrot.slane %v4807_v51, 1  ;;  %v5146_v49 = vrot.slane %v12045_v19, 4  ;;  %v5148_v1 = vrot.slane %v12053_v39, 3  ;;  %v15134_v50 = vld [vmem:[#allocation12_spill] sm:$0xff] }
 0x269   :  { %v5145_v17 = vsel %vm4466_vm11, %v15133_v63, %v11769_v47  ;;  %v4846_v10 = vsel %vm4472_vm13, %v4845_v0, %v4844_v22  ;;  %v2848_v46 = vcombine.high %v2624_v31, %v2624_v31  ;;  %v2855_v28 = vrot.slane %v2624_v31, %v11655_v57  ;;  %v15135_v47 = vld [vmem:[#allocation60_spill] sm:$0xff] }
 0x26a   :  { %v2865_v37 = vcombine.high %v2625_v55, %v2625_v55  ;;  %v2872_v24 = vrot.slane %v2625_v55, %v11655_v57  ;;  %v4848_v25 = vsel %vm4475_vm14, %v4847_v44, %v4846_v10  ;;  %v5147_v16 = vsel %vm4469_vm12, %v5146_v49, %v5145_v17 }
 0x26b   :  { %v5150_v34 = vrot.slane %v4807_v51, 2  ;;  %v2299_v8 = vadd.f32 %v15135_v47, %v15134_v50  ;;  %v2862_v0 = vrot.slane %v2848_v46, %v11655_v57  ;;  %v2863_v22 = vcombine.high %v2855_v28, %v2855_v28 }
 0x26c   :  { %v8843_v63 = vrot.slane %v2855_v28, 9  ;;  %v12091_v32 = vrot.slane %v2865_v37, %v11655_v57  ;;  %v2880_v39 = vcombine.high %v2872_v24, %v2872_v24  ;;  %v8847_v31 = vrot.slane %v2872_v24, 9 }
 0x26d   :  { %v4850_v19 = vsel %vm4478_vm15, %v4849_v20, %v4848_v25  ;;  %v5149_v55 = vsel %vm4472_vm13, %v5148_v1, %v5147_v16  ;;  %v2864_v44 = vcombine.high %v2862_v0, %v2862_v0  ;;  %v8844_v10 = vrot.slane %v2863_v22, 9 }
 0x26e   :  { %v8845_v17 = vrot.slane %v2862_v0, 9  ;;  %v3774_v51 = vmax.f32 %v2855_v28, %v8843_v63  ;;  %v8848_v49 = vrot.slane %v2880_v39, 9  ;;  %v3778_v47 = vmax.f32 %v2872_v24, %v8847_v31 }
 0x26f   :  { %v5048_v46 = vpack.c.b16 %v4850_v19, %v4850_v19  ;;  %v8846_v30 = vrot.slane %v2864_v44, 9  ;;  %v3775_v9 = vmax.f32 %v2863_v22, %v8844_v10  ;;  %v12099_v20 = vsel %vm4475_vm14, %v5150_v34, %v5149_v55 }
 0x270   :  { %v3776_v26 = vmax.f32 %v2862_v0, %v8845_v17  ;;  %v9394_v37 = vpack.c.bf16 %v3774_v51, %v3774_v51  ;;  %v12096_v35 = vmax.f32 %v2880_v39, %v8848_v49  ;;  %v9398_v56 = vpack.c.bf16 %v3778_v47, %v3778_v47  ;;  %15136 = vst [vmem:[#allocation12_spill] sm:$0xff] %v12099_v20  ;;  %v12130_v47 = vld [vmem:[%s14940_s2] ss:$0 sm:$0xff]  ;;  %v15153_v17 = vld [vmem:[#allocation67_spill] sm:$0xff] }
 0x271   :  { %5065 = vrot.lane.b32.xlu1 %v5048_v46, %s10208_s29  ;;  %v2370_v1 = vadd.f32 %v11631_v4, %v2299_v8  ;;  %v3777_v28 = vmax.f32 %v2864_v44, %v8846_v30  ;;  %v9395_v25 = vpack.c.bf16 %v3775_v9, %v3775_v9  ;;  %v15139_v8 = vld [vmem:[#allocation61_spill] sm:$0xff]  ;;  %v15142_v46 = vld [vmem:[#allocation14_spill] sm:$0xff] }
 0x272   :  { %v9396_v16 = vpack.c.bf16 %v3776_v26, %v3776_v26  ;;  %v12103_v63 = vunpack.c.l.b16 %v9394_v37  ;;  %v12107_v24 = vunpack.c.l.b16 %v9398_v56  ;;  %v15140_v56 = vld [vmem:[#allocation10_spill] sm:$0xff]  ;;  %v12175_v39 = vld [vmem:[%s14942_s4] ss:$0 sm:$0xff] }
 0x273   :  { %v2434_v0 = vmax.f32 %v2370_v1, 0.0  ;;  %v9397_v34 = vpack.c.bf16 %v3777_v28, %v3777_v28  ;;  %v12111_v22 = vunpack.c.l.b16 %v9395_v25  ;;  %v2297_v55 = vadd.f32 %v15140_v56, %v15139_v8  ;;  %v15143_v37 = vld [vmem:[#allocation62_spill] sm:$0xff]  ;;  %v15144_v28 = vld [vmem:[#allocation11_spill] sm:$0xff] }
 0x274   :  { %15137 = vst [vmem:[#allocation60_spill] sm:$0xff] %v12107_v24  ;;  %v12113_v31 = vunpack.c.l.b16 %v9396_v16  ;;  %v4532_v4 = vrot.slane %v12103_v63, 7  ;;  %v2300_v1 = vadd.f32 %v15143_v37, %v15142_v46  ;;  %v2298_v25 = vadd.f32 %v15144_v28, %v11821_v3  ;;  %v12165_v28 = vld [vmem:[%s14941_s3] ss:$0 sm:$0xff] }
 0x275   :  { %v2505_v30 = vmul.f32 %v11637_v14, %v2434_v0  ;;  %v12121_v44 = vunpack.c.l.b16 %v9397_v34  ;;  %v4533_v10 = vrot.slane %v12111_v22, 6  ;;  %v2368_v14 = vadd.f32 %v12130_v47, %v2297_v55 }
 0x276   :  { %15138 = vst [vmem:[#allocation94_spill] sm:$0xff] %v12113_v31  ;;  %v5188_v51 = vrot.slane %v12113_v31, 7  ;;  %v2371_v8 = vadd.f32 %v12130_v47, %v2300_v1  ;;  %v2369_v56 = vadd.f32 %v12130_v47, %v2298_v25  ;;  %v2779_v55 = vcombine.high %v11835_v13, %v11835_v13  ;;  %v12160_v1 = vpop.f32.mrb[136].mxu0 }
 0x277   :  { %15141 = vst [vmem:[#allocation61_spill] sm:$0xff] %v12121_v44  ;;  %v2576_v49 = vadd.f32 %v11644_v11, %v2505_v30  ;;  %v12138_v16 = vsel %vm4463_vm9, %v4533_v10, %v4532_v4  ;;  %v5190_v34 = vrot.slane %v12121_v44, 6  ;;  %v2432_v30 = vmax.f32 %v2368_v14, 0.0  ;;  %v15149_v14 = vld [vmem:[#allocation64_spill] sm:$0xff]  ;;  %15150 = vst [vmem:[#allocation62_spill] sm:$0xff] %v12160_v1 }
 0x278   :  { %15145 = vst [vmem:[#allocation10_spill] sm:$0xff] %v12138_v16  ;;  %v5189_v11 = vsel %vm4823_vm10, %v5188_v51, %v12111_v22  ;;  %v15146_v4 = vrot.slane %v11835_v13, 9  ;;  %v15147_v51 = vpack.c.bf16 %v11859_v29, %v11859_v29  ;;  %v4851_v37 = vrot.slane %v15149_v14, 7 }
 0x279   :  { %v12149_v3 = vsel %vm4463_vm9, %v5190_v34, %v5189_v11  ;;  %v2503_v25 = vmul.f32 %v12165_v28, %v2432_v30  ;;  %v2435_v11 = vmax.f32 %v2371_v8, 0.0  ;;  %v2433_v34 = vmax.f32 %v2369_v56, 0.0 }
 0x27a   :  { %v3756_v10 = vmax.f32 %v11835_v13, %v15146_v4  ;;  %v12157_v46 = vunpack.c.l.b16 %v15147_v51  ;;  %v8826_v26 = vrot.slane %v2779_v55, 9  ;;  %v15151_v4 = vld [vmem:[#allocation63_spill] sm:$0xff]  ;;  %v15152_v51 = vld [vmem:[#allocation65_spill] sm:$0xff]  ;;  %v4855_v14 = vrot.slane %v15153_v17, 5 }
 0x27b   :  { %v4852_v29 = vsel %vm4823_vm10, %v4851_v37, %v15151_v4  ;;  %v4853_v0 = vrot.slane %v15152_v51, 6  ;;  %v2574_v9 = vadd.f32 %v12175_v39, %v2503_v25  ;;  %v2506_v30 = vmul.f32 %v12165_v28, %v2435_v11 }
 0x27c   :  { %15148 = vst [vmem:[#allocation14_spill] sm:$0xff] %v12157_v46  ;;  %v9379_v13 = vpack.c.bf16 %v3756_v10, %v3756_v10  ;;  %v2504_v8 = vmul.f32 %v12165_v28, %v2433_v34  ;;  %v3757_v56 = vmax.f32 %v2779_v55, %v8826_v26  ;;  %v12180_v10 = vpop.f32.mrb[137].mxu0  ;;  %v4857_v4 = vrot.slane %v11867_v2, 4  ;;  %v15156_v55 = vld [vmem:[#allocation72_spill] sm:$0xff] }
 0x27d   :  { %15154 = vst [vmem:[#allocation11_spill] sm:$0xff] %v12180_v10  ;;  %v4854_v37 = vsel %vm4463_vm9, %v4853_v0, %v4852_v29  ;;  %v4859_v50 = vrot.slane %v12157_v46, 3  ;;  %v2626_v16 = vmax.f32 %v2574_v9, %v2576_v49  ;;  %v2577_v17 = vadd.f32 %v12175_v39, %v2506_v30  ;;  %v12197_v30 = vpop.f32.mrb[138].mxu0 }
 0x27e   :  { %v12182_v19 = vunpack.c.l.b16 %v9379_v13  ;;  %v2575_v25 = vadd.f32 %v12175_v39, %v2504_v8  ;;  %v9473_v51 = vpack.c.bf16 %v3757_v56, %v3757_v56  ;;  %v4856_v11 = vsel %vm4466_vm11, %v4855_v14, %v4854_v37  ;;  %15158 = vst [vmem:[#allocation63_spill] sm:$0xff] %v12197_v30  ;;  %v15159_v37 = vld [vmem:[#allocation16_spill] sm:$0xff]  ;;  %v12204_v18 = vpop.f32.mrb[139].mxu0 }
 0x27f   :  { %v15157_v34 = vrot.slane %v11867_v2, 5  ;;  %v5158_v0 = vrot.slane %v12157_v46, 4  ;;  %v2882_v29 = vcombine.high %v2626_v16, %v2626_v16  ;;  %v2889_v20 = vrot.slane %v2626_v16, %v11655_v57  ;;  %15161 = vst [vmem:[#allocation72_spill] sm:$0xff] %v12204_v18  ;;  %v12214_v40 = vpop.f32.mrb[140].mxu0 }
 0x280   :  { %15155 = vst [vmem:[#allocation64_spill] sm:$0xff] %v12182_v19  ;;  %v4861_v26 = vrot.slane %v12182_v19, 2  ;;  %v2627_v9 = vmax.f32 %v2575_v25, %v2577_v17  ;;  %v4808_v49 = vunpack.c.l.b16 %v9473_v51  ;;  %v4858_v8 = vsel %vm4469_vm12, %v4857_v4, %v4856_v11 }
 0x281   :  { %v5157_v13 = vsel %vm4466_vm11, %v15157_v34, %v15156_v55  ;;  %v5160_v56 = vrot.slane %v12182_v19, 3  ;;  %v2303_v2 = vadd.f32 %v15160_v12, %v15159_v37  ;;  %v2896_v55 = vrot.slane %v2882_v29, %v11655_v57 }
 0x282   :  { %v5159_v14 = vsel %vm4469_vm12, %v5158_v0, %v5157_v13  ;;  %v2897_v34 = vcombine.high %v2889_v20, %v2889_v20  ;;  %v8851_v46 = vrot.slane %v2889_v20, 9  ;;  %v2899_v16 = vcombine.high %v2627_v9, %v2627_v9 }
 0x283   :  { %v2906_v17 = vrot.slane %v2627_v9, %v11655_v57  ;;  %v4860_v51 = vsel %vm4472_vm13, %v4859_v50, %v4858_v8  ;;  %v4863_v25 = vrot.slane %v4808_v49, 1  ;;  %v5161_v4 = vsel %vm4472_vm13, %v5160_v56, %v5159_v14 }
 0x284   :  { %v2898_v11 = vcombine.high %v2896_v55, %v2896_v55  ;;  %v8852_v13 = vrot.slane %v2897_v34, 9  ;;  %v8853_v0 = vrot.slane %v2896_v55, 9  ;;  %v3782_v19 = vmax.f32 %v2889_v20, %v8851_v46  ;;  %v12218_v20 = vpop.f32.mrb[141].mxu0 }
 0x285   :  { %v12211_v12 = vrot.slane %v2899_v16, %v11655_v57  ;;  %v2914_v37 = vcombine.high %v2906_v17, %v2906_v17  ;;  %v8855_v18 = vrot.slane %v2906_v17, 9  ;;  %v4862_v29 = vsel %vm4475_vm14, %v4861_v26, %v4860_v51  ;;  %15162 = vst [vmem:[#allocation16_spill] sm:$0xff] %v12218_v20  ;;  %v12222_v26 = vpop.f32.mrb[142].mxu0 }
 0x286   :  { %v8854_v30 = vrot.slane %v2898_v11, 9  ;;  %v3783_v10 = vmax.f32 %v2897_v34, %v8852_v13  ;;  %v3784_v1 = vmax.f32 %v2896_v55, %v8853_v0  ;;  %v9401_v9 = vpack.c.bf16 %v3782_v19, %v3782_v19  ;;  %15163 = vst [vmem:[#allocation66_spill] sm:$0xff] %v12222_v26  ;;  %v12226_v13 = vpop.f32.mrb[143].mxu0 }
 0x287   :  { %v8856_v50 = vrot.slane %v2914_v37, 9  ;;  %v3786_v14 = vmax.f32 %v2906_v17, %v8855_v18  ;;  %v4864_v56 = vsel %vm4478_vm15, %v4863_v25, %v4862_v29  ;;  %v5162_v51 = vrot.slane %v4808_v49, 2  ;;  %15164 = vst [vmem:[#allocation95_spill] sm:$0xff] %v12226_v13 }
 0x288   :  { %v3785_v46 = vmax.f32 %v2898_v11, %v8854_v30  ;;  %v9402_v16 = vpack.c.bf16 %v3783_v10, %v3783_v10  ;;  %v9403_v42 = vpack.c.bf16 %v3784_v1, %v3784_v1  ;;  %v12220_v61 = vunpack.c.l.b16 %v9401_v9 }
 0x289   :  { %v12224_v34 = vmax.f32 %v2914_v37, %v8856_v50  ;;  %v9405_v19 = vpack.c.bf16 %v3786_v14, %v3786_v14  ;;  %v5049_v55 = vpack.c.b16 %v4864_v56, %v4864_v56  ;;  %v12238_v25 = vsel %vm4475_vm14, %v5162_v51, %v5161_v4  ;;  %v15170_v51 = vld [vmem:[#allocation68_spill] sm:$0xff]  ;;  %v15175_v4 = vld [vmem:[#allocation15_spill] sm:$0xff] }
 0x28a   :  { %v9404_v0 = vpack.c.bf16 %v3785_v46, %v3785_v46  ;;  %v12228_v18 = vunpack.c.l.b16 %v9402_v16  ;;  %v12230_v17 = vunpack.c.l.b16 %v9403_v42  ;;  %v4545_v30 = vrot.slane %v12220_v61, 7  ;;  %15167 = vst [vmem:[#allocation98_spill] sm:$0xff] %v12238_v25  ;;  %v15173_v42 = vld [vmem:[#allocation69_spill] sm:$0xff] }
 0x28b   :  { %v12235_v10 = vunpack.c.l.b16 %v9405_v19  ;;  %5067 = vrot.lane.b32.xlu0 %v5049_v55, %s10208_s29  ;;  %v2374_v49 = vadd.f32 %v12130_v47, %v2303_v2  ;;  %v9965_v19 = vld [vmem:[%s14943_s5 + $0x4] ss:$8 sps:$4 sm:$0xff]   ;;  %v2813_v1 = vcombine.high %v11911_v45, %v11911_v45 }
 0x28c   :  { %15165 = vst [vmem:[#allocation96_spill] sm:$0xff] %v12230_v17  ;;  %v12242_v11 = vunpack.c.l.b16 %v9404_v0  ;;  %v4546_v37 = vrot.slane %v12228_v18, 6  ;;  %v5200_v29 = vrot.slane %v12230_v17, 7  ;;  %v15171_v0 = vld [vmem:[#allocation13_spill] sm:$0xff]  ;;  %5687 = vmatprep.subr.bf16.mxu1 %v9965_v19 }
 0x28d   :  { %15166 = vst [vmem:[#allocation97_spill] sm:$0xff] %v12235_v10  ;;  %v2438_v14 = vmax.f32 %v2374_v49, 0.0  ;;  %v2301_v9 = vadd.f32 %v15171_v0, %v15170_v51  ;;  %v15172_v49 = vld [vmem:[#allocation17_spill] sm:$0xff] }
 0x28e   :  { %15168 = vst [vmem:[#allocation99_spill] sm:$0xff] %v12242_v11  ;;  %v12252_v56 = vsel %vm4463_vm9, %v4546_v37, %v4545_v30  ;;  %v5201_v46 = vsel %vm4823_vm10, %v5200_v29, %v12228_v18  ;;  %v5202_v16 = vrot.slane %v12242_v11, 6  ;;  %v2304_v30 = vadd.f32 %v15173_v42, %v15172_v49  ;;  %v15174_v37 = vld [vmem:[#allocation71_spill] sm:$0xff]  ;;  %v9963_v29 = vld [vmem:[%s14943_s5] ss:$8 sps:$4 sm:$0xff]  }
 0x28f   :  { %15169 = vst [vmem:[#allocation100_spill] sm:$0xff] %v12252_v56  ;;  %v2509_v55 = vmul.f32 %v12165_v28, %v2438_v14  ;;  %v2302_v2 = vadd.f32 %v15175_v4, %v15174_v37  ;;  %v15176_v14 = vrot.slane %v11911_v45, 9  ;;  %v15177_v42 = vpack.c.bf16 %v11931_v33, %v11931_v33  ;;  %5688 = vmatpush1.bf16.msra.mxu1 %v9963_v29  ;;  %v9968_v33 = vld [vmem:[%s14943_s5 + $0x14] ss:$8 sps:$4 sm:$0xff]  }
 0x290   :  { %v12272_v50 = vsel %vm4463_vm9, %v5202_v16, %v5201_v46  ;;  %v2372_v49 = vadd.f32 %v12130_v47, %v2301_v9  ;;  %v2375_v46 = vadd.f32 %v12130_v47, %v2304_v30  ;;  %v8834_v37 = vrot.slane %v2813_v1, 9  ;;  %5689 = vmatprep.subr.bf16.mxu1 %v9968_v33 }
 0x291   :  { %v3764_v51 = vmax.f32 %v11911_v45, %v15176_v14  ;;  %v12282_v0 = vunpack.c.l.b16 %v15177_v42  ;;  %v2580_v4 = vadd.f32 %v12175_v39, %v2509_v55  ;;  %v2373_v16 = vadd.f32 %v12130_v47, %v2302_v2  ;;  %v9966_v2 = vld [vmem:[%s14943_s5 + $0x10] ss:$8 sps:$4 sm:$0xff]  }
 0x292   :  { %v4865_v56 = vrot.slane %v11881_v36, 7  ;;  %v4867_v45 = vrot.slane %v11883_v5, 6  ;;  %v2436_v19 = vmax.f32 %v2372_v49, 0.0  ;;  %v2439_v14 = vmax.f32 %v2375_v46, 0.0 }
 0x293   :  { %15178 = vst [vmem:[#allocation68_spill] sm:$0xff] %v12282_v0  ;;  %v9386_v8 = vpack.c.bf16 %v3764_v51, %v3764_v51  ;;  %v2437_v55 = vmax.f32 %v2373_v16, 0.0  ;;  %v4869_v9 = vrot.slane %v11886_v48, 5  ;;  %v3765_v30 = vmax.f32 %v2813_v1, %v8834_v37  ;;  %5690 = vmatpush1.bf16.msra.mxu1 %v9966_v2 }
 0x294   :  { %v4866_v36 = vsel %vm4823_vm10, %v4865_v56, %v11875_v38  ;;  %v4871_v51 = vrot.slane %v11943_v54, 4  ;;  %v2507_v42 = vmul.f32 %v12165_v28, %v2436_v19  ;;  %v2510_v49 = vmul.f32 %v12165_v28, %v2439_v14 }
 0x295   :  { %v12297_v29 = vunpack.c.l.b16 %v9386_v8  ;;  %v2508_v46 = vmul.f32 %v12165_v28, %v2437_v55  ;;  %v4868_v16 = vsel %vm4463_vm9, %v4867_v45, %v4866_v36  ;;  %v9474_v48 = vpack.c.bf16 %v3765_v30, %v3765_v30 }
 0x296   :  { %v4870_v1 = vsel %vm4466_vm11, %v4869_v9, %v4868_v16  ;;  %v4873_v8 = vrot.slane %v12282_v0, 3  ;;  %v2578_v38 = vadd.f32 %v12175_v39, %v2507_v42  ;;  %v2581_v56 = vadd.f32 %v12175_v39, %v2510_v49 }
 0x297   :  { %15179 = vst [vmem:[#allocation13_spill] sm:$0xff] %v12297_v29  ;;  %v4875_v37 = vrot.slane %v12297_v29, 2  ;;  %v2579_v33 = vadd.f32 %v12175_v39, %v2508_v46  ;;  %v4872_v19 = vsel %vm4469_vm12, %v4871_v51, %v4870_v1  ;;  %v4809_v14 = vunpack.c.l.b16 %v9474_v48 }
 0x298   :  { %v4874_v55 = vsel %vm4472_vm13, %v4873_v8, %v4872_v19  ;;  %v15180_v45 = vrot.slane %v11943_v54, 5  ;;  %v5170_v2 = vrot.slane %v12282_v0, 4  ;;  %v2628_v30 = vmax.f32 %v2578_v38, %v2580_v4 }
 0x299   :  { %v2629_v36 = vmax.f32 %v2579_v33, %v2581_v56  ;;  %v4876_v42 = vsel %vm4475_vm14, %v4875_v37, %v4874_v55  ;;  %v5172_v49 = vrot.slane %v12297_v29, 3  ;;  %v4877_v16 = vrot.slane %v4809_v14, 1 }
 0x29a   :  { %v5169_v9 = vsel %vm4466_vm11, %v15180_v45, %v11904_v60  ;;  %v5174_v51 = vrot.slane %v4809_v14, 2  ;;  %v2847_v48 = vcombine.high %v11971_v59, %v11971_v59  ;;  %v2916_v1 = vcombine.high %v2628_v30, %v2628_v30 }
 0x29b   :  { %v5171_v46 = vsel %vm4469_vm12, %v5170_v2, %v5169_v9  ;;  %v2923_v8 = vrot.slane %v2628_v30, %v11655_v57  ;;  %v2933_v19 = vcombine.high %v2629_v36, %v2629_v36  ;;  %v2940_v60 = vrot.slane %v2629_v36, %v11655_v57 }
 0x29c   :  { %v4878_v4 = vsel %vm4478_vm15, %v4877_v16, %v4876_v42  ;;  %v5173_v38 = vsel %vm4472_vm13, %v5172_v49, %v5171_v46  ;;  %v8842_v37 = vrot.slane %v2847_v48, 9  ;;  %v15181_v56 = vrot.slane %v11971_v59, 9 }
 0x29d   :  { %v2930_v14 = vrot.slane %v2916_v1, %v11655_v57  ;;  %v2931_v55 = vcombine.high %v2923_v8, %v2923_v8  ;;  %v8859_v45 = vrot.slane %v2923_v8, 9  ;;  %v12333_v9 = vrot.slane %v2933_v19, %v11655_v57 }
 0x29e   :  { %v3772_v33 = vmax.f32 %v11971_v59, %v15181_v56  ;;  %v2948_v2 = vcombine.high %v2940_v60, %v2940_v60  ;;  %v8863_v30 = vrot.slane %v2940_v60, 9  ;;  %v5050_v54 = vpack.c.b16 %v4878_v4, %v4878_v4 }
 0x29f   :  { %v12336_v36 = vsel %vm4475_vm14, %v5174_v51, %v5173_v38  ;;  %v2932_v42 = vcombine.high %v2930_v14, %v2930_v14  ;;  %v8860_v49 = vrot.slane %v2931_v55, 9  ;;  %v8861_v16 = vrot.slane %v2930_v14, 9 }
 0x2a0   :  { %15182 = vst [vmem:[#allocation17_spill] sm:$0xff] %v12336_v36  ;;  %v3790_v46 = vmax.f32 %v2923_v8, %v8859_v45  ;;  %v8864_v29 = vrot.slane %v2948_v2, 9  ;;  %v3794_v56 = vmax.f32 %v2940_v60, %v8863_v30  ;;  %5069 = vrot.lane.b32.xlu1 %v5050_v54, %s10208_s29  ;;  %v3773_v38 = vmax.f32 %v2847_v48, %v8842_v37  ;;  %v15193_v60 = vld [vmem:[#allocation22_spill] sm:$0xff] }
 0x2a1   :  { %v8862_v19 = vrot.slane %v2932_v42, 9  ;;  %v3791_v0 = vmax.f32 %v2931_v55, %v8860_v49  ;;  %v3792_v5 = vmax.f32 %v2930_v14, %v8861_v16  ;;  %v9393_v13 = vpack.c.bf16 %v3772_v33, %v3772_v33  ;;  %v12357_v55 = vpop.f32.mrb[144].mxu0 }
 0x2a2   :  { %v9408_v4 = vpack.c.bf16 %v3790_v46, %v3790_v46  ;;  %v12342_v25 = vmax.f32 %v2948_v2, %v8864_v29  ;;  %v9412_v51 = vpack.c.bf16 %v3794_v56, %v3794_v56  ;;  %v15184_v54 = vpack.c.bf16 %v11986_v21, %v11986_v21  ;;  %v12372_v46 = vpop.f32.mrb[145].mxu0 }
 0x2a3   :  { %v3793_v26 = vmax.f32 %v2932_v42, %v8862_v19  ;;  %v9409_v8 = vpack.c.bf16 %v3791_v0, %v3791_v0  ;;  %v9410_v45 = vpack.c.bf16 %v3792_v5, %v3792_v5  ;;  %v12355_v29 = vunpack.c.l.b16 %v9393_v13 }
 0x2a4   :  { %v12344_v20 = vunpack.c.l.b16 %v9408_v4  ;;  %v12348_v30 = vunpack.c.l.b16 %v9412_v51  ;;  %v12353_v14 = vunpack.c.l.b16 %v15184_v54  ;;  %v9475_v42 = vpack.c.bf16 %v3773_v38, %v3773_v38 }
 0x2a5   :  { %15186 = vst [vmem:[#allocation15_spill] sm:$0xff] %v12355_v29  ;;  %v9411_v48 = vpack.c.bf16 %v3793_v26, %v3793_v26  ;;  %v12359_v37 = vunpack.c.l.b16 %v9409_v8  ;;  %v12361_v5 = vunpack.c.l.b16 %v9410_v45  ;;  %v4879_v21 = vrot.slane %v11974_v43, 7 }
 0x2a6   :  { %15183 = vst [vmem:[#allocation69_spill] sm:$0xff] %v12348_v30  ;;  %15185 = vst [vmem:[#allocation71_spill] sm:$0xff] %v12353_v14  ;;  %v4558_v0 = vrot.slane %v12344_v20, 7  ;;  %v4810_v56 = vunpack.c.l.b16 %v9475_v42  ;;  %v4881_v4 = vrot.slane %v11976_v27, 6  ;;  %v4883_v51 = vrot.slane %v11981_v6, 5 }
 0x2a7   :  { %15187 = vst [vmem:[#allocation101_spill] sm:$0xff] %v12361_v5  ;;  %v12367_v49 = vunpack.c.l.b16 %v9411_v48  ;;  %v4559_v13 = vrot.slane %v12359_v37, 6  ;;  %v5212_v26 = vrot.slane %v12361_v5, 7  ;;  %v4880_v19 = vsel %vm4823_vm10, %v4879_v21, %v11968_v62 }
 0x2a8   :  { %v4882_v54 = vsel %vm4463_vm9, %v4881_v4, %v4880_v19  ;;  %v4885_v48 = vrot.slane %v11999_v58, 4  ;;  %v4887_v62 = vrot.slane %v12353_v14, 3  ;;  %v4889_v42 = vrot.slane %v12355_v29, 2  ;;  %v9969_v4 = vld [vmem:[%s14943_s5 + $0x180] ss:$8 sps:$4 sm:$0xff]  }
 0x2a9   :  { %15188 = vst [vmem:[#allocation102_spill] sm:$0xff] %v12367_v49  ;;  %v12379_v43 = vsel %vm4463_vm9, %v4559_v13, %v4558_v0  ;;  %v5213_v8 = vsel %vm4823_vm10, %v5212_v26, %v12359_v37  ;;  %v5214_v45 = vrot.slane %v12367_v49, 6  ;;  %v9971_v0 = vld [vmem:[%s14943_s5 + $0x184] ss:$8 sps:$4 sm:$0xff]   ;;  %v4884_v13 = vsel %vm4466_vm11, %v4883_v51, %v4882_v54  ;;  %v15191_v54 = vld [vmem:[#allocation20_spill] sm:$0xff] }
 0x2aa   :  { %15189 = vst [vmem:[#allocation103_spill] sm:$0xff] %v12379_v43  ;;  %v4891_v26 = vrot.slane %v4810_v56, 1  ;;  %v15190_v33 = vrot.slane %v11999_v58, 5  ;;  %v4886_v38 = vsel %vm4469_vm12, %v4885_v48, %v4884_v13  ;;  %v5182_v16 = vrot.slane %v12353_v14, 4  ;;  %6227 = vmatprep.subr.bf16.mxu0 %v9971_v0  ;;  %v15194_v43 = vld [vmem:[#allocation77_spill] sm:$0xff]  ;;  %v15195_v0 = vld [vmem:[#allocation19_spill] sm:$0xff] }
 0x2ab   :  { %v12393_v21 = vsel %vm4463_vm9, %v5214_v45, %v5213_v8  ;;  %v5184_v1 = vrot.slane %v12355_v29, 3  ;;  %v5186_v8 = vrot.slane %v4810_v56, 2  ;;  %v12406_v45 = vpop.f32.mrb[146].mxu0  ;;  %v4888_v51 = vsel %vm4472_vm13, %v4887_v62, %v4886_v38  ;;  %6228 = vmatpush1.bf16.msra.mxu0 %v9969_v4 }
 0x2ac   :  { %v5181_v19 = vsel %vm4466_vm11, %v15190_v33, %v12004_v53  ;;  %v2307_v2 = vadd.f32 %v11908_v41, %v15191_v54  ;;  %v15192_v53 = vld [vmem:[#allocation18_spill] sm:$0xff]  ;;  %v2308_v59 = vadd.f32 %v11924_v23, %v15193_v60  ;;  %v12415_v48 = vpop.f32.mrb[147].mxu0  ;;  %v4890_v13 = vsel %vm4475_vm14, %v4889_v42, %v4888_v51 }
 0x2ad   :  { %v2305_v33 = vadd.f32 %v15192_v53, %v11915_v52  ;;  %v5183_v56 = vsel %vm4469_vm12, %v5182_v16, %v5181_v19  ;;  %v2306_v58 = vadd.f32 %v15195_v0, %v15194_v43  ;;  %v2881_v38 = vcombine.high %v12091_v32, %v12091_v32 }
 0x2ae   :  { %v4892_v41 = vsel %vm4478_vm15, %v4891_v26, %v4890_v13  ;;  %v5185_v52 = vsel %vm4472_vm13, %v5184_v1, %v5183_v56  ;;  %v2378_v62 = vadd.f32 %v12130_v47, %v2307_v2  ;;  %v2379_v16 = vadd.f32 %v12130_v47, %v2308_v59 }
 0x2af   :  { %v2376_v23 = vadd.f32 %v12130_v47, %v2305_v33  ;;  %v5051_v60 = vpack.c.b16 %v4892_v41, %v4892_v41  ;;  %v12428_v4 = vsel %vm4475_vm14, %v5186_v8, %v5185_v52  ;;  %v2377_v42 = vadd.f32 %v12130_v47, %v2306_v58 }
 0x2b0   :  { %15196 = vst [vmem:[#allocation20_spill] sm:$0xff] %v12428_v4  ;;  %v2442_v19 = vmax.f32 %v2378_v62, 0.0  ;;  %v8850_v26 = vrot.slane %v2881_v38, 9  ;;  %v2443_v1 = vmax.f32 %v2379_v16, 0.0  ;;  %v15197_v54 = vrot.slane %v12091_v32, 9 }
 0x2b1   :  { %v2440_v51 = vmax.f32 %v2376_v23, 0.0  ;;  %5071 = vrot.lane.b32.xlu0 %v5051_v60, %s10208_s29  ;;  %v2441_v2 = vmax.f32 %v2377_v42, 0.0  ;;  %v15198_v8 = vpack.c.bf16 %v12096_v35, %v12096_v35  ;;  %v4893_v56 = vrot.slane %v12111_v22, 7 }
 0x2b2   :  { %v3780_v53 = vmax.f32 %v12091_v32, %v15197_v54  ;;  %v2513_v58 = vmul.f32 %v12165_v28, %v2442_v19  ;;  %v3781_v13 = vmax.f32 %v2881_v38, %v8850_v26  ;;  %v2514_v0 = vmul.f32 %v12165_v28, %v2443_v1 }
 0x2b3   :  { %v12441_v59 = vunpack.c.l.b16 %v15198_v8  ;;  %v2511_v33 = vmul.f32 %v12165_v28, %v2440_v51  ;;  %v2512_v41 = vmul.f32 %v12165_v28, %v2441_v2  ;;  %v4895_v62 = vrot.slane %v12113_v31, 6 }
 0x2b4   :  { %v9400_v52 = vpack.c.bf16 %v3780_v53, %v3780_v53  ;;  %v2584_v32 = vadd.f32 %v12175_v39, %v2513_v58  ;;  %v9476_v23 = vpack.c.bf16 %v3781_v13, %v3781_v13  ;;  %v4894_v60 = vsel %vm4823_vm10, %v4893_v56, %v12103_v63 }
 0x2b5   :  { %15199 = vst [vmem:[#allocation18_spill] sm:$0xff] %v12441_v59  ;;  %v2582_v35 = vadd.f32 %v12175_v39, %v2511_v33  ;;  %v2585_v16 = vadd.f32 %v12175_v39, %v2514_v0  ;;  %v2583_v38 = vadd.f32 %v12175_v39, %v2512_v41  ;;  %v4896_v42 = vsel %vm4463_vm9, %v4895_v62, %v4894_v60 }
 0x2b6   :  { %v12455_v22 = vunpack.c.l.b16 %v9400_v52  ;;  %v12458_v51 = vunpack.c.l.b16 %v9476_v23  ;;  %v4897_v26 = vrot.slane %v12121_v44, 5  ;;  %v4899_v1 = vrot.slane %v12107_v24, 4 }
 0x2b7   :  { %v2630_v19 = vmax.f32 %v2582_v35, %v2584_v32  ;;  %v2631_v2 = vmax.f32 %v2583_v38, %v2585_v16  ;;  %v4901_v54 = vrot.slane %v12441_v59, 3  ;;  %v15201_v53 = vrot.slane %v12107_v24, 5  ;;  %v9977_v32 = vld [vmem:[%s14943_s5 + $0x194] ss:$8 sps:$4 sm:$0xff]   ;;  %v9975_v16 = vld [vmem:[%s14943_s5 + $0x190] ss:$8 sps:$4 sm:$0xff]  }
 0x2b8   :  { %15200 = vst [vmem:[#allocation22_spill] sm:$0xff] %v12455_v22  ;;  %v4903_v63 = vrot.slane %v12455_v22, 2  ;;  %v4898_v13 = vsel %vm4466_vm11, %v4897_v26, %v4896_v42  ;;  %v4905_v56 = vrot.slane %v12458_v51, 1  ;;  %v5194_v62 = vrot.slane %v12441_v59, 4  ;;  %6229 = vmatprep.subr.bf16.mxu0 %v9977_v32  ;;  %v9980_v32 = vld [vmem:[%s14943_s5 + $0x1a4] ss:$8 sps:$4 sm:$0xff]  }
 0x2b9   :  { %v5193_v8 = vsel %vm4466_vm11, %v15201_v53, %v12149_v3  ;;  %v2950_v58 = vcombine.high %v2630_v19, %v2630_v19  ;;  %v2957_v33 = vrot.slane %v2630_v19, %v11655_v57  ;;  %v2967_v0 = vcombine.high %v2631_v2, %v2631_v2  ;;  %6230 = vmatpush1.bf16.msra.mxu0 %v9975_v16 }
 0x2ba   :  { %v2974_v41 = vrot.slane %v2631_v2, %v11655_v57  ;;  %v4900_v52 = vsel %vm4469_vm12, %v4899_v1, %v4898_v13  ;;  %v9972_v1 = vld [vmem:[%s14943_s5 + $0x20] ss:$8 sps:$4 sm:$0xff]   ;;  %v9974_v2 = vld [vmem:[%s14943_s5 + $0x24] ss:$8 sps:$4 sm:$0xff]   ;;  %6231 = vmatprep.subr.bf16.mxu0 %v9980_v32 }
 0x2bb   :  { %v2964_v3 = vrot.slane %v2950_v58, %v11655_v57  ;;  %v2965_v35 = vcombine.high %v2957_v33, %v2957_v33  ;;  %v8867_v23 = vrot.slane %v2957_v33, 9  ;;  %v4902_v60 = vsel %vm4472_vm13, %v4901_v54, %v4900_v52  ;;  %v12492_v54 = vpop.f32.mrb[148].mxu0  ;;  %5691 = vmatprep.subr.bf16.mxu1 %v9974_v2 }
 0x2bc   :  { %v12483_v38 = vrot.slane %v2967_v0, %v11655_v57  ;;  %v2982_v42 = vcombine.high %v2974_v41, %v2974_v41  ;;  %v8871_v19 = vrot.slane %v2974_v41, 9  ;;  %v4904_v26 = vsel %vm4475_vm14, %v4903_v63, %v4902_v60  ;;  %v12494_v52 = vpop.f32.mrb[149].mxu0  ;;  %5692 = vmatpush1.bf16.msra.mxu1 %v9972_v1 }
 0x2bd   :  { %v2966_v53 = vcombine.high %v2964_v3, %v2964_v3  ;;  %v8868_v58 = vrot.slane %v2965_v35, 9  ;;  %v8869_v13 = vrot.slane %v2964_v3, 9  ;;  %v3798_v0 = vmax.f32 %v2957_v33, %v8867_v23  ;;  %v9978_v33 = vld [vmem:[%s14943_s5 + $0x1a0] ss:$8 sps:$4 sm:$0xff]  }
 0x2be   :  { %v8872_v43 = vrot.slane %v2982_v42, 9  ;;  %v3802_v60 = vmax.f32 %v2974_v41, %v8871_v19  ;;  %v4906_v24 = vsel %vm4478_vm15, %v4905_v56, %v4904_v26  ;;  %v5195_v56 = vsel %vm4469_vm12, %v5194_v62, %v5193_v8  ;;  %v12507_v19 = vpop.f32.mrb[150].mxu0  ;;  %6232 = vmatpush1.bf16.msra.mxu0 %v9978_v33 }
 0x2bf   :  { %v8870_v59 = vrot.slane %v2966_v53, 9  ;;  %v3799_v44 = vmax.f32 %v2965_v35, %v8868_v58  ;;  %v3800_v31 = vmax.f32 %v2964_v3, %v8869_v13  ;;  %v9415_v4 = vpack.c.bf16 %v3798_v0, %v3798_v0  ;;  %v12511_v3 = vpop.f32.mrb[151].mxu0  ;;  %v15203_v58 = vld [vmem:[#allocation24_spill] sm:$0xff]  ;;  %v15204_v13 = vld [vmem:[#allocation81_spill] sm:$0xff] }
 0x2c0   :  { %v12504_v23 = vmax.f32 %v2982_v42, %v8872_v43  ;;  %v9419_v16 = vpack.c.bf16 %v3802_v60, %v3802_v60  ;;  %v5052_v41 = vpack.c.b16 %v4906_v24, %v4906_v24  ;;  %v5196_v24 = vrot.slane %v12455_v22, 3 }
 0x2c1   :  { %v3801_v26 = vmax.f32 %v2966_v53, %v8870_v59  ;;  %v9416_v2 = vpack.c.bf16 %v3799_v44, %v3799_v44  ;;  %v9417_v63 = vpack.c.bf16 %v3800_v31, %v3800_v31  ;;  %v12509_v35 = vunpack.c.l.b16 %v9415_v4 }
 0x2c2   :  { %v12515_v43 = vunpack.c.l.b16 %v9419_v16  ;;  %v5198_v8 = vrot.slane %v12458_v51, 2  ;;  %5073 = vrot.lane.b32.xlu1 %v5052_v41, %s10208_s29  ;;  %v5197_v53 = vsel %vm4472_vm13, %v5196_v24, %v5195_v56  ;;  %v2311_v0 = vadd.f32 %v15204_v13, %v15203_v58  ;;  %v15206_v41 = vld [vmem:[#allocation82_spill] sm:$0xff] }
 0x2c3   :  { %v9418_v62 = vpack.c.bf16 %v3801_v26, %v3801_v26  ;;  %v12520_v59 = vunpack.c.l.b16 %v9416_v2  ;;  %v12522_v31 = vunpack.c.l.b16 %v9417_v63  ;;  %v4571_v44 = vrot.slane %v12509_v35, 7  ;;  %v15207_v26 = vld [vmem:[#allocation21_spill] sm:$0xff]  ;;  %v15208_v56 = vld [vmem:[#allocation26_spill] sm:$0xff] }
 0x2c4   :  { %15202 = vst [vmem:[#allocation77_spill] sm:$0xff] %v12515_v43  ;;  %v12536_v33 = vsel %vm4475_vm14, %v5198_v8, %v5197_v53  ;;  %v2382_v16 = vadd.f32 %v12130_v47, %v2311_v0  ;;  %v2309_v2 = vadd.f32 %v15207_v26, %v15206_v41  ;;  %v2312_v24 = vadd.f32 %v11961_v7, %v15208_v56 }
 0x2c5   :  { %v12530_v60 = vunpack.c.l.b16 %v9418_v62  ;;  %v4572_v51 = vrot.slane %v12520_v59, 6  ;;  %v5224_v63 = vrot.slane %v12522_v31, 7  ;;  %15205 = vst [vmem:[#allocation19_spill] sm:$0xff] %v12536_v33  ;;  %v2915_v56 = vcombine.high %v12211_v12, %v12211_v12 }
 0x2c6   :  { %v2446_v53 = vmax.f32 %v2382_v16, 0.0  ;;  %v2380_v0 = vadd.f32 %v12130_v47, %v2309_v2  ;;  %v2383_v41 = vadd.f32 %v12130_v47, %v2312_v24  ;;  %v15213_v2 = vpack.c.bf16 %v12224_v34, %v12224_v34 }
 0x2c7   :  { %v12544_v62 = vsel %vm4463_vm9, %v4572_v51, %v4571_v44  ;;  %v5225_v13 = vsel %vm4823_vm10, %v5224_v63, %v12520_v59  ;;  %v5226_v4 = vrot.slane %v12530_v60, 6  ;;  %v15210_v44 = vld [vmem:[#allocation83_spill] sm:$0xff]  ;;  %v15212_v63 = vrot.slane %v12211_v12, 9 }
 0x2c8   :  { %15209 = vst [vmem:[#allocation24_spill] sm:$0xff] %v12544_v62  ;;  %v15211_v51 = vld [vmem:[#allocation23_spill] sm:$0xff]  ;;  %v2517_v32 = vmul.f32 %v12165_v28, %v2446_v53  ;;  %v2444_v16 = vmax.f32 %v2380_v0, 0.0  ;;  %v2447_v8 = vmax.f32 %v2383_v41, 0.0  ;;  %v12568_v24 = vunpack.c.l.b16 %v15213_v2 }
 0x2c9   :  { %v12555_v7 = vsel %vm4463_vm9, %v5226_v4, %v5225_v13  ;;  %v2310_v26 = vadd.f32 %v15211_v51, %v15210_v44  ;;  %v3788_v58 = vmax.f32 %v12211_v12, %v15212_v63  ;;  %v8858_v13 = vrot.slane %v2915_v56, 9 }
 0x2ca   :  { %15214 = vst [vmem:[#allocation81_spill] sm:$0xff] %v12568_v24  ;;  %v4907_v51 = vrot.slane %v12228_v18, 7  ;;  %v2588_v42 = vadd.f32 %v12175_v39, %v2517_v32  ;;  %v2515_v1 = vmul.f32 %v12165_v28, %v2444_v16  ;;  %v2518_v12 = vmul.f32 %v12165_v28, %v2447_v8 }
 0x2cb   :  { %v2381_v4 = vadd.f32 %v12130_v47, %v2310_v26  ;;  %v9407_v44 = vpack.c.bf16 %v3788_v58, %v3788_v58  ;;  %v4909_v53 = vrot.slane %v12230_v17, 6  ;;  %v3789_v41 = vmax.f32 %v2915_v56, %v8858_v13 }
 0x2cc   :  { %v4908_v34 = vsel %vm4823_vm10, %v4907_v51, %v12220_v61  ;;  %v2586_v26 = vadd.f32 %v12175_v39, %v2515_v1  ;;  %v2589_v58 = vadd.f32 %v12175_v39, %v2518_v12  ;;  %v4911_v32 = vrot.slane %v12242_v11, 5  ;;  %v9986_v61 = vld [vmem:[%s14943_s5 + $0x1b4] ss:$8 sps:$4 sm:$0xff]  }
 0x2cd   :  { %v2445_v0 = vmax.f32 %v2381_v4, 0.0  ;;  %v12576_v63 = vunpack.c.l.b16 %v9407_v44  ;;  %v4910_v18 = vsel %vm4463_vm9, %v4909_v53, %v4908_v34  ;;  %v9477_v8 = vpack.c.bf16 %v3789_v41, %v3789_v41  ;;  %v9983_v4 = vld [vmem:[%s14943_s5 + $0x34] ss:$8 sps:$4 sm:$0xff]   ;;  %v9981_v53 = vld [vmem:[%s14943_s5 + $0x30] ss:$8 sps:$4 sm:$0xff]   ;;  %6233 = vmatprep.subr.bf16.mxu0 %v9986_v61 }
 0x2ce   :  { %v4913_v2 = vrot.slane %v12235_v10, 4  ;;  %v4915_v56 = vrot.slane %v12568_v24, 3  ;;  %v2632_v1 = vmax.f32 %v2586_v26, %v2588_v42  ;;  %v4912_v13 = vsel %vm4466_vm11, %v4911_v32, %v4910_v18  ;;  %5693 = vmatprep.subr.bf16.mxu1 %v9983_v4  ;;  %v9989_v4 = vld [vmem:[%s14943_s5 + $0x44] ss:$8 sps:$4 sm:$0xff]  }
 0x2cf   :  { %15215 = vst [vmem:[#allocation82_spill] sm:$0xff] %v12576_v63  ;;  %v2516_v16 = vmul.f32 %v12165_v28, %v2445_v0  ;;  %v4917_v44 = vrot.slane %v12576_v63, 2  ;;  %v15216_v51 = vrot.slane %v12235_v10, 5  ;;  %v9984_v0 = vld [vmem:[%s14943_s5 + $0x1b0] ss:$8 sps:$4 sm:$0xff]   ;;  %v4812_v42 = vunpack.c.l.b16 %v9477_v8  ;;  %5694 = vmatpush1.bf16.msra.mxu1 %v9981_v53 }
 0x2d0   :  { %v4914_v34 = vsel %vm4469_vm12, %v4913_v2, %v4912_v13  ;;  %v5206_v26 = vrot.slane %v12568_v24, 4  ;;  %v2984_v18 = vcombine.high %v2632_v1, %v2632_v1  ;;  %6234 = vmatpush1.bf16.msra.mxu0 %v9984_v0  ;;  %v12613_v2 = vpop.f32.mrb[152].mxu0  ;;  %v9990_v53 = vld [vmem:[%s14943_s5 + $0x1c0] ss:$8 sps:$4 sm:$0xff]   ;;  %5695 = vmatprep.subr.bf16.mxu1 %v9989_v4 }
 0x2d1   :  { %v5205_v12 = vsel %vm4466_vm11, %v15216_v51, %v12272_v50  ;;  %v2587_v41 = vadd.f32 %v12175_v39, %v2516_v16  ;;  %v2991_v50 = vrot.slane %v2632_v1, %v11655_v57  ;;  %v4916_v32 = vsel %vm4472_vm13, %v4915_v56, %v4914_v34  ;;  %15217 = vst [vmem:[#allocation21_spill] sm:$0xff] %v12613_v2  ;;  %v9992_v56 = vld [vmem:[%s14943_s5 + $0x1c4] ss:$8 sps:$4 sm:$0xff]  }
 0x2d2   :  { %v5208_v51 = vrot.slane %v12576_v63, 3  ;;  %v4918_v10 = vsel %vm4475_vm14, %v4917_v44, %v4916_v32  ;;  %v4919_v16 = vrot.slane %v4812_v42, 1  ;;  %v5207_v8 = vsel %vm4469_vm12, %v5206_v26, %v5205_v12  ;;  %v12623_v44 = vpop.f32.mrb[153].mxu0  ;;  %v9987_v12 = vld [vmem:[%s14943_s5 + $0x40] ss:$8 sps:$4 sm:$0xff]   ;;  %6235 = vmatprep.subr.bf16.mxu0 %v9992_v56 }
 0x2d3   :  { %v2633_v62 = vmax.f32 %v2587_v41, %v2589_v58  ;;  %v2998_v61 = vrot.slane %v2984_v18, %v11655_v57  ;;  %v2999_v1 = vcombine.high %v2991_v50, %v2991_v50  ;;  %v8875_v13 = vrot.slane %v2991_v50, 9  ;;  %15218 = vst [vmem:[#allocation26_spill] sm:$0xff] %v12623_v44  ;;  %v12633_v18 = vpop.f32.mrb[154].mxu0  ;;  %5696 = vmatpush1.bf16.msra.mxu1 %v9987_v12 }
 0x2d4   :  { %v5209_v58 = vsel %vm4472_vm13, %v5208_v51, %v5207_v8  ;;  %v4920_v34 = vsel %vm4478_vm15, %v4919_v16, %v4918_v10  ;;  %v5210_v26 = vrot.slane %v4812_v42, 2  ;;  %15219 = vst [vmem:[#allocation83_spill] sm:$0xff] %v12633_v18  ;;  %v12635_v11 = vpop.f32.mrb[155].mxu0  ;;  %6236 = vmatpush1.bf16.msra.mxu0 %v9990_v53 }
 0x2d5   :  { %v3001_v0 = vcombine.high %v2633_v62, %v2633_v62  ;;  %v3008_v41 = vrot.slane %v2633_v62, %v11655_v57  ;;  %v3000_v32 = vcombine.high %v2998_v61, %v2998_v61  ;;  %v8876_v51 = vrot.slane %v2999_v1, 9  ;;  %15220 = vst [vmem:[#allocation23_spill] sm:$0xff] %v12635_v11 }
 0x2d6   :  { %v8877_v8 = vrot.slane %v2998_v61, 9  ;;  %v3806_v63 = vmax.f32 %v2991_v50, %v8875_v13  ;;  %v5053_v33 = vpack.c.b16 %v4920_v34, %v4920_v34  ;;  %v12642_v50 = vsel %vm4475_vm14, %v5210_v26, %v5209_v58 }
 0x2d7   :  { %v12638_v24 = vrot.slane %v3001_v0, %v11655_v57  ;;  %v3016_v17 = vcombine.high %v3008_v41, %v3008_v41  ;;  %v8879_v62 = vrot.slane %v3008_v41, 9  ;;  %v8878_v10 = vrot.slane %v3000_v32, 9  ;;  %15221 = vst [vmem:[#allocation104_spill] sm:$0xff] %v12642_v50 }
 0x2d8   :  { %v3807_v42 = vmax.f32 %v2999_v1, %v8876_v51  ;;  %v3808_v16 = vmax.f32 %v2998_v61, %v8877_v8  ;;  %v9422_v22 = vpack.c.bf16 %v3806_v63, %v3806_v63  ;;  %5075 = vrot.lane.b32.xlu0 %v5053_v33, %s10208_s29  ;;  %v15222_v61 = vld [vmem:[#allocation28_spill] sm:$0xff]  ;;  %v15231_v63 = vld [vmem:[#allocation93_spill] sm:$0xff] }
 0x2d9   :  { %v8880_v4 = vrot.slane %v3016_v17, 9  ;;  %v3810_v29 = vmax.f32 %v3008_v41, %v8879_v62  ;;  %v3809_v13 = vmax.f32 %v3000_v32, %v8878_v10  ;;  %v2315_v1 = vadd.f32 %v12047_v15, %v15222_v61  ;;  %v15226_v32 = vld [vmem:[#allocation25_spill] sm:$0xff] }
 0x2da   :  { %v9423_v12 = vpack.c.bf16 %v3807_v42, %v3807_v42  ;;  %v9424_v53 = vpack.c.bf16 %v3808_v16, %v3808_v16  ;;  %v12645_v0 = vunpack.c.l.b16 %v9422_v22  ;;  %v15230_v16 = vld [vmem:[#allocation92_spill] sm:$0xff]  ;;  %v4923_v22 = vrot.slane %v12361_v5, 6 }
 0x2db   :  { %v12647_v6 = vmax.f32 %v3016_v17, %v8880_v4  ;;  %v9426_v34 = vpack.c.bf16 %v3810_v29, %v3810_v29  ;;  %v9425_v41 = vpack.c.bf16 %v3809_v13, %v3809_v13  ;;  %v2386_v17 = vadd.f32 %v12130_v47, %v2315_v1  ;;  %v15225_v29 = vld [vmem:[#allocation90_spill] sm:$0xff] }
 0x2dc   :  { %v12653_v51 = vunpack.c.l.b16 %v9423_v12  ;;  %v12655_v58 = vunpack.c.l.b16 %v9424_v53  ;;  %v4584_v33 = vrot.slane %v12645_v0, 7  ;;  %v2313_v8 = vadd.f32 %v15226_v32, %v15225_v29  ;;  %v15229_v32 = vld [vmem:[#allocation30_spill] sm:$0xff] }
 0x2dd   :  { %v12660_v26 = vunpack.c.l.b16 %v9426_v34  ;;  %v12665_v62 = vunpack.c.l.b16 %v9425_v41  ;;  %v2450_v13 = vmax.f32 %v2386_v17, 0.0  ;;  %v2316_v10 = vadd.f32 %v15230_v16, %v15229_v32  ;;  %v15232_v17 = vld [vmem:[#allocation27_spill] sm:$0xff] }
 0x2de   :  { %15223 = vst [vmem:[#allocation28_spill] sm:$0xff] %v12655_v58  ;;  %v4585_v15 = vrot.slane %v12653_v51, 6  ;;  %v5236_v42 = vrot.slane %v12655_v58, 7  ;;  %v2384_v12 = vadd.f32 %v12130_v47, %v2313_v8  ;;  %v2314_v4 = vadd.f32 %v15232_v17, %v15231_v63 }
 0x2df   :  { %15224 = vst [vmem:[#allocation105_spill] sm:$0xff] %v12660_v26  ;;  %15227 = vst [vmem:[#allocation90_spill] sm:$0xff] %v12665_v62  ;;  %v5238_v1 = vrot.slane %v12665_v62, 6  ;;  %v2521_v41 = vmul.f32 %v12165_v28, %v2450_v13  ;;  %v15234_v13 = vpack.c.bf16 %v12342_v25, %v12342_v25  ;;  %v2387_v63 = vadd.f32 %v12130_v47, %v2316_v10 }
 0x2e0   :  { %v12674_v53 = vsel %vm4463_vm9, %v4585_v15, %v4584_v33  ;;  %v5237_v61 = vsel %vm4823_vm10, %v5236_v42, %v12653_v51  ;;  %v2448_v29 = vmax.f32 %v2384_v12, 0.0  ;;  %v2949_v33 = vcombine.high %v12333_v9, %v12333_v9 }
 0x2e1   :  { %15228 = vst [vmem:[#allocation25_spill] sm:$0xff] %v12674_v53  ;;  %v12686_v8 = vsel %vm4463_vm9, %v5238_v1, %v5237_v61  ;;  %v15233_v15 = vrot.slane %v12333_v9, 9  ;;  %v12696_v12 = vunpack.c.l.b16 %v15234_v13  ;;  %v2592_v16 = vadd.f32 %v12175_v39, %v2521_v41 }
 0x2e2   :  { %v2519_v32 = vmul.f32 %v12165_v28, %v2448_v29  ;;  %v2385_v61 = vadd.f32 %v12130_v47, %v2314_v4  ;;  %v8866_v1 = vrot.slane %v2949_v33, 9  ;;  %v4921_v34 = vrot.slane %v12359_v37, 7 }
 0x2e3   :  { %v3796_v42 = vmax.f32 %v12333_v9, %v15233_v15  ;;  %15235 = vst [vmem:[#allocation30_spill] sm:$0xff] %v12696_v12  ;;  %v2451_v15 = vmax.f32 %v2387_v63, 0.0  ;;  %v4925_v13 = vrot.slane %v12367_v49, 5  ;;  %v4927_v47 = vrot.slane %v12348_v30, 4 }
 0x2e4   :  { %v2590_v9 = vadd.f32 %v12175_v39, %v2519_v32  ;;  %v2449_v25 = vmax.f32 %v2385_v61, 0.0  ;;  %v3797_v56 = vmax.f32 %v2949_v33, %v8866_v1  ;;  %v4922_v10 = vsel %vm4823_vm10, %v4921_v34, %v12344_v20  ;;  %v9995_v20 = vld [vmem:[%s14943_s5 + $0x54] ss:$8 sps:$4 sm:$0xff]   ;;  %v9993_v1 = vld [vmem:[%s14943_s5 + $0x50] ss:$8 sps:$4 sm:$0xff]  }
 0x2e5   :  { %v9414_v17 = vpack.c.bf16 %v3796_v42, %v3796_v42  ;;  %v2522_v29 = vmul.f32 %v12165_v28, %v2451_v15  ;;  %v4924_v42 = vsel %vm4463_vm9, %v4923_v22, %v4922_v10  ;;  %v4929_v61 = vrot.slane %v12696_v12, 3  ;;  %v9998_v34 = vld [vmem:[%s14943_s5 + $0x1d4] ss:$8 sps:$4 sm:$0xff]   ;;  %5697 = vmatprep.subr.bf16.mxu1 %v9995_v20  ;;  %v10001_v20 = vld [vmem:[%s14943_s5 + $0x64] ss:$8 sps:$4 sm:$0xff]  }
 0x2e6   :  { %v2634_v4 = vmax.f32 %v2590_v9, %v2592_v16  ;;  %v2520_v37 = vmul.f32 %v12165_v28, %v2449_v25  ;;  %v9478_v32 = vpack.c.bf16 %v3797_v56, %v3797_v56  ;;  %v4926_v63 = vsel %vm4466_vm11, %v4925_v13, %v4924_v42  ;;  %6237 = vmatprep.subr.bf16.mxu0 %v9998_v34 }
 0x2e7   :  { %v12706_v41 = vunpack.c.l.b16 %v9414_v17  ;;  %v2593_v22 = vadd.f32 %v12175_v39, %v2522_v29  ;;  %v9996_v17 = vld [vmem:[%s14943_s5 + $0x1d0] ss:$8 sps:$4 sm:$0xff]   ;;  %v4928_v15 = vsel %vm4469_vm12, %v4927_v47, %v4926_v63  ;;  %v15237_v25 = vrot.slane %v12348_v30, 5  ;;  %5698 = vmatpush1.bf16.msra.mxu1 %v9993_v1  ;;  %v10004_v1 = vld [vmem:[%s14943_s5 + $0x1e4] ss:$8 sps:$4 sm:$0xff]  }
 0x2e8   :  { %v3018_v16 = vcombine.high %v2634_v4, %v2634_v4  ;;  %v3025_v28 = vrot.slane %v2634_v4, %v11655_v57  ;;  %v2591_v56 = vadd.f32 %v12175_v39, %v2520_v37  ;;  %v12732_v9 = vunpack.c.l.b16 %v9478_v32  ;;  %6238 = vmatpush1.bf16.msra.mxu0 %v9996_v17  ;;  %5699 = vmatprep.subr.bf16.mxu1 %v10001_v20 }
 0x2e9   :  { %15236 = vst [vmem:[#allocation92_spill] sm:$0xff] %v12706_v41  ;;  %v4931_v33 = vrot.slane %v12706_v41, 2  ;;  %v5217_v13 = vsel %vm4466_vm11, %v15237_v25, %v12393_v21  ;;  %v5218_v10 = vrot.slane %v12696_v12, 4  ;;  %v4930_v42 = vsel %vm4472_vm13, %v4929_v61, %v4928_v15  ;;  %v9999_v21 = vld [vmem:[%s14943_s5 + $0x60] ss:$8 sps:$4 sm:$0xff]   ;;  %6239 = vmatprep.subr.bf16.mxu0 %v10004_v1 }
 0x2ea   :  { %v3032_v39 = vrot.slane %v3018_v16, %v11655_v57  ;;  %v3033_v4 = vcombine.high %v3025_v28, %v3025_v28  ;;  %v8883_v29 = vrot.slane %v3025_v28, 9  ;;  %v2635_v37 = vmax.f32 %v2591_v56, %v2593_v22  ;;  %v10002_v61 = vld [vmem:[%s14943_s5 + $0x1e0] ss:$8 sps:$4 sm:$0xff]  }
 0x2eb   :  { %v4933_v47 = vrot.slane %v12732_v9, 1  ;;  %v5219_v32 = vsel %vm4469_vm12, %v5218_v10, %v5217_v13  ;;  %v5220_v63 = vrot.slane %v12706_v41, 3  ;;  %v4932_v25 = vsel %vm4475_vm14, %v4931_v33, %v4930_v42  ;;  %5700 = vmatpush1.bf16.msra.mxu1 %v9999_v21 }
 0x2ec   :  { %v3034_v34 = vcombine.high %v3032_v39, %v3032_v39  ;;  %v8884_v16 = vrot.slane %v3033_v4, 9  ;;  %v8885_v22 = vrot.slane %v3032_v39, 9  ;;  %v3814_v56 = vmax.f32 %v3025_v28, %v8883_v29  ;;  %6240 = vmatpush1.bf16.msra.mxu0 %v10002_v61 }
 0x2ed   :  { %v3035_v17 = vcombine.high %v2635_v37, %v2635_v37  ;;  %v3042_v15 = vrot.slane %v2635_v37, %v11655_v57  ;;  %v5221_v13 = vsel %vm4472_vm13, %v5220_v63, %v5219_v32  ;;  %v4934_v49 = vsel %vm4478_vm15, %v4933_v47, %v4932_v25 }
 0x2ee   :  { %v8886_v10 = vrot.slane %v3034_v34, 9  ;;  %v3815_v53 = vmax.f32 %v3033_v4, %v8884_v16  ;;  %v3816_v30 = vmax.f32 %v3032_v39, %v8885_v22  ;;  %v9429_v28 = vpack.c.bf16 %v3814_v56, %v3814_v56  ;;  %v10011_v4 = vld [vmem:[%s14943_s5 + $0x80] ss:$8 sps:$4 sm:$0xff]  }
 0x2ef   :  { %v12761_v29 = vrot.slane %v3035_v17, %v11655_v57  ;;  %v3050_v41 = vcombine.high %v3042_v15, %v3042_v15  ;;  %v8887_v12 = vrot.slane %v3042_v15, 9  ;;  %v5054_v63 = vpack.c.b16 %v4934_v49, %v4934_v49 }
 0x2f0   :  { %v3817_v37 = vmax.f32 %v3034_v34, %v8886_v10  ;;  %v9430_v5 = vpack.c.bf16 %v3815_v53, %v3815_v53  ;;  %v9431_v33 = vpack.c.bf16 %v3816_v30, %v3816_v30  ;;  %v12764_v42 = vunpack.c.l.b16 %v9429_v28  ;;  %v15238_v30 = vld [vmem:[#allocation32_spill] sm:$0xff]  ;;  %v15239_v34 = vld [vmem:[#allocation62_spill] sm:$0xff] }
 0x2f1   :  { %v8888_v32 = vrot.slane %v3050_v41, 9  ;;  %v3818_v39 = vmax.f32 %v3042_v15, %v8887_v12  ;;  %v5222_v53 = vrot.slane %v12732_v9, 2  ;;  %5077 = vrot.lane.b32.xlu1 %v5054_v63, %s10208_s29  ;;  %v2319_v61 = vadd.f32 %v15239_v34, %v15238_v30  ;;  %v12793_v15 = vld [vmem:[%s14940_s2] ss:$0 sm:$0xff]  ;;  %v15244_v30 = vld [vmem:[#allocation11_spill] sm:$0xff] }
 0x2f2   :  { %v9432_v20 = vpack.c.bf16 %v3817_v37, %v3817_v37  ;;  %v12767_v21 = vunpack.c.l.b16 %v9430_v5  ;;  %v12769_v16 = vunpack.c.l.b16 %v9431_v33  ;;  %v4597_v22 = vrot.slane %v12764_v42, 7  ;;  %v15245_v34 = vld [vmem:[#allocation29_spill] sm:$0xff]  ;;  %v15249_v5 = vld [vmem:[#allocation31_spill] sm:$0xff] }
 0x2f3   :  { %v12772_v56 = vmax.f32 %v3050_v41, %v8888_v32  ;;  %v9433_v47 = vpack.c.bf16 %v3818_v39, %v3818_v39  ;;  %v12788_v9 = vsel %vm4475_vm14, %v5222_v53, %v5221_v13  ;;  %v2390_v25 = vadd.f32 %v12793_v15, %v2319_v61  ;;  %v10005_v13 = vld [vmem:[%s14943_s5 + $0x70] ss:$8 sps:$4 sm:$0xff]   ;;  %v10007_v32 = vld [vmem:[%s14943_s5 + $0x74] ss:$8 sps:$4 sm:$0xff]  }
 0x2f4   :  { %v12778_v1 = vunpack.c.l.b16 %v9432_v20  ;;  %v4598_v49 = vrot.slane %v12767_v21, 6  ;;  %v5248_v12 = vrot.slane %v12769_v16, 7  ;;  %15241 = vst [vmem:[#allocation27_spill] sm:$0xff] %v12788_v9  ;;  %v2317_v61 = vadd.f32 %v15245_v34, %v15244_v30  ;;  %v15248_v39 = vld [vmem:[#allocation72_spill] sm:$0xff]  ;;  %5701 = vmatprep.subr.bf16.mxu1 %v10007_v32  ;;  %v10013_v20 = vld [vmem:[%s14943_s5 + $0x84] ss:$8 sps:$4 sm:$0xff]  }
 0x2f5   :  { %v12785_v17 = vunpack.c.l.b16 %v9433_v47  ;;  %v10008_v47 = vld [vmem:[%s14943_s5 + $0x1f0] ss:$8 sps:$4 sm:$0xff]   ;;  %v2318_v63 = vadd.f32 %v15249_v5, %v15248_v39  ;;  %v15252_v32 = vld [vmem:[#allocation33_spill] sm:$0xff]  ;;  %5702 = vmatpush1.bf16.msra.mxu1 %v10005_v13 }
 0x2f6   :  { %v12797_v10 = vsel %vm4463_vm9, %v4598_v49, %v4597_v22  ;;  %v5249_v37 = vsel %vm4823_vm10, %v5248_v12, %v12767_v21  ;;  %v5250_v33 = vrot.slane %v12778_v1, 6  ;;  %v2454_v22 = vmax.f32 %v2390_v25, 0.0  ;;  %v15246_v49 = vld [vmem:[#allocation34_spill] sm:$0xff]  ;;  %v15247_v12 = vld [vmem:[#allocation63_spill] sm:$0xff]  ;;  %v10010_v25 = vld [vmem:[%s14943_s5 + $0x1f4] ss:$8 sps:$4 sm:$0xff]   ;;  %5703 = vmatprep.subr.bf16.mxu1 %v10013_v20 }
 0x2f7   :  { %15240 = vst [vmem:[#allocation93_spill] sm:$0xff] %v12785_v17  ;;  %15242 = vst [vmem:[#allocation32_spill] sm:$0xff] %v12797_v10  ;;  %v2320_v28 = vadd.f32 %v15247_v12, %v15246_v49  ;;  %v15250_v30 = vld [vmem:[#allocation36_spill] sm:$0xff]  ;;  %v15253_v49 = vld [vmem:[#allocation38_spill] sm:$0xff]  ;;  %6241 = vmatprep.subr.bf16.mxu0 %v10010_v25 }
 0x2f8   :  { %v12817_v53 = vsel %vm4463_vm9, %v5250_v33, %v5249_v37  ;;  %v12834_v37 = vld [vmem:[%s14941_s3] ss:$0 sm:$0xff]  ;;  %v2323_v34 = vadd.f32 %v12214_v40, %v15250_v30  ;;  %v15251_v5 = vld [vmem:[#allocation16_spill] sm:$0xff]  ;;  %v15254_v12 = vld [vmem:[#allocation66_spill] sm:$0xff]  ;;  %v2389_v40 = vadd.f32 %v12793_v15, %v2318_v63  ;;  %6242 = vmatpush1.bf16.msra.mxu0 %v10008_v47 }
 0x2f9   :  { %15243 = vst [vmem:[#allocation62_spill] sm:$0xff] %v12817_v53  ;;  %v2525_v33 = vmul.f32 %v12834_v37, %v2454_v22  ;;  %v2321_v39 = vadd.f32 %v15252_v32, %v15251_v5  ;;  %v2324_v41 = vadd.f32 %v15254_v12, %v15253_v49  ;;  %v10016_v10 = vld [vmem:[%s14943_s5 + $0x204] ss:$8 sps:$4 sm:$0xff]   ;;  %v2388_v22 = vadd.f32 %v12793_v15, %v2317_v61  ;;  %v12857_v13 = vld [vmem:[%s14942_s4] ss:$0 sm:$0xff] }
 0x2fa   :  { %v2391_v9 = vadd.f32 %v12793_v15, %v2320_v28  ;;  %v15255_v30 = vld [vmem:[#allocation95_spill] sm:$0xff]  ;;  %v2394_v12 = vadd.f32 %v12793_v15, %v2323_v34  ;;  %v10014_v28 = vld [vmem:[%s14943_s5 + $0x200] ss:$8 sps:$4 sm:$0xff]   ;;  %6243 = vmatprep.subr.bf16.mxu0 %v10016_v10  ;;  %v2983_v34 = vcombine.high %v12483_v38, %v12483_v38  ;;  %5704 = vmatpush1.bf16.msra.mxu1 %v10011_v4 }
 0x2fb   :  { %v15256_v5 = vld [vmem:[#allocation35_spill] sm:$0xff]  ;;  %v2596_v49 = vadd.f32 %v12857_v13, %v2525_v33  ;;  %v2392_v50 = vadd.f32 %v12793_v15, %v2321_v39  ;;  %v2395_v61 = vadd.f32 %v12793_v15, %v2324_v41  ;;  %v2452_v63 = vmax.f32 %v2388_v22, 0.0 }
 0x2fc   :  { %v2322_v32 = vadd.f32 %v15256_v5, %v15255_v30  ;;  %v2455_v25 = vmax.f32 %v2391_v9, 0.0  ;;  %v2453_v30 = vmax.f32 %v2389_v40, 0.0  ;;  %v2458_v14 = vmax.f32 %v2394_v12, 0.0  ;;  %v10017_v9 = vld [vmem:[%s14943_s5 + $0x90] ss:$8 sps:$4 sm:$0xff]   ;;  %6244 = vmatpush1.bf16.msra.mxu0 %v10014_v28 }
 0x2fd   :  { %v2456_v33 = vmax.f32 %v2392_v50, 0.0  ;;  %v2459_v27 = vmax.f32 %v2395_v61, 0.0  ;;  %v2523_v41 = vmul.f32 %v12834_v37, %v2452_v63  ;;  %v10019_v50 = vld [vmem:[%s14943_s5 + $0x94] ss:$8 sps:$4 sm:$0xff]   ;;  %v8874_v40 = vrot.slane %v2983_v34, 9 }
 0x2fe   :  { %v2393_v5 = vadd.f32 %v12793_v15, %v2322_v32  ;;  %v2526_v47 = vmul.f32 %v12834_v37, %v2455_v25  ;;  %v2524_v39 = vmul.f32 %v12834_v37, %v2453_v30  ;;  %v2529_v10 = vmul.f32 %v12834_v37, %v2458_v14  ;;  %v10020_v32 = vld [vmem:[%s14943_s5 + $0x210] ss:$8 sps:$4 sm:$0xff]   ;;  %v10022_v12 = vld [vmem:[%s14943_s5 + $0x214] ss:$8 sps:$4 sm:$0xff]   ;;  %5705 = vmatprep.subr.bf16.mxu1 %v10019_v50 }
 0x2ff   :  { %v2527_v20 = vmul.f32 %v12834_v37, %v2456_v33  ;;  %v2530_v4 = vmul.f32 %v12834_v37, %v2459_v27  ;;  %v2594_v61 = vadd.f32 %v12857_v13, %v2523_v41  ;;  %6245 = vmatprep.subr.bf16.mxu0 %v10022_v12  ;;  %v12898_v11 = vmax.f32 %v2983_v34, %v8874_v40 }
 0x300   :  { %v2457_v22 = vmax.f32 %v2393_v5, 0.0  ;;  %v2597_v63 = vadd.f32 %v12857_v13, %v2526_v47  ;;  %v2595_v14 = vadd.f32 %v12857_v13, %v2524_v39  ;;  %v2600_v27 = vadd.f32 %v12857_v13, %v2529_v10  ;;  %5706 = vmatpush1.bf16.msra.mxu1 %v10017_v9  ;;  %6246 = vmatpush1.bf16.msra.mxu0 %v10020_v32  ;;  %v10028_v32 = vld [vmem:[%s14943_s5 + $0x224] ss:$8 sps:$4 sm:$0xff]  }
 0x301   :  { %v2598_v28 = vadd.f32 %v12857_v13, %v2527_v20  ;;  %v2601_v30 = vadd.f32 %v12857_v13, %v2530_v4  ;;  %v15257_v5 = vrot.slane %v12483_v38, 9  ;;  %v2636_v36 = vmax.f32 %v2594_v61, %v2596_v49  ;;  %v10025_v49 = vld [vmem:[%s14943_s5 + $0xa4] ss:$8 sps:$4 sm:$0xff]   ;;  %6247 = vmatprep.subr.bf16.mxu0 %v10028_v32 }
 0x302   :  { %v2528_v25 = vmul.f32 %v12834_v37, %v2457_v22  ;;  %v2637_v41 = vmax.f32 %v2595_v14, %v2597_v63  ;;  %v15258_v50 = vpack.c.bf16 %v12504_v23, %v12504_v23  ;;  %v10026_v23 = vld [vmem:[%s14943_s5 + $0x220] ss:$8 sps:$4 sm:$0xff]   ;;  %5707 = vmatprep.subr.bf16.mxu1 %v10025_v49 }
 0x303   :  { %v3804_v33 = vmax.f32 %v12483_v38, %v15257_v5  ;;  %v2638_v39 = vmax.f32 %v2598_v28, %v2600_v27  ;;  %v10023_v38 = vld [vmem:[%s14943_s5 + $0xa0] ss:$8 sps:$4 sm:$0xff]   ;;  %v3052_v34 = vcombine.high %v2636_v36, %v2636_v36  ;;  %v3059_v9 = vrot.slane %v2636_v36, %v11655_v57 }
 0x304   :  { %v2599_v47 = vadd.f32 %v12857_v13, %v2528_v25  ;;  %v12903_v10 = vunpack.c.l.b16 %v15258_v50  ;;  %v3069_v4 = vcombine.high %v2637_v41, %v2637_v41  ;;  %v3076_v40 = vrot.slane %v2637_v41, %v11655_v57  ;;  %5708 = vmatpush1.bf16.msra.mxu1 %v10023_v38  ;;  %6248 = vmatpush1.bf16.msra.mxu0 %v10026_v23  ;;  %v10029_v23 = vld [vmem:[%s14943_s5 + $0xb0] ss:$8 sps:$4 sm:$0xff]  }
 0x305   :  { %v9421_v22 = vpack.c.bf16 %v3804_v33, %v3804_v33  ;;  %v3086_v12 = vcombine.high %v2638_v39, %v2638_v39  ;;  %v3093_v61 = vrot.slane %v2638_v39, %v11655_v57  ;;  %v3066_v36 = vrot.slane %v3052_v34, %v11655_v57 }
 0x306   :  { %v12921_v63 = vmax.f32 %v2599_v47, %v2601_v30  ;;  %v3067_v25 = vcombine.high %v3059_v9, %v3059_v9  ;;  %v8891_v27 = vrot.slane %v3059_v9, 9  ;;  %v12927_v28 = vrot.slane %v3069_v4, %v11655_v57 }
 0x307   :  { %v12923_v14 = vunpack.c.l.b16 %v9421_v22  ;;  %v3084_v5 = vcombine.high %v3076_v40, %v3076_v40  ;;  %v8895_v33 = vrot.slane %v3076_v40, 9  ;;  %v3100_v41 = vrot.slane %v3086_v12, %v11655_v57 }
 0x308   :  { %v3101_v50 = vcombine.high %v3093_v61, %v3093_v61  ;;  %v3068_v30 = vcombine.high %v3066_v36, %v3066_v36  ;;  %v8892_v47 = vrot.slane %v3067_v25, 9  ;;  %v8893_v39 = vrot.slane %v3066_v36, 9 }
 0x309   :  { %v3822_v22 = vmax.f32 %v3059_v9, %v8891_v27  ;;  %v8896_v49 = vrot.slane %v3084_v5, 9  ;;  %v3826_v20 = vmax.f32 %v3076_v40, %v8895_v33  ;;  %v3102_v18 = vcombine.high %v3100_v41, %v3100_v41  ;;  %v10031_v9 = vld [vmem:[%s14943_s5 + $0xb4] ss:$8 sps:$4 sm:$0xff]  }
 0x30a   :  { %v8894_v44 = vrot.slane %v3068_v30, 9  ;;  %v3823_v4 = vmax.f32 %v3067_v25, %v8892_v47  ;;  %v3824_v2 = vmax.f32 %v3066_v36, %v8893_v39  ;;  %v8899_v17 = vrot.slane %v3093_v61, 9  ;;  %v10032_v36 = vld [vmem:[%s14943_s5 + $0x230] ss:$8 sps:$4 sm:$0xff]   ;;  %5709 = vmatprep.subr.bf16.mxu1 %v10031_v9 }
 0x30b   :  { %v9436_v32 = vpack.c.bf16 %v3822_v22, %v3822_v22  ;;  %v12931_v38 = vmax.f32 %v3084_v5, %v8896_v49  ;;  %v9440_v53 = vpack.c.bf16 %v3826_v20, %v3826_v20  ;;  %v8900_v12 = vrot.slane %v3101_v50, 9  ;;  %v10034_v20 = vld [vmem:[%s14943_s5 + $0x234] ss:$8 sps:$4 sm:$0xff]   ;;  %5710 = vmatpush1.bf16.msra.mxu1 %v10029_v23 }
 0x30c   :  { %v3825_v27 = vmax.f32 %v3068_v30, %v8894_v44  ;;  %v9437_v40 = vpack.c.bf16 %v3823_v4, %v3823_v4  ;;  %v9438_v33 = vpack.c.bf16 %v3824_v2, %v3824_v2  ;;  %v8901_v47 = vrot.slane %v3100_v41, 9  ;;  %6249 = vmatprep.subr.bf16.mxu0 %v10034_v20 }
 0x30d   :  { %15259 = vst [vmem:[#allocation11_spill] sm:$0xff] %v12931_v38  ;;  %v12939_v34 = vunpack.c.l.b16 %v9436_v32  ;;  %v12949_v5 = vunpack.c.l.b16 %v9440_v53  ;;  %v8902_v39 = vrot.slane %v3102_v18, 9  ;;  %v3830_v32 = vmax.f32 %v3093_v61, %v8899_v17  ;;  %6250 = vmatpush1.bf16.msra.mxu0 %v10032_v36 }
 0x30e   :  { %v9439_v44 = vpack.c.bf16 %v3825_v27, %v3825_v27  ;;  %v12951_v2 = vunpack.c.l.b16 %v9437_v40  ;;  %v12953_v30 = vunpack.c.l.b16 %v9438_v33  ;;  %v3831_v25 = vmax.f32 %v3101_v50, %v8900_v12 }
 0x30f   :  { %15260 = vst [vmem:[#allocation29_spill] sm:$0xff] %v12939_v34  ;;  %15261 = vst [vmem:[#allocation34_spill] sm:$0xff] %v12949_v5  ;;  %v4610_v22 = vrot.slane %v12939_v34, 7  ;;  %v3832_v33 = vmax.f32 %v3100_v41, %v8901_v47  ;;  %v3833_v38 = vmax.f32 %v3102_v18, %v8902_v39  ;;  %v9443_v34 = vpack.c.bf16 %v3830_v32, %v3830_v32 }
 0x310   :  { %v12958_v53 = vunpack.c.l.b16 %v9439_v44  ;;  %v4611_v9 = vrot.slane %v12951_v2, 6  ;;  %v5260_v40 = vrot.slane %v12953_v30, 7  ;;  %v9444_v20 = vpack.c.bf16 %v3831_v25, %v3831_v25 }
 0x311   :  { %v9445_v50 = vpack.c.bf16 %v3832_v33, %v3832_v33  ;;  %v9446_v12 = vpack.c.bf16 %v3833_v38, %v3833_v38  ;;  %v12970_v36 = vunpack.c.l.b16 %v9443_v34  ;;  %v3103_v41 = vcombine.high %v12921_v63, %v12921_v63 }
 0x312   :  { %15262 = vst [vmem:[#allocation63_spill] sm:$0xff] %v12958_v53  ;;  %v12964_v23 = vsel %vm4463_vm9, %v4611_v9, %v4610_v22  ;;  %v5261_v17 = vsel %vm4823_vm10, %v5260_v40, %v12951_v2  ;;  %v5262_v61 = vrot.slane %v12958_v53, 6  ;;  %v12972_v44 = vunpack.c.l.b16 %v9444_v20 }
 0x313   :  { %15263 = vst [vmem:[#allocation72_spill] sm:$0xff] %v12964_v23  ;;  %v3110_v25 = vrot.slane %v12921_v63, %v11655_v57  ;;  %v9479_v47 = vpack.c.bf16 %v12898_v11, %v12898_v11  ;;  %v12983_v39 = vunpack.c.l.b16 %v9445_v50  ;;  %v12985_v22 = vunpack.c.l.b16 %v9446_v12  ;;  %v15267_v23 = vld [vmem:[#allocation40_spill] sm:$0xff] }
 0x314   :  { %v12975_v18 = vsel %vm4463_vm9, %v5262_v61, %v5261_v17  ;;  %v4623_v34 = vrot.slane %v12970_v36, 7  ;;  %v4624_v38 = vrot.slane %v12972_v44, 6  ;;  %v12990_v32 = vrot.slane %v3103_v41, %v11655_v57 }
 0x315   :  { %v3118_v9 = vcombine.high %v3110_v25, %v3110_v25  ;;  %v8903_v40 = vrot.slane %v3110_v25, 9  ;;  %v4814_v33 = vunpack.c.l.b16 %v9479_v47  ;;  %v5272_v17 = vrot.slane %v12983_v39, 7 }
 0x316   :  { %v12993_v20 = vsel %vm4463_vm9, %v4624_v38, %v4623_v34  ;;  %v5274_v61 = vrot.slane %v12985_v22, 6  ;;  %v15265_v47 = vrot.slane %v12520_v59, 7  ;;  %v4937_v38 = vrot.slane %v12522_v31, 6 }
 0x317   :  { %15264 = vst [vmem:[#allocation31_spill] sm:$0xff] %v12993_v20  ;;  %v8904_v50 = vrot.slane %v3118_v9, 9  ;;  %v3834_v49 = vmax.f32 %v3110_v25, %v8903_v40  ;;  %v5273_v41 = vsel %vm4823_vm10, %v5272_v17, %v12972_v44  ;;  %v4939_v11 = vrot.slane %v12530_v60, 5 }
 0x318   :  { %v4936_v34 = vsel %vm4823_vm10, %v15265_v47, %v12509_v35  ;;  %v13009_v63 = vsel %vm4463_vm9, %v5274_v61, %v5273_v41  ;;  %v4941_v25 = vrot.slane %v12515_v43, 4  ;;  %v4943_v17 = vrot.slane %v12903_v10, 3 }
 0x319   :  { %v13011_v27 = vmax.f32 %v3118_v9, %v8904_v50  ;;  %v9447_v4 = vpack.c.bf16 %v3834_v49, %v3834_v49  ;;  %v4938_v40 = vsel %vm4463_vm9, %v4937_v38, %v4936_v34  ;;  %v4945_v59 = vrot.slane %v12923_v14, 2 }
 0x31a   :  { %v4947_v12 = vrot.slane %v4814_v33, 1  ;;  %v4940_v61 = vsel %vm4466_vm11, %v4939_v11, %v4938_v40  ;;  %v15266_v9 = vrot.slane %v12515_v43, 5  ;;  %v5230_v41 = vrot.slane %v12903_v10, 4 }
 0x31b   :  { %v13019_v47 = vunpack.c.l.b16 %v9447_v4  ;;  %v4942_v50 = vsel %vm4469_vm12, %v4941_v25, %v4940_v61  ;;  %v5232_v34 = vrot.slane %v12923_v14, 3  ;;  %v5234_v38 = vrot.slane %v4814_v33, 2  ;;  %v15268_v25 = vld [vmem:[#allocation37_spill] sm:$0xff] }
 0x31c   :  { %v5229_v49 = vsel %vm4466_vm11, %v15266_v9, %v12555_v7  ;;  %v4944_v4 = vsel %vm4472_vm13, %v4943_v17, %v4942_v50  ;;  %v2327_v11 = vadd.f32 %v12357_v55, %v15267_v23  ;;  %v2325_v61 = vadd.f32 %v15268_v25, %v12372_v46  ;;  %v15269_v9 = vld [vmem:[#allocation42_spill] sm:$0xff]  ;;  %v15270_v17 = vld [vmem:[#allocation39_spill] sm:$0xff] }
 0x31d   :  { %v4946_v40 = vsel %vm4475_vm14, %v4945_v59, %v4944_v4  ;;  %v5231_v7 = vsel %vm4469_vm12, %v5230_v41, %v5229_v49  ;;  %v2328_v43 = vadd.f32 %v12406_v45, %v15269_v9  ;;  %v2326_v50 = vadd.f32 %v15270_v17, %v12415_v48 }
 0x31e   :  { %v4948_v33 = vsel %vm4478_vm15, %v4947_v12, %v4946_v40  ;;  %v5233_v20 = vsel %vm4472_vm13, %v5232_v34, %v5231_v7  ;;  %v2398_v35 = vadd.f32 %v12793_v15, %v2327_v11  ;;  %v2396_v59 = vadd.f32 %v12793_v15, %v2325_v61 }
 0x31f   :  { %v5055_v55 = vpack.c.b16 %v4948_v33, %v4948_v33  ;;  %v13046_v23 = vsel %vm4475_vm14, %v5234_v38, %v5233_v20  ;;  %v2399_v46 = vadd.f32 %v12793_v15, %v2328_v43  ;;  %v2397_v12 = vadd.f32 %v12793_v15, %v2326_v50 }
 0x320   :  { %v2462_v49 = vmax.f32 %v2398_v35, 0.0  ;;  %v3017_v41 = vcombine.high %v12638_v24, %v12638_v24  ;;  %v2460_v48 = vmax.f32 %v2396_v59, 0.0  ;;  %v15271_v20 = vrot.slane %v12638_v24, 9 }
 0x321   :  { %5079 = vrot.lane.b32.xlu0 %v5055_v55, %s10208_s29  ;;  %v2463_v34 = vmax.f32 %v2399_v46, 0.0  ;;  %v15272_v43 = vpack.c.bf16 %v12647_v6, %v12647_v6  ;;  %v2461_v11 = vmax.f32 %v2397_v12, 0.0  ;;  %v4949_v7 = vrot.slane %v12653_v51, 7 }
 0x322   :  { %v3812_v38 = vmax.f32 %v12638_v24, %v15271_v20  ;;  %v2533_v35 = vmul.f32 %v12834_v37, %v2462_v49  ;;  %v8882_v40 = vrot.slane %v3017_v41, 9  ;;  %v2531_v25 = vmul.f32 %v12834_v37, %v2460_v48 }
 0x323   :  { %v13062_v4 = vunpack.c.l.b16 %v15272_v43  ;;  %v2534_v61 = vmul.f32 %v12834_v37, %v2463_v34  ;;  %v4951_v33 = vrot.slane %v12655_v58, 6  ;;  %v2532_v17 = vmul.f32 %v12834_v37, %v2461_v11 }
 0x324   :  { %v9428_v9 = vpack.c.bf16 %v3812_v38, %v3812_v38  ;;  %v2604_v24 = vadd.f32 %v12857_v13, %v2533_v35  ;;  %v3813_v6 = vmax.f32 %v3017_v41, %v8882_v40  ;;  %v4950_v50 = vsel %vm4823_vm10, %v4949_v7, %v12645_v0 }
 0x325   :  { %15273 = vst [vmem:[#allocation36_spill] sm:$0xff] %v13062_v4  ;;  %v2602_v55 = vadd.f32 %v12857_v13, %v2531_v25  ;;  %v2605_v59 = vadd.f32 %v12857_v13, %v2534_v61  ;;  %v4952_v46 = vsel %vm4463_vm9, %v4951_v33, %v4950_v50  ;;  %v2603_v49 = vadd.f32 %v12857_v13, %v2532_v17 }
 0x326   :  { %v13075_v51 = vunpack.c.l.b16 %v9428_v9  ;;  %v9480_v12 = vpack.c.bf16 %v3813_v6, %v3813_v6  ;;  %v4953_v48 = vrot.slane %v12665_v62, 5  ;;  %v4955_v34 = vrot.slane %v12660_v26, 4 }
 0x327   :  { %v2640_v20 = vmax.f32 %v2602_v55, %v2604_v24  ;;  %v4957_v41 = vrot.slane %v13062_v4, 3  ;;  %v15275_v38 = vrot.slane %v12660_v26, 5  ;;  %v2641_v35 = vmax.f32 %v2603_v49, %v2605_v59 }
 0x328   :  { %15274 = vst [vmem:[#allocation16_spill] sm:$0xff] %v13075_v51  ;;  %v4959_v0 = vrot.slane %v13075_v51, 2  ;;  %v4815_v11 = vunpack.c.l.b16 %v9480_v12  ;;  %v4954_v40 = vsel %vm4466_vm11, %v4953_v48, %v4952_v46  ;;  %v5242_v7 = vrot.slane %v13062_v4, 4 }
 0x329   :  { %v5241_v43 = vsel %vm4466_vm11, %v15275_v38, %v12686_v8  ;;  %v3120_v25 = vcombine.high %v2640_v20, %v2640_v20  ;;  %v3127_v61 = vrot.slane %v2640_v20, %v11655_v57  ;;  %v4956_v9 = vsel %vm4469_vm12, %v4955_v34, %v4954_v40 }
 0x32a   :  { %v5244_v33 = vrot.slane %v13075_v51, 3  ;;  %v3137_v24 = vcombine.high %v2641_v35, %v2641_v35  ;;  %v3144_v17 = vrot.slane %v2641_v35, %v11655_v57  ;;  %v4958_v6 = vsel %vm4472_vm13, %v4957_v41, %v4956_v9 }
 0x32b   :  { %v4961_v50 = vrot.slane %v4815_v11, 1  ;;  %v3134_v8 = vrot.slane %v3120_v25, %v11655_v57  ;;  %v3135_v55 = vcombine.high %v3127_v61, %v3127_v61  ;;  %v8907_v59 = vrot.slane %v3127_v61, 9 }
 0x32c   :  { %v4960_v46 = vsel %vm4475_vm14, %v4959_v0, %v4958_v6  ;;  %v13097_v49 = vrot.slane %v3137_v24, %v11655_v57  ;;  %v3152_v12 = vcombine.high %v3144_v17, %v3144_v17  ;;  %v8911_v48 = vrot.slane %v3144_v17, 9 }
 0x32d   :  { %v4962_v34 = vsel %vm4478_vm15, %v4961_v50, %v4960_v46  ;;  %v3136_v20 = vcombine.high %v3134_v8, %v3134_v8  ;;  %v8908_v38 = vrot.slane %v3135_v55, 9  ;;  %v8909_v40 = vrot.slane %v3134_v8, 9 }
 0x32e   :  { %v3838_v35 = vmax.f32 %v3127_v61, %v8907_v59  ;;  %v8912_v45 = vrot.slane %v3152_v12, 9  ;;  %v3842_v9 = vmax.f32 %v3144_v17, %v8911_v48  ;;  %v5056_v25 = vpack.c.b16 %v4962_v34, %v4962_v34  ;;  %v10051_v61 = vld [vmem:[%s14943_s5 + $0xc4] ss:$8 sps:$4 sm:$0xff]  }
 0x32f   :  { %v8910_v26 = vrot.slane %v3136_v20, 9  ;;  %v3839_v62 = vmax.f32 %v3135_v55, %v8908_v38  ;;  %v3840_v51 = vmax.f32 %v3134_v8, %v8909_v40  ;;  %v5243_v58 = vsel %vm4469_vm12, %v5242_v7, %v5241_v43  ;;  %v15276_v43 = vld [vmem:[#allocation44_spill] sm:$0xff]  ;;  %5957 = vmatprep.subr.bf16.mxu1 %v10051_v61  ;;  %v15285_v61 = vld [vmem:[#allocation62_spill] sm:$0xff]  ;;  %v15288_v40 = vld [vmem:[#allocation21_spill] sm:$0xff] }
 0x330   :  { %v9450_v0 = vpack.c.bf16 %v3838_v35, %v3838_v35  ;;  %v13101_v6 = vmax.f32 %v3152_v12, %v8912_v45  ;;  %v9454_v24 = vpack.c.bf16 %v3842_v9, %v3842_v9  ;;  %v5246_v4 = vrot.slane %v4815_v11, 2  ;;  %5081 = vrot.lane.b32.xlu1 %v5056_v25, %s10208_s29  ;;  %v15277_v9 = vld [vmem:[#allocation41_spill] sm:$0xff] }
 0x331   :  { %v3841_v50 = vmax.f32 %v3136_v20, %v8910_v26  ;;  %v9451_v59 = vpack.c.bf16 %v3839_v62, %v3839_v62  ;;  %v9452_v17 = vpack.c.bf16 %v3840_v51, %v3840_v51  ;;  %v5245_v55 = vsel %vm4472_vm13, %v5244_v33, %v5243_v58  ;;  %v15287_v20 = vld [vmem:[#allocation48_spill] sm:$0xff] }
 0x332   :  { %v13108_v46 = vunpack.c.l.b16 %v9450_v0  ;;  %v13112_v45 = vunpack.c.l.b16 %v9454_v24  ;;  %v2331_v11 = vadd.f32 %v12492_v54, %v15276_v43  ;;  %v13125_v34 = vsel %vm4475_vm14, %v5246_v4, %v5245_v55  ;;  %v15278_v0 = vld [vmem:[#allocation46_spill] sm:$0xff] }
 0x333   :  { %v9453_v7 = vpack.c.bf16 %v3841_v50, %v3841_v50  ;;  %v13117_v12 = vunpack.c.l.b16 %v9451_v59  ;;  %v13119_v48 = vunpack.c.l.b16 %v9452_v17  ;;  %v2329_v25 = vadd.f32 %v15277_v9, %v12494_v52  ;;  %v15280_v52 = vld [vmem:[#allocation43_spill] sm:$0xff] }
 0x334   :  { %v4636_v26 = vrot.slane %v13108_v46, 7  ;;  %v2402_v58 = vadd.f32 %v12793_v15, %v2331_v11  ;;  %v2332_v4 = vadd.f32 %v12507_v19, %v15278_v0  ;;  %v2330_v11 = vadd.f32 %v15280_v52, %v12511_v3 }
 0x335   :  { %v13128_v33 = vunpack.c.l.b16 %v9453_v7  ;;  %v4637_v54 = vrot.slane %v13117_v12, 6  ;;  %v5284_v38 = vrot.slane %v13119_v48, 7  ;;  %v2400_v55 = vadd.f32 %v12793_v15, %v2329_v25 }
 0x336   :  { %v2466_v35 = vmax.f32 %v2402_v58, 0.0  ;;  %v2403_v43 = vadd.f32 %v12793_v15, %v2332_v4  ;;  %v3051_v7 = vcombine.high %v12761_v29, %v12761_v29  ;;  %v2401_v3 = vadd.f32 %v12793_v15, %v2330_v11 }
 0x337   :  { %v13140_v24 = vsel %vm4463_vm9, %v4637_v54, %v4636_v26  ;;  %v5285_v50 = vsel %vm4823_vm10, %v5284_v38, %v13117_v12  ;;  %v5286_v59 = vrot.slane %v13128_v33, 6  ;;  %v15281_v26 = vrot.slane %v12761_v29, 9 }
 0x338   :  { %15279 = vst [vmem:[#allocation33_spill] sm:$0xff] %v13140_v24  ;;  %v2537_v17 = vmul.f32 %v12834_v37, %v2466_v35  ;;  %v15282_v54 = vpack.c.bf16 %v12772_v56, %v12772_v56  ;;  %v2464_v9 = vmax.f32 %v2400_v55, 0.0  ;;  %v2467_v25 = vmax.f32 %v2403_v43, 0.0  ;;  %v15284_v55 = vld [vmem:[#allocation93_spill] sm:$0xff] }
 0x339   :  { %v13152_v19 = vsel %vm4463_vm9, %v5286_v59, %v5285_v50  ;;  %v3820_v58 = vmax.f32 %v12761_v29, %v15281_v26  ;;  %v8890_v0 = vrot.slane %v3051_v7, 9  ;;  %v4963_v50 = vrot.slane %v12767_v21, 7 }
 0x33a   :  { %v13162_v38 = vunpack.c.l.b16 %v15282_v54  ;;  %v2608_v35 = vadd.f32 %v12857_v13, %v2537_v17  ;;  %v4965_v59 = vrot.slane %v12769_v16, 6  ;;  %v2535_v52 = vmul.f32 %v12834_v37, %v2464_v9 }
 0x33b   :  { %v9435_v4 = vpack.c.bf16 %v3820_v58, %v3820_v58  ;;  %v2538_v29 = vmul.f32 %v12834_v37, %v2467_v25  ;;  %v2465_v26 = vmax.f32 %v2401_v3, 0.0  ;;  %v4967_v56 = vrot.slane %v12778_v1, 5 }
 0x33c   :  { %v3821_v54 = vmax.f32 %v3051_v7, %v8890_v0  ;;  %v4964_v17 = vsel %vm4823_vm10, %v4963_v50, %v12764_v42  ;;  %v4969_v43 = vrot.slane %v15284_v55, 4  ;;  %v2606_v11 = vadd.f32 %v12857_v13, %v2535_v52 }
 0x33d   :  { %v13171_v62 = vunpack.c.l.b16 %v9435_v4  ;;  %v2609_v21 = vadd.f32 %v12857_v13, %v2538_v29  ;;  %v2536_v58 = vmul.f32 %v12834_v37, %v2465_v26  ;;  %v4966_v9 = vsel %vm4463_vm9, %v4965_v59, %v4964_v17 }
 0x33e   :  { %v9481_v25 = vpack.c.bf16 %v3821_v54, %v3821_v54  ;;  %v4968_v3 = vsel %vm4466_vm11, %v4967_v56, %v4966_v9  ;;  %v4971_v7 = vrot.slane %v13162_v38, 3  ;;  %v2642_v4 = vmax.f32 %v2606_v11, %v2608_v35 }
 0x33f   :  { %15283 = vst [vmem:[#allocation38_spill] sm:$0xff] %v13171_v62  ;;  %v4973_v0 = vrot.slane %v13171_v62, 2  ;;  %v2607_v42 = vadd.f32 %v12857_v13, %v2536_v58  ;;  %v4970_v50 = vsel %vm4469_vm12, %v4969_v43, %v4968_v3  ;;  %v15286_v52 = vrot.slane %v15284_v55, 5 }
 0x340   :  { %v4816_v26 = vunpack.c.l.b16 %v9481_v25  ;;  %v4972_v59 = vsel %vm4472_vm13, %v4971_v7, %v4970_v50  ;;  %v5254_v54 = vrot.slane %v13162_v38, 4  ;;  %v5256_v56 = vrot.slane %v13171_v62, 3 }
 0x341   :  { %v5253_v29 = vsel %vm4466_vm11, %v15286_v52, %v15285_v61  ;;  %v3154_v17 = vcombine.high %v2642_v4, %v2642_v4  ;;  %v3161_v9 = vrot.slane %v2642_v4, %v11655_v57  ;;  %v2643_v35 = vmax.f32 %v2607_v42, %v2609_v21 }
 0x342   :  { %v4974_v11 = vsel %vm4475_vm14, %v4973_v0, %v4972_v59  ;;  %v4975_v58 = vrot.slane %v4816_v26, 1  ;;  %v5255_v43 = vsel %vm4469_vm12, %v5254_v54, %v5253_v29  ;;  %v5258_v3 = vrot.slane %v4816_v26, 2 }
 0x343   :  { %v2335_v61 = vadd.f32 %v15288_v40, %v15287_v20  ;;  %v3168_v25 = vrot.slane %v3154_v17, %v11655_v57  ;;  %v3169_v7 = vcombine.high %v3161_v9, %v3161_v9  ;;  %v8915_v50 = vrot.slane %v3161_v9, 9 }
 0x344   :  { %v3171_v52 = vcombine.high %v2643_v35, %v2643_v35  ;;  %v3178_v51 = vrot.slane %v2643_v35, %v11655_v57  ;;  %v4976_v8 = vsel %vm4478_vm15, %v4975_v58, %v4974_v11  ;;  %v5257_v21 = vsel %vm4472_vm13, %v5256_v56, %v5255_v43 }
 0x345   :  { %v2406_v0 = vadd.f32 %v12793_v15, %v2335_v61  ;;  %v3170_v4 = vcombine.high %v3168_v25, %v3168_v25  ;;  %v8916_v42 = vrot.slane %v3169_v7, 9  ;;  %v8917_v29 = vrot.slane %v3168_v25, 9 }
 0x346   :  { %v3846_v26 = vmax.f32 %v3161_v9, %v8915_v50  ;;  %v13203_v59 = vrot.slane %v3171_v52, %v11655_v57  ;;  %v3186_v20 = vcombine.high %v3178_v51, %v3178_v51  ;;  %v8919_v40 = vrot.slane %v3178_v51, 9 }
 0x347   :  { %v5057_v54 = vpack.c.b16 %v4976_v8, %v4976_v8  ;;  %v8918_v17 = vrot.slane %v3170_v4, 9  ;;  %v3847_v41 = vmax.f32 %v3169_v7, %v8916_v42  ;;  %v3848_v24 = vmax.f32 %v3168_v25, %v8917_v29  ;;  %v15296_v25 = vld [vmem:[#allocation47_spill] sm:$0xff] }
 0x348   :  { %v9457_v35 = vpack.c.bf16 %v3846_v26, %v3846_v26  ;;  %v8920_v62 = vrot.slane %v3186_v20, 9  ;;  %v3850_v56 = vmax.f32 %v3178_v51, %v8919_v40  ;;  %v13207_v58 = vsel %vm4475_vm14, %v5258_v3, %v5257_v21  ;;  %v15290_v21 = vld [vmem:[#allocation26_spill] sm:$0xff]  ;;  %v15295_v40 = vld [vmem:[#allocation23_spill] sm:$0xff] }
 0x349   :  { %15289 = vst [vmem:[#allocation66_spill] sm:$0xff] %v13207_v58  ;;  %5083 = vrot.lane.b32.xlu0 %v5057_v54, %s10208_s29  ;;  %v3849_v9 = vmax.f32 %v3170_v4, %v8918_v17  ;;  %v9458_v43 = vpack.c.bf16 %v3847_v41, %v3847_v41  ;;  %v9459_v61 = vpack.c.bf16 %v3848_v24, %v3848_v24  ;;  %v2470_v7 = vmax.f32 %v2406_v0, 0.0  ;;  %v15291_v4 = vld [vmem:[#allocation45_spill] sm:$0xff] }
 0x34a   :  { %v13210_v50 = vunpack.c.l.b16 %v9457_v35  ;;  %v13212_v52 = vmax.f32 %v3186_v20, %v8920_v62  ;;  %v9461_v8 = vpack.c.bf16 %v3850_v56, %v3850_v56  ;;  %v2333_v26 = vadd.f32 %v15291_v4, %v15290_v21  ;;  %v15293_v21 = vld [vmem:[#allocation49_spill] sm:$0xff]  ;;  %v15294_v4 = vld [vmem:[#allocation83_spill] sm:$0xff] }
 0x34b   :  { %v9460_v42 = vpack.c.bf16 %v3849_v9, %v3849_v9  ;;  %v13216_v29 = vunpack.c.l.b16 %v9458_v43  ;;  %v13218_v51 = vunpack.c.l.b16 %v9459_v61  ;;  %v2541_v62 = vmul.f32 %v12834_v37, %v2470_v7 }
 0x34c   :  { %v4649_v3 = vrot.slane %v13210_v50, 7  ;;  %v13223_v24 = vunpack.c.l.b16 %v9461_v8  ;;  %v2404_v9 = vadd.f32 %v12793_v15, %v2333_v26  ;;  %v2336_v17 = vadd.f32 %v15294_v4, %v15293_v21 }
 0x34d   :  { %v13228_v20 = vunpack.c.l.b16 %v9460_v42  ;;  %v4650_v0 = vrot.slane %v13216_v29, 6  ;;  %v5296_v54 = vrot.slane %v13218_v51, 7  ;;  %v2612_v56 = vadd.f32 %v12857_v13, %v2541_v62 }
 0x34e   :  { %v2468_v42 = vmax.f32 %v2404_v9, 0.0  ;;  %v2334_v35 = vadd.f32 %v15296_v25, %v15295_v40  ;;  %v3085_v62 = vcombine.high %v12927_v28, %v12927_v28  ;;  %v15297_v26 = vrot.slane %v12927_v28, 9 }
 0x34f   :  { %v13238_v43 = vsel %vm4463_vm9, %v4650_v0, %v4649_v3  ;;  %v5297_v8 = vsel %vm4823_vm10, %v5296_v54, %v13216_v29  ;;  %v5298_v7 = vrot.slane %v13228_v20, 6  ;;  %v15298_v54 = vld [vmem:[#allocation11_spill] sm:$0xff]  ;;  %v4977_v21 = vrot.slane %v12951_v2, 7 }
 0x350   :  { %15292 = vst [vmem:[#allocation95_spill] sm:$0xff] %v13238_v43  ;;  %v3828_v0 = vmax.f32 %v12927_v28, %v15297_v26  ;;  %v15299_v61 = vpack.c.bf16 %v15298_v54, %v15298_v54  ;;  %v2539_v4 = vmul.f32 %v12834_v37, %v2468_v42  ;;  %v2407_v25 = vadd.f32 %v12793_v15, %v2336_v17 }
 0x351   :  { %v13251_v3 = vsel %vm4463_vm9, %v5298_v7, %v5297_v8  ;;  %v2405_v40 = vadd.f32 %v12793_v15, %v2334_v35  ;;  %v8898_v41 = vrot.slane %v3085_v62, 9  ;;  %v15300_v7 = vld [vmem:[#allocation29_spill] sm:$0xff]  ;;  %v4979_v28 = vrot.slane %v12953_v30, 6 }
 0x352   :  { %v13259_v9 = vunpack.c.l.b16 %v15299_v61  ;;  %v9442_v8 = vpack.c.bf16 %v3828_v0, %v3828_v0  ;;  %v4978_v11 = vsel %vm4823_vm10, %v4977_v21, %v15300_v7  ;;  %v4981_v26 = vrot.slane %v12958_v53, 5 }
 0x353   :  { %v2610_v61 = vadd.f32 %v12857_v13, %v2539_v4  ;;  %v2471_v54 = vmax.f32 %v2407_v25, 0.0  ;;  %v2469_v43 = vmax.f32 %v2405_v40, 0.0  ;;  %v3829_v2 = vmax.f32 %v3085_v62, %v8898_v41 }
 0x354   :  { %v13270_v58 = vunpack.c.l.b16 %v9442_v8  ;;  %v4980_v17 = vsel %vm4463_vm9, %v4979_v28, %v4978_v11  ;;  %v4983_v15 = vrot.slane %v12949_v5, 4  ;;  %v4985_v35 = vrot.slane %v13259_v9, 3 }
 0x355   :  { %v2644_v42 = vmax.f32 %v2610_v61, %v2612_v56  ;;  %v2542_v0 = vmul.f32 %v12834_v37, %v2471_v54  ;;  %v2540_v21 = vmul.f32 %v12834_v37, %v2469_v43  ;;  %v9482_v7 = vpack.c.bf16 %v3829_v2, %v3829_v2 }
 0x356   :  { %15301 = vst [vmem:[#allocation35_spill] sm:$0xff] %v13270_v58  ;;  %v4982_v53 = vsel %vm4466_vm11, %v4981_v26, %v4980_v17  ;;  %v4987_v4 = vrot.slane %v13270_v58, 2  ;;  %v15302_v41 = vrot.slane %v12949_v5, 5  ;;  %v5266_v11 = vrot.slane %v13259_v9, 4 }
 0x357   :  { %v3188_v25 = vcombine.high %v2644_v42, %v2644_v42  ;;  %v3195_v40 = vrot.slane %v2644_v42, %v11655_v57  ;;  %v2613_v56 = vadd.f32 %v12857_v13, %v2542_v0  ;;  %v2611_v8 = vadd.f32 %v12857_v13, %v2540_v21 }
 0x358   :  { %v5265_v62 = vsel %vm4466_vm11, %v15302_v41, %v12975_v18  ;;  %v4817_v37 = vunpack.c.l.b16 %v9482_v7  ;;  %v4984_v43 = vsel %vm4469_vm12, %v4983_v15, %v4982_v53  ;;  %v5268_v26 = vrot.slane %v13270_v58, 3 }
 0x359   :  { %v5267_v28 = vsel %vm4469_vm12, %v5266_v11, %v5265_v62  ;;  %v3202_v61 = vrot.slane %v3188_v25, %v11655_v57  ;;  %v3203_v54 = vcombine.high %v3195_v40, %v3195_v40  ;;  %v8923_v18 = vrot.slane %v3195_v40, 9 }
 0x35a   :  { %v2645_v2 = vmax.f32 %v2611_v8, %v2613_v56  ;;  %v4986_v17 = vsel %vm4472_vm13, %v4985_v35, %v4984_v43  ;;  %v4989_v41 = vrot.slane %v4817_v37, 1  ;;  %v5269_v42 = vsel %vm4472_vm13, %v5268_v26, %v5267_v28 }
 0x35b   :  { %v5270_v0 = vrot.slane %v4817_v37, 2  ;;  %v3204_v5 = vcombine.high %v3202_v61, %v3202_v61  ;;  %v8924_v13 = vrot.slane %v3203_v54, 9  ;;  %v8925_v21 = vrot.slane %v3202_v61, 9 }
 0x35c   :  { %v3854_v7 = vmax.f32 %v3195_v40, %v8923_v18  ;;  %v3205_v53 = vcombine.high %v2645_v2, %v2645_v2  ;;  %v3212_v15 = vrot.slane %v2645_v2, %v11655_v57  ;;  %v4988_v62 = vsel %vm4475_vm14, %v4987_v4, %v4986_v17 }
 0x35d   :  { %v13296_v11 = vsel %vm4475_vm14, %v5270_v0, %v5269_v42  ;;  %v8926_v25 = vrot.slane %v3204_v5, 9  ;;  %v3855_v56 = vmax.f32 %v3203_v54, %v8924_v13  ;;  %v3856_v8 = vmax.f32 %v3202_v61, %v8925_v21 }
 0x35e   :  { %v9464_v35 = vpack.c.bf16 %v3854_v7, %v3854_v7  ;;  %v13299_v43 = vrot.slane %v3205_v53, %v11655_v57  ;;  %v3220_v37 = vcombine.high %v3212_v15, %v3212_v15  ;;  %v8927_v28 = vrot.slane %v3212_v15, 9 }
 0x35f   :  { %v4990_v26 = vsel %vm4478_vm15, %v4989_v41, %v4988_v62  ;;  %v3857_v40 = vmax.f32 %v3204_v5, %v8926_v25  ;;  %v9465_v18 = vpack.c.bf16 %v3855_v56, %v3855_v56  ;;  %v9466_v58 = vpack.c.bf16 %v3856_v8, %v3856_v8 }
 0x360   :  { %v13302_v2 = vunpack.c.l.b16 %v9464_v35  ;;  %v8928_v4 = vrot.slane %v3220_v37, 9  ;;  %v3858_v42 = vmax.f32 %v3212_v15, %v8927_v28  ;;  %v5058_v0 = vpack.c.b16 %v4990_v26, %v4990_v26 }
 0x361   :  { %v9467_v54 = vpack.c.bf16 %v3857_v40, %v3857_v40  ;;  %v13305_v61 = vunpack.c.l.b16 %v9465_v18  ;;  %v13307_v13 = vunpack.c.l.b16 %v9466_v58  ;;  %v3119_v53 = vcombine.high %v12990_v32, %v12990_v32 }
 0x362   :  { %v4662_v21 = vrot.slane %v13302_v2, 7  ;;  %v13310_v7 = vmax.f32 %v3220_v37, %v8928_v4  ;;  %v9468_v41 = vpack.c.bf16 %v3858_v42, %v3858_v42  ;;  %5085 = vrot.lane.b32.xlu1 %v5058_v0, %s10208_s29  ;;  %v15303_v37 = vrot.slane %v12990_v32, 9 }
 0x363   :  { %v13317_v15 = vunpack.c.l.b16 %v9467_v54  ;;  %v4663_v62 = vrot.slane %v13305_v61, 6  ;;  %v5308_v25 = vrot.slane %v13307_v13, 7  ;;  %v8906_v35 = vrot.slane %v3119_v53, 9 }
 0x364   :  { %v13324_v8 = vunpack.c.l.b16 %v9468_v41  ;;  %v3836_v28 = vmax.f32 %v12990_v32, %v15303_v37  ;;  %v15304_v32 = vpack.c.bf16 %v13011_v27, %v13011_v27  ;;  %v4995_v42 = vrot.slane %v12985_v22, 5 }
 0x365   :  { %v13330_v26 = vsel %vm4463_vm9, %v4663_v62, %v4662_v21  ;;  %v5309_v18 = vsel %vm4823_vm10, %v5308_v25, %v13305_v61  ;;  %v5310_v4 = vrot.slane %v13317_v15, 6  ;;  %v3837_v54 = vmax.f32 %v3119_v53, %v8906_v35 }
 0x366   :  { %v9449_v41 = vpack.c.bf16 %v3836_v28, %v3836_v28  ;;  %v13344_v21 = vunpack.c.l.b16 %v15304_v32  ;;  %v4991_v62 = vrot.slane %v12972_v44, 7  ;;  %v4993_v25 = vrot.slane %v12983_v39, 6 }
 0x367   :  { %v13339_v58 = vsel %vm4463_vm9, %v5310_v4, %v5309_v18  ;;  %v9483_v40 = vpack.c.bf16 %v3837_v54, %v3837_v54  ;;  %v4997_v53 = vrot.slane %v13019_v47, 4  ;;  %v15305_v27 = vrot.slane %v13019_v47, 5 }
 0x368   :  { %v13348_v37 = vunpack.c.l.b16 %v9449_v41  ;;  %v4992_v35 = vsel %vm4823_vm10, %v4991_v62, %v12970_v36  ;;  %v4999_v28 = vrot.slane %v13344_v21, 3  ;;  %v5278_v44 = vrot.slane %v13344_v21, 4 }
 0x369   :  { %v5277_v18 = vsel %vm4466_vm11, %v15305_v27, %v13009_v63  ;;  %v4818_v4 = vunpack.c.l.b16 %v9483_v40  ;;  %v4994_v41 = vsel %vm4463_vm9, %v4993_v25, %v4992_v35  ;;  %v3153_v62 = vcombine.high %v13097_v49, %v13097_v49 }
 0x36a   :  { %v5001_v54 = vrot.slane %v13348_v37, 2  ;;  %v5280_v32 = vrot.slane %v13348_v37, 3  ;;  %v4996_v5 = vsel %vm4466_vm11, %v4995_v42, %v4994_v41  ;;  %v5279_v36 = vsel %vm4469_vm12, %v5278_v44, %v5277_v18 }
 0x36b   :  { %v15306_v0 = vrot.slane %v13097_v49, 9  ;;  %v4998_v27 = vsel %vm4469_vm12, %v4997_v53, %v4996_v5  ;;  %v5003_v40 = vrot.slane %v4818_v4, 1  ;;  %v5282_v35 = vrot.slane %v4818_v4, 2 }
 0x36c   :  { %v5281_v25 = vsel %vm4472_vm13, %v5280_v32, %v5279_v36  ;;  %v5000_v56 = vsel %vm4472_vm13, %v4999_v28, %v4998_v27  ;;  %v8914_v17 = vrot.slane %v3153_v62, 9  ;;  %v15307_v42 = vpack.c.bf16 %v13101_v6, %v13101_v6 }
 0x36d   :  { %v3844_v63 = vmax.f32 %v13097_v49, %v15306_v0  ;;  %v5002_v44 = vsel %vm4475_vm14, %v5001_v54, %v5000_v56  ;;  %v13380_v41 = vsel %vm4475_vm14, %v5282_v35, %v5281_v25  ;;  %v5005_v49 = vrot.slane %v13117_v12, 7 }
 0x36e   :  { %v13376_v18 = vunpack.c.l.b16 %v15307_v42  ;;  %v5007_v5 = vrot.slane %v13119_v48, 6  ;;  %v5004_v0 = vsel %vm4478_vm15, %v5003_v40, %v5002_v44  ;;  %v3845_v28 = vmax.f32 %v3153_v62, %v8914_v17 }
 0x36f   :  { %v9456_v57 = vpack.c.bf16 %v3844_v63, %v3844_v63  ;;  %v5059_v6 = vpack.c.b16 %v5004_v0, %v5004_v0  ;;  %v5006_v32 = vsel %vm4823_vm10, %v5005_v49, %v13108_v46  ;;  %v5009_v56 = vrot.slane %v13128_v33, 5  ;;  %v15312_v0 = vld [vmem:[#allocation52_spill] sm:$0xff] }
 0x370   :  { %v5011_v54 = vrot.slane %v13112_v45, 4  ;;  %v9484_v36 = vpack.c.bf16 %v3845_v28, %v3845_v28  ;;  %v5008_v12 = vsel %vm4463_vm9, %v5007_v5, %v5006_v32  ;;  %v5013_v63 = vrot.slane %v13376_v18, 3  ;;  %v15311_v5 = vld [vmem:[#allocation55_spill] sm:$0xff] }
 0x371   :  { %v13387_v4 = vunpack.c.l.b16 %v9456_v57  ;;  %5087 = vrot.lane.b32.xlu0 %v5059_v6, %s10208_s29  ;;  %v5010_v57 = vsel %vm4466_vm11, %v5009_v56, %v5008_v12  ;;  %v15308_v17 = vrot.slane %v13112_v45, 5  ;;  %v5290_v62 = vrot.slane %v13376_v18, 4  ;;  %v15314_v6 = vld [vmem:[#allocation78_spill] sm:$0xff] }
 0x372   :  { %v4819_v25 = vunpack.c.l.b16 %v9484_v36  ;;  %v5012_v35 = vsel %vm4469_vm12, %v5011_v54, %v5010_v57  ;;  %v4474_v32 = vrot.slane %v15314_v6, 2 }
 0x373   :  { %v5015_v27 = vrot.slane %v13387_v4, 2  ;;  %v5289_v46 = vsel %vm4466_vm11, %v15308_v17, %v13152_v19  ;;  %v5292_v40 = vrot.slane %v13387_v4, 3  ;;  %v5014_v42 = vsel %vm4472_vm13, %v5013_v63, %v5012_v35  ;;  %v15319_v35 = vld [vmem:[#allocation53_spill] sm:$0xff] }
 0x374   :  { %v5291_v44 = vsel %vm4469_vm12, %v5290_v62, %v5289_v46  ;;  %v15313_v19 = vrot.slane %v15312_v0, 5  ;;  %v5017_v54 = vrot.slane %v4819_v25, 1  ;;  %v5294_v12 = vrot.slane %v4819_v25, 2  ;;  %v15318_v46 = vld [vmem:[#allocation79_spill] sm:$0xff] }
 0x375   :  { %v5016_v56 = vsel %vm4475_vm14, %v5015_v27, %v5014_v42  ;;  %v5293_v36 = vsel %vm4472_vm13, %v5292_v40, %v5291_v44  ;;  %v15315_v63 = vmov 0   ;;  %v15316_v27 = vld [vmem:[#allocation54_spill] sm:$0xff]  ;;  %v4477_v62 = vrot.slane %v15318_v46, 1 }
 0x376   :  { %v4467_v28 = vsel %vm4466_vm11, %v15313_v19, %v15311_v5  ;;  %3994 = vst.msk [vmem:[#allocation3 + $0x8] sm:$0xff] %vm13407_vm3, %v15315_v63  ;;  %3993 = vst.msk [vmem:[#allocation3] sm:$0xff] %vm13407_vm3, %v15315_v63  ;;  %v15317_v57 = vrot.slane %v15316_v27, 4  ;;  %v5018_v40 = vsel %vm4478_vm15, %v5017_v54, %v5016_v56  ;;  %v13484_v25 = vsel %vm4475_vm14, %v5294_v12, %v5293_v36 }
 0x377   :  { %3995 = vst.msk [vmem:[#allocation3 + $0x10] sm:$0xff] %vm13407_vm3, %v15315_v63  ;;  %3996 = vst.msk [vmem:[#allocation3 + $0x18] sm:$0xff] %vm13407_vm3, %v15315_v63  ;;  %v15320_v42 = vrot.slane %v15319_v35, 3  ;;  %v5060_v49 = vpack.c.b16 %v5018_v40, %v5018_v40  ;;  %v3187_v19 = vcombine.high %v13203_v59, %v13203_v59  ;;  %v15323_v56 = vrot.slane %v13203_v59, 9 }
 0x378   :  { %3997 = vst.msk [vmem:[#allocation3 + $0x20] sm:$0xff] %vm13407_vm3, %v15315_v63  ;;  %3998 = vst.msk [vmem:[#allocation3 + $0x28] sm:$0xff] %vm13407_vm3, %v15315_v63  ;;  %v4470_v17 = vsel %vm4469_vm12, %v15317_v57, %v4467_v28  ;;  %v15324_v36 = vpack.c.bf16 %v13212_v52, %v13212_v52 }
 0x379   :  { %3999 = vst.msk [vmem:[#allocation3 + $0x30] sm:$0xff] %vm13407_vm3, %v15315_v63  ;;  %4000 = vst.msk [vmem:[#allocation3 + $0x38] sm:$0xff] %vm13407_vm3, %v15315_v63  ;;  %v4473_v44 = vsel %vm4472_vm13, %v15320_v42, %v4470_v17  ;;  %v3852_v54 = vmax.f32 %v13203_v59, %v15323_v56  ;;  %5089 = vrot.lane.b32.xlu1 %v5060_v49, %s10208_s29  ;;  %v8922_v57 = vrot.slane %v3187_v19, 9  ;;  %v5021_v17 = vrot.slane %v13218_v51, 6  ;;  %v5064_v42 = vpop.permute.xlu0 %5063 }
 0x37a   :  { %4001 = vst.msk [vmem:[#allocation3 + $0x40] sm:$0xff] %vm13407_vm3, %v15315_v63  ;;  %4002 = vst.msk [vmem:[#allocation3 + $0x48] sm:$0xff] %vm13407_vm3, %v15315_v63  ;;  %v4476_v0 = vsel %vm4475_vm14, %v4474_v32, %v4473_v44  ;;  %v13507_v12 = vunpack.c.l.b16 %v15324_v36  ;;  %v5019_v32 = vrot.slane %v13216_v29, 7  ;;  %v5023_v59 = vrot.slane %v13228_v20, 5 }
 0x37b   :  { %4003 = vst.msk [vmem:[#allocation3 + $0x50] sm:$0xff] %vm13407_vm3, %v15315_v63  ;;  %4004 = vst.msk [vmem:[#allocation3 + $0x58] sm:$0xff] %vm13407_vm3, %v15315_v63  ;;  %v4479_v28 = vsel %vm4478_vm15, %v4477_v62, %v4476_v0  ;;  %v9463_v46 = vpack.c.bf16 %v3852_v54, %v3852_v54  ;;  %v5025_v62 = vrot.slane %v13223_v24, 4  ;;  %v3853_v44 = vmax.f32 %v3187_v19, %v8922_v57  ;;  %v15328_v54 = vld [vmem:[#allocation88_spill] sm:$0xff] }
 0x37c   :  { %4005 = vst.msk [vmem:[#allocation3 + $0x60] sm:$0xff] %vm13407_vm3, %v15315_v63  ;;  %4006 = vst.msk [vmem:[#allocation3 + $0x68] sm:$0xff] %vm13407_vm3, %v15315_v63  ;;  %v5020_v52 = vsel %vm4823_vm10, %v5019_v32, %v13210_v50  ;;  %v5027_v29 = vrot.slane %v13507_v12, 3  ;;  %v15327_v0 = vrot.slane %v13223_v24, 5  ;;  %v5302_v56 = vrot.slane %v13507_v12, 4 }
 0x37d   :  { %4007 = vst.msk [vmem:[#allocation3 + $0x70] sm:$0xff] %vm13407_vm3, %v15315_v63  ;;  %4008 = vst.msk [vmem:[#allocation3 + $0x78] sm:$0xff] %vm13407_vm3, %v15315_v63  ;;  %v4710_v40 = vld [vmem:[#allocation3 + $0x8] sm:$0xf]  ;;  %v5354_v35 = vld [vmem:[#allocation3 + $0xc] sm:$0xf]  ;;  %v5022_v49 = vsel %vm4463_vm9, %v5021_v17, %v5020_v52  ;;  %v15329_v36 = vpack.c.b16 %v15328_v54, %v15328_v54  ;;  %v13535_v5 = vunpack.c.l.b16 %v9463_v46  ;;  %v9485_v57 = vpack.c.bf16 %v3853_v44, %v3853_v44 }
 0x37e   :  { %4009 = vst.msk [vmem:[#allocation3 + $0x80] sm:$0xff] %vm13407_vm3, %v15315_v63  ;;  %4010 = vst.msk [vmem:[#allocation3 + $0x88] sm:$0xff] %vm13407_vm3, %v15315_v63  ;;  %v5024_v19 = vsel %vm4466_vm11, %v5023_v59, %v5022_v49  ;;  %v15330_v52 = vld [vmem:[#allocation58_spill] sm:$0xff]  ;;  %v5357_v54 = vld [vmem:[#allocation3 + $0x14] sm:$0xf] }
 0x37f   :  { %4011 = vst.msk [vmem:[#allocation3 + $0x90] sm:$0xff] %vm13407_vm3, %v15315_v63  ;;  %4012 = vst.msk [vmem:[#allocation3 + $0x98] sm:$0xff] %vm13407_vm3, %v15315_v63  ;;  %v4675_v63 = vpack.c.b16 %v4479_v28, %v4479_v28  ;;  %v5301_v28 = vsel %vm4466_vm11, %v15327_v0, %v13251_v3  ;;  %v5355_v32 = vsel %vm13512_vm8, %v15329_v36, %v5354_v35  ;;  %v15331_v0 = vld [vmem:[#allocation56_spill] sm:$0xff]  ;;  %v5029_v35 = vrot.slane %v13535_v5, 2  ;;  %v15333_v49 = vld [vmem:[#allocation57_spill] sm:$0xff] }
 0x380   :  { %5356 = vst [vmem:[#allocation3 + $0xc] sm:$0xf] %v5355_v32  ;;  %v5026_v3 = vsel %vm4469_vm12, %v5025_v62, %v5024_v19  ;;  %v5303_v17 = vsel %vm4469_vm12, %v5302_v56, %v5301_v28  ;;  %v5304_v59 = vrot.slane %v13535_v5, 3  ;;  %v15334_v44 = vrot.slane %v15333_v49, 4  ;;  %v15335_v28 = vld [vmem:[#allocation59_spill] sm:$0xff]  ;;  %v15337_v32 = vld [vmem:[#allocation89_spill] sm:$0xff] }
 0x381   :  { %v4711_v50 = vsel %vm13497_vm7, %v4675_v63, %v4710_v40  ;;  %v15332_v63 = vrot.slane %v15331_v0, 5  ;;  %v5028_v46 = vsel %vm4472_vm13, %v5027_v29, %v5026_v3  ;;  %v15336_v56 = vrot.slane %v15335_v28, 3  ;;  %v15339_v3 = vld [vmem:[#allocation12_spill] sm:$0xff] }
 0x382   :  { %4712 = vst [vmem:[#allocation3 + $0x8] sm:$0xf] %v4711_v50  ;;  %v4820_v50 = vunpack.c.l.b16 %v9485_v57  ;;  %v4489_v19 = vrot.slane %v15337_v32, 2  ;;  %v5305_v29 = vsel %vm4472_vm13, %v5304_v59, %v5303_v17  ;;  %v15341_v17 = vrot.slane %v13299_v43, 9 }
 0x383   :  { %v4484_v40 = vsel %vm4466_vm11, %v15332_v63, %v15330_v52  ;;  %5112 = vst.msk [vmem:[#allocation3 + $0x8] sm:$0xf] %vm5111_vm5, %v5064_v42  ;;  %v15338_v52 = vld [vmem:[#allocation91_spill] sm:$0xff]  ;;  %v5030_v42 = vsel %vm4475_vm14, %v5029_v35, %v5028_v46  ;;  %v15340_v63 = vpack.c.b16 %v15339_v3, %v15339_v3  ;;  %v15342_v59 = vpack.c.bf16 %v13310_v7, %v13310_v7  ;;  %v5066_v3 = vpop.permute.xlu1 %5065 }
 0x384   :  { %v4486_v62 = vsel %vm4469_vm12, %v15334_v44, %v4484_v40  ;;  %v4491_v0 = vrot.slane %v15338_v52, 1  ;;  %v5031_v57 = vrot.slane %v4820_v50, 1  ;;  %v5306_v40 = vrot.slane %v4820_v50, 2  ;;  %v4713_v46 = vld [vmem:[#allocation3 + $0x10] sm:$0xf] }
 0x385   :  { %v4488_v36 = vsel %vm4472_vm13, %v15336_v56, %v4486_v62  ;;  %v5358_v49 = vsel %vm13512_vm8, %v15340_v63, %v5357_v54  ;;  %v3221_v62 = vcombine.high %v13299_v43, %v13299_v43  ;;  %v3860_v35 = vmax.f32 %v13299_v43, %v15341_v17 }
 0x386   :  { %v4490_v44 = vsel %vm4475_vm14, %v4489_v19, %v4488_v36  ;;  %5359 = vst [vmem:[#allocation3 + $0x14] sm:$0xf] %v5358_v49  ;;  %v13573_v54 = vunpack.c.l.b16 %v15342_v59  ;;  %v5033_v50 = vrot.slane %v13305_v61, 7  ;;  %v5032_v56 = vsel %vm4478_vm15, %v5031_v57, %v5030_v42  ;;  %v10049_v61 = vld [vmem:[%s14943_s5 + $0xc0] ss:$8 sps:$4 sm:$0xff]  }
 0x387   :  { %v4492_v28 = vsel %vm4478_vm15, %v4491_v0, %v4490_v44  ;;  %v13578_v36 = vsel %vm4475_vm14, %v5306_v40, %v5305_v29  ;;  %v8930_v19 = vrot.slane %v3221_v62, 9  ;;  %v5061_v52 = vpack.c.b16 %v5032_v56, %v5032_v56  ;;  %v13591_v63 = vld [vmem:[#allocation3 + $0x4] ss:$8 sps:$4 sm:$0xff]   ;;  %v15347_v56 = vld [vmem:[#allocation65_spill] sm:$0xff] }
 0x388   :  { %v4676_v32 = vpack.c.b16 %v4492_v28, %v4492_v28  ;;  %v9470_v43 = vpack.c.bf16 %v3860_v35, %v3860_v35  ;;  %v5034_v7 = vsel %vm4823_vm10, %v5033_v50, %v13302_v2  ;;  %15344 = vst [vmem:[#allocation37_spill] sm:$0xff] %v13591_v63  ;;  %v5035_v57 = vrot.slane %v13307_v13, 6  ;;  %9103 = vmatprep.mubr.msk.bf16.mxu1 %vm5656_vm2, %v13591_v63  ;;  %v15346_v50 = vld [vmem:[#allocation70_spill] sm:$0xff] }
 0x389   :  { %v3861_v49 = vmax.f32 %v3221_v62, %v8930_v19  ;;  %v15345_v40 = vrot.slane %v13324_v8, 5  ;;  %5091 = vrot.lane.b32.xlu0 %v5061_v52, %s10208_s29  ;;  %v5037_v28 = vrot.slane %v13317_v15, 5  ;;  %v5041_v17 = vrot.slane %v13573_v54, 3  ;;  %v10055_v62 = vld [vmem:[%s14943_s5 + $0xd4] ss:$8 sps:$4 sm:$0xff]   ;;  %9219 = vmatprep.mubr.msk.bf16.mxu0 %vm5656_vm2, %v13591_v63 }
 0x38a   :  { %v4714_v42 = vsel %vm13497_vm7, %v4676_v32, %v4713_v46  ;;  %v13589_v29 = vld [vmem:[#allocation3] ss:$8 sps:$4 sm:$0xff]   ;;  %v13599_v2 = vunpack.c.l.b16 %v9470_v43  ;;  %v5039_v46 = vrot.slane %v13324_v8, 4  ;;  %v5036_v35 = vsel %vm4463_vm9, %v5035_v57, %v5034_v7  ;;  %v5360_v57 = vld [vmem:[#allocation3 + $0x1c] sm:$0xf] }
 0x38b   :  { %15343 = vst [vmem:[#allocation40_spill] sm:$0xff] %v13589_v29  ;;  %v5313_v44 = vsel %vm4466_vm11, %v15345_v40, %v13339_v58  ;;  %4715 = vst [vmem:[#allocation3 + $0x10] sm:$0xf] %v4714_v42  ;;  %v9486_v58 = vpack.c.bf16 %v3861_v49, %v3861_v49  ;;  %v5314_v59 = vrot.slane %v13573_v54, 4  ;;  %v15348_v32 = vrot.slane %v15347_v56, 5  ;;  %5720 = vmatmul.mubr.bf16.vlgmr.msra.gmra.mrb[60].mxu1 %v13589_v29  ;;  %v15349_v42 = vld [vmem:[#allocation67_spill] sm:$0xff] }
 0x38c   :  { %5113 = vst.msk [vmem:[#allocation3 + $0x10] sm:$0xf] %vm5111_vm5, %v5066_v3  ;;  %6260 = vmatmul.mubr.bf16.vlgmr.msra.gmra.mrb[156].mxu0 %v13589_v29  ;;  %v5038_v52 = vsel %vm4466_vm11, %v5037_v28, %v5036_v35  ;;  %v5043_v3 = vrot.slane %v13599_v2, 2  ;;  %v5316_v43 = vrot.slane %v13599_v2, 3  ;;  %v15350_v49 = vrot.slane %v15349_v42, 4  ;;  %5958 = vmatpush1.bf16.msra.mxu1 %v10049_v61 }
 0x38d   :  { %v4497_v19 = vsel %vm4466_vm11, %v15348_v32, %v15346_v50  ;;  %v4821_v40 = vunpack.c.l.b16 %v9486_v58  ;;  %v5040_v56 = vsel %vm4469_vm12, %v5039_v46, %v5038_v52  ;;  %v5315_v50 = vsel %vm4469_vm12, %v5314_v59, %v5313_v44  ;;  %v15351_v32 = vld [vmem:[#allocation73_spill] sm:$0xff]  ;;  %v10053_v28 = vld [vmem:[%s14943_s5 + $0xd0] ss:$8 sps:$4 sm:$0xff]   ;;  %5959 = vmatprep.subr.bf16.mxu1 %v10055_v62  ;;  %v10058_v44 = vld [vmem:[%s14943_s5 + $0xe4] ss:$8 sps:$4 sm:$0xff]  }
 0x38e   :  { %v4499_v7 = vsel %vm4469_vm12, %v15350_v49, %v4497_v19  ;;  %v15352_v0 = vrot.slane %v15351_v32, 3  ;;  %v5042_v35 = vsel %vm4472_vm13, %v5041_v17, %v5040_v56  ;;  %v5317_v42 = vsel %vm4472_vm13, %v5316_v43, %v5315_v50  ;;  %v15353_v19 = vld [vmem:[#allocation14_spill] sm:$0xff]  ;;  %v15354_v58 = vld [vmem:[#allocation64_spill] sm:$0xff] }
 0x38f   :  { %v4502_v49 = vrot.slane %v15353_v19, 2  ;;  %v4504_v29 = vrot.slane %v15354_v58, 1  ;;  %v5045_v61 = vrot.slane %v4821_v40, 1  ;;  %v5318_v46 = vrot.slane %v4821_v40, 2  ;;  %v15355_v59 = vld [vmem:[#allocation98_spill] sm:$0xff]  ;;  %v15360_v32 = vld [vmem:[#allocation68_spill] sm:$0xff] }
 0x390   :  { %v4501_v53 = vsel %vm4472_vm13, %v15352_v0, %v4499_v7  ;;  %v5044_v0 = vsel %vm4475_vm14, %v5043_v3, %v5042_v35  ;;  %v15356_v52 = vpack.c.b16 %v15355_v59, %v15355_v59  ;;  %v15357_v7 = vld [vmem:[#allocation76_spill] sm:$0xff]  ;;  %v15358_v56 = vld [vmem:[#allocation74_spill] sm:$0xff]  ;;  %v4515_v19 = vrot.slane %v15360_v32, 2  ;;  %v15361_v58 = vld [vmem:[#allocation13_spill] sm:$0xff]  ;;  %5960 = vmatpush1.bf16.msra.mxu1 %v10053_v28  ;;  %v5068_v28 = vpop.permute.xlu0 %5067 }
 0x391   :  { %v4503_v43 = vsel %vm4475_vm14, %v4502_v49, %v4501_v53  ;;  %v15359_v62 = vrot.slane %v15358_v56, 5  ;;  %v4517_v3 = vrot.slane %v15361_v58, 1  ;;  %v5363_v35 = vld [vmem:[#allocation3 + $0x24] sm:$0xf]  ;;  %v5046_v40 = vsel %vm4478_vm15, %v5045_v61, %v5044_v0  ;;  %v15363_v53 = vld [vmem:[#allocation75_spill] sm:$0xff]  ;;  %v15365_v61 = vld [vmem:[#allocation80_spill] sm:$0xff]  ;;  %5961 = vmatprep.subr.bf16.mxu1 %v10058_v44 }
 0x392   :  { %v5361_v17 = vsel %vm13512_vm8, %v15356_v52, %v5360_v57  ;;  %v13656_v59 = vsel %vm4475_vm14, %v5318_v46, %v5317_v42  ;;  %v4505_v57 = vsel %vm4478_vm15, %v4504_v29, %v4503_v43  ;;  %v4716_v52 = vld [vmem:[#allocation3 + $0x18] sm:$0xf]  ;;  %v15364_v49 = vrot.slane %v15363_v53, 4  ;;  %v5366_v29 = vld [vmem:[#allocation3 + $0x2c] sm:$0xf]  ;;  %v15367_v32 = vld [vmem:[#allocation17_spill] sm:$0xff] }
 0x393   :  { %5362 = vst [vmem:[#allocation3 + $0x1c] sm:$0xf] %v5361_v17  ;;  %v4510_v50 = vsel %vm4466_vm11, %v15359_v62, %v15357_v7  ;;  %15362 = vst [vmem:[#allocation42_spill] sm:$0xff] %v13656_v59  ;;  %v10056_v7 = vld [vmem:[%s14943_s5 + $0xe0] ss:$8 sps:$4 sm:$0xff]   ;;  %v5062_v56 = vpack.c.b16 %v5046_v40, %v5046_v40  ;;  %v4677_v0 = vpack.c.b16 %v4505_v57, %v4505_v57  ;;  %v15366_v42 = vrot.slane %v15365_v61, 3 }
 0x394   :  { %v4512_v17 = vsel %vm4469_vm12, %v15364_v49, %v4510_v50  ;;  %v10064_v43 = vld [vmem:[%s14943_s5 + $0xf4] ss:$8 sps:$4 sm:$0xff]   ;;  %v15368_v58 = vpack.c.b16 %v15367_v32, %v15367_v32  ;;  %v15369_v57 = vld [vmem:[#allocation86_spill] sm:$0xff]  ;;  %v15372_v61 = vld [vmem:[#allocation71_spill] sm:$0xff]  ;;  %5962 = vmatpush1.bf16.msra.mxu1 %v10056_v7  ;;  %vm7366_vm9 = vcmask 228352  }
 0x395   :  { %v4514_v46 = vsel %vm4472_vm13, %v15366_v42, %v4512_v17  ;;  %v15370_v53 = vld [vmem:[#allocation84_spill] sm:$0xff]  ;;  %v4528_v44 = vrot.slane %v15372_v61, 2  ;;  %5093 = vrot.lane.b32.xlu1 %v5062_v56, %s10208_s29  ;;  %v4717_v42 = vsel %vm13497_vm7, %v4677_v0, %v4716_v52  ;;  %v15373_v32 = vld [vmem:[#allocation85_spill] sm:$0xff]  ;;  %v15380_v0 = vld [vmem:[#allocation10_spill] sm:$0xff]  ;;  %5963 = vmatprep.subr.bf16.mxu1 %v10064_v43 }
 0x396   :  { %v4516_v50 = vsel %vm4475_vm14, %v4515_v19, %v4514_v46  ;;  %v5364_v40 = vsel %vm13512_vm8, %v15368_v58, %v5363_v35  ;;  %v15371_v49 = vrot.slane %v15370_v53, 5  ;;  %v4719_v46 = vld [vmem:[#allocation3 + $0x20] sm:$0xf]  ;;  %v15374_v62 = vrot.slane %v15373_v32, 4  ;;  %v15375_v58 = vld [vmem:[#allocation15_spill] sm:$0xff]  ;;  %v15378_v59 = vld [vmem:[#allocation20_spill] sm:$0xff] }
 0x397   :  { %v4518_v19 = vsel %vm4478_vm15, %v4517_v3, %v4516_v50  ;;  %5365 = vst [vmem:[#allocation3 + $0x24] sm:$0xf] %v5364_v40  ;;  %v4530_v63 = vrot.slane %v15375_v58, 1  ;;  %v5369_v53 = vld [vmem:[#allocation3 + $0x34] sm:$0xf]  ;;  %v15379_v52 = vpack.c.b16 %v15378_v59, %v15378_v59  ;;  %v15381_v50 = vld [vmem:[#allocation94_spill] sm:$0xff] }
 0x398   :  { %v4523_v17 = vsel %vm4466_vm11, %v15371_v49, %v15369_v57  ;;  %4718 = vst [vmem:[#allocation3 + $0x18] sm:$0xf] %v4717_v42  ;;  %v4678_v57 = vpack.c.b16 %v4518_v19, %v4518_v19  ;;  %v15376_v49 = vld [vmem:[#allocation87_spill] sm:$0xff]  ;;  %v15382_v40 = vrot.slane %v15381_v50, 5  ;;  %v5070_v42 = vpop.permute.xlu1 %5069  ;;  %v15383_v59 = vld [vmem:[#allocation61_spill] sm:$0xff] }
 0x399   :  { %v4525_v35 = vsel %vm4469_vm12, %v15374_v62, %v4523_v17  ;;  %v15377_v61 = vrot.slane %v15376_v49, 3  ;;  %v5367_v3 = vsel %vm13512_vm8, %v15379_v52, %v5366_v29  ;;  %v10062_v17 = vld [vmem:[%s14943_s5 + $0xf0] ss:$8 sps:$4 sm:$0xff]   ;;  %5114 = vst.msk [vmem:[#allocation3 + $0x18] sm:$0xf] %vm5111_vm5, %v5068_v28  ;;  %v15384_v32 = vrot.slane %v15383_v59, 4 }
 0x39a   :  { %v4536_v62 = vsel %vm4466_vm11, %v15382_v40, %v15380_v0  ;;  %5368 = vst [vmem:[#allocation3 + $0x2c] sm:$0xf] %v5367_v3  ;;  %v15386_v49 = vld [vmem:[#allocation22_spill] sm:$0xff]  ;;  %v5372_v52 = vld [vmem:[#allocation3 + $0x3c] sm:$0xf]  ;;  %v4720_v28 = vsel %vm13497_vm7, %v4678_v57, %v4719_v46  ;;  %v15387_v3 = vld [vmem:[#allocation60_spill] sm:$0xff]  ;;  %5964 = vmatpush1.bf16.msra.mxu1 %v10062_v17 }
 0x39b   :  { %v4527_v56 = vsel %vm4472_vm13, %v15377_v61, %v4525_v35  ;;  %v4538_v29 = vsel %vm4469_vm12, %v15384_v32, %v4536_v62  ;;  %v15385_v35 = vld [vmem:[#allocation18_spill] sm:$0xff]  ;;  %v4543_v61 = vrot.slane %v15386_v49, 1  ;;  %v15388_v0 = vrot.slane %v15387_v3, 3  ;;  %v15389_v40 = vld [vmem:[#allocation19_spill] sm:$0xff]  ;;  %4721 = vst [vmem:[#allocation3 + $0x20] sm:$0xf] %v4720_v28  ;;  %v5072_v3 = vpop.permute.xlu0 %5071 }
 0x39c   :  { %v4529_v19 = vsel %vm4475_vm14, %v4528_v44, %v4527_v56  ;;  %v4541_v58 = vrot.slane %v15385_v35, 2  ;;  %v10067_v7 = vld [vmem:[%s14943_s5 + $0x104] ss:$8 sps:$4 sm:$0xff]   ;;  %v4722_v56 = vld [vmem:[#allocation3 + $0x28] sm:$0xf]  ;;  %v15390_v62 = vpack.c.b16 %v15389_v40, %v15389_v40  ;;  %v15391_v35 = vld [vmem:[#allocation100_spill] sm:$0xff]  ;;  %v5074_v17 = vpop.permute.xlu1 %5073 }
 0x39d   :  { %v4531_v44 = vsel %vm4478_vm15, %v4530_v63, %v4529_v19  ;;  %v4540_v50 = vsel %vm4472_vm13, %v15388_v0, %v4538_v29  ;;  %v15392_v46 = vld [vmem:[#allocation96_spill] sm:$0xff]  ;;  %v15394_v19 = vld [vmem:[#allocation81_spill] sm:$0xff]  ;;  %5115 = vst.msk [vmem:[#allocation3 + $0x20] sm:$0xf] %vm5111_vm5, %v5070_v42  ;;  %v4725_v28 = vld [vmem:[#allocation3 + $0x30] sm:$0xf]  ;;  %5965 = vmatprep.subr.bf16.mxu1 %v10067_v7 }
 0x39e   :  { %v5370_v43 = vsel %vm13512_vm8, %v15390_v62, %v5369_v53  ;;  %v4679_v59 = vpack.c.b16 %v4531_v44, %v4531_v44  ;;  %v4542_v32 = vsel %vm4475_vm14, %v4541_v58, %v4540_v50  ;;  %v15393_v57 = vrot.slane %v15392_v46, 5  ;;  %v10065_v29 = vld [vmem:[%s14943_s5 + $0x100] ss:$8 sps:$4 sm:$0xff]   ;;  %v15395_v44 = vld [vmem:[#allocation99_spill] sm:$0xff]  ;;  %v15398_v62 = vld [vmem:[#allocation104_spill] sm:$0xff] }
 0x39f   :  { %5371 = vst [vmem:[#allocation3 + $0x34] sm:$0xf] %v5370_v43  ;;  %v4554_v49 = vrot.slane %v15394_v19, 2  ;;  %v4544_v53 = vsel %vm4478_vm15, %v4543_v61, %v4542_v32  ;;  %v15396_v58 = vrot.slane %v15395_v44, 4  ;;  %v15397_v50 = vld [vmem:[#allocation82_spill] sm:$0xff]  ;;  %v15399_v43 = vpack.c.b16 %v15398_v62, %v15398_v62  ;;  %v15400_v61 = vld [vmem:[#allocation97_spill] sm:$0xff]  ;;  %5966 = vmatpush1.bf16.msra.mxu1 %v10065_v29 }
 0x3a0   :  { %v4549_v63 = vsel %vm4466_vm11, %v15393_v57, %v15391_v35  ;;  %v4556_v40 = vrot.slane %v15397_v50, 1  ;;  %v5375_v46 = vld [vmem:[#allocation3 + $0x44] sm:$0xf]  ;;  %v4723_v42 = vsel %vm13497_vm7, %v4679_v59, %v4722_v56  ;;  %v4680_v57 = vpack.c.b16 %v4544_v53, %v4544_v53  ;;  %v15403_v44 = vld [vmem:[#allocation101_spill] sm:$0xff] }
 0x3a1   :  { %v4551_v0 = vsel %vm4469_vm12, %v15396_v58, %v4549_v63  ;;  %v5373_v35 = vsel %vm13512_vm8, %v15399_v43, %v5372_v52  ;;  %v15401_v32 = vrot.slane %v15400_v61, 3  ;;  %v15402_v63 = vld [vmem:[#allocation103_spill] sm:$0xff]  ;;  %v15404_v58 = vrot.slane %v15403_v44, 5  ;;  %v10073_v52 = vld [vmem:[%s14943_s5 + $0x114] ss:$8 sps:$4 sm:$0xff]   ;;  %v15405_v59 = vld [vmem:[#allocation102_spill] sm:$0xff] }
 0x3a2   :  { %5374 = vst [vmem:[#allocation3 + $0x3c] sm:$0xf] %v5373_v35  ;;  %4724 = vst [vmem:[#allocation3 + $0x28] sm:$0xf] %v4723_v42  ;;  %v15406_v53 = vrot.slane %v15405_v59, 4  ;;  %v15408_v35 = vld [vmem:[#allocation92_spill] sm:$0xff]  ;;  %v4726_v7 = vsel %vm13497_vm7, %v4680_v57, %v4725_v28  ;;  %5967 = vmatprep.subr.bf16.mxu1 %v10073_v52 }
 0x3a3   :  { %v4553_v19 = vsel %vm4472_vm13, %v15401_v32, %v4551_v0  ;;  %v4562_v50 = vsel %vm4466_vm11, %v15404_v58, %v15402_v63  ;;  %v15407_v0 = vld [vmem:[#allocation30_spill] sm:$0xff]  ;;  %v4569_v61 = vrot.slane %v15408_v35, 1  ;;  %v5378_v32 = vld [vmem:[#allocation3 + $0x5c] sm:$0xf]  ;;  %5116 = vst.msk [vmem:[#allocation3 + $0x28] sm:$0xf] %vm5111_vm5, %v5072_v3 }
 0x3a4   :  { %v4555_v56 = vsel %vm4475_vm14, %v4554_v49, %v4553_v19  ;;  %v4564_v62 = vsel %vm4469_vm12, %v15406_v53, %v4562_v50  ;;  %v4567_v43 = vrot.slane %v15407_v0, 2  ;;  %v4728_v42 = vld [vmem:[#allocation3 + $0x38] sm:$0xf]  ;;  %v15409_v44 = vld [vmem:[#allocation69_spill] sm:$0xff]  ;;  %v15411_v19 = vld [vmem:[#allocation27_spill] sm:$0xff] }
 0x3a5   :  { %v4557_v63 = vsel %vm4478_vm15, %v4556_v40, %v4555_v56  ;;  %v15410_v58 = vrot.slane %v15409_v44, 3  ;;  %v15412_v50 = vpack.c.b16 %v15411_v19, %v15411_v19  ;;  %v5381_v53 = vld [vmem:[#allocation3 + $0x64] sm:$0xf]  ;;  %v10071_v3 = vld [vmem:[%s14943_s5 + $0x110] ss:$8 sps:$4 sm:$0xff]   ;;  %v5076_v44 = vpop.permute.xlu0 %5075  ;;  %v15417_v29 = vld [vmem:[#allocation77_spill] sm:$0xff] }
 0x3a6   :  { %v13781_v0 = vld [vmem:[#allocation3 + $0x14] ss:$8 sps:$4 sm:$0xff]   ;;  %v13783_v28 = vld [vmem:[#allocation3 + $0x10] ss:$8 sps:$4 sm:$0xff]   ;;  %4727 = vst [vmem:[#allocation3 + $0x30] sm:$0xf] %v4726_v7  ;;  %v4681_v40 = vpack.c.b16 %v4557_v63, %v4557_v63  ;;  %5968 = vmatpush1.bf16.msra.mxu1 %v10071_v3 }
 0x3a7   :  { %v4566_v49 = vsel %vm4472_vm13, %v15410_v58, %v4564_v62  ;;  %v5376_v59 = vsel %vm13512_vm8, %v15412_v50, %v5375_v46  ;;  %v15413_v56 = vld [vmem:[#allocation24_spill] sm:$0xff]  ;;  %v15414_v62 = vrot.slane %v12522_v31, 5  ;;  %v4580_v46 = vrot.slane %v12903_v10, 2  ;;  %5117 = vst.msk [vmem:[#allocation3 + $0x30] sm:$0xf] %vm5111_vm5, %v5074_v17  ;;  %9104 = vmatprep.mubr.msk.bf16.mxu1 %vm5656_vm2, %v13781_v0  ;;  %9220 = vmatprep.mubr.msk.bf16.mxu0 %vm5656_vm2, %v13781_v0 }
 0x3a8   :  { %v4568_v57 = vsel %vm4475_vm14, %v4567_v43, %v4566_v49  ;;  %5377 = vst [vmem:[#allocation3 + $0x44] sm:$0xf] %v5376_v59  ;;  %v4731_v19 = vld [vmem:[#allocation3 + $0x40] sm:$0xf]  ;;  %v15415_v7 = vrot.slane %v12530_v60, 4  ;;  %v4582_v43 = vrot.slane %v12923_v14, 1  ;;  %v15416_v31 = vpack.c.b16 %v13046_v23, %v13046_v23  ;;  %5730 = vmatmul.mubr.bf16.gmra.mrb[64].mxu1 %v13783_v28  ;;  %6266 = vmatmul.mubr.bf16.gmra.mrb[160].mxu0 %v13783_v28 }
 0x3a9   :  { %v4575_v35 = vsel %vm4466_vm11, %v15414_v62, %v15413_v56  ;;  %v4570_v58 = vsel %vm4478_vm15, %v4569_v61, %v4568_v57  ;;  %v10076_v10 = vld [vmem:[%s14943_s5 + $0x124] ss:$8 sps:$4 sm:$0xff]   ;;  %v4729_v60 = vsel %vm13497_vm7, %v4681_v40, %v4728_v42  ;;  %v15418_v23 = vrot.slane %v15417_v29, 3  ;;  %v15419_v52 = vld [vmem:[#allocation36_spill] sm:$0xff]  ;;  %v15420_v59 = vld [vmem:[#allocation25_spill] sm:$0xff] }
 0x3aa   :  { %v4577_v63 = vsel %vm4469_vm12, %v15415_v7, %v4575_v35  ;;  %v5379_v49 = vsel %vm13512_vm8, %v15416_v31, %v5378_v32  ;;  %v4682_v14 = vpack.c.b16 %v4570_v58, %v4570_v58  ;;  %v4593_v61 = vrot.slane %v15419_v52, 2  ;;  %4730 = vst [vmem:[#allocation3 + $0x38] sm:$0xf] %v4729_v60  ;;  %v5078_v32 = vpop.permute.xlu1 %5077  ;;  %v15421_v57 = vld [vmem:[#allocation28_spill] sm:$0xff]  ;;  %v5384_v7 = vld [vmem:[#allocation3 + $0x6c] sm:$0xf]  ;;  %5969 = vmatprep.subr.bf16.mxu1 %v10076_v10 }
 0x3ab   :  { %v4579_v17 = vsel %vm4472_vm13, %v15418_v23, %v4577_v63  ;;  %5380 = vst [vmem:[#allocation3 + $0x5c] sm:$0xf] %v5379_v49  ;;  %v15422_v56 = vrot.slane %v15421_v57, 5  ;;  %v15423_v40 = vld [vmem:[#allocation16_spill] sm:$0xff]  ;;  %v15424_v35 = vpack.c.b16 %v13125_v34, %v13125_v34  ;;  %5118 = vst.msk [vmem:[#allocation3 + $0x38] sm:$0xf] %vm5111_vm5, %v5076_v44  ;;  %v5080_v57 = vpop.permute.xlu0 %5079 }
 0x3ac   :  { %v4581_v50 = vsel %vm4475_vm14, %v4580_v46, %v4579_v17  ;;  %v4595_v62 = vrot.slane %v15423_v40, 1  ;;  %v4732_v63 = vsel %vm13497_vm7, %v4682_v14, %v4731_v19  ;;  %v4734_v31 = vld [vmem:[#allocation3 + $0x58] sm:$0xf]  ;;  %v15425_v49 = vld [vmem:[#allocation90_spill] sm:$0xff]  ;;  %v15428_v34 = vrot.slane %v12769_v16, 5  ;;  %v15429_v44 = vld [vmem:[#allocation105_spill] sm:$0xff] }
 0x3ad   :  { %v4588_v42 = vsel %vm4466_vm11, %v15422_v56, %v15420_v59  ;;  %v5382_v58 = vsel %vm13512_vm8, %v15424_v35, %v5381_v53  ;;  %v4583_v46 = vsel %vm4478_vm15, %v4582_v43, %v4581_v50  ;;  %v15426_v60 = vrot.slane %v15425_v49, 4  ;;  %v15427_v23 = vld [vmem:[#allocation32_spill] sm:$0xff]  ;;  %4733 = vst [vmem:[#allocation3 + $0x40] sm:$0xf] %v4732_v63  ;;  %v10074_v59 = vld [vmem:[%s14943_s5 + $0x120] ss:$8 sps:$4 sm:$0xff]  }
 0x3ae   :  { %5383 = vst [vmem:[#allocation3 + $0x64] sm:$0xf] %v5382_v58  ;;  %v4601_v17 = vsel %vm4466_vm11, %v15428_v34, %v15427_v23  ;;  %v4683_v53 = vpack.c.b16 %v4583_v46, %v4583_v46  ;;  %v15430_v52 = vrot.slane %v15429_v44, 3  ;;  %v15431_v43 = vrot.slane %v12778_v1, 4  ;;  %v10079_v16 = vld [vmem:[%s14943_s5 + $0x134] ss:$8 sps:$4 sm:$0xff]   ;;  %5970 = vmatpush1.bf16.msra.mxu1 %v10074_v59 }
 0x3af   :  { %v4590_v29 = vsel %vm4469_vm12, %v15426_v60, %v4588_v42  ;;  %v4606_v50 = vrot.slane %v13162_v38, 2  ;;  %v13852_v3 = vld [vmem:[#allocation3 + $0x24] ss:$8 sps:$4 sm:$0xff]   ;;  %5119 = vst.msk [vmem:[#allocation3 + $0x40] sm:$0xf] %vm5111_vm5, %v5078_v32  ;;  %v15432_v56 = vrot.slane %v15284_v55, 3  ;;  %5971 = vmatprep.subr.bf16.mxu1 %v10079_v16 }
 0x3b0   :  { %v4592_v19 = vsel %vm4472_vm13, %v15430_v52, %v4590_v29  ;;  %v4603_v14 = vsel %vm4469_vm12, %v15431_v43, %v4601_v17  ;;  %v15433_v42 = vld [vmem:[#allocation38_spill] sm:$0xff]  ;;  %v5387_v63 = vld [vmem:[#allocation3 + $0x74] sm:$0xf]  ;;  %v4735_v32 = vsel %vm13497_vm7, %v4683_v53, %v4734_v31  ;;  %v4737_v49 = vld [vmem:[#allocation3 + $0x60] sm:$0xf]  ;;  %v15437_v29 = vrot.slane %v12953_v30, 5  ;;  %9105 = vmatprep.mubr.msk.bf16.mxu1 %vm5656_vm2, %v13852_v3  ;;  %9221 = vmatprep.mubr.msk.bf16.mxu0 %vm5656_vm2, %v13852_v3  ;;  %v5082_v30 = vpop.permute.xlu1 %5081 }
 0x3b1   :  { %v4594_v1 = vsel %vm4475_vm14, %v4593_v61, %v4592_v19  ;;  %v4605_v38 = vsel %vm4472_vm13, %v15432_v56, %v4603_v14  ;;  %v4608_v40 = vrot.slane %v15433_v42, 1  ;;  %v15434_v35 = vld [vmem:[#allocation66_spill] sm:$0xff]  ;;  %v15436_v60 = vld [vmem:[#allocation72_spill] sm:$0xff]  ;;  %4736 = vst [vmem:[#allocation3 + $0x58] sm:$0xf] %v4735_v32  ;;  %v15438_v34 = vld [vmem:[#allocation63_spill] sm:$0xff]  ;;  %v15443_v56 = vpack.c.b16 %v13296_v11, %v13296_v11 }
 0x3b2   :  { %v15435_v10 = vpack.c.b16 %v15434_v35, %v15434_v35  ;;  %v13865_v46 = vld [vmem:[#allocation3 + $0x20] ss:$8 sps:$4 sm:$0xff]   ;;  %v4596_v61 = vsel %vm4478_vm15, %v4595_v62, %v4594_v1  ;;  %v4607_v55 = vsel %vm4475_vm14, %v4606_v50, %v4605_v38  ;;  %v4614_v23 = vsel %vm4466_vm11, %v15437_v29, %v15436_v60  ;;  %5120 = vst.msk [vmem:[#allocation3 + $0x58] sm:$0xf] %vm5111_vm5, %v5080_v57  ;;  %v15442_v50 = vld [vmem:[#allocation35_spill] sm:$0xff] }
 0x3b3   :  { %v4609_v31 = vsel %vm4478_vm15, %v4608_v40, %v4607_v55  ;;  %v4740_v62 = vld [vmem:[#allocation3 + $0x68] sm:$0xf]  ;;  %v15439_v17 = vrot.slane %v15438_v34, 4  ;;  %v4619_v44 = vrot.slane %v13259_v9, 2  ;;  %v4621_v1 = vrot.slane %v15442_v50, 1  ;;  %v15444_v35 = vld [vmem:[#allocation31_spill] sm:$0xff]  ;;  %5740 = vmatmul.mubr.bf16.gmra.mrb[68].mxu1 %v13865_v46  ;;  %6276 = vmatmul.mubr.bf16.gmra.mrb[164].mxu0 %v13865_v46 }
 0x3b4   :  { %v5385_v58 = vsel %vm13512_vm8, %v15435_v10, %v5384_v7  ;;  %v4684_v7 = vpack.c.b16 %v4596_v61, %v4596_v61  ;;  %v4685_v52 = vpack.c.b16 %v4609_v31, %v4609_v31  ;;  %v15440_v19 = vld [vmem:[#allocation34_spill] sm:$0xff]  ;;  %v5388_v38 = vsel %vm13512_vm8, %v15443_v56, %v5387_v63  ;;  %v5390_v42 = vld [vmem:[#allocation3 + $0x7c] sm:$0xf]  ;;  %v10077_v9 = vld [vmem:[%s14943_s5 + $0x130] ss:$8 sps:$4 sm:$0xff]  }
 0x3b5   :  { %5386 = vst [vmem:[#allocation3 + $0x6c] sm:$0xf] %v5385_v58  ;;  %v4616_v53 = vsel %vm4469_vm12, %v15439_v17, %v4614_v23  ;;  %v15441_v43 = vrot.slane %v15440_v19, 3  ;;  %5389 = vst [vmem:[#allocation3 + $0x74] sm:$0xf] %v5388_v38  ;;  %v15445_v10 = vrot.slane %v12983_v39, 5  ;;  %5972 = vmatpush1.bf16.msra.mxu1 %v10077_v9 }
 0x3b6   :  { %v4738_v57 = vsel %vm13497_vm7, %v4684_v7, %v4737_v49  ;;  %v4632_v58 = vrot.slane %v13344_v21, 2  ;;  %v5393_v63 = vld [vmem:[#allocation3 + $0x84] sm:$0xf]  ;;  %v13910_v32 = vld [vmem:[#allocation3 + $0x34] ss:$8 sps:$4 sm:$0xff]   ;;  %v4741_v39 = vsel %vm13497_vm7, %v4685_v52, %v4740_v62  ;;  %v15446_v21 = vrot.slane %v12985_v22, 4 }
 0x3b7   :  { %v4618_v14 = vsel %vm4472_vm13, %v15441_v43, %v4616_v53  ;;  %v4627_v11 = vsel %vm4466_vm11, %v15445_v10, %v15444_v35  ;;  %v10085_v59 = vld [vmem:[%s14943_s5 + $0x144] ss:$8 sps:$4 sm:$0xff]   ;;  %4739 = vst [vmem:[#allocation3 + $0x60] sm:$0xf] %v4738_v57  ;;  %v4743_v49 = vld [vmem:[#allocation3 + $0x70] sm:$0xf]  ;;  %v15448_v7 = vpack.c.b16 %v13380_v41, %v13380_v41  ;;  %9106 = vmatprep.mubr.msk.bf16.mxu1 %vm5656_vm2, %v13910_v32 }
 0x3b8   :  { %v4620_v40 = vsel %vm4475_vm14, %v4619_v44, %v4618_v14  ;;  %v4629_v16 = vsel %vm4469_vm12, %v15446_v21, %v4627_v11  ;;  %v4634_v55 = vrot.slane %v13348_v37, 1  ;;  %5121 = vst.msk [vmem:[#allocation3 + $0x60] sm:$0xf] %vm5111_vm5, %v5082_v30  ;;  %4742 = vst [vmem:[#allocation3 + $0x68] sm:$0xf] %v4741_v39  ;;  %v15447_v29 = vrot.slane %v13019_v47, 3  ;;  %9222 = vmatprep.mubr.msk.bf16.mxu0 %vm5656_vm2, %v13910_v32 }
 0x3b9   :  { %v4622_v61 = vsel %vm4478_vm15, %v4621_v1, %v4620_v40  ;;  %v5391_v31 = vsel %vm13512_vm8, %v15448_v7, %v5390_v42  ;;  %v15449_v62 = vld [vmem:[#allocation33_spill] sm:$0xff]  ;;  %v15450_v22 = vrot.slane %v13119_v48, 5  ;;  %v15451_v37 = vrot.slane %v13128_v33, 4  ;;  %v5396_v44 = vld [vmem:[#allocation3 + $0x8c] sm:$0xf]  ;;  %5973 = vmatprep.subr.bf16.mxu1 %v10085_v59 }
 0x3ba   :  { %v4686_v60 = vpack.c.b16 %v4622_v61, %v4622_v61  ;;  %v4631_v23 = vsel %vm4472_vm13, %v15447_v29, %v4629_v16  ;;  %5392 = vst [vmem:[#allocation3 + $0x7c] sm:$0xf] %v5391_v31  ;;  %v4645_v17 = vrot.slane %v13376_v18, 2  ;;  %v15452_v48 = vpack.c.b16 %v13484_v25, %v13484_v25  ;;  %v4746_v19 = vld [vmem:[#allocation3 + $0x78] sm:$0xf]  ;;  %v15454_v56 = vld [vmem:[#allocation95_spill] sm:$0xff] }
 0x3bb   :  { %v4640_v34 = vsel %vm4466_vm11, %v15450_v22, %v15449_v62  ;;  %v4633_v47 = vsel %vm4475_vm14, %v4632_v58, %v4631_v23  ;;  %v15453_v43 = vrot.slane %v13112_v45, 3  ;;  %v4647_v14 = vrot.slane %v13387_v4, 1  ;;  %v10083_v18 = vld [vmem:[%s14943_s5 + $0x140] ss:$8 sps:$4 sm:$0xff]   ;;  %v13956_v25 = vld [vmem:[#allocation3 + $0x30] ss:$8 sps:$4 sm:$0xff]  }
 0x3bc   :  { %v4642_v41 = vsel %vm4469_vm12, %v15451_v37, %v4640_v34  ;;  %v5394_v53 = vsel %vm13512_vm8, %v15452_v48, %v5393_v63  ;;  %v4744_v30 = vsel %vm13497_vm7, %v4686_v60, %v4743_v49  ;;  %v4635_v52 = vsel %vm4478_vm15, %v4634_v55, %v4633_v47  ;;  %v13964_v4 = vld [vmem:[#allocation3 + $0x44] ss:$8 sps:$4 sm:$0xff]   ;;  %v4749_v57 = vld [vmem:[#allocation3 + $0x80] sm:$0xf]  ;;  %v5399_v39 = vld [vmem:[#allocation3 + $0x94] sm:$0xf]  ;;  %5974 = vmatpush1.bf16.msra.mxu1 %v10083_v18 }
 0x3bd   :  { %v4644_v33 = vsel %vm4472_vm13, %v15453_v43, %v4642_v41  ;;  %5395 = vst [vmem:[#allocation3 + $0x84] sm:$0xf] %v5394_v53  ;;  %4745 = vst [vmem:[#allocation3 + $0x70] sm:$0xf] %v4744_v30  ;;  %v4687_v50 = vpack.c.b16 %v4635_v52, %v4635_v52  ;;  %v15455_v38 = vrot.slane %v13218_v51, 5  ;;  %v4658_v42 = vrot.slane %v13507_v12, 2  ;;  %5750 = vmatmul.mubr.bf16.gmra.mrb[72].mxu1 %v13956_v25 }
 0x3be   :  { %v4646_v1 = vsel %vm4475_vm14, %v4645_v17, %v4644_v33  ;;  %v15456_v40 = vrot.slane %v13228_v20, 4  ;;  %v4660_v10 = vrot.slane %v13535_v5, 1  ;;  %v15457_v11 = vpack.c.b16 %v13578_v36, %v13578_v36  ;;  %v10088_v20 = vld [vmem:[%s14943_s5 + $0x154] ss:$8 sps:$4 sm:$0xff]   ;;  %6286 = vmatmul.mubr.bf16.gmra.mrb[168].mxu0 %v13956_v25  ;;  %v4752_v55 = vld [vmem:[#allocation3 + $0x88] sm:$0xf]  ;;  %9107 = vmatprep.mubr.msk.bf16.mxu1 %vm5656_vm2, %v13964_v4 }
 0x3bf   :  { %v4653_v45 = vsel %vm4466_vm11, %v15455_v38, %v15454_v56  ;;  %v4648_v9 = vsel %vm4478_vm15, %v4647_v14, %v4646_v1  ;;  %v4747_v12 = vsel %vm13497_vm7, %v4687_v50, %v4746_v19  ;;  %v15458_v63 = vrot.slane %v13223_v24, 3  ;;  %v10086_v24 = vld [vmem:[%s14943_s5 + $0x150] ss:$8 sps:$4 sm:$0xff]   ;;  %9223 = vmatprep.mubr.msk.bf16.mxu0 %vm5656_vm2, %v13964_v4  ;;  %v15462_v31 = vld [vmem:[#allocation42_spill] sm:$0xff]  ;;  %5975 = vmatprep.subr.bf16.mxu1 %v10088_v20  ;;  %v10059_v27 = vld [vmem:[#allocation3 + $0x54] ss:$8 sps:$4 sm:$0xff]  }
 0x3c0   :  { %v4655_v35 = vsel %vm4469_vm12, %v15456_v40, %v4653_v45  ;;  %v5397_v51 = vsel %vm13512_vm8, %v15457_v11, %v5396_v44  ;;  %v4688_v58 = vpack.c.b16 %v4648_v9, %v4648_v9  ;;  %v15459_v5 = vrot.slane %v13307_v13, 5  ;;  %4748 = vst [vmem:[#allocation3 + $0x78] sm:$0xf] %v4747_v12  ;;  %v4755_v22 = vld [vmem:[#allocation3 + $0x90] sm:$0xf]  ;;  %5976 = vmatpush1.bf16.msra.mxu1 %v10086_v24  ;;  %v5084_v44 = vpop.permute.xlu0 %5083  ;;  %v15464_v9 = vld [vmem:[#allocation37_spill] sm:$0xff] }
 0x3c1   :  { %v4657_v59 = vsel %vm4472_vm13, %v15458_v63, %v4655_v35  ;;  %5398 = vst [vmem:[#allocation3 + $0x8c] sm:$0xf] %v5397_v51  ;;  %v15460_v49 = vrot.slane %v13317_v15, 4  ;;  %v4671_v16 = vrot.slane %v13573_v54, 2  ;;  %v15461_v60 = vrot.slane %v13324_v8, 3 }
 0x3c2   :  { %v4666_v36 = vsel %vm4466_vm11, %v15459_v5, %v13330_v26  ;;  %v4659_v61 = vsel %vm4475_vm14, %v4658_v42, %v4657_v59  ;;  %v4750_v13 = vsel %vm13497_vm7, %v4688_v58, %v4749_v57  ;;  %v4673_v15 = vrot.slane %v13599_v2, 1  ;;  %v10094_v54 = vld [vmem:[%s14943_s5 + $0x164] ss:$8 sps:$4 sm:$0xff]   ;;  %v10092_v37 = vld [vmem:[%s14943_s5 + $0x160] ss:$8 sps:$4 sm:$0xff]   ;;  %v15465_v57 = vld [vmem:[#allocation40_spill] sm:$0xff] }
 0x3c3   :  { %v4668_v21 = vsel %vm4469_vm12, %v15460_v49, %v4666_v36  ;;  %v4661_v26 = vsel %vm4478_vm15, %v4660_v10, %v4659_v61  ;;  %4751 = vst [vmem:[#allocation3 + $0x80] sm:$0xf] %v4750_v13  ;;  %v15463_v8 = vpack.c.b16 %v15462_v31, %v15462_v31  ;;  %v14024_v41 = vld [vmem:[#allocation3 + $0x40] ss:$8 sps:$4 sm:$0xff]   ;;  %5977 = vmatprep.subr.bf16.mxu1 %v10094_v54  ;;  %v10100_v48 = vld [vmem:[%s14943_s5 + $0x174] ss:$8 sps:$4 sm:$0xff]  }
 0x3c4   :  { %v4670_v29 = vsel %vm4472_vm13, %v15461_v60, %v4668_v21  ;;  %v4689_v23 = vpack.c.b16 %v4661_v26, %v4661_v26  ;;  %5978 = vmatpush1.bf16.msra.mxu1 %v10092_v37  ;;  %v10098_v53 = vld [vmem:[%s14943_s5 + $0x170] ss:$8 sps:$4 sm:$0xff]   ;;  %5122 = vst.msk [vmem:[#allocation3 + $0x68] sm:$0xf] %vm5111_vm5, %v5084_v44  ;;  %v10068_v30 = vld [vmem:[#allocation3 + $0x64] ss:$8 sps:$4 sm:$0xff]  }
 0x3c5   :  { %v4672_v7 = vsel %vm4475_vm14, %v4671_v16, %v4670_v29  ;;  %v5400_v2 = vsel %vm13512_vm8, %v15463_v8, %v5399_v39  ;;  %5760 = vmatmul.mubr.bf16.gmra.mrb[76].mxu1 %v14024_v41  ;;  %5979 = vmatprep.subr.bf16.mxu1 %v10100_v48  ;;  %v10061_v6 = vld [vmem:[#allocation3 + $0x50] ss:$8 sps:$4 sm:$0xff]   ;;  %v10080_v14 = vld [vmem:[#allocation3 + $0x74] ss:$8 sps:$4 sm:$0xff]   ;;  %vm8534_vm11 = vcmask 130048   ;;  %vm8524_vm12 = vcmask 123904  }
 0x3c6   :  { %v4674_v62 = vsel %vm4478_vm15, %v4673_v15, %v4672_v7  ;;  %5401 = vst [vmem:[#allocation3 + $0x94] sm:$0xf] %v5400_v2  ;;  %v4753_v34 = vsel %vm13497_vm7, %v4689_v23, %v4752_v55  ;;  %6296 = vmatmul.mubr.bf16.gmra.mrb[172].mxu0 %v14024_v41  ;;  %9108 = vmatprep.mubr.msk.bf16.mxu1 %vm5656_vm2, %v10059_v27  ;;  %v10101_v20 = vld [vmem:[%s14947_s9 + $0x14] ss:$8 sps:$4 sm:$0xff]   ;;  %v10103_v5 = vld [vmem:[%s14947_s9 + $0x10] ss:$8 sps:$4 sm:$0xff]  }
 0x3c7   :  { %v4690_v47 = vpack.c.b16 %v4674_v62, %v4674_v62  ;;  %4754 = vst [vmem:[#allocation3 + $0x88] sm:$0xf] %v4753_v34  ;;  %9224 = vmatprep.mubr.msk.bf16.mxu0 %vm5656_vm2, %v10059_v27 }
 0x3c8   :  { %5980 = vmatpush1.bf16.msra.mxu1 %v10098_v53  ;;  %v10089_v1 = vld [vmem:[#allocation3 + $0x84] ss:$8 sps:$4 sm:$0xff]  }
 0x3c9   :  { %v4756_v17 = vsel %vm13497_vm7, %v4690_v47, %v4755_v22  ;;  %9270 = vmatprep.subr.msk.bf16.mxu1 %vm7366_vm9, %v10101_v20  ;;  %v10107_v20 = vld [vmem:[%s14947_s9 + $0x24] ss:$8 sps:$4 sm:$0xff]  }
 0x3ca   :  { %4757 = vst [vmem:[#allocation3 + $0x90] sm:$0xf] %v4756_v17 }
 0x3cb   :  { %v10070_v52 = vld [vmem:[#allocation3 + $0x60] ss:$8 sps:$4 sm:$0xff]  }
 0x3cd   :  { %5766 = vmatmul.mubr.bf16.gmra.mrb[80].mxu1 %v10061_v6  ;;  %v10095_v45 = vld [vmem:[#allocation3 + $0x94] ss:$8 sps:$4 sm:$0xff]  }
 0x3ce   :  { %6306 = vmatmul.mubr.bf16.gmra.mrb[176].mxu0 %v10061_v6  ;;  %9109 = vmatprep.mubr.msk.bf16.mxu1 %vm5656_vm2, %v10068_v30 }
 0x3cf   :  { %9225 = vmatprep.mubr.msk.bf16.mxu0 %vm5656_vm2, %v10068_v30 }
 0x3d4   :  { %v5086_v19 = vpop.permute.xlu1 %5085 }
 0x3d5   :  { %5776 = vmatmul.mubr.bf16.gmra.mrb[84].mxu1 %v10070_v52  ;;  %5123 = vst.msk [vmem:[#allocation3 + $0x70] sm:$0xf] %vm5111_vm5, %v5086_v19 }
 0x3d6   :  { %6312 = vmatmul.mubr.bf16.gmra.mrb[180].mxu0 %v10070_v52  ;;  %9110 = vmatprep.mubr.msk.bf16.mxu1 %vm5656_vm2, %v10080_v14 }
 0x3d7   :  { %9226 = vmatprep.mubr.msk.bf16.mxu0 %vm5656_vm2, %v10080_v14 }
 0x3e3   :  { %v5088_v43 = vpop.permute.xlu0 %5087 }
 0x3e4   :  { %5124 = vst.msk [vmem:[#allocation3 + $0x78] sm:$0xf] %vm5111_vm5, %v5088_v43 }
 0x3eb   :  { %v5090_v33 = vpop.permute.xlu1 %5089  ;;  %v10082_v18 = vld [vmem:[#allocation3 + $0x70] ss:$8 sps:$4 sm:$0xff]  }
 0x3ec   :  { %5125 = vst.msk [vmem:[#allocation3 + $0x80] sm:$0xf] %vm5111_vm5, %v5090_v33  ;;  %5786 = vmatmul.mubr.bf16.gmra.mrb[88].mxu1 %v10082_v18  ;;  %6322 = vmatmul.mubr.bf16.gmra.mrb[184].mxu0 %v10082_v18 }
 0x3ed   :  { %9111 = vmatprep.mubr.msk.bf16.mxu1 %vm5656_vm2, %v10089_v1  ;;  %9227 = vmatprep.mubr.msk.bf16.mxu0 %vm5656_vm2, %v10089_v1 }
 0x3fb   :  { %v5092_v50 = vpop.permute.xlu0 %5091 }
 0x3fc   :  { %5126 = vst.msk [vmem:[#allocation3 + $0x88] sm:$0xf] %vm5111_vm5, %v5092_v50 }
 0x403   :  { %v10091_v56 = vld [vmem:[#allocation3 + $0x80] ss:$8 sps:$4 sm:$0xff]  }
 0x404   :  { %5796 = vmatmul.mubr.bf16.gmra.mrb[92].mxu1 %v10091_v56  ;;  %6332 = vmatmul.mubr.bf16.gmra.mrb[188].mxu0 %v10091_v56 }
 0x405   :  { %9112 = vmatprep.mubr.msk.bf16.mxu1 %vm5656_vm2, %v10095_v45  ;;  %9228 = vmatprep.mubr.msk.bf16.mxu0 %vm5656_vm2, %v10095_v45 }
 0x407   :  { %v5094_v38 = vpop.permute.xlu1 %5093 }
 0x408   :  { %5127 = vst.msk [vmem:[#allocation3 + $0x90] sm:$0xf] %vm5111_vm5, %v5094_v38 }
 0x40f   :  { %v10097_v42 = vld [vmem:[#allocation3 + $0x90] ss:$8 sps:$4 sm:$0xff]  }
 0x410   :  { %5806 = vmatmul.mubr.bf16.gmra.mrb[96].mxu1 %v10097_v42  ;;  %6342 = vmatmul.mubr.bf16.gmra.mrb[192].mxu0 %v10097_v42 }
 0x411   :  { %9161 = vmatprep.mubr.msk.bf16.mxu1 %vm5656_vm2, %v15464_v9 }
 0x418   :  { %5990 = vmatmul.mubr.bf16.vlgmr.msra.gmra.mrb[100].mxu1 %v15465_v57 }
 0x419   :  { %9162 = vmatprep.mubr.msk.bf16.mxu1 %vm5656_vm2, %v13781_v0  ;;  %7448 = vmatpush1.bf16.xpose.msra.mxu1 %v10103_v5 }
 0x41a   :  { %9276 = vmatprep.subr.msk.bf16.mxu1 %vm7366_vm9, %v10107_v20 }
 0x420   :  { %5998 = vmatmul.mubr.bf16.gmra.mrb[104].mxu1 %v13783_v28 }
 0x421   :  { %9163 = vmatprep.mubr.msk.bf16.mxu1 %vm5656_vm2, %v13852_v3 }
 0x428   :  { %6008 = vmatmul.mubr.bf16.gmra.mrb[108].mxu1 %v13865_v46 }
 0x429   :  { %9164 = vmatprep.mubr.msk.bf16.mxu1 %vm5656_vm2, %v13910_v32 }
 0x430   :  { %6018 = vmatmul.mubr.bf16.gmra.mrb[112].mxu1 %v13956_v25 }
 0x431   :  { %9165 = vmatprep.mubr.msk.bf16.mxu1 %vm5656_vm2, %v13964_v4 }
 0x438   :  { %6028 = vmatmul.mubr.bf16.gmra.mrb[116].mxu1 %v14024_v41 }
 0x439   :  { %9166 = vmatprep.mubr.msk.bf16.mxu1 %vm5656_vm2, %v10059_v27 }
 0x440   :  { %6036 = vmatmul.mubr.bf16.gmra.mrb[120].mxu1 %v10061_v6 }
 0x441   :  { %9167 = vmatprep.mubr.msk.bf16.mxu1 %vm5656_vm2, %v10068_v30 }
 0x448   :  { %6044 = vmatmul.mubr.bf16.gmra.mrb[124].mxu1 %v10070_v52 }
 0x449   :  { %9168 = vmatprep.mubr.msk.bf16.mxu1 %vm5656_vm2, %v10080_v14 }
 0x450   :  { %6054 = vmatmul.mubr.bf16.gmra.mrb[128].mxu1 %v10082_v18 }
 0x451   :  { %9169 = vmatprep.mubr.msk.bf16.mxu1 %vm5656_vm2, %v10089_v1 }
 0x458   :  { %6064 = vmatmul.mubr.bf16.gmra.mrb[132].mxu1 %v10091_v56 }
 0x459   :  { %9170 = vmatprep.mubr.msk.bf16.mxu1 %vm5656_vm2, %v10095_v45 }
 0x45e   :  { %v14072_v0 = vpop.f32.mrb[60].mxu1 }
 0x45f   :  { %v6261_v28 = vpop.f32.mrb[156].mxu0  ;;  %v14074_v3 = vpop.f32.mrb[61].mxu1 }
 0x460   :  { %v6262_v46 = vpop.f32.mrb[157].mxu0  ;;  %6074 = vmatmul.mubr.bf16.gmra.mrb[136].mxu1 %v10097_v42  ;;  %v14076_v32 = vpop.f32.mrb[62].mxu1  ;;  %v10104_v28 = vld [vmem:[%s14947_s9 + $0x4] ss:$8 sps:$4 sm:$0xff]  }
 0x461   :  { %v6263_v25 = vpop.f32.mrb[158].mxu0  ;;  %v14078_v4 = vpop.f32.mrb[63].mxu1  ;;  %v10106_v46 = vld [vmem:[%s14947_s9] ss:$8 sps:$4 sm:$0xff]   ;;  %9264 = vmatprep.subr.msk.bf16.mxu0 %vm7366_vm9, %v10104_v28 }
 0x462   :  { %v6264_v40 = vpop.f32.mrb[159].mxu0  ;;  %7374 = vmatpush1.bf16.xpose.msra.mxu0 %v10106_v46 }
 0x47b   :  { %v14080_v35 = vpop.f32.mrb[64].mxu1  ;;  %v14082_v10 = vpop.f32.mrb[160].mxu0 }
 0x47c   :  { %v14084_v11 = vpop.f32.mrb[65].mxu1  ;;  %v14086_v51 = vpop.f32.mrb[161].mxu0 }
 0x47d   :  { %v14088_v12 = vpop.f32.mrb[66].mxu1  ;;  %v14090_v58 = vpop.f32.mrb[162].mxu0 }
 0x47e   :  { %v14092_v63 = vpop.f32.mrb[67].mxu1  ;;  %v14094_v59 = vpop.f32.mrb[163].mxu0 }
 0x486   :  { %v14102_v36 = vpop.f32.mrb[68].mxu1  ;;  %v14104_v39 = vpop.f32.mrb[164].mxu0 }
 0x487   :  { %v14106_v61 = vpop.f32.mrb[69].mxu1  ;;  %v14108_v24 = vpop.f32.mrb[165].mxu0 }
 0x488   :  { %v14111_v49 = vpop.f32.mrb[70].mxu1  ;;  %v14113_v21 = vpop.f32.mrb[166].mxu0 }
 0x489   :  { %v14115_v16 = vpop.f32.mrb[71].mxu1  ;;  %v14117_v13 = vpop.f32.mrb[167].mxu0 }
 0x490   :  { %v14119_v26 = vpop.f32.mrb[72].mxu1 }
 0x491   :  { %v14121_v55 = vpop.f32.mrb[168].mxu0  ;;  %v14123_v60 = vpop.f32.mrb[73].mxu1 }
 0x492   :  { %v14125_v29 = vpop.f32.mrb[169].mxu0  ;;  %v14127_v15 = vpop.f32.mrb[74].mxu1 }
 0x493   :  { %v14129_v54 = vpop.f32.mrb[170].mxu0  ;;  %v14131_v23 = vpop.f32.mrb[75].mxu1 }
 0x494   :  { %v14133_v7 = vpop.f32.mrb[171].mxu0 }
 0x498   :  { %v5761_v31 = vpop.f32.mrb[76].mxu1 }
 0x499   :  { %v14135_v8 = vpop.f32.mrb[172].mxu0  ;;  %v5762_v2 = vpop.f32.mrb[77].mxu1 }
 0x49a   :  { %v14137_v62 = vpop.f32.mrb[173].mxu0  ;;  %v5763_v22 = vpop.f32.mrb[78].mxu1 }
 0x49b   :  { %v14139_v34 = vpop.f32.mrb[174].mxu0  ;;  %v5764_v47 = vpop.f32.mrb[79].mxu1 }
 0x49c   :  { %v14141_v37 = vpop.f32.mrb[175].mxu0 }
 0x4a0   :  { %v14143_v41 = vpop.f32.mrb[80].mxu1 }
 0x4a1   :  { %v6307_v27 = vpop.f32.mrb[176].mxu0  ;;  %v14145_v17 = vpop.f32.mrb[81].mxu1 }
 0x4a2   :  { %v6308_v48 = vpop.f32.mrb[177].mxu0  ;;  %v14147_v53 = vpop.f32.mrb[82].mxu1 }
 0x4a3   :  { %v6309_v6 = vpop.f32.mrb[178].mxu0  ;;  %v14149_v44 = vpop.f32.mrb[83].mxu1 }
 0x4a4   :  { %v6310_v30 = vpop.f32.mrb[179].mxu0 }
 0x4a8   :  { %v14151_v52 = vpop.f32.mrb[84].mxu1 }
 0x4a9   :  { %v14153_v19 = vpop.f32.mrb[180].mxu0  ;;  %v14155_v43 = vpop.f32.mrb[85].mxu1 }
 0x4aa   :  { %v14157_v33 = vpop.f32.mrb[181].mxu0  ;;  %v14159_v14 = vpop.f32.mrb[86].mxu1 }
 0x4ab   :  { %v14161_v18 = vpop.f32.mrb[182].mxu0  ;;  %v14163_v50 = vpop.f32.mrb[87].mxu1 }
 0x4ac   :  { %v14165_v1 = vpop.f32.mrb[183].mxu0 }
 0x4bf   :  { %v14167_v56 = vpop.f32.mrb[88].mxu1  ;;  %v14169_v38 = vpop.f32.mrb[184].mxu0 }
 0x4c0   :  { %15466 = vst [vmem:[#allocation39_spill] sm:$0xff] %v14167_v56  ;;  %v14171_v45 = vpop.f32.mrb[89].mxu1  ;;  %v14173_v42 = vpop.f32.mrb[185].mxu0 }
 0x4c1   :  { %15467 = vst [vmem:[#allocation44_spill] sm:$0xff] %v14171_v45  ;;  %v14175_v9 = vpop.f32.mrb[90].mxu1  ;;  %v14177_v57 = vpop.f32.mrb[186].mxu0 }
 0x4c2   :  { %15468 = vst [vmem:[#allocation41_spill] sm:$0xff] %v14175_v9  ;;  %15469 = vst [vmem:[#allocation46_spill] sm:$0xff] %v14177_v57  ;;  %v14185_v25 = vpop.f32.mrb[91].mxu1  ;;  %v14187_v40 = vpop.f32.mrb[187].mxu0 }
 0x4c3   :  { %15470 = vst [vmem:[#allocation43_spill] sm:$0xff] %v14185_v25  ;;  %15471 = vst [vmem:[#allocation93_spill] sm:$0xff] %v14187_v40 }
 0x4d7   :  { %v14194_v5 = vpop.f32.mrb[92].mxu1  ;;  %v14196_v31 = vpop.f32.mrb[188].mxu0 }
 0x4d8   :  { %15472 = vst [vmem:[#allocation62_spill] sm:$0xff] %v14194_v5  ;;  %15473 = vst [vmem:[#allocation48_spill] sm:$0xff] %v14196_v31  ;;  %v14198_v2 = vpop.f32.mrb[93].mxu1  ;;  %v14200_v22 = vpop.f32.mrb[189].mxu0 }
 0x4d9   :  { %15474 = vst [vmem:[#allocation21_spill] sm:$0xff] %v14198_v2  ;;  %15475 = vst [vmem:[#allocation26_spill] sm:$0xff] %v14200_v22  ;;  %v14202_v47 = vpop.f32.mrb[94].mxu1  ;;  %v14204_v27 = vpop.f32.mrb[190].mxu0  ;;  %v15484_v22 = vld [vmem:[#allocation50_spill] sm:$0xff] }
 0x4da   :  { %15476 = vst [vmem:[#allocation45_spill] sm:$0xff] %v14202_v47  ;;  %15477 = vst [vmem:[#allocation49_spill] sm:$0xff] %v14204_v27  ;;  %v14206_v48 = vpop.f32.mrb[95].mxu1  ;;  %v14208_v6 = vpop.f32.mrb[191].mxu0  ;;  %v14219_v47 = vsub.s32 0, %v15484_v22 }
 0x4db   :  { %15478 = vst [vmem:[#allocation83_spill] sm:$0xff] %v14206_v48  ;;  %15479 = vst [vmem:[#allocation23_spill] sm:$0xff] %v14208_v6  ;;  %v6416_v48 = vld [vmem:[%s14944_s6] sm:$0x3] }
 0x4e3   :  { %v5807_v30 = vpop.f32.mrb[96].mxu1  ;;  %v14210_v28 = vpop.f32.mrb[192].mxu0 }
 0x4e4   :  { %15480 = vst [vmem:[#allocation47_spill] sm:$0xff] %v14210_v28  ;;  %v5808_v46 = vpop.f32.mrb[97].mxu1  ;;  %v14212_v20 = vpop.f32.mrb[193].mxu0  ;;  %v6424_v30 = vsub.s32 1, %v15484_v22 }
 0x4e5   :  { %15481 = vst [vmem:[#allocation11_spill] sm:$0xff] %v14212_v20  ;;  %v5809_v5 = vpop.f32.mrb[98].mxu1  ;;  %v14214_v25 = vpop.f32.mrb[194].mxu0 }
 0x4e6   :  { %15482 = vst [vmem:[#allocation29_spill] sm:$0xff] %v14214_v25  ;;  %v5810_v2 = vpop.f32.mrb[99].mxu1  ;;  %v14216_v9 = vpop.f32.mrb[195].mxu0  ;;  %v14227_v5 = vrot.slane %v6416_v48, %v14219_v47  ;;  %v14230_v25 = vrot.slane %v6416_v48, %v6424_v30 }
 0x4e7   :  { %15483 = vst [vmem:[#allocation55_spill] sm:$0xff] %v14216_v9 }
 0x4eb   :  { %v5991_v27 = vpop.f32.mrb[100].mxu1 }
 0x4ec   :  { %v5992_v28 = vpop.f32.mrb[101].mxu1 }
 0x4ed   :  { %v5993_v46 = vpop.f32.mrb[102].mxu1  ;;  %v6492_v28 = vld [vmem:[%s14945_s7] sm:$0x3] }
 0x4ee   :  { %v6352_v20 = vadd.f32 %v5993_v46, %v14072_v0  ;;  %v5995_v2 = vpop.f32.mrb[103].mxu1 }
 0x4ef   :  { %v6353_v9 = vadd.f32 %v5995_v2, %v14074_v3  ;;  %v14241_v3 = vrot.slane %v6492_v28, %v14219_v47 }
 0x4f0   :  { %v6384_v27 = vadd.f32 %v6352_v20, %v14082_v10 }
 0x4f1   :  { %v6385_v6 = vadd.f32 %v6353_v9, %v14086_v51  ;;  %v6536_v51 = vld [vmem:[%s14946_s8] sm:$0x3] }
 0x4f2   :  { %v6428_v31 = vadd.f32 %v14227_v5, %v6384_v27  ;;  %v14249_v27 = vrot.slane %v6492_v28, %v6424_v30  ;;  %v14257_v57 = vrot.slane %v6536_v51, %v14219_v47 }
 0x4f3   :  { %v6429_v0 = vadd.f32 %v14230_v25, %v6385_v6  ;;  %v5999_v46 = vpop.f32.mrb[104].mxu1 }
 0x4f4   :  { %v6354_v45 = vadd.f32 %v5999_v46, %v14076_v32  ;;  %v6001_v40 = vpop.f32.mrb[105].mxu1  ;;  %v6460_v56 = vmax.f32 %v6428_v31, 0.0 }
 0x4f5   :  { %v6355_v10 = vadd.f32 %v6001_v40, %v14078_v4  ;;  %v6003_v48 = vpop.f32.mrb[106].mxu1  ;;  %v6461_v2 = vmax.f32 %v6429_v0, 0.0  ;;  %v14263_v0 = vrot.slane %v6536_v51, %v6424_v30 }
 0x4f6   :  { %v6386_v9 = vadd.f32 %v6354_v45, %v14090_v58  ;;  %v6356_v20 = vadd.f32 %v6003_v48, %v14080_v35  ;;  %v6005_v6 = vpop.f32.mrb[107].mxu1  ;;  %v6504_v40 = vmul.f32 %v14241_v3, %v6460_v56 }
 0x4f7   :  { %v6387_v32 = vadd.f32 %v6355_v10, %v14094_v59  ;;  %v6357_v31 = vadd.f32 %v6005_v6, %v14084_v11  ;;  %v6505_v59 = vmul.f32 %v14249_v27, %v6461_v2 }
 0x4f8   :  { %v6430_v46 = vadd.f32 %v14227_v5, %v6386_v9  ;;  %v6388_v4 = vadd.f32 %v6356_v20, %v14104_v39  ;;  %v6548_v20 = vadd.f32 %v14257_v57, %v6504_v40 }
 0x4f9   :  { %v6431_v58 = vadd.f32 %v14230_v25, %v6387_v32  ;;  %v6389_v35 = vadd.f32 %v6357_v31, %v14108_v24 }
 0x4fa   :  { %v6462_v45 = vmax.f32 %v6430_v46, 0.0  ;;  %v6432_v28 = vadd.f32 %v14227_v5, %v6388_v4 }
 0x4fb   :  { %v6463_v11 = vmax.f32 %v6431_v58, 0.0  ;;  %v6433_v10 = vadd.f32 %v14230_v25, %v6389_v35  ;;  %v6009_v39 = vpop.f32.mrb[108].mxu1  ;;  %v6549_v58 = vadd.f32 %v14263_v0, %v6505_v59 }
 0x4fc   :  { %v6506_v56 = vmul.f32 %v14241_v3, %v6462_v45  ;;  %v6358_v48 = vadd.f32 %v6009_v39, %v14088_v12  ;;  %v6011_v9 = vpop.f32.mrb[109].mxu1  ;;  %v6464_v6 = vmax.f32 %v6432_v28, 0.0 }
 0x4fd   :  { %v6507_v24 = vmul.f32 %v14249_v27, %v6463_v11  ;;  %v6359_v32 = vadd.f32 %v6011_v9, %v14092_v63  ;;  %v6013_v31 = vpop.f32.mrb[110].mxu1  ;;  %v6465_v51 = vmax.f32 %v6433_v10, 0.0 }
 0x4fe   :  { %v6550_v30 = vadd.f32 %v14257_v57, %v6506_v56  ;;  %v6390_v2 = vadd.f32 %v6358_v48, %v14113_v21  ;;  %v6360_v46 = vadd.f32 %v6013_v31, %v14102_v36  ;;  %v6015_v4 = vpop.f32.mrb[111].mxu1  ;;  %v6508_v21 = vmul.f32 %v14241_v3, %v6464_v6 }
 0x4ff   :  { %v6551_v12 = vadd.f32 %v14263_v0, %v6507_v24  ;;  %v6391_v40 = vadd.f32 %v6359_v32, %v14117_v13  ;;  %v6361_v35 = vadd.f32 %v6015_v4, %v14106_v61  ;;  %v6509_v59 = vmul.f32 %v14249_v27, %v6465_v51  ;;  %v15485_v32 = vld [vmem:[#allocation51_spill] sm:$0xff] }
 0x500   :  { %v14278_v45 = vmax.f32 %v6548_v20, %v6550_v30  ;;  %v6434_v63 = vadd.f32 %v14227_v5, %v6390_v2  ;;  %v6392_v28 = vadd.f32 %v6360_v46, %v14121_v55  ;;  %v6552_v31 = vadd.f32 %v14257_v57, %v6508_v21 }
 0x501   :  { %v6581_v11 = vmax.f32 %v6549_v58, %v6551_v12  ;;  %v6435_v36 = vadd.f32 %v14230_v25, %v6391_v40  ;;  %v6393_v10 = vadd.f32 %v6361_v35, %v14125_v29  ;;  %v6553_v35 = vadd.f32 %v14263_v0, %v6509_v59 }
 0x502   :  { %v6466_v39 = vmax.f32 %v6434_v63, 0.0  ;;  %v6436_v13 = vadd.f32 %v14227_v5, %v6392_v28 }
 0x503   :  { %v6612_v61 = vcombine.low %v14278_v45, %v6581_v11  ;;  %v6613_v56 = vcombine.high %v14278_v45, %v6581_v11  ;;  %v6467_v48 = vmax.f32 %v6435_v36, 0.0  ;;  %v6437_v9 = vadd.f32 %v14230_v25, %v6393_v10  ;;  %v6019_v55 = vpop.f32.mrb[112].mxu1 }
 0x504   :  { %v6510_v20 = vmul.f32 %v14241_v3, %v6466_v39  ;;  %v6362_v24 = vadd.f32 %v6019_v55, %v14111_v49  ;;  %v6021_v6 = vpop.f32.mrb[113].mxu1  ;;  %v6468_v51 = vmax.f32 %v6436_v13, 0.0 }
 0x505   :  { %v6620_v29 = vrot.slane %v6612_v61, %v15485_v32  ;;  %v6511_v30 = vmul.f32 %v14249_v27, %v6467_v48  ;;  %v6023_v2 = vpop.f32.mrb[114].mxu1  ;;  %v6469_v4 = vmax.f32 %v6437_v9, 0.0  ;;  %v6363_v12 = vadd.f32 %v6021_v6, %v14115_v16 }
 0x506   :  { %v6554_v46 = vadd.f32 %v14257_v57, %v6510_v20  ;;  %v6394_v58 = vadd.f32 %v6362_v24, %v14129_v54  ;;  %v6025_v40 = vpop.f32.mrb[115].mxu1  ;;  %v6364_v45 = vadd.f32 %v6023_v2, %v14119_v26  ;;  %v6512_v54 = vmul.f32 %v14241_v3, %v6468_v51 }
 0x507   :  { %v6555_v49 = vadd.f32 %v14263_v0, %v6511_v30  ;;  %v6365_v63 = vadd.f32 %v6025_v40, %v14123_v60  ;;  %v6395_v21 = vadd.f32 %v6363_v12, %v14133_v7  ;;  %v6513_v59 = vmul.f32 %v14249_v27, %v6469_v4 }
 0x508   :  { %v14302_v28 = vmax.f32 %v6552_v31, %v6554_v46  ;;  %v6438_v11 = vadd.f32 %v14227_v5, %v6394_v58  ;;  %v6396_v16 = vadd.f32 %v6364_v45, %v14135_v8  ;;  %v9229_v13 = vrot.slane %v6620_v29, 9 }
 0x509   :  { %v6583_v36 = vmax.f32 %v6553_v35, %v6555_v49  ;;  %v6397_v10 = vadd.f32 %v6365_v63, %v14137_v62  ;;  %v6439_v26 = vadd.f32 %v14230_v25, %v6395_v21  ;;  %v14318_v24 = vsub.s32 2, %v15484_v22 }
 0x50a   :  { %v6470_v39 = vmax.f32 %v6438_v11, 0.0  ;;  %v6440_v48 = vadd.f32 %v14227_v5, %v6396_v16  ;;  %v6556_v6 = vadd.f32 %v14257_v57, %v6512_v54  ;;  %v6884_v51 = vmax.f32 %v6620_v29, %v9229_v13 }
 0x50b   :  { %v6630_v60 = vcombine.low %v14302_v28, %v6583_v36  ;;  %v6631_v61 = vcombine.high %v14302_v28, %v6583_v36  ;;  %v6441_v7 = vadd.f32 %v14230_v25, %v6397_v10  ;;  %v6029_v9 = vpop.f32.mrb[116].mxu1  ;;  %v6471_v8 = vmax.f32 %v6439_v26, 0.0 }
 0x50c   :  { %v6514_v55 = vmul.f32 %v14241_v3, %v6470_v39  ;;  %v6366_v62 = vadd.f32 %v6029_v9, %v14127_v15  ;;  %v6031_v20 = vpop.f32.mrb[117].mxu1  ;;  %v6472_v31 = vmax.f32 %v6440_v48, 0.0  ;;  %v6628_v2 = vcombine.high %v6620_v29, %v6620_v29 }
 0x50d   :  { %v6033_v30 = vpop.f32.mrb[118].mxu1  ;;  %v6515_v4 = vmul.f32 %v14249_v27, %v6471_v8  ;;  %v6367_v12 = vadd.f32 %v6031_v20, %v14131_v23  ;;  %v6627_v15 = vrot.slane %v6613_v56, %v15485_v32  ;;  %v6557_v22 = vadd.f32 %v14263_v0, %v6513_v59 }
 0x50e   :  { %v6558_v46 = vadd.f32 %v14257_v57, %v6514_v55  ;;  %v6398_v58 = vadd.f32 %v6366_v62, %v14139_v34  ;;  %v6034_v40 = vpop.f32.mrb[119].mxu1  ;;  %v6473_v35 = vmax.f32 %v6441_v7, 0.0  ;;  %v6516_v28 = vmul.f32 %v14241_v3, %v6472_v31 }
 0x50f   :  { %v6559_v45 = vadd.f32 %v14263_v0, %v6515_v4  ;;  %v6399_v63 = vadd.f32 %v6367_v12, %v14141_v37  ;;  %v6951_v34 = vrot.slane %v6884_v51, %v14219_v47  ;;  %v6955_v23 = vrot.slane %v6884_v51, %v14318_v24 }
 0x510   :  { %v14327_v49 = vmax.f32 %v6556_v6, %v6558_v46  ;;  %v6442_v29 = vadd.f32 %v14227_v5, %v6398_v58  ;;  %v9230_v36 = vrot.slane %v6628_v2, 9  ;;  %v6517_v54 = vmul.f32 %v14249_v27, %v6473_v35 }
 0x511   :  { %v14335_v11 = vmax.f32 %v6557_v22, %v6559_v45  ;;  %v6443_v21 = vadd.f32 %v14230_v25, %v6399_v63  ;;  %v9231_v10 = vrot.slane %v6627_v15, 9  ;;  %v6560_v48 = vadd.f32 %v14257_v57, %v6516_v28 }
 0x512   :  { %v6474_v56 = vmax.f32 %v6442_v29, 0.0  ;;  %v7269_v9 = vpack.c.bf16 %v6955_v23, %v6955_v23  ;;  %v6885_v55 = vmax.f32 %v6628_v2, %v9230_v36  ;;  %v6629_v8 = vcombine.high %v6627_v15, %v6627_v15 }
 0x513   :  { %v6037_v16 = vpop.f32.mrb[120].mxu1  ;;  %v6648_v59 = vcombine.low %v14327_v49, %v14335_v11  ;;  %v6649_v37 = vcombine.high %v14327_v49, %v14335_v11  ;;  %v6475_v26 = vmax.f32 %v6443_v21, 0.0  ;;  %v7268_v31 = vpack.c.bf16 %v6951_v34, %v6951_v34 }
 0x514   :  { %v6518_v39 = vmul.f32 %v14241_v3, %v6474_v56  ;;  %v6038_v13 = vpop.f32.mrb[121].mxu1  ;;  %v6886_v30 = vmax.f32 %v6627_v15, %v9231_v10  ;;  %v14348_v51 = vrot.slane %v6630_v60, %v15485_v32  ;;  %v14351_v46 = vrot.slane %v6631_v61, %v15485_v32 }
 0x515   :  { %v6039_v7 = vpop.f32.mrb[122].mxu1  ;;  %v6519_v20 = vmul.f32 %v14249_v27, %v6475_v26  ;;  %v6561_v2 = vadd.f32 %v14263_v0, %v6517_v54  ;;  %v6963_v22 = vrot.slane %v6885_v55, %v14318_v24  ;;  %v14362_v35 = vunpack.c.l.b16 %v7269_v9 }
 0x516   :  { %v6562_v62 = vadd.f32 %v14257_v57, %v6518_v39  ;;  %v6041_v6 = vpop.f32.mrb[123].mxu1  ;;  %v6368_v4 = vadd.f32 %v6039_v7, %v14143_v41  ;;  %v9232_v61 = vrot.slane %v6629_v8, 9  ;;  %v14366_v41 = vunpack.c.l.b16 %v7268_v31 }
 0x517   :  { %v6369_v58 = vadd.f32 %v6041_v6, %v14145_v17  ;;  %v6563_v40 = vadd.f32 %v14263_v0, %v6519_v20  ;;  %v6959_v17 = vrot.slane %v6885_v55, %v14219_v47  ;;  %v6971_v29 = vrot.slane %v6886_v30, %v14318_v24 }
 0x518   :  { %v14356_v12 = vmax.f32 %v6560_v48, %v6562_v62  ;;  %v6400_v15 = vadd.f32 %v6368_v4, %v14153_v19  ;;  %v6967_v19 = vrot.slane %v6886_v30, %v14219_v47  ;;  %v7271_v54 = vpack.c.bf16 %v6963_v22, %v6963_v22 }
 0x519   :  { %v6401_v60 = vadd.f32 %v6369_v58, %v14157_v33  ;;  %v14364_v45 = vmax.f32 %v6561_v2, %v6563_v40  ;;  %v9233_v33 = vrot.slane %v14348_v51, 9  ;;  %v6887_v13 = vmax.f32 %v6629_v8, %v9232_v61 }
 0x51a   :  { %v6444_v63 = vadd.f32 %v14227_v5, %v6400_v15  ;;  %v7270_v55 = vpack.c.bf16 %v6959_v17, %v6959_v17  ;;  %v7273_v62 = vpack.c.bf16 %v6971_v29, %v6971_v29  ;;  %v14383_v20 = vrot.slane %v6648_v59, %v15485_v32 }
 0x51b   :  { %v6445_v28 = vadd.f32 %v14230_v25, %v6401_v60  ;;  %v6045_v34 = vpop.f32.mrb[124].mxu1  ;;  %v6666_v23 = vcombine.low %v14356_v12, %v14364_v45  ;;  %v6667_v56 = vcombine.high %v14356_v12, %v14364_v45  ;;  %v7272_v31 = vpack.c.bf16 %v6967_v19, %v6967_v19 }
 0x51c   :  { %v6370_v21 = vadd.f32 %v6045_v34, %v14147_v53  ;;  %v6047_v36 = vpop.f32.mrb[125].mxu1  ;;  %v6476_v16 = vmax.f32 %v6444_v63, 0.0  ;;  %v14393_v58 = vunpack.c.l.b16 %v7271_v54  ;;  %v6979_v59 = vrot.slane %v6887_v13, %v14318_v24 }
 0x51d   :  { %v6477_v10 = vmax.f32 %v6445_v28, 0.0  ;;  %v6371_v39 = vadd.f32 %v6047_v36, %v14149_v44  ;;  %v6049_v26 = vpop.f32.mrb[126].mxu1  ;;  %v14397_v2 = vunpack.c.l.b16 %v7270_v55  ;;  %v14399_v40 = vunpack.c.l.b16 %v7273_v62  ;;  %v15488_v55 = vld [vmem:[#allocation93_spill] sm:$0xff]  ;;  %v15489_v62 = vld [vmem:[#allocation44_spill] sm:$0xff] }
 0x51e   :  { %v6402_v48 = vadd.f32 %v6370_v21, %v14161_v18  ;;  %v6372_v7 = vadd.f32 %v6049_v26, %v14151_v52  ;;  %v6051_v9 = vpop.f32.mrb[127].mxu1  ;;  %v6520_v30 = vmul.f32 %v14241_v3, %v6476_v16  ;;  %v6975_v61 = vrot.slane %v6887_v13, %v14219_v47  ;;  %v15487_v13 = vld [vmem:[#allocation39_spill] sm:$0xff] }
 0x51f   :  { %v6403_v53 = vadd.f32 %v6371_v39, %v14165_v1  ;;  %v6373_v6 = vadd.f32 %v6051_v9, %v14155_v43  ;;  %v6521_v44 = vmul.f32 %v14249_v27, %v6477_v10  ;;  %v7275_v54 = vpack.c.bf16 %v6979_v59, %v6979_v59  ;;  %v15486_v39 = vld [vmem:[#allocation46_spill] sm:$0xff] }
 0x520   :  { %v6446_v8 = vadd.f32 %v14227_v5, %v6402_v48  ;;  %v6404_v18 = vadd.f32 %v6372_v7, %v14169_v38  ;;  %v14402_v38 = vunpack.c.l.b16 %v7272_v31  ;;  %v15491_v59 = vld [vmem:[#allocation26_spill] sm:$0xff] }
 0x521   :  { %v6447_v52 = vadd.f32 %v14230_v25, %v6403_v53  ;;  %v6405_v4 = vadd.f32 %v6373_v6, %v14173_v42  ;;  %v6564_v42 = vadd.f32 %v14257_v57, %v6520_v30  ;;  %v6565_v17 = vadd.f32 %v14263_v0, %v6521_v44  ;;  %v15490_v30 = vld [vmem:[#allocation48_spill] sm:$0xff] }
 0x522   :  { %v6478_v1 = vmax.f32 %v6446_v8, 0.0  ;;  %v6448_v43 = vadd.f32 %v14227_v5, %v6404_v18  ;;  %v7274_v6 = vpack.c.bf16 %v6975_v61, %v6975_v61  ;;  %v14420_v8 = vmax.f32 %v14348_v51, %v9233_v33 }
 0x523   :  { %v6479_v22 = vmax.f32 %v6447_v52, 0.0  ;;  %v6449_v15 = vadd.f32 %v14230_v25, %v6405_v4  ;;  %v6055_v60 = vpop.f32.mrb[128].mxu1 }
 0x524   :  { %v6522_v29 = vmul.f32 %v14241_v3, %v6478_v1  ;;  %v6374_v63 = vadd.f32 %v6055_v60, %v14159_v14  ;;  %v6057_v28 = vpop.f32.mrb[129].mxu1  ;;  %v6480_v19 = vmax.f32 %v6448_v43, 0.0  ;;  %v14429_v60 = vcombine.high %v14348_v51, %v14348_v51 }
 0x525   :  { %v6523_v34 = vmul.f32 %v14249_v27, %v6479_v22  ;;  %v6375_v21 = vadd.f32 %v6057_v28, %v14163_v50  ;;  %v6059_v36 = vpop.f32.mrb[130].mxu1  ;;  %v6481_v10 = vmax.f32 %v6449_v15, 0.0  ;;  %v15492_v28 = vld [vmem:[#allocation41_spill] sm:$0xff] }
 0x526   :  { %v6566_v16 = vadd.f32 %v14257_v57, %v6522_v29  ;;  %v6406_v26 = vadd.f32 %v6374_v63, %v15486_v39  ;;  %v6376_v48 = vadd.f32 %v6059_v36, %v15487_v13  ;;  %v6061_v7 = vpop.f32.mrb[131].mxu1  ;;  %v6524_v52 = vmul.f32 %v14241_v3, %v6480_v19 }
 0x527   :  { %v6567_v9 = vadd.f32 %v14263_v0, %v6523_v34  ;;  %v6407_v14 = vadd.f32 %v6375_v21, %v15488_v55  ;;  %v6377_v53 = vadd.f32 %v6061_v7, %v15489_v62  ;;  %v6525_v43 = vmul.f32 %v14249_v27, %v6481_v10  ;;  %v15493_v7 = vld [vmem:[#allocation49_spill] sm:$0xff]  ;;  %v15494_v55 = vld [vmem:[#allocation43_spill] sm:$0xff] }
 0x528   :  { %v6588_v31 = vmax.f32 %v6564_v42, %v6566_v16  ;;  %v6450_v50 = vadd.f32 %v14227_v5, %v6406_v26  ;;  %v6408_v44 = vadd.f32 %v6376_v48, %v15490_v30  ;;  %v14434_v21 = vunpack.c.l.b16 %v7275_v54 }
 0x529   :  { %v6589_v18 = vmax.f32 %v6565_v17, %v6567_v9  ;;  %v6451_v4 = vadd.f32 %v14230_v25, %v6407_v14  ;;  %v6409_v1 = vadd.f32 %v6377_v53, %v15491_v59  ;;  %v14436_v36 = vunpack.c.l.b16 %v7274_v6  ;;  %v15495_v6 = vld [vmem:[#allocation62_spill] sm:$0xff] }
 0x52a   :  { %v6482_v22 = vmax.f32 %v6450_v50, 0.0  ;;  %v6452_v15 = vadd.f32 %v14227_v5, %v6408_v44  ;;  %v6568_v51 = vadd.f32 %v14257_v57, %v6524_v52  ;;  %v6569_v54 = vadd.f32 %v14263_v0, %v6525_v43  ;;  %v15496_v50 = vld [vmem:[#allocation21_spill] sm:$0xff]  ;;  %v15498_v43 = vld [vmem:[#allocation47_spill] sm:$0xff] }
 0x52b   :  { %v6684_v61 = vcombine.low %v6588_v31, %v6589_v18  ;;  %v6685_v42 = vcombine.high %v6588_v31, %v6589_v18  ;;  %v6483_v33 = vmax.f32 %v6451_v4, 0.0  ;;  %v6453_v17 = vadd.f32 %v14230_v25, %v6409_v1  ;;  %v6065_v29 = vpop.f32.mrb[132].mxu1  ;;  %v15497_v4 = vld [vmem:[#allocation23_spill] sm:$0xff] }
 0x52c   :  { %v6526_v63 = vmul.f32 %v14241_v3, %v6482_v22  ;;  %v6378_v34 = vadd.f32 %v6065_v29, %v15492_v28  ;;  %v6067_v19 = vpop.f32.mrb[133].mxu1  ;;  %v6484_v39 = vmax.f32 %v6452_v15, 0.0 }
 0x52d   :  { %v6692_v16 = vrot.slane %v6684_v61, %v15485_v32  ;;  %v6527_v10 = vmul.f32 %v14249_v27, %v6483_v33  ;;  %v6069_v26 = vpop.f32.mrb[134].mxu1  ;;  %v6485_v48 = vmax.f32 %v6453_v17, 0.0  ;;  %v6379_v14 = vadd.f32 %v6067_v19, %v15494_v55  ;;  %v15499_v61 = vld [vmem:[#allocation11_spill] sm:$0xff] }
 0x52e   :  { %v6570_v13 = vadd.f32 %v14257_v57, %v6526_v63  ;;  %v6410_v9 = vadd.f32 %v6378_v34, %v15493_v7  ;;  %v6071_v62 = vpop.f32.mrb[135].mxu1  ;;  %v6380_v31 = vadd.f32 %v6069_v26, %v15495_v6  ;;  %v14449_v44 = vrot.slane %v6685_v42, %v15485_v32 }
 0x52f   :  { %v6571_v53 = vadd.f32 %v14263_v0, %v6527_v10  ;;  %v6381_v30 = vadd.f32 %v6071_v62, %v15496_v50  ;;  %v6411_v59 = vadd.f32 %v6379_v14, %v15497_v4  ;;  %v6528_v22 = vmul.f32 %v14241_v3, %v6484_v39  ;;  %v15501_v50 = vld [vmem:[#allocation29_spill] sm:$0xff] }
 0x530   :  { %v14451_v18 = vmax.f32 %v6568_v51, %v6570_v13  ;;  %v6454_v52 = vadd.f32 %v14227_v5, %v6410_v9  ;;  %v6412_v15 = vadd.f32 %v6380_v31, %v15498_v43  ;;  %v6529_v17 = vmul.f32 %v14249_v27, %v6485_v48  ;;  %v15500_v13 = vld [vmem:[#allocation45_spill] sm:$0xff] }
 0x531   :  { %v14455_v1 = vmax.f32 %v6569_v54, %v6571_v53  ;;  %v6413_v33 = vadd.f32 %v6381_v30, %v15499_v61  ;;  %v6455_v42 = vadd.f32 %v14230_v25, %v6411_v59  ;;  %v9245_v63 = vrot.slane %v6692_v16, 9 }
 0x532   :  { %v6486_v29 = vmax.f32 %v6454_v52, 0.0  ;;  %v6456_v19 = vadd.f32 %v14227_v5, %v6412_v15  ;;  %v6572_v55 = vadd.f32 %v14257_v57, %v6528_v22  ;;  %v6700_v53 = vcombine.high %v6692_v16, %v6692_v16  ;;  %v15502_v52 = vld [vmem:[#allocation83_spill] sm:$0xff] }
 0x533   :  { %v6702_v28 = vcombine.low %v14451_v18, %v14455_v1  ;;  %v6703_v34 = vcombine.high %v14451_v18, %v14455_v1  ;;  %v6457_v51 = vadd.f32 %v14230_v25, %v6413_v33  ;;  %v6075_v10 = vpop.f32.mrb[136].mxu1  ;;  %v6487_v26 = vmax.f32 %v6455_v42, 0.0  ;;  %v15503_v42 = vld [vmem:[#allocation55_spill] sm:$0xff] }
 0x534   :  { %v6530_v39 = vmul.f32 %v14241_v3, %v6486_v29  ;;  %v6382_v48 = vadd.f32 %v6075_v10, %v15500_v13  ;;  %v6077_v7 = vpop.f32.mrb[137].mxu1  ;;  %v6900_v9 = vmax.f32 %v6692_v16, %v9245_v63  ;;  %v6488_v14 = vmax.f32 %v6456_v19, 0.0 }
 0x535   :  { %v6489_v62 = vmax.f32 %v6457_v51, 0.0  ;;  %v6079_v54 = vpop.f32.mrb[138].mxu1  ;;  %v6531_v31 = vmul.f32 %v14249_v27, %v6487_v26  ;;  %v6383_v4 = vadd.f32 %v6077_v7, %v15502_v52  ;;  %v6573_v43 = vadd.f32 %v14263_v0, %v6529_v17 }
 0x536   :  { %v6574_v6 = vadd.f32 %v14257_v57, %v6530_v39  ;;  %v6414_v30 = vadd.f32 %v6382_v48, %v15501_v50  ;;  %v6080_v59 = vpop.f32.mrb[139].mxu1  ;;  %v6532_v15 = vmul.f32 %v14241_v3, %v6488_v14  ;;  %v7079_v61 = vrot.slane %v6900_v9, %v14219_v47 }
 0x537   :  { %v7083_v22 = vrot.slane %v6900_v9, %v14318_v24  ;;  %v6575_v16 = vadd.f32 %v14263_v0, %v6531_v31  ;;  %v6415_v63 = vadd.f32 %v6383_v4, %v15503_v42  ;;  %v14485_v19 = vrot.slane %v6702_v28, %v15485_v32 }
 0x538   :  { %v14479_v33 = vmax.f32 %v6572_v55, %v6574_v6  ;;  %v6458_v29 = vadd.f32 %v14227_v5, %v6414_v30  ;;  %v6533_v51 = vmul.f32 %v14249_v27, %v6489_v62  ;;  %v7300_v10 = vpack.c.bf16 %v7079_v61, %v7079_v61 }
 0x539   :  { %v7301_v17 = vpack.c.bf16 %v7083_v22, %v7083_v22  ;;  %v14488_v39 = vmax.f32 %v6573_v43, %v6575_v16  ;;  %v6459_v13 = vadd.f32 %v14230_v25, %v6415_v63  ;;  %v9246_v48 = vrot.slane %v6700_v53, 9 }
 0x53a   :  { %v6490_v26 = vmax.f32 %v6458_v29, 0.0  ;;  %v6576_v7 = vadd.f32 %v14257_v57, %v6532_v15  ;;  %v7348_v55 = vunpack.c.l.b16 %v7300_v10  ;;  %v9247_v5 = vrot.slane %v14449_v44, 9 }
 0x53b   :  { %v7349_v9 = vunpack.c.l.b16 %v7301_v17  ;;  %v6720_v28 = vcombine.low %v14479_v33, %v14488_v39  ;;  %v6721_v14 = vcombine.high %v14479_v33, %v14488_v39  ;;  %v6491_v54 = vmax.f32 %v6459_v13, 0.0 }
 0x53c   :  { %v6534_v62 = vmul.f32 %v14241_v3, %v6490_v26  ;;  %v7350_v31 = vrot.slane %v7348_v55, 7  ;;  %v6901_v50 = vmax.f32 %v6700_v53, %v9246_v48  ;;  %v6902_v25 = vmax.f32 %v14449_v44, %v9247_v5 }
 0x53d   :  { %v7352_v6 = vrot.slane %v7349_v9, 7  ;;  %v6577_v30 = vadd.f32 %v14263_v0, %v6533_v51  ;;  %v6535_v4 = vmul.f32 %v14249_v27, %v6491_v54  ;;  %v6701_v59 = vcombine.high %v14449_v44, %v14449_v44 }
 0x53e   :  { %v6578_v52 = vadd.f32 %v14257_v57, %v6534_v62  ;;  %v7351_v3 = vsel %vm4823_vm10, %v7350_v31, %v14366_v41  ;;  %v7087_v15 = vrot.slane %v6901_v50, %v14219_v47  ;;  %v7091_v53 = vrot.slane %v6901_v50, %v14318_v24 }
 0x53f   :  { %v7353_v43 = vsel %vm4823_vm10, %v7352_v6, %v14362_v35  ;;  %v6579_v22 = vadd.f32 %v14263_v0, %v6535_v4  ;;  %v7354_v16 = vpack.c.b16 %v7351_v3, %v7351_v3  ;;  %v7099_v44 = vrot.slane %v6902_v25, %v14318_v24 }
 0x540   :  { %v14510_v61 = vmax.f32 %v6576_v7, %v6578_v52  ;;  %v7355_v57 = vpack.c.b16 %v7353_v43, %v7353_v43  ;;  %v7303_v27 = vpack.c.bf16 %v7091_v53, %v7091_v53  ;;  %v7302_v29 = vpack.c.bf16 %v7087_v15, %v7087_v15  ;;  %v10109_v15 = vld [vmem:[%s14947_s9 + $0x20] ss:$8 sps:$4 sm:$0xff]  }
 0x541   :  { %v7095_v42 = vrot.slane %v6902_v25, %v14219_v47  ;;  %v14515_v35 = vmax.f32 %v6577_v30, %v6579_v22  ;;  %v9248_v41 = vrot.slane %v6701_v59, 9  ;;  %v9249_v63 = vrot.slane %v14485_v19, 9 }
 0x542   :  { %9265 = vmatprep.mubr.msk.bf16.mxu0 %vm7366_vm9, %v7355_v57  ;;  %v6987_v51 = vrot.slane %v14420_v8, %v14318_v24  ;;  %v7424_v0 = vunpack.c.l.b16 %v7303_v27  ;;  %v7423_v17 = vunpack.c.l.b16 %v7302_v29  ;;  %v7305_v10 = vpack.c.bf16 %v7099_v44, %v7099_v44 }
 0x543   :  { %7406 = vmatmul.mubr.bf16.vlgmr.msra.gmra.mrb[196].mxu0 %v7354_v16  ;;  %v7304_v26 = vpack.c.bf16 %v7095_v42, %v7095_v42  ;;  %v6738_v13 = vcombine.low %v14510_v61, %v14515_v35  ;;  %v6739_v48 = vcombine.high %v14510_v61, %v14515_v35  ;;  %v6903_v7 = vmax.f32 %v6701_v59, %v9248_v41 }
 0x544   :  { %v6904_v9 = vmax.f32 %v14485_v19, %v9249_v63  ;;  %v7427_v55 = vrot.slane %v7424_v0, 7  ;;  %v7425_v5 = vrot.slane %v7423_v17, 7  ;;  %v7498_v62 = vunpack.c.l.b16 %v7305_v10 }
 0x545   :  { %v7497_v54 = vunpack.c.l.b16 %v7304_v26  ;;  %v7107_v6 = vrot.slane %v6903_v7, %v14318_v24  ;;  %v7103_v31 = vrot.slane %v6903_v7, %v14219_v47  ;;  %v7277_v50 = vpack.c.bf16 %v6987_v51, %v6987_v51 }
 0x546   :  { %v6983_v25 = vrot.slane %v14420_v8, %v14219_v47  ;;  %v7428_v30 = vsel %vm4823_vm10, %v7427_v55, %v14393_v58  ;;  %v7426_v52 = vsel %vm4823_vm10, %v7425_v5, %v14397_v2  ;;  %v7501_v4 = vrot.slane %v7498_v62, 7  ;;  %v10110_v58 = vld [vmem:[%s14947_s9 + $0x34] ss:$8 sps:$4 sm:$0xff]  }
 0x547   :  { %v7499_v59 = vrot.slane %v7497_v54, 7  ;;  %v7430_v43 = vpack.c.b16 %v7428_v30, %v7428_v30  ;;  %v7429_v3 = vpack.c.b16 %v7426_v52, %v7426_v52  ;;  %v7307_v53 = vpack.c.bf16 %v7107_v6, %v7107_v6 }
 0x548   :  { %v7306_v22 = vpack.c.bf16 %v7103_v31, %v7103_v31  ;;  %v7502_v57 = vsel %vm4823_vm10, %v7501_v4, %v14399_v40  ;;  %v7115_v8 = vrot.slane %v6904_v9, %v14318_v24  ;;  %v7111_v16 = vrot.slane %v6904_v9, %v14219_v47 }
 0x549   :  { %v7500_v2 = vsel %vm4823_vm10, %v7499_v59, %v14402_v38  ;;  %v6717_v27 = vrot.slane %v6703_v34, %v15485_v32  ;;  %9271 = vmatprep.mubr.msk.bf16.mxu1 %vm7366_vm9, %v7430_v43  ;;  %v7504_v29 = vpack.c.b16 %v7502_v57, %v7502_v57  ;;  %v7572_v40 = vunpack.c.l.b16 %v7307_v53  ;;  %v10112_v57 = vld [vmem:[%s14947_s9 + $0x30] ss:$8 sps:$4 sm:$0xff]  }
 0x54a   :  { %v7571_v44 = vunpack.c.l.b16 %v7306_v22  ;;  %7480 = vmatmul.mubr.bf16.vlgmr.msra.gmra.mrb[140].mxu1 %v7429_v3  ;;  %v7309_v42 = vpack.c.bf16 %v7115_v8, %v7115_v8  ;;  %v7276_v41 = vpack.c.bf16 %v6983_v25, %v6983_v25  ;;  %v7308_v63 = vpack.c.bf16 %v7111_v16, %v7111_v16 }
 0x54b   :  { %v6718_v38 = vcombine.high %v14485_v19, %v14485_v19  ;;  %7522 = vmatpush1.bf16.xpose.msra.mxu1 %v10109_v15  ;;  %9277 = vmatprep.mubr.msk.bf16.mxu1 %vm7366_vm9, %v7504_v29  ;;  %v7575_v51 = vrot.slane %v7572_v40, 7  ;;  %v9234_v18 = vrot.slane %v14429_v60, 9  ;;  %v9235_v1 = vrot.slane %v14351_v46, 9 }
 0x54c   :  { %v7573_v0 = vrot.slane %v7571_v44, 7  ;;  %v14560_v34 = vrot.slane %v6720_v28, %v15485_v32  ;;  %9282 = vmatprep.subr.msk.bf16.mxu1 %vm7366_vm9, %v10110_v58  ;;  %v7646_v17 = vunpack.c.l.b16 %v7309_v42  ;;  %v7645_v10 = vunpack.c.l.b16 %v7308_v63 }
 0x54d   :  { %v9250_v19 = vrot.slane %v6718_v38, 9  ;;  %v7576_v26 = vsel %vm4823_vm10, %v7575_v51, %v14434_v21  ;;  %v6889_v9 = vmax.f32 %v14429_v60, %v9234_v18  ;;  %v9251_v55 = vrot.slane %v6717_v27, 9 }
 0x54e   :  { %v14567_v7 = vsel %vm4823_vm10, %v7573_v0, %v14436_v36  ;;  %v7644_v5 = vunpack.c.l.b16 %v7277_v50  ;;  %v7649_v62 = vrot.slane %v7646_v17, 7  ;;  %v7643_v54 = vunpack.c.l.b16 %v7276_v41 }
 0x54f   :  { %v7647_v28 = vrot.slane %v7645_v10, 7  ;;  %v6905_v6 = vmax.f32 %v6718_v38, %v9250_v19  ;;  %v6995_v31 = vrot.slane %v6889_v9, %v14318_v24  ;;  %v6991_v25 = vrot.slane %v6889_v9, %v14219_v47 }
 0x550   :  { %v6890_v30 = vmax.f32 %v14351_v46, %v9235_v1  ;;  %v7503_v52 = vpack.c.b16 %v7500_v2, %v7500_v2  ;;  %v14574_v21 = vsel %vm4823_vm10, %v7649_v62, %v7644_v5  ;;  %v6906_v60 = vmax.f32 %v6717_v27, %v9251_v55 }
 0x551   :  { %v14577_v36 = vsel %vm4823_vm10, %v7647_v28, %v7643_v54  ;;  %v7578_v4 = vpack.c.b16 %v7576_v26, %v7576_v26  ;;  %v7123_v50 = vrot.slane %v6905_v6, %v14318_v24  ;;  %v7279_v59 = vpack.c.bf16 %v6995_v31, %v6995_v31 }
 0x552   :  { %v6647_v43 = vcombine.high %v14351_v46, %v14351_v46  ;;  %v7119_v3 = vrot.slane %v6905_v6, %v14219_v47  ;;  %v7278_v15 = vpack.c.bf16 %v6991_v25, %v6991_v25  ;;  %v7003_v53 = vrot.slane %v6890_v30, %v14318_v24  ;;  %v10113_v46 = vld [vmem:[%s14947_s9 + $0x44] ss:$8 sps:$4 sm:$0xff]  }
 0x553   :  { %v7131_v22 = vrot.slane %v6906_v60, %v14318_v24  ;;  %v7311_v58 = vpack.c.bf16 %v7123_v50, %v7123_v50  ;;  %v7718_v2 = vunpack.c.l.b16 %v7279_v59  ;;  %v6999_v8 = vrot.slane %v6890_v30, %v14219_v47 }
 0x554   :  { %v7127_v16 = vrot.slane %v6906_v60, %v14219_v47  ;;  %v7310_v29 = vpack.c.bf16 %v7119_v3, %v7119_v3  ;;  %v7717_v40 = vunpack.c.l.b16 %v7278_v15  ;;  %v7281_v44 = vpack.c.bf16 %v7003_v53, %v7003_v53 }
 0x555   :  { %v7313_v42 = vpack.c.bf16 %v7131_v22, %v7131_v22  ;;  %v7720_v41 = vunpack.c.l.b16 %v7311_v58  ;;  %v7280_v63 = vpack.c.bf16 %v6999_v8, %v6999_v8  ;;  %v6719_v51 = vcombine.high %v6717_v27, %v6717_v27 }
 0x556   :  { %v7312_v38 = vpack.c.bf16 %v7127_v16, %v7127_v16  ;;  %7554 = vmatmul.mubr.bf16.vlgmr.msra.gmra.mrb[140].mxu1 %v7503_v52  ;;  %v7719_v0 = vunpack.c.l.b16 %v7310_v29  ;;  %v7792_v18 = vunpack.c.l.b16 %v7281_v44  ;;  %v9236_v17 = vrot.slane %v6647_v43, 9 }
 0x557   :  { %v7794_v1 = vunpack.c.l.b16 %v7313_v42  ;;  %7596 = vmatpush1.bf16.xpose.msra.mxu1 %v10112_v57  ;;  %9283 = vmatprep.mubr.msk.bf16.mxu1 %vm7366_vm9, %v7578_v4  ;;  %v7723_v10 = vrot.slane %v7720_v41, 7  ;;  %v7791_v19 = vunpack.c.l.b16 %v7280_v63  ;;  %v9252_v9 = vrot.slane %v6719_v51, 9 }
 0x558   :  { %v7793_v26 = vunpack.c.l.b16 %v7312_v38  ;;  %9288 = vmatprep.subr.msk.bf16.mxu1 %vm7366_vm9, %v10113_v46  ;;  %v7721_v55 = vrot.slane %v7719_v0, 7  ;;  %v6891_v62 = vmax.f32 %v6647_v43, %v9236_v17  ;;  %v9237_v54 = vrot.slane %v14383_v20, 9 }
 0x559   :  { %v7797_v5 = vrot.slane %v7794_v1, 7  ;;  %v14597_v27 = vsel %vm4823_vm10, %v7723_v10, %v7718_v2  ;;  %v6907_v6 = vmax.f32 %v6719_v51, %v9252_v9  ;;  %v9253_v31 = vrot.slane %v14560_v34, 9 }
 0x55a   :  { %v7795_v28 = vrot.slane %v7793_v26, 7  ;;  %v14604_v25 = vrot.slane %v6649_v37, %v15485_v32  ;;  %v14607_v30 = vsel %vm4823_vm10, %v7721_v55, %v7717_v40  ;;  %v7011_v60 = vrot.slane %v6891_v62, %v14318_v24 }
 0x55b   :  { %v14610_v52 = vsel %vm4823_vm10, %v7797_v5, %v7792_v18  ;;  %v14617_v4 = vrot.slane %v6666_v23, %v15485_v32  ;;  %v7577_v50 = vpack.c.b16 %v14567_v7, %v14567_v7  ;;  %v7139_v11 = vrot.slane %v6907_v6, %v14318_v24 }
 0x55c   :  { %v14622_v49 = vsel %vm4823_vm10, %v7795_v28, %v7791_v19  ;;  %v7652_v37 = vpack.c.b16 %v14574_v21, %v14574_v21  ;;  %v7283_v59 = vpack.c.bf16 %v7011_v60, %v7011_v60  ;;  %v7007_v43 = vrot.slane %v6891_v62, %v14219_v47  ;;  %v10115_v21 = vld [vmem:[%s14947_s9 + $0x40] ss:$8 sps:$4 sm:$0xff]  }
 0x55d   :  { %v7135_v3 = vrot.slane %v6907_v6, %v14219_v47  ;;  %v7315_v15 = vpack.c.bf16 %v7139_v11, %v7139_v11  ;;  %v6892_v23 = vmax.f32 %v14383_v20, %v9237_v54  ;;  %v6908_v53 = vmax.f32 %v14560_v34, %v9253_v31 }
 0x55e   :  { %v6664_v7 = vcombine.high %v14383_v20, %v14383_v20  ;;  %v7866_v22 = vunpack.c.l.b16 %v7283_v59  ;;  %v7282_v57 = vpack.c.bf16 %v7007_v43, %v7007_v43  ;;  %v6736_v2 = vcombine.high %v14560_v34, %v14560_v34  ;;  %v10116_v20 = vld [vmem:[%s14947_s9 + $0x54] ss:$8 sps:$4 sm:$0xff]  }
 0x55f   :  { %v7314_v58 = vpack.c.bf16 %v7135_v3, %v7135_v3  ;;  %v7868_v8 = vunpack.c.l.b16 %v7315_v15  ;;  %v7019_v16 = vrot.slane %v6892_v23, %v14318_v24  ;;  %v7147_v46 = vrot.slane %v6908_v53, %v14318_v24 }
 0x560   :  { %v7015_v29 = vrot.slane %v6892_v23, %v14219_v47  ;;  %v7865_v40 = vunpack.c.l.b16 %v7282_v57  ;;  %v7143_v42 = vrot.slane %v6908_v53, %v14219_v47  ;;  %v9238_v34 = vrot.slane %v6664_v7, 9 }
 0x561   :  { %v7867_v44 = vunpack.c.l.b16 %v7314_v58  ;;  %v7871_v41 = vrot.slane %v7868_v8, 7  ;;  %v7285_v63 = vpack.c.bf16 %v7019_v16, %v7019_v16  ;;  %v7317_v38 = vpack.c.bf16 %v7147_v46, %v7147_v46 }
 0x562   :  { %v7284_v51 = vpack.c.bf16 %v7015_v29, %v7015_v29  ;;  %7628 = vmatmul.mubr.bf16.vlgmr.msra.gmra.mrb[140].mxu1 %v7577_v50  ;;  %v7316_v18 = vpack.c.bf16 %v7143_v42, %v7143_v42  ;;  %v9254_v1 = vrot.slane %v6736_v2, 9  ;;  %v6893_v17 = vmax.f32 %v6664_v7, %v9238_v34 }
 0x563   :  { %v7869_v0 = vrot.slane %v7867_v44, 7  ;;  %v6735_v10 = vrot.slane %v6721_v14, %v15485_v32  ;;  %v14653_v19 = vrot.slane %v6738_v13, %v15485_v32  ;;  %7670 = vmatpush1.bf16.xpose.msra.mxu1 %v10115_v21  ;;  %9289 = vmatprep.mubr.msk.bf16.mxu1 %vm7366_vm9, %v7652_v37  ;;  %v14657_v26 = vsel %vm4823_vm10, %v7871_v41, %v7866_v22 }
 0x564   :  { %v7942_v9 = vunpack.c.l.b16 %v7317_v38  ;;  %9294 = vmatprep.subr.msk.bf16.mxu1 %vm7366_vm9, %v10116_v20  ;;  %v7940_v33 = vunpack.c.l.b16 %v7285_v63  ;;  %v7941_v39 = vunpack.c.l.b16 %v7316_v18  ;;  %v6909_v14 = vmax.f32 %v6736_v2, %v9254_v1  ;;  %v10119_v20 = vld [vmem:[%s14947_s9 + $0x64] ss:$8 sps:$4 sm:$0xff]  }
 0x565   :  { %v14661_v55 = vsel %vm4823_vm10, %v7869_v0, %v7865_v40  ;;  %v7939_v62 = vunpack.c.l.b16 %v7284_v51  ;;  %v7027_v13 = vrot.slane %v6893_v17, %v14318_v24  ;;  %v7023_v54 = vrot.slane %v6893_v17, %v14219_v47 }
 0x566   :  { %v7945_v5 = vrot.slane %v7942_v9, 7  ;;  %v7943_v28 = vrot.slane %v7941_v39, 7  ;;  %v7155_v6 = vrot.slane %v6909_v14, %v14318_v24  ;;  %v7151_v31 = vrot.slane %v6909_v14, %v14219_v47 }
 0x567   :  { %v9239_v60 = vrot.slane %v14604_v25, 9  ;;  %v7287_v11 = vpack.c.bf16 %v7027_v13, %v7027_v13  ;;  %v7286_v37 = vpack.c.bf16 %v7023_v54, %v7023_v54  ;;  %v9255_v59 = vrot.slane %v6735_v10, 9 }
 0x568   :  { %v14669_v50 = vsel %vm4823_vm10, %v7945_v5, %v7940_v33  ;;  %v7651_v43 = vpack.c.b16 %v14577_v36, %v14577_v36  ;;  %v14674_v3 = vsel %vm4823_vm10, %v7943_v28, %v7939_v62  ;;  %v7319_v15 = vpack.c.bf16 %v7155_v6, %v7155_v6  ;;  %v10118_v36 = vld [vmem:[%s14947_s9 + $0x50] ss:$8 sps:$4 sm:$0xff]  }
 0x569   :  { %v7318_v23 = vpack.c.bf16 %v7151_v31, %v7151_v31  ;;  %v7726_v53 = vpack.c.b16 %v14597_v27, %v14597_v27  ;;  %v8014_v7 = vunpack.c.l.b16 %v7287_v11  ;;  %v8013_v22 = vunpack.c.l.b16 %v7286_v37 }
 0x56a   :  { %v6894_v57 = vmax.f32 %v14604_v25, %v9239_v60  ;;  %v8016_v58 = vunpack.c.l.b16 %v7319_v15  ;;  %v6910_v21 = vmax.f32 %v6735_v10, %v9255_v59  ;;  %v6665_v8 = vcombine.high %v14604_v25, %v14604_v25 }
 0x56b   :  { %v8015_v2 = vunpack.c.l.b16 %v7318_v23  ;;  %v6737_v29 = vcombine.high %v6735_v10, %v6735_v10  ;;  %v9241_v27 = vrot.slane %v14617_v4, 9  ;;  %v14702_v17 = vrot.slane %v6667_v56, %v15485_v32 }
 0x56c   :  { %v7035_v16 = vrot.slane %v6894_v57, %v14318_v24  ;;  %v7031_v46 = vrot.slane %v6894_v57, %v14219_v47  ;;  %v8019_v40 = vrot.slane %v8016_v58, 7  ;;  %v7163_v42 = vrot.slane %v6910_v21, %v14318_v24  ;;  %v10121_v57 = vld [vmem:[%s14947_s9 + $0x60] ss:$8 sps:$4 sm:$0xff]  }
 0x56d   :  { %v8017_v44 = vrot.slane %v8015_v2, 7  ;;  %v7159_v25 = vrot.slane %v6910_v21, %v14219_v47  ;;  %v9240_v63 = vrot.slane %v6665_v8, 9  ;;  %v9256_v38 = vrot.slane %v6737_v29, 9 }
 0x56e   :  { %v7289_v34 = vpack.c.bf16 %v7035_v16, %v7035_v16  ;;  %v7288_v41 = vpack.c.bf16 %v7031_v46, %v7031_v46  ;;  %7702 = vmatmul.mubr.bf16.vlgmr.msra.gmra.mrb[140].mxu1 %v7651_v43  ;;  %v14693_v51 = vsel %vm4823_vm10, %v8019_v40, %v8014_v7  ;;  %v7321_v18 = vpack.c.bf16 %v7163_v42, %v7163_v42 }
 0x56f   :  { %v14696_v0 = vsel %vm4823_vm10, %v8017_v44, %v8013_v22  ;;  %v7320_v1 = vpack.c.bf16 %v7159_v25, %v7159_v25  ;;  %v14708_v10 = vrot.slane %v6739_v48, %v15485_v32  ;;  %7744 = vmatpush1.bf16.xpose.msra.mxu1 %v10118_v36  ;;  %9295 = vmatprep.mubr.msk.bf16.mxu1 %vm7366_vm9, %v7726_v53  ;;  %v9257_v12 = vrot.slane %v14653_v19, 9 }
 0x570   :  { %v8088_v9 = vunpack.c.l.b16 %v7289_v34  ;;  %9300 = vmatprep.subr.msk.bf16.mxu1 %vm7366_vm9, %v10119_v20  ;;  %v8090_v33 = vunpack.c.l.b16 %v7321_v18  ;;  %v6895_v14 = vmax.f32 %v6665_v8, %v9240_v63  ;;  %v6911_v5 = vmax.f32 %v6737_v29, %v9256_v38 }
 0x571   :  { %v8089_v39 = vunpack.c.l.b16 %v7320_v1  ;;  %v8087_v62 = vunpack.c.l.b16 %v7288_v41  ;;  %v6896_v45 = vmax.f32 %v14617_v4, %v9241_v27  ;;  %v6682_v56 = vcombine.high %v14617_v4, %v14617_v4 }
 0x572   :  { %v8093_v32 = vrot.slane %v8090_v33, 7  ;;  %v7043_v35 = vrot.slane %v6895_v14, %v14318_v24  ;;  %v7171_v48 = vrot.slane %v6911_v5, %v14318_v24  ;;  %v7039_v13 = vrot.slane %v6895_v14, %v14219_v47 }
 0x573   :  { %v8091_v61 = vrot.slane %v8089_v39, 7  ;;  %v7167_v54 = vrot.slane %v6911_v5, %v14219_v47  ;;  %v6912_v28 = vmax.f32 %v14653_v19, %v9257_v12  ;;  %v7051_v6 = vrot.slane %v6896_v45, %v14318_v24 }
 0x574   :  { %v14723_v31 = vsel %vm4823_vm10, %v8093_v32, %v8088_v9  ;;  %v7291_v4 = vpack.c.bf16 %v7043_v35, %v7043_v35  ;;  %v7323_v11 = vpack.c.bf16 %v7171_v48, %v7171_v48  ;;  %v7725_v37 = vpack.c.b16 %v14607_v30, %v14607_v30 }
 0x575   :  { %v14726_v60 = vsel %vm4823_vm10, %v8091_v61, %v8087_v62  ;;  %v7290_v59 = vpack.c.bf16 %v7039_v13, %v7039_v13  ;;  %v7322_v43 = vpack.c.bf16 %v7167_v54, %v7167_v54  ;;  %v6754_v15 = vcombine.high %v14653_v19, %v14653_v19  ;;  %v10122_v19 = vld [vmem:[%s14947_s9 + $0x74] ss:$8 sps:$4 sm:$0xff]  }
 0x576   :  { %v7800_v23 = vpack.c.b16 %v14610_v52, %v14610_v52  ;;  %v8162_v53 = vunpack.c.l.b16 %v7291_v4  ;;  %v8164_v7 = vunpack.c.l.b16 %v7323_v11  ;;  %v7179_v22 = vrot.slane %v6912_v28, %v14318_v24 }
 0x577   :  { %v8163_v58 = vunpack.c.l.b16 %v7322_v43  ;;  %v7293_v2 = vpack.c.bf16 %v7051_v6, %v7051_v6  ;;  %v7047_v30 = vrot.slane %v6896_v45, %v14219_v47  ;;  %v7175_v21 = vrot.slane %v6912_v28, %v14219_v47 }
 0x578   :  { %v8167_v8 = vrot.slane %v8164_v7, 7  ;;  %v8161_v52 = vunpack.c.l.b16 %v7290_v59  ;;  %v7325_v36 = vpack.c.bf16 %v7179_v22, %v7179_v22  ;;  %v9242_v16 = vrot.slane %v6682_v56, 9 }
 0x579   :  { %v8165_v46 = vrot.slane %v8163_v58, 7  ;;  %v7292_v29 = vpack.c.bf16 %v7047_v30, %v7047_v30  ;;  %v7324_v27 = vpack.c.bf16 %v7175_v21, %v7175_v21  ;;  %v9258_v20 = vrot.slane %v6754_v15, 9  ;;  %v10125_v58 = vld [vmem:[%s14947_s9 + $0x84] ss:$8 sps:$4 sm:$0xff]  }
 0x57a   :  { %7776 = vmatmul.mubr.bf16.vlgmr.msra.gmra.mrb[140].mxu1 %v7725_v37  ;;  %v14744_v40 = vsel %vm4823_vm10, %v8167_v8, %v8162_v53  ;;  %v8238_v44 = vunpack.c.l.b16 %v7325_v36  ;;  %v6897_v42 = vmax.f32 %v6682_v56, %v9242_v16  ;;  %v9243_v25 = vrot.slane %v14702_v17, 9 }
 0x57b   :  { %7818 = vmatpush1.bf16.xpose.msra.mxu1 %v10121_v57  ;;  %9301 = vmatprep.mubr.msk.bf16.mxu1 %vm7366_vm9, %v7800_v23  ;;  %v14749_v34 = vsel %vm4823_vm10, %v8165_v46, %v8161_v52  ;;  %v8236_v41 = vunpack.c.l.b16 %v7293_v2  ;;  %v8237_v63 = vunpack.c.l.b16 %v7324_v27  ;;  %v8235_v18 = vunpack.c.l.b16 %v7292_v29 }
 0x57c   :  { %9306 = vmatprep.subr.msk.bf16.mxu1 %vm7366_vm9, %v10122_v19  ;;  %v8241_v38 = vrot.slane %v8238_v44, 7  ;;  %v6913_v1 = vmax.f32 %v6754_v15, %v9258_v20  ;;  %v7059_v9 = vrot.slane %v6897_v42, %v14318_v24  ;;  %v7055_v39 = vrot.slane %v6897_v42, %v14219_v47 }
 0x57d   :  { %v8239_v33 = vrot.slane %v8237_v63, 7  ;;  %v9259_v14 = vrot.slane %v14708_v10, 9  ;;  %v6898_v5 = vmax.f32 %v14702_v17, %v9243_v25  ;;  %v7799_v48 = vpack.c.b16 %v14622_v49, %v14622_v49  ;;  %v10124_v49 = vld [vmem:[%s14947_s9 + $0x70] ss:$8 sps:$4 sm:$0xff]  }
 0x57e   :  { %v14757_v62 = vsel %vm4823_vm10, %v8241_v38, %v8236_v41  ;;  %v7187_v12 = vrot.slane %v6913_v1, %v14318_v24  ;;  %v7295_v45 = vpack.c.bf16 %v7059_v9, %v7059_v9  ;;  %v7183_v56 = vrot.slane %v6913_v1, %v14219_v47 }
 0x57f   :  { %v14762_v32 = vsel %vm4823_vm10, %v8239_v33, %v8235_v18  ;;  %v7294_v61 = vpack.c.bf16 %v7055_v39, %v7055_v39  ;;  %v6914_v35 = vmax.f32 %v14708_v10, %v9259_v14  ;;  %v7067_v4 = vrot.slane %v6898_v5, %v14318_v24 }
 0x580   :  { %v7327_v13 = vpack.c.bf16 %v7187_v12, %v7187_v12  ;;  %v8310_v54 = vunpack.c.l.b16 %v7295_v45  ;;  %v7326_v28 = vpack.c.bf16 %v7183_v56, %v7183_v56  ;;  %v7063_v37 = vrot.slane %v6898_v5, %v14219_v47  ;;  %v10127_v12 = vld [vmem:[%s14947_s9 + $0x80] ss:$8 sps:$4 sm:$0xff]  }
 0x581   :  { %v8309_v6 = vunpack.c.l.b16 %v7294_v61  ;;  %v7195_v11 = vrot.slane %v6914_v35, %v14318_v24  ;;  %v7191_v15 = vrot.slane %v6914_v35, %v14219_v47  ;;  %v6683_v23 = vcombine.high %v14702_v17, %v14702_v17 }
 0x582   :  { %v8312_v59 = vunpack.c.l.b16 %v7327_v13  ;;  %v8311_v43 = vunpack.c.l.b16 %v7326_v28  ;;  %v7297_v53 = vpack.c.bf16 %v7067_v4, %v7067_v4  ;;  %v7296_v22 = vpack.c.bf16 %v7063_v37, %v7063_v37  ;;  %v10131_v4 = vld [vmem:[%s14947_s9 + $0xa4] ss:$8 sps:$4 sm:$0xff]   ;;  %v10133_v37 = vld [vmem:[%s14947_s9 + $0xa0] ss:$8 sps:$4 sm:$0xff]  }
 0x583   :  { %v7329_v7 = vpack.c.bf16 %v7195_v11, %v7195_v11  ;;  %v6755_v57 = vcombine.high %v14708_v10, %v14708_v10  ;;  %v7328_v21 = vpack.c.bf16 %v7191_v15, %v7191_v15  ;;  %v9244_v19 = vrot.slane %v6683_v23, 9  ;;  %v10137_v15 = vld [vmem:[%s14947_s9 + $0xc4] ss:$8 sps:$4 sm:$0xff]  }
 0x584   :  { %v8315_v2 = vrot.slane %v8312_v59, 7  ;;  %v8313_v30 = vrot.slane %v8311_v43, 7  ;;  %v7874_v17 = vpack.c.b16 %v14657_v26, %v14657_v26  ;;  %v8384_v29 = vunpack.c.l.b16 %v7297_v53  ;;  %v10134_v59 = vld [vmem:[%s14947_s9 + $0xb4] ss:$8 sps:$4 sm:$0xff]   ;;  %v10136_v43 = vld [vmem:[%s14947_s9 + $0xb0] ss:$8 sps:$4 sm:$0xff]  }
 0x585   :  { %v8386_v8 = vunpack.c.l.b16 %v7329_v7  ;;  %v9260_v52 = vrot.slane %v6755_v57, 9  ;;  %v8385_v10 = vunpack.c.l.b16 %v7328_v21  ;;  %v6899_v46 = vmax.f32 %v6683_v23, %v9244_v19  ;;  %v10139_v23 = vld [vmem:[%s14947_s9 + $0xc0] ss:$8 sps:$4 sm:$0xff]   ;;  %v10142_v53 = vld [vmem:[%s14947_s9 + $0xd0] ss:$8 sps:$4 sm:$0xff]  }
 0x586   :  { %7850 = vmatmul.mubr.bf16.vlgmr.msra.gmra.mrb[140].mxu1 %v7799_v48  ;;  %v14784_v36 = vsel %vm4823_vm10, %v8315_v2, %v8310_v54  ;;  %v14787_v16 = vsel %vm4823_vm10, %v8313_v30, %v8309_v6  ;;  %v8383_v26 = vunpack.c.l.b16 %v7296_v22  ;;  %v7948_v48 = vpack.c.b16 %v14669_v50, %v14669_v50  ;;  %v10130_v50 = vld [vmem:[%s14947_s9 + $0x90] ss:$8 sps:$4 sm:$0xff]   ;;  %v10143_v7 = vld [vmem:[%s14947_s9 + $0xe4] ss:$8 sps:$4 sm:$0xff]   ;;  %v10145_v22 = vld [vmem:[%s14947_s9 + $0xe0] ss:$8 sps:$4 sm:$0xff]  }
 0x587   :  { %7892 = vmatpush1.bf16.xpose.msra.mxu1 %v10124_v49  ;;  %9307 = vmatprep.mubr.msk.bf16.mxu1 %vm7366_vm9, %v7874_v17  ;;  %v8389_v27 = vrot.slane %v8386_v8, 7  ;;  %v6915_v20 = vmax.f32 %v6755_v57, %v9260_v52  ;;  %v8387_v44 = vrot.slane %v8385_v10, 7  ;;  %v7075_v42 = vrot.slane %v6899_v46, %v14318_v24  ;;  %v10140_v49 = vld [vmem:[%s14947_s9 + $0xd4] ss:$8 sps:$4 sm:$0xff]   ;;  %v10148_v2 = vld [vmem:[%s14947_s9 + $0xf0] ss:$8 sps:$4 sm:$0xff]  }
 0x588   :  { %9312 = vmatprep.subr.msk.bf16.mxu1 %vm7366_vm9, %v10125_v58  ;;  %v7071_v25 = vrot.slane %v6899_v46, %v14219_v47  ;;  %v10209_v28 = vmov 0.0   ;;  %v7947_v6 = vpack.c.b16 %v14674_v3, %v14674_v3  ;;  %v8022_v11 = vpack.c.b16 %v14693_v51, %v14693_v51  ;;  %v10146_v57 = vld [vmem:[%s14947_s9 + $0xf4] ss:$8 sps:$4 sm:$0xff]  }
 0x589   :  { %v14794_v41 = vsel %vm4823_vm10, %v8389_v27, %v8384_v29  ;;  %v7203_v63 = vrot.slane %v6915_v20, %v14318_v24  ;;  %v7199_v38 = vrot.slane %v6915_v20, %v14219_v47  ;;  %v14799_v18 = vsel %vm4823_vm10, %v8387_v44, %v8383_v26  ;;  %v10128_v24 = vld [vmem:[%s14947_s9 + $0x94] ss:$8 sps:$4 sm:$0xff]   ;;  %9840 = vmatprep.subr.mxu0 %v10209_v28 }
 0x58a   :  { %v7299_v1 = vpack.c.bf16 %v7075_v42, %v7075_v42  ;;  %v7298_v33 = vpack.c.bf16 %v7071_v25, %v7071_v25  ;;  %v7873_v47 = vpack.c.b16 %v14661_v55, %v14661_v55  ;;  %v8526_v55 = vld [vmem:[%s14949_s11] sm:$0x3]  ;;  %v8021_v3 = vpack.c.b16 %v14696_v0, %v14696_v0 }
 0x58b   :  { %v7331_v9 = vpack.c.bf16 %v7203_v63, %v7203_v63  ;;  %v7330_v39 = vpack.c.bf16 %v7199_v38, %v7199_v38  ;;  %9841 = vmatpush3.xpose.msk.msra.mxu0 %vm8534_vm11, %v8526_v55  ;;  %v8096_v51 = vpack.c.b16 %v14723_v31, %v14723_v31  ;;  %v8095_v0 = vpack.c.b16 %v14726_v60, %v14726_v60 }
 0x58c   :  { %v8458_v45 = vunpack.c.l.b16 %v7299_v1  ;;  %v8457_v61 = vunpack.c.l.b16 %v7298_v33  ;;  %v8170_v31 = vpack.c.b16 %v14744_v40, %v14744_v40  ;;  %v8169_v60 = vpack.c.b16 %v14749_v34, %v14749_v34 }
 0x58d   :  { %v8460_v14 = vunpack.c.l.b16 %v7331_v9  ;;  %v8459_v5 = vunpack.c.l.b16 %v7330_v39  ;;  %v8244_v40 = vpack.c.b16 %v14757_v62, %v14757_v62  ;;  %v8243_v34 = vpack.c.b16 %v14762_v32, %v14762_v32 }
 0x58e   :  { %v8318_v62 = vpack.c.b16 %v14784_v36, %v14784_v36  ;;  %v8317_v32 = vpack.c.b16 %v14787_v16, %v14787_v16  ;;  %v8392_v58 = vpack.c.b16 %v14794_v41, %v14794_v41  ;;  %v8391_v30 = vpack.c.b16 %v14799_v18, %v14799_v18  ;;  %v9261_v16 = vld [vmem:[%s14948_s10] ss:$0 sm:$0xff] }
 0x58f   :  { %v8463_v56 = vrot.slane %v8460_v14, 7  ;;  %v8461_v35 = vrot.slane %v8459_v5, 7 }
 0x591   :  { %v14812_v13 = vsel %vm4823_vm10, %v8463_v56, %v8458_v45  ;;  %v14815_v54 = vsel %vm4823_vm10, %v8461_v35, %v8457_v61  ;;  %vm10210_vm10 = vmmov 0  }
 0x592   :  { %7924 = vmatmul.mubr.bf16.vlgmr.msra.gmra.mrb[140].mxu1 %v7873_v47  ;;  %v8466_v21 = vpack.c.b16 %v14812_v13, %v14812_v13  ;;  %v8465_v19 = vpack.c.b16 %v14815_v54, %v14815_v54  ;;  %9842 = vmatprep.mubr.msk.f32.mxu0 %vm10210_vm10, %v10209_v28 }
 0x593   :  { %7966 = vmatpush1.bf16.xpose.msra.mxu1 %v10127_v12  ;;  %9313 = vmatprep.mubr.msk.bf16.mxu1 %vm7366_vm9, %v7948_v48 }
 0x594   :  { %9318 = vmatprep.subr.msk.bf16.mxu1 %vm7366_vm9, %v10128_v24 }
 0x59e   :  { %7998 = vmatmul.mubr.bf16.vlgmr.msra.gmra.mrb[140].mxu1 %v7947_v6 }
 0x59f   :  { %8040 = vmatpush1.bf16.xpose.msra.mxu1 %v10130_v50  ;;  %9319 = vmatprep.mubr.msk.bf16.mxu1 %vm7366_vm9, %v8022_v11 }
 0x5a0   :  { %9324 = vmatprep.subr.msk.bf16.mxu1 %vm7366_vm9, %v10131_v4 }
 0x5aa   :  { %8072 = vmatmul.mubr.bf16.vlgmr.msra.gmra.mrb[140].mxu1 %v8021_v3 }
 0x5ab   :  { %8114 = vmatpush1.bf16.xpose.msra.mxu1 %v10133_v37  ;;  %9325 = vmatprep.mubr.msk.bf16.mxu1 %vm7366_vm9, %v8096_v51 }
 0x5ac   :  { %9330 = vmatprep.subr.msk.bf16.mxu1 %vm7366_vm9, %v10134_v59 }
 0x5b6   :  { %8146 = vmatmul.mubr.bf16.vlgmr.msra.gmra.mrb[140].mxu1 %v8095_v0 }
 0x5b7   :  { %8188 = vmatpush1.bf16.xpose.msra.mxu1 %v10136_v43  ;;  %9331 = vmatprep.mubr.msk.bf16.mxu1 %vm7366_vm9, %v8170_v31 }
 0x5b8   :  { %9336 = vmatprep.subr.msk.bf16.mxu1 %vm7366_vm9, %v10137_v15 }
 0x5c2   :  { %8220 = vmatmul.mubr.bf16.vlgmr.msra.gmra.mrb[140].mxu1 %v8169_v60 }
 0x5c3   :  { %8262 = vmatpush1.bf16.xpose.msra.mxu1 %v10139_v23  ;;  %9337 = vmatprep.mubr.msk.bf16.mxu1 %vm7366_vm9, %v8244_v40 }
 0x5c4   :  { %9342 = vmatprep.subr.msk.bf16.mxu1 %vm7366_vm9, %v10140_v49 }
 0x5ce   :  { %8294 = vmatmul.mubr.bf16.vlgmr.msra.gmra.mrb[140].mxu1 %v8243_v34 }
 0x5cf   :  { %8336 = vmatpush1.bf16.xpose.msra.mxu1 %v10142_v53  ;;  %9343 = vmatprep.mubr.msk.bf16.mxu1 %vm7366_vm9, %v8318_v62 }
 0x5d0   :  { %9348 = vmatprep.subr.msk.bf16.mxu1 %vm7366_vm9, %v10143_v7 }
 0x5da   :  { %8368 = vmatmul.mubr.bf16.vlgmr.msra.gmra.mrb[140].mxu1 %v8317_v32 }
 0x5db   :  { %8410 = vmatpush1.bf16.xpose.msra.mxu1 %v10145_v22  ;;  %9349 = vmatprep.mubr.msk.bf16.mxu1 %vm7366_vm9, %v8392_v58 }
 0x5dc   :  { %9354 = vmatprep.subr.msk.bf16.mxu1 %vm7366_vm9, %v10146_v57 }
 0x5e6   :  { %8442 = vmatmul.mubr.bf16.vlgmr.msra.gmra.mrb[140].mxu1 %v8391_v30 }
 0x5e7   :  { %8484 = vmatpush1.bf16.xpose.msra.mxu1 %v10148_v2  ;;  %9355 = vmatprep.mubr.msk.bf16.mxu1 %vm7366_vm9, %v8466_v21 }
 0x5f2   :  { %8516 = vmatmul.mubr.bf16.vlgmr.msra.gmra.mrb[140].mxu1 %v8465_v19 }
 0x616   :  { %v7407_v17 = vpop.f32.mrb[196].mxu0 }
 0x617   :  { %v7409_v8 = vpop.f32.mrb[197].mxu0  ;;  %v7413_v10 = vadd.f32 %v9261_v16, %v7407_v17 }
 0x618   :  { %v7410_v52 = vpop.f32.mrb[198].mxu0 }
 0x619   :  { %v7411_v36 = vpop.f32.mrb[199].mxu0 }
 0x6c5   :  { %v8517_v46 = vpop.f32.mrb[140].mxu1 }
 0x6c6   :  { %v9852_v29 = vadd.f32 %v8517_v46, %v7413_v10  ;;  %v8519_v27 = vpop.f32.mrb[141].mxu1 }
 0x6c7   :  { %v8520_v20 = vpop.f32.mrb[142].mxu1 }
 0x6c8   :  { %v8521_v26 = vpop.f32.mrb[143].mxu1  ;;  %9843 = vmatmul.mubr.msk.f32.vlgmr.msra.gmra.mrb[200].mxu0 %vm8534_vm11, %v9852_v29  ;;  %8525 = vst.msk [vmem:[#allocation6] sm:$0x3] %vm8524_vm12, %v9852_v29 }
 0x6c9   :  { %10167 = shalt.err (!%p10164_p4)
}
 0x6ca   :  { %s10168_s5 = scalar_lea.hbm %s14952_s14, 32 }
 0x6cb   :  { %p10169_p5 = scmp.ne.s32.totalorder %s14952_s14, %s10168_s5  ;;  %p10172_p6 = scmp.lt.u32.totalorder %s10168_s5, %s14952_s14 }
 0x6cd   :  { %p10174_p7 = pnand %p10172_p6, %p10169_p5 }
 0x6cf   :  { %10177 = shalt.err (!%p10174_p7)
}
 0x6d0   :  { %8632 = dma.vmem_to_hbm [thread:$0]  %s8630_s18, 32, %s14952_s14, [#allocation7]   ;;  %v9356_v44 = vld [vmem:[%s14950_s12] ss:$0 sm:$0xff]  ;;  %vm8611_vm13 = vcmask 9216  }
 0x6d1   :  { %s10212_s29 = smov [#allocation4]  }
 0x6d2   :  { %s8619_s24 = sshll.u32 %s10212_s29, 4  ;;  %s8620_s24 = int_to_ptr.vmem [resolvable:$true] %s8619_s24 }
 0x6d3   :  { %s10178_s25 = scalar_lea.vmem %s8620_s24, 32  ;;  %p10183_p9 = scmp.lt.s32.totalorder %s8620_s24, %s8620_s24 }
 0x6d4   :  { %p10179_p8 = scmp.ne.s32.totalorder %s8620_s24, %s10178_s25  ;;  %p10184_p10 = scmp.lt.s32.totalorder %s10178_s25, %s10178_s25 }
 0x6d6   :  { %p10185_p11 = por %p10184_p10, %p10183_p9 }
 0x6d8   :  { %p10186_p12 = pnand %p10185_p11, %p10179_p8 }
 0x79b   :  { %v8607_v42 = vpop.f32.mrb[200].mxu0 }
 0x79c   :  { %v8608_v25 = vadd.f32 %v9356_v44, %v8607_v42  ;;  %v9844_v41 = vpop.f32.mrb[201].mxu0 }
 0x79e   :  { %8612 = vst.msk [vmem:[#allocation4] sm:$0x3] %vm8611_vm13, %v8608_v25 }
 0x79f   :  { %10189 = shalt.err (!%p10186_p12)
}
 0x7a0   :  { %s10190_s4 = scalar_lea.hbm %s14951_s13, 32 }
 0x7a1   :  { %p10191_p13 = scmp.ne.s32.totalorder %s14951_s13, %s10190_s4  ;;  %p10194_p0 = scmp.lt.u32.totalorder %s10190_s4, %s14951_s13 }
 0x7a3   :  { %p10196_p1 = pnand %p10194_p0, %p10191_p13 }
 0x7a5   :  { %10199 = shalt.err (!%p10196_p1)
}
 0x7a6   :  { %8622 = dma.vmem_to_hbm [thread:$0]  %s8620_s24, 32, %s14951_s13, [#allocation5]  }
 0x7a7   :  { %10200 = dma.done.wait [#allocation5], 32  }
 0x7a8   :  { %10201 = vsyncadd [#allocation5], 4294967264 }
 0x7a9   :  { %10202 = dma.done.wait [#allocation7], 32  }
 0x7aa   :  { %10203 = vsyncadd [#allocation7], 4294967264 }
 0x7ab   :  { %8639 = vsyncpa [#allocation5], 1 }
 0x7ac   :  { %8640 = vsyncpa [#allocation7], 1 }

</bundles_post_ra>
